<compile_context>
chip_gen: v5e
topology: v5e:2x2
jax: 0.10.0
libtpu: 0.0.40
codegen_flags: <defaults>
</compile_context>

<pallas_src>
import math
from functools import partial

import numpy as np
import jax
import jax.numpy as jnp
from jax.experimental import pallas as pl
from jax.experimental.pallas import tpu as pltpu

EPS_BN = 1e-5
VMEM = pltpu.MemorySpace.VMEM


# ------------------------------ fused kernel -------------------------------

def _fused_kernel(*refs, HW, R, C0, epsilon, has_sc):
    """Whole Atk_Generator_deep forward in one kernel.

    Input ref order (must match atk_generator_deep):
      z, sel, mk, pp, ppT, l1w, l1b,
      per block: g1, b1, g2, b2, c1w, c1b, c2w, c2b, [scw, scb],
      l4w, l4b
    """
    o_ref = refs[-1]
    it = iter(refs[:-1])

    def nxt():
        return next(it)

    f32 = jnp.float32

    def dot(a, b):
        return jnp.dot(a, b, preferred_element_type=f32)

    z = nxt()[...]          # (B, Z)
    sel = nxt()[...]        # (R, B)   row -> sample one-hot
    mk_ref = nxt()          # (9, R, R) shift+mask matrices (shared by all convs)
    pp_ref = nxt()          # (HW, R, B) spatial placement (scatter) matrices
    ppT_ref = nxt()         # (HW, B, R) their transposes (gather)
    l1w_ref = nxt()         # (HW, Z, C0)  l1 weight, NHWC-permuted, split by spatial p
    l1b_ref = nxt()         # (HW, 1, C0)

    # Hoist the 9 shift/mask matrices into values once (reused by all 6 convs).
    mks = [mk_ref[k] for k in range(9)]

    # ---- l1 + (NCHW .view -> NHWC rows) fused via placement matmuls ----
    x = jnp.zeros((R, C0), f32)
    for p in range(HW):
        xp = dot(z, l1w_ref[p]) + l1b_ref[p]       # (B, C0) features at spatial p
        x = x + dot(pp_ref[p], xp)                 # scatter into rows b*HW + p

    # ---- helpers ----
    def cond_bn_relu(h, g, b):
        # training-mode BN: biased stats over all B*H*W rows, per channel.
        mean = jnp.mean(h, axis=0, keepdims=True)
        var = jnp.maximum(jnp.mean(h * h, axis=0, keepdims=True) - mean * mean, 0.0)
        hn = (h - mean) * jax.lax.rsqrt(var + EPS_BN)
        # per-sample conditional scale/shift, expanded in-kernel (no host repeat)
        return jnp.maximum(dot(sel, g) * hn + dot(sel, b), 0.0)

    def conv3x3(h, w_ref, bias):
        # sum_k (shift_mask_k @ h) @ W_k  — 3x3 conv, pad 1, stride 1, on MXU.
        acc = dot(dot(mks[0], h), w_ref[0])
        for k in range(1, 9):
            acc = acc + dot(dot(mks[k], h), w_ref[k])
        return acc + bias

    # ---- residual blocks ----
    for sc_flag in has_sc:
        g1 = nxt()[...]; b1 = nxt()[...]           # (B, Cin)
        g2 = nxt()[...]; b2 = nxt()[...]           # (B, Ch)
        c1w = nxt(); c1b = nxt()[...]              # (9, Cin, Ch), (1, Ch)
        c2w = nxt(); c2b = nxt()[...]              # (9, Ch, Cout), (1, Cout)
        if sc_flag:
            scw = nxt()[...]; scb = nxt()[...]     # (Cin, Cout), (1, Cout)
            sc = dot(x, scw) + scb                 # 1x1 shortcut conv
        else:
            sc = x                                 # identity shortcut
        h = cond_bn_relu(x, g1, b1)
        h = conv3x3(h, c1w, c1b)
        h = cond_bn_relu(h, g2, b2)
        h = conv3x3(h, c2w, c2b)
        x = sc + h

    # ---- l4 (NHWC rows -> NCHW flatten fused via gather matmuls) ----
    l4w_ref = nxt()          # (HW, C0, Z) l4 weight rows, NHWC-permuted, split by p
    l4b = nxt()[...]         # (1, Z)
    acc = jnp.zeros(z.shape, f32)
    for p in range(HW):
        xb = dot(ppT_ref[p], x)                    # (B, C0) rows b*HW + p
        acc = acc + dot(xb, l4w_ref[p])
    h_out = acc + l4b

    # ---- tanh residual ----
    o_ref[...] = z + epsilon * jnp.tanh(h_out)


# --------------------------- host-side preparation --------------------------

def build_geometry(B, H, W):
    """Constant one-hot matrices: row->sample select, spatial placement, conv shifts."""
    HW = H * W
    R = B * HW
    sel = np.zeros((R, B), np.float32)
    pp = np.zeros((HW, R, B), np.float32)
    for b in range(B):
        sel[b * HW:(b + 1) * HW, b] = 1.0
        for p in range(HW):
            pp[p, b * HW + p, b] = 1.0
    ppT = np.ascontiguousarray(np.transpose(pp, (0, 2, 1)))

    mk = np.zeros((9, R, R), np.float32)
    for k in range(9):
        dh, dw = k // 3 - 1, k % 3 - 1
        for b in range(B):
            for h in range(H):
                for w in range(W):
                    h2, w2 = h + dh, w + dw
                    if 0 <= h2 < H and 0 <= w2 < W:
                        mk[k, b * HW + h * W + w, b * HW + h2 * W + w2] = 1.0
    return {"sel": jnp.asarray(sel), "pp": jnp.asarray(pp),
            "ppT": jnp.asarray(ppT), "mk": jnp.asarray(mk)}


def prepare_fused_params(params, bottom_width=4, fea=32):
    """One-time weight re-layout: fold the NCHW .view() permutations into l1/l4,
    reshape conv weights to (9, Cin, Cout), biases to (1, C)."""
    HW = bottom_width ** 2
    Z = params["l1_w"].shape[0]
    C0 = fea
    assert params["l1_w"].shape[1] == C0 * HW

    # l1: column j = c*HW + p (NCHW flatten)  ->  split by p: (HW, Z, C0)
    l1w = jnp.transpose(params["l1_w"].reshape(Z, C0, HW), (2, 0, 1))
    l1b = jnp.transpose(params["l1_b"].reshape(C0, HW), (1, 0)).reshape(HW, 1, C0)
    # l4: row j = c*HW + p  ->  split by p: (HW, C0, Z)
    l4w = jnp.transpose(params["l4_w"].reshape(C0, HW, -1), (1, 0, 2))
    l4b = params["l4_b"].reshape(1, -1)

    blocks = []
    for name in ("block2", "block3", "block4"):
        p = params[name]
        bp = {
            "b1_w": p["b1_w"], "b1_b": p["b1_b"],
            "b2_w": p["b2_w"], "b2_b": p["b2_b"],
            "c1_w": p["c1_w"].reshape(9, p["c1_w"].shape[2], p["c1_w"].shape[3]),
            "c1_b": p["c1_b"].reshape(1, -1),
            "c2_w": p["c2_w"].reshape(9, p["c2_w"].shape[2], p["c2_w"].shape[3]),
            "c2_b": p["c2_b"].reshape(1, -1),
        }
        if "csc_w" in p:
            bp["csc_w"] = p["csc_w"]
            bp["csc_b"] = p["csc_b"].reshape(1, -1)
        blocks.append(bp)
    return {"l1_w": l1w, "l1_b": l1b, "l4_w": l4w, "l4_b": l4b, "blocks": blocks}


def atk_generator_deep(z, y, prep, geom, *, epsilon=0.1):
    """Fused forward: host does only the 12 tiny embedding gathers + one pallas_call."""
    B, Z = z.shape
    HW = geom["pp"].shape[0]
    R = B * HW
    C0 = prep["l1_w"].shape[-1]
    assert geom["sel"].shape == (R, B)
    assert y.shape[0] == B

    inputs = [z, geom["sel"], geom["mk"], geom["pp"], geom["ppT"],
              prep["l1_w"], prep["l1_b"]]
    has_sc = []
    for bp in prep["blocks"]:
        inputs += [bp["b1_w"][y], bp["b1_b"][y], bp["b2_w"][y], bp["b2_b"][y],
                   bp["c1_w"], bp["c1_b"], bp["c2_w"], bp["c2_b"]]
        if "csc_w" in bp:
            inputs += [bp["csc_w"], bp["csc_b"]]
            has_sc.append(True)
        else:
            has_sc.append(False)
    inputs += [prep["l4_w"], prep["l4_b"]]

    kernel = partial(_fused_kernel, HW=HW, R=R, C0=C0,
                     epsilon=float(epsilon), has_sc=tuple(has_sc))
    return pl.pallas_call(
        kernel,
        out_shape=jax.ShapeDtypeStruct((B, Z), jnp.float32),
        in_specs=[pl.BlockSpec(memory_space=VMEM) for _ in inputs],
        out_specs=pl.BlockSpec(memory_space=VMEM),
    )(*inputs)


# ------------------------------ params (synth) ------------------------------

def init_params(key, z_dim=256, num_classes=10, bottom_width=4, fea=32):
    h_ch = 2 * fea
    ks = iter(jax.random.split(key, 32))

    def dense(fan_in, fan_out):
        w = jax.random.normal(next(ks), (fan_in, fan_out), jnp.float32) / math.sqrt(fan_in)
        b = jax.random.normal(next(ks), (fan_out,), jnp.float32) * 0.01
        return w, b

    def conv(kh, kw, cin, cout):
        w = jax.random.normal(next(ks), (kh, kw, cin, cout), jnp.float32) / math.sqrt(kh * kw * cin)
        b = jax.random.normal(next(ks), (cout,), jnp.float32) * 0.01
        return w, b

    def block(in_ch, out_ch, h_ch_):
        c1w, c1b = conv(3, 3, in_ch, h_ch_)
        c2w, c2b = conv(3, 3, h_ch_, out_ch)
        p = {
            # CategoricalConditionalBatchNorm2d embeddings: ones / zeros (per _initialize)
            "b1_w": jnp.ones((num_classes, in_ch), jnp.float32),
            "b1_b": jnp.zeros((num_classes, in_ch), jnp.float32),
            "b2_w": jnp.ones((num_classes, h_ch_), jnp.float32),
            "b2_b": jnp.zeros((num_classes, h_ch_), jnp.float32),
            "c1_w": c1w, "c1_b": c1b, "c2_w": c2w, "c2_b": c2b,
        }
        if in_ch != out_ch:  # learnable_sc (upsample=False everywhere here)
            scw, scb = conv(1, 1, in_ch, out_ch)
            p["csc_w"] = scw.reshape(in_ch, out_ch)
            p["csc_b"] = scb
        return p

    l1w, l1b = dense(z_dim, fea * bottom_width ** 2)
    l4w, l4b = dense(fea * bottom_width ** 2, z_dim)
    return {
        "l1_w": l1w, "l1_b": l1b, "l4_w": l4w, "l4_b": l4b,
        "block2": block(fea, h_ch, h_ch),     # 32 -> 64 (h=64)
        "block3": block(h_ch, h_ch, h_ch),    # 64 -> 64 (identity shortcut)
        "block4": block(h_ch, fea, fea),      # 64 -> 32 (h=32)
    }


# ---------------------------- pure-JAX reference ----------------------------

def reference(z, y, params, epsilon, bottom_width, fea):
    B = z.shape[0]

    def bn(x, g_bc, b_bc, relu):
        Bn, H, W, C = x.shape
        x2 = x.reshape(Bn * H * W, C)
        mean = x2.mean(0, keepdims=True)
        var = ((x2 - mean) ** 2).mean(0, keepdims=True)
        xn = (x2 - mean) / jnp.sqrt(var + EPS_BN)
        g = jnp.repeat(g_bc, H * W, axis=0)
        bb = jnp.repeat(b_bc, H * W, axis=0)
        out = g * xn + bb
        if relu:
            out = jnp.maximum(out, 0.0)
        return out.reshape(Bn, H, W, C)

    def conv3(x, w, b):
        return jax.lax.conv_general_dilated(
            x, w, window_strides=(1, 1), padding="SAME",
            dimension_numbers=("NHWC", "HWIO", "NHWC")) + b

    def blk(x, p):
        g1, b1 = p["b1_w"][y], p["b1_b"][y]
        g2, b2 = p["b2_w"][y], p["b2_b"][y]
        sc = (jnp.einsum("bhwc,cd->bhwd", x, p["csc_w"]) + p["csc_b"]) if "csc_w" in p else x
        h = bn(x, g1, b1, True)
        h = conv3(h, p["c1_w"], p["c1_b"])
        h = bn(h, g2, b2, True)
        h = conv3(h, p["c2_w"], p["c2_b"])
        return sc + h

    h = z @ params["l1_w"] + params["l1_b"]
    h = jnp.transpose(h.reshape(B, fea, bottom_width, bottom_width), (0, 2, 3, 1))
    h = blk(h, params["block2"])
    h = blk(h, params["block3"])
    h = blk(h, params["block4"])
    h = jnp.transpose(h, (0, 3, 1, 2)).reshape(B, -1)
    h = h @ params["l4_w"] + params["l4_b"]
    return z + epsilon * jnp.tanh(h)


# TODO(synk): BatchNorm running_mean/running_var momentum updates are a training-time
# side effect (they do not affect this forward's output) and are not reproduced.

if __name__ == "__main__":
    key = jax.random.PRNGKey(0)
    kp, kz, ky = jax.random.split(key, 3)

    B, Z_DIM, NUM_CLASSES, BW, FEA, EPSILON = 2, 256, 10, 4, 32, 0.1
    params = init_params(kp, Z_DIM, NUM_CLASSES, BW, FEA)
    z = jax.random.normal(kz, (B, Z_DIM), jnp.float32)
    y = jax.random.randint(ky, (B,), 0, NUM_CLASSES)

    prep = prepare_fused_params(params, BW, FEA)   # one-time weight re-layout
    geom = build_geometry(B, BW, BW)               # one-time one-hot constants

    fwd = jax.jit(lambda z_, y_: atk_generator_deep(z_, y_, prep, geom, epsilon=EPSILON))
    out = jax.block_until_ready(fwd(z, y))

    ref = reference(z, y, params, EPSILON, BW, FEA)
    assert out.shape == (B, Z_DIM), out.shape
    assert bool(jnp.all(jnp.isfinite(out)))
    max_err = float(jnp.max(jnp.abs(out - ref)))
    assert bool(jnp.allclose(out, ref, atol=1e-3, rtol=1e-3)), max_err
    print("KERNEL_OK")
</pallas_src>

<mosaic_0001>
module attributes {stable_mosaic.version = 11 : i64} {
  func.func @_fused_kernel(%arg0: memref<2x256xf32, #tpu.memory_space<vmem>>, %arg1: memref<32x2xf32, #tpu.memory_space<vmem>>, %arg2: memref<9x32x32xf32, #tpu.memory_space<vmem>>, %arg3: memref<16x32x2xf32, #tpu.memory_space<vmem>>, %arg4: memref<16x2x32xf32, #tpu.memory_space<vmem>>, %arg5: memref<16x256x32xf32, #tpu.memory_space<vmem>>, %arg6: memref<16x1x32xf32, #tpu.memory_space<vmem>>, %arg7: memref<2x32xf32, #tpu.memory_space<vmem>>, %arg8: memref<2x32xf32, #tpu.memory_space<vmem>>, %arg9: memref<2x64xf32, #tpu.memory_space<vmem>>, %arg10: memref<2x64xf32, #tpu.memory_space<vmem>>, %arg11: memref<9x32x64xf32, #tpu.memory_space<vmem>>, %arg12: memref<1x64xf32, #tpu.memory_space<vmem>>, %arg13: memref<9x64x64xf32, #tpu.memory_space<vmem>>, %arg14: memref<1x64xf32, #tpu.memory_space<vmem>>, %arg15: memref<32x64xf32, #tpu.memory_space<vmem>>, %arg16: memref<1x64xf32, #tpu.memory_space<vmem>>, %arg17: memref<2x64xf32, #tpu.memory_space<vmem>>, %arg18: memref<2x64xf32, #tpu.memory_space<vmem>>, %arg19: memref<2x64xf32, #tpu.memory_space<vmem>>, %arg20: memref<2x64xf32, #tpu.memory_space<vmem>>, %arg21: memref<9x64x64xf32, #tpu.memory_space<vmem>>, %arg22: memref<1x64xf32, #tpu.memory_space<vmem>>, %arg23: memref<9x64x64xf32, #tpu.memory_space<vmem>>, %arg24: memref<1x64xf32, #tpu.memory_space<vmem>>, %arg25: memref<2x64xf32, #tpu.memory_space<vmem>>, %arg26: memref<2x64xf32, #tpu.memory_space<vmem>>, %arg27: memref<2x32xf32, #tpu.memory_space<vmem>>, %arg28: memref<2x32xf32, #tpu.memory_space<vmem>>, %arg29: memref<9x64x32xf32, #tpu.memory_space<vmem>>, %arg30: memref<1x32xf32, #tpu.memory_space<vmem>>, %arg31: memref<9x32x32xf32, #tpu.memory_space<vmem>>, %arg32: memref<1x32xf32, #tpu.memory_space<vmem>>, %arg33: memref<64x32xf32, #tpu.memory_space<vmem>>, %arg34: memref<1x32xf32, #tpu.memory_space<vmem>>, %arg35: memref<16x32x256xf32, #tpu.memory_space<vmem>>, %arg36: memref<1x256xf32, #tpu.memory_space<vmem>>, %arg37: memref<2x256xf32, #tpu.memory_space<vmem>>) attributes {dimension_semantics = [], scalar_prefetch = 0 : i64, scratch_operands = 0 : i64, tpu.core_type = #tpu.core_type<tc>} {
    %c0 = arith.constant 0 : index
    %c0_0 = arith.constant 0 : index
    %0 = vector.load %arg0[%c0, %c0_0] : memref<2x256xf32, #tpu.memory_space<vmem>>, vector<2x256xf32>
    %c0_1 = arith.constant 0 : index
    %c0_2 = arith.constant 0 : index
    %1 = vector.load %arg1[%c0_1, %c0_2] : memref<32x2xf32, #tpu.memory_space<vmem>>, vector<32x2xf32>
    %c0_3 = arith.constant 0 : index
    %c0_4 = arith.constant 0 : index
    %c0_5 = arith.constant 0 : index
    %2 = vector.load %arg2[%c0_3, %c0_4, %c0_5] : memref<9x32x32xf32, #tpu.memory_space<vmem>>, vector<1x32x32xf32>
    %3 = vector.shape_cast %2 : vector<1x32x32xf32> to vector<32x32xf32>
    %c1 = arith.constant 1 : index
    %c0_6 = arith.constant 0 : index
    %c0_7 = arith.constant 0 : index
    %4 = vector.load %arg2[%c1, %c0_6, %c0_7] : memref<9x32x32xf32, #tpu.memory_space<vmem>>, vector<1x32x32xf32>
    %5 = vector.shape_cast %4 : vector<1x32x32xf32> to vector<32x32xf32>
    %c2 = arith.constant 2 : index
    %c0_8 = arith.constant 0 : index
    %c0_9 = arith.constant 0 : index
    %6 = vector.load %arg2[%c2, %c0_8, %c0_9] : memref<9x32x32xf32, #tpu.memory_space<vmem>>, vector<1x32x32xf32>
    %7 = vector.shape_cast %6 : vector<1x32x32xf32> to vector<32x32xf32>
    %c3 = arith.constant 3 : index
    %c0_10 = arith.constant 0 : index
    %c0_11 = arith.constant 0 : index
    %8 = vector.load %arg2[%c3, %c0_10, %c0_11] : memref<9x32x32xf32, #tpu.memory_space<vmem>>, vector<1x32x32xf32>
    %9 = vector.shape_cast %8 : vector<1x32x32xf32> to vector<32x32xf32>
    %c4 = arith.constant 4 : index
    %c0_12 = arith.constant 0 : index
    %c0_13 = arith.constant 0 : index
    %10 = vector.load %arg2[%c4, %c0_12, %c0_13] : memref<9x32x32xf32, #tpu.memory_space<vmem>>, vector<1x32x32xf32>
    %11 = vector.shape_cast %10 : vector<1x32x32xf32> to vector<32x32xf32>
    %c5 = arith.constant 5 : index
    %c0_14 = arith.constant 0 : index
    %c0_15 = arith.constant 0 : index
    %12 = vector.load %arg2[%c5, %c0_14, %c0_15] : memref<9x32x32xf32, #tpu.memory_space<vmem>>, vector<1x32x32xf32>
    %13 = vector.shape_cast %12 : vector<1x32x32xf32> to vector<32x32xf32>
    %c6 = arith.constant 6 : index
    %c0_16 = arith.constant 0 : index
    %c0_17 = arith.constant 0 : index
    %14 = vector.load %arg2[%c6, %c0_16, %c0_17] : memref<9x32x32xf32, #tpu.memory_space<vmem>>, vector<1x32x32xf32>
    %15 = vector.shape_cast %14 : vector<1x32x32xf32> to vector<32x32xf32>
    %c7 = arith.constant 7 : index
    %c0_18 = arith.constant 0 : index
    %c0_19 = arith.constant 0 : index
    %16 = vector.load %arg2[%c7, %c0_18, %c0_19] : memref<9x32x32xf32, #tpu.memory_space<vmem>>, vector<1x32x32xf32>
    %17 = vector.shape_cast %16 : vector<1x32x32xf32> to vector<32x32xf32>
    %c8 = arith.constant 8 : index
    %c0_20 = arith.constant 0 : index
    %c0_21 = arith.constant 0 : index
    %18 = vector.load %arg2[%c8, %c0_20, %c0_21] : memref<9x32x32xf32, #tpu.memory_space<vmem>>, vector<1x32x32xf32>
    %19 = vector.shape_cast %18 : vector<1x32x32xf32> to vector<32x32xf32>
    %cst = arith.constant 0.000000e+00 : f32
    %20 = vector.broadcast %cst : f32 to vector<32x32xf32>
    %c0_22 = arith.constant 0 : index
    %c0_23 = arith.constant 0 : index
    %c0_24 = arith.constant 0 : index
    %21 = vector.load %arg5[%c0_22, %c0_23, %c0_24] : memref<16x256x32xf32, #tpu.memory_space<vmem>>, vector<1x256x32xf32>
    %22 = vector.shape_cast %21 : vector<1x256x32xf32> to vector<256x32xf32>
    %cst_25 = arith.constant dense<0.000000e+00> : vector<2x32xf32>
    %23 = tpu.matmul %0, %22, %cst_25 {dimension_numbers = #tpu.dot_dimension_numbers<[1], [0], [0], [1], [0, 0, 1, 1], [], []>} : vector<2x256xf32>, vector<256x32xf32>, vector<2x32xf32> -> vector<2x32xf32>
    %c0_26 = arith.constant 0 : index
    %c0_27 = arith.constant 0 : index
    %c0_28 = arith.constant 0 : index
    %24 = vector.load %arg6[%c0_26, %c0_27, %c0_28] : memref<16x1x32xf32, #tpu.memory_space<vmem>>, vector<1x1x32xf32>
    %25 = vector.shape_cast %24 : vector<1x1x32xf32> to vector<1x32xf32>
    %26 = vector.broadcast %25 : vector<1x32xf32> to vector<2x32xf32>
    %27 = arith.addf %23, %26 : vector<2x32xf32>
    %c0_29 = arith.constant 0 : index
    %c0_30 = arith.constant 0 : index
    %c0_31 = arith.constant 0 : index
    %28 = vector.load %arg3[%c0_29, %c0_30, %c0_31] : memref<16x32x2xf32, #tpu.memory_space<vmem>>, vector<1x32x2xf32>
    %29 = vector.shape_cast %28 : vector<1x32x2xf32> to vector<32x2xf32>
    %cst_32 = arith.constant dense<0.000000e+00> : vector<32x32xf32>
    %30 = tpu.matmul %29, %27, %cst_32 {dimension_numbers = #tpu.dot_dimension_numbers<[1], [0], [0], [1], [0, 0, 1, 1], [], []>} : vector<32x2xf32>, vector<2x32xf32>, vector<32x32xf32> -> vector<32x32xf32>
    %31 = arith.addf %20, %30 : vector<32x32xf32>
    %c1_33 = arith.constant 1 : index
    %c0_34 = arith.constant 0 : index
    %c0_35 = arith.constant 0 : index
    %32 = vector.load %arg5[%c1_33, %c0_34, %c0_35] : memref<16x256x32xf32, #tpu.memory_space<vmem>>, vector<1x256x32xf32>
    %33 = vector.shape_cast %32 : vector<1x256x32xf32> to vector<256x32xf32>
    %cst_36 = arith.constant dense<0.000000e+00> : vector<2x32xf32>
    %34 = tpu.matmul %0, %33, %cst_36 {dimension_numbers = #tpu.dot_dimension_numbers<[1], [0], [0], [1], [0, 0, 1, 1], [], []>} : vector<2x256xf32>, vector<256x32xf32>, vector<2x32xf32> -> vector<2x32xf32>
    %c1_37 = arith.constant 1 : index
    %c0_38 = arith.constant 0 : index
    %c0_39 = arith.constant 0 : index
    %35 = vector.load %arg6[%c1_37, %c0_38, %c0_39] : memref<16x1x32xf32, #tpu.memory_space<vmem>>, vector<1x1x32xf32>
    %36 = vector.shape_cast %35 : vector<1x1x32xf32> to vector<1x32xf32>
    %37 = vector.broadcast %36 : vector<1x32xf32> to vector<2x32xf32>
    %38 = arith.addf %34, %37 : vector<2x32xf32>
    %c1_40 = arith.constant 1 : index
    %c0_41 = arith.constant 0 : index
    %c0_42 = arith.constant 0 : index
    %39 = vector.load %arg3[%c1_40, %c0_41, %c0_42] : memref<16x32x2xf32, #tpu.memory_space<vmem>>, vector<1x32x2xf32>
    %40 = vector.shape_cast %39 : vector<1x32x2xf32> to vector<32x2xf32>
    %cst_43 = arith.constant dense<0.000000e+00> : vector<32x32xf32>
    %41 = tpu.matmul %40, %38, %cst_43 {dimension_numbers = #tpu.dot_dimension_numbers<[1], [0], [0], [1], [0, 0, 1, 1], [], []>} : vector<32x2xf32>, vector<2x32xf32>, vector<32x32xf32> -> vector<32x32xf32>
    %42 = arith.addf %31, %41 : vector<32x32xf32>
    %c2_44 = arith.constant 2 : index
    %c0_45 = arith.constant 0 : index
    %c0_46 = arith.constant 0 : index
    %43 = vector.load %arg5[%c2_44, %c0_45, %c0_46] : memref<16x256x32xf32, #tpu.memory_space<vmem>>, vector<1x256x32xf32>
    %44 = vector.shape_cast %43 : vector<1x256x32xf32> to vector<256x32xf32>
    %cst_47 = arith.constant dense<0.000000e+00> : vector<2x32xf32>
    %45 = tpu.matmul %0, %44, %cst_47 {dimension_numbers = #tpu.dot_dimension_numbers<[1], [0], [0], [1], [0, 0, 1, 1], [], []>} : vector<2x256xf32>, vector<256x32xf32>, vector<2x32xf32> -> vector<2x32xf32>
    %c2_48 = arith.constant 2 : index
    %c0_49 = arith.constant 0 : index
    %c0_50 = arith.constant 0 : index
    %46 = vector.load %arg6[%c2_48, %c0_49, %c0_50] : memref<16x1x32xf32, #tpu.memory_space<vmem>>, vector<1x1x32xf32>
    %47 = vector.shape_cast %46 : vector<1x1x32xf32> to vector<1x32xf32>
    %48 = vector.broadcast %47 : vector<1x32xf32> to vector<2x32xf32>
    %49 = arith.addf %45, %48 : vector<2x32xf32>
    %c2_51 = arith.constant 2 : index
    %c0_52 = arith.constant 0 : index
    %c0_53 = arith.constant 0 : index
    %50 = vector.load %arg3[%c2_51, %c0_52, %c0_53] : memref<16x32x2xf32, #tpu.memory_space<vmem>>, vector<1x32x2xf32>
    %51 = vector.shape_cast %50 : vector<1x32x2xf32> to vector<32x2xf32>
    %cst_54 = arith.constant dense<0.000000e+00> : vector<32x32xf32>
    %52 = tpu.matmul %51, %49, %cst_54 {dimension_numbers = #tpu.dot_dimension_numbers<[1], [0], [0], [1], [0, 0, 1, 1], [], []>} : vector<32x2xf32>, vector<2x32xf32>, vector<32x32xf32> -> vector<32x32xf32>
    %53 = arith.addf %42, %52 : vector<32x32xf32>
    %c3_55 = arith.constant 3 : index
    %c0_56 = arith.constant 0 : index
    %c0_57 = arith.constant 0 : index
    %54 = vector.load %arg5[%c3_55, %c0_56, %c0_57] : memref<16x256x32xf32, #tpu.memory_space<vmem>>, vector<1x256x32xf32>
    %55 = vector.shape_cast %54 : vector<1x256x32xf32> to vector<256x32xf32>
    %cst_58 = arith.constant dense<0.000000e+00> : vector<2x32xf32>
    %56 = tpu.matmul %0, %55, %cst_58 {dimension_numbers = #tpu.dot_dimension_numbers<[1], [0], [0], [1], [0, 0, 1, 1], [], []>} : vector<2x256xf32>, vector<256x32xf32>, vector<2x32xf32> -> vector<2x32xf32>
    %c3_59 = arith.constant 3 : index
    %c0_60 = arith.constant 0 : index
    %c0_61 = arith.constant 0 : index
    %57 = vector.load %arg6[%c3_59, %c0_60, %c0_61] : memref<16x1x32xf32, #tpu.memory_space<vmem>>, vector<1x1x32xf32>
    %58 = vector.shape_cast %57 : vector<1x1x32xf32> to vector<1x32xf32>
    %59 = vector.broadcast %58 : vector<1x32xf32> to vector<2x32xf32>
    %60 = arith.addf %56, %59 : vector<2x32xf32>
    %c3_62 = arith.constant 3 : index
    %c0_63 = arith.constant 0 : index
    %c0_64 = arith.constant 0 : index
    %61 = vector.load %arg3[%c3_62, %c0_63, %c0_64] : memref<16x32x2xf32, #tpu.memory_space<vmem>>, vector<1x32x2xf32>
    %62 = vector.shape_cast %61 : vector<1x32x2xf32> to vector<32x2xf32>
    %cst_65 = arith.constant dense<0.000000e+00> : vector<32x32xf32>
    %63 = tpu.matmul %62, %60, %cst_65 {dimension_numbers = #tpu.dot_dimension_numbers<[1], [0], [0], [1], [0, 0, 1, 1], [], []>} : vector<32x2xf32>, vector<2x32xf32>, vector<32x32xf32> -> vector<32x32xf32>
    %64 = arith.addf %53, %63 : vector<32x32xf32>
    %c4_66 = arith.constant 4 : index
    %c0_67 = arith.constant 0 : index
    %c0_68 = arith.constant 0 : index
    %65 = vector.load %arg5[%c4_66, %c0_67, %c0_68] : memref<16x256x32xf32, #tpu.memory_space<vmem>>, vector<1x256x32xf32>
    %66 = vector.shape_cast %65 : vector<1x256x32xf32> to vector<256x32xf32>
    %cst_69 = arith.constant dense<0.000000e+00> : vector<2x32xf32>
    %67 = tpu.matmul %0, %66, %cst_69 {dimension_numbers = #tpu.dot_dimension_numbers<[1], [0], [0], [1], [0, 0, 1, 1], [], []>} : vector<2x256xf32>, vector<256x32xf32>, vector<2x32xf32> -> vector<2x32xf32>
    %c4_70 = arith.constant 4 : index
    %c0_71 = arith.constant 0 : index
    %c0_72 = arith.constant 0 : index
    %68 = vector.load %arg6[%c4_70, %c0_71, %c0_72] : memref<16x1x32xf32, #tpu.memory_space<vmem>>, vector<1x1x32xf32>
    %69 = vector.shape_cast %68 : vector<1x1x32xf32> to vector<1x32xf32>
    %70 = vector.broadcast %69 : vector<1x32xf32> to vector<2x32xf32>
    %71 = arith.addf %67, %70 : vector<2x32xf32>
    %c4_73 = arith.constant 4 : index
    %c0_74 = arith.constant 0 : index
    %c0_75 = arith.constant 0 : index
    %72 = vector.load %arg3[%c4_73, %c0_74, %c0_75] : memref<16x32x2xf32, #tpu.memory_space<vmem>>, vector<1x32x2xf32>
    %73 = vector.shape_cast %72 : vector<1x32x2xf32> to vector<32x2xf32>
    %cst_76 = arith.constant dense<0.000000e+00> : vector<32x32xf32>
    %74 = tpu.matmul %73, %71, %cst_76 {dimension_numbers = #tpu.dot_dimension_numbers<[1], [0], [0], [1], [0, 0, 1, 1], [], []>} : vector<32x2xf32>, vector<2x32xf32>, vector<32x32xf32> -> vector<32x32xf32>
    %75 = arith.addf %64, %74 : vector<32x32xf32>
    %c5_77 = arith.constant 5 : index
    %c0_78 = arith.constant 0 : index
    %c0_79 = arith.constant 0 : index
    %76 = vector.load %arg5[%c5_77, %c0_78, %c0_79] : memref<16x256x32xf32, #tpu.memory_space<vmem>>, vector<1x256x32xf32>
    %77 = vector.shape_cast %76 : vector<1x256x32xf32> to vector<256x32xf32>
    %cst_80 = arith.constant dense<0.000000e+00> : vector<2x32xf32>
    %78 = tpu.matmul %0, %77, %cst_80 {dimension_numbers = #tpu.dot_dimension_numbers<[1], [0], [0], [1], [0, 0, 1, 1], [], []>} : vector<2x256xf32>, vector<256x32xf32>, vector<2x32xf32> -> vector<2x32xf32>
    %c5_81 = arith.constant 5 : index
    %c0_82 = arith.constant 0 : index
    %c0_83 = arith.constant 0 : index
    %79 = vector.load %arg6[%c5_81, %c0_82, %c0_83] : memref<16x1x32xf32, #tpu.memory_space<vmem>>, vector<1x1x32xf32>
    %80 = vector.shape_cast %79 : vector<1x1x32xf32> to vector<1x32xf32>
    %81 = vector.broadcast %80 : vector<1x32xf32> to vector<2x32xf32>
    %82 = arith.addf %78, %81 : vector<2x32xf32>
    %c5_84 = arith.constant 5 : index
    %c0_85 = arith.constant 0 : index
    %c0_86 = arith.constant 0 : index
    %83 = vector.load %arg3[%c5_84, %c0_85, %c0_86] : memref<16x32x2xf32, #tpu.memory_space<vmem>>, vector<1x32x2xf32>
    %84 = vector.shape_cast %83 : vector<1x32x2xf32> to vector<32x2xf32>
    %cst_87 = arith.constant dense<0.000000e+00> : vector<32x32xf32>
    %85 = tpu.matmul %84, %82, %cst_87 {dimension_numbers = #tpu.dot_dimension_numbers<[1], [0], [0], [1], [0, 0, 1, 1], [], []>} : vector<32x2xf32>, vector<2x32xf32>, vector<32x32xf32> -> vector<32x32xf32>
    %86 = arith.addf %75, %85 : vector<32x32xf32>
    %c6_88 = arith.constant 6 : index
    %c0_89 = arith.constant 0 : index
    %c0_90 = arith.constant 0 : index
    %87 = vector.load %arg5[%c6_88, %c0_89, %c0_90] : memref<16x256x32xf32, #tpu.memory_space<vmem>>, vector<1x256x32xf32>
    %88 = vector.shape_cast %87 : vector<1x256x32xf32> to vector<256x32xf32>
    %cst_91 = arith.constant dense<0.000000e+00> : vector<2x32xf32>
    %89 = tpu.matmul %0, %88, %cst_91 {dimension_numbers = #tpu.dot_dimension_numbers<[1], [0], [0], [1], [0, 0, 1, 1], [], []>} : vector<2x256xf32>, vector<256x32xf32>, vector<2x32xf32> -> vector<2x32xf32>
    %c6_92 = arith.constant 6 : index
    %c0_93 = arith.constant 0 : index
    %c0_94 = arith.constant 0 : index
    %90 = vector.load %arg6[%c6_92, %c0_93, %c0_94] : memref<16x1x32xf32, #tpu.memory_space<vmem>>, vector<1x1x32xf32>
    %91 = vector.shape_cast %90 : vector<1x1x32xf32> to vector<1x32xf32>
    %92 = vector.broadcast %91 : vector<1x32xf32> to vector<2x32xf32>
    %93 = arith.addf %89, %92 : vector<2x32xf32>
    %c6_95 = arith.constant 6 : index
    %c0_96 = arith.constant 0 : index
    %c0_97 = arith.constant 0 : index
    %94 = vector.load %arg3[%c6_95, %c0_96, %c0_97] : memref<16x32x2xf32, #tpu.memory_space<vmem>>, vector<1x32x2xf32>
    %95 = vector.shape_cast %94 : vector<1x32x2xf32> to vector<32x2xf32>
    %cst_98 = arith.constant dense<0.000000e+00> : vector<32x32xf32>
    %96 = tpu.matmul %95, %93, %cst_98 {dimension_numbers = #tpu.dot_dimension_numbers<[1], [0], [0], [1], [0, 0, 1, 1], [], []>} : vector<32x2xf32>, vector<2x32xf32>, vector<32x32xf32> -> vector<32x32xf32>
    %97 = arith.addf %86, %96 : vector<32x32xf32>
    %c7_99 = arith.constant 7 : index
    %c0_100 = arith.constant 0 : index
    %c0_101 = arith.constant 0 : index
    %98 = vector.load %arg5[%c7_99, %c0_100, %c0_101] : memref<16x256x32xf32, #tpu.memory_space<vmem>>, vector<1x256x32xf32>
    %99 = vector.shape_cast %98 : vector<1x256x32xf32> to vector<256x32xf32>
    %cst_102 = arith.constant dense<0.000000e+00> : vector<2x32xf32>
    %100 = tpu.matmul %0, %99, %cst_102 {dimension_numbers = #tpu.dot_dimension_numbers<[1], [0], [0], [1], [0, 0, 1, 1], [], []>} : vector<2x256xf32>, vector<256x32xf32>, vector<2x32xf32> -> vector<2x32xf32>
    %c7_103 = arith.constant 7 : index
    %c0_104 = arith.constant 0 : index
    %c0_105 = arith.constant 0 : index
    %101 = vector.load %arg6[%c7_103, %c0_104, %c0_105] : memref<16x1x32xf32, #tpu.memory_space<vmem>>, vector<1x1x32xf32>
    %102 = vector.shape_cast %101 : vector<1x1x32xf32> to vector<1x32xf32>
    %103 = vector.broadcast %102 : vector<1x32xf32> to vector<2x32xf32>
    %104 = arith.addf %100, %103 : vector<2x32xf32>
    %c7_106 = arith.constant 7 : index
    %c0_107 = arith.constant 0 : index
    %c0_108 = arith.constant 0 : index
    %105 = vector.load %arg3[%c7_106, %c0_107, %c0_108] : memref<16x32x2xf32, #tpu.memory_space<vmem>>, vector<1x32x2xf32>
    %106 = vector.shape_cast %105 : vector<1x32x2xf32> to vector<32x2xf32>
    %cst_109 = arith.constant dense<0.000000e+00> : vector<32x32xf32>
    %107 = tpu.matmul %106, %104, %cst_109 {dimension_numbers = #tpu.dot_dimension_numbers<[1], [0], [0], [1], [0, 0, 1, 1], [], []>} : vector<32x2xf32>, vector<2x32xf32>, vector<32x32xf32> -> vector<32x32xf32>
    %108 = arith.addf %97, %107 : vector<32x32xf32>
    %c8_110 = arith.constant 8 : index
    %c0_111 = arith.constant 0 : index
    %c0_112 = arith.constant 0 : index
    %109 = vector.load %arg5[%c8_110, %c0_111, %c0_112] : memref<16x256x32xf32, #tpu.memory_space<vmem>>, vector<1x256x32xf32>
    %110 = vector.shape_cast %109 : vector<1x256x32xf32> to vector<256x32xf32>
    %cst_113 = arith.constant dense<0.000000e+00> : vector<2x32xf32>
    %111 = tpu.matmul %0, %110, %cst_113 {dimension_numbers = #tpu.dot_dimension_numbers<[1], [0], [0], [1], [0, 0, 1, 1], [], []>} : vector<2x256xf32>, vector<256x32xf32>, vector<2x32xf32> -> vector<2x32xf32>
    %c8_114 = arith.constant 8 : index
    %c0_115 = arith.constant 0 : index
    %c0_116 = arith.constant 0 : index
    %112 = vector.load %arg6[%c8_114, %c0_115, %c0_116] : memref<16x1x32xf32, #tpu.memory_space<vmem>>, vector<1x1x32xf32>
    %113 = vector.shape_cast %112 : vector<1x1x32xf32> to vector<1x32xf32>
    %114 = vector.broadcast %113 : vector<1x32xf32> to vector<2x32xf32>
    %115 = arith.addf %111, %114 : vector<2x32xf32>
    %c8_117 = arith.constant 8 : index
    %c0_118 = arith.constant 0 : index
    %c0_119 = arith.constant 0 : index
    %116 = vector.load %arg3[%c8_117, %c0_118, %c0_119] : memref<16x32x2xf32, #tpu.memory_space<vmem>>, vector<1x32x2xf32>
    %117 = vector.shape_cast %116 : vector<1x32x2xf32> to vector<32x2xf32>
    %cst_120 = arith.constant dense<0.000000e+00> : vector<32x32xf32>
    %118 = tpu.matmul %117, %115, %cst_120 {dimension_numbers = #tpu.dot_dimension_numbers<[1], [0], [0], [1], [0, 0, 1, 1], [], []>} : vector<32x2xf32>, vector<2x32xf32>, vector<32x32xf32> -> vector<32x32xf32>
    %119 = arith.addf %108, %118 : vector<32x32xf32>
    %c9 = arith.constant 9 : index
    %c0_121 = arith.constant 0 : index
    %c0_122 = arith.constant 0 : index
    %120 = vector.load %arg5[%c9, %c0_121, %c0_122] : memref<16x256x32xf32, #tpu.memory_space<vmem>>, vector<1x256x32xf32>
    %121 = vector.shape_cast %120 : vector<1x256x32xf32> to vector<256x32xf32>
    %cst_123 = arith.constant dense<0.000000e+00> : vector<2x32xf32>
    %122 = tpu.matmul %0, %121, %cst_123 {dimension_numbers = #tpu.dot_dimension_numbers<[1], [0], [0], [1], [0, 0, 1, 1], [], []>} : vector<2x256xf32>, vector<256x32xf32>, vector<2x32xf32> -> vector<2x32xf32>
    %c9_124 = arith.constant 9 : index
    %c0_125 = arith.constant 0 : index
    %c0_126 = arith.constant 0 : index
    %123 = vector.load %arg6[%c9_124, %c0_125, %c0_126] : memref<16x1x32xf32, #tpu.memory_space<vmem>>, vector<1x1x32xf32>
    %124 = vector.shape_cast %123 : vector<1x1x32xf32> to vector<1x32xf32>
    %125 = vector.broadcast %124 : vector<1x32xf32> to vector<2x32xf32>
    %126 = arith.addf %122, %125 : vector<2x32xf32>
    %c9_127 = arith.constant 9 : index
    %c0_128 = arith.constant 0 : index
    %c0_129 = arith.constant 0 : index
    %127 = vector.load %arg3[%c9_127, %c0_128, %c0_129] : memref<16x32x2xf32, #tpu.memory_space<vmem>>, vector<1x32x2xf32>
    %128 = vector.shape_cast %127 : vector<1x32x2xf32> to vector<32x2xf32>
    %cst_130 = arith.constant dense<0.000000e+00> : vector<32x32xf32>
    %129 = tpu.matmul %128, %126, %cst_130 {dimension_numbers = #tpu.dot_dimension_numbers<[1], [0], [0], [1], [0, 0, 1, 1], [], []>} : vector<32x2xf32>, vector<2x32xf32>, vector<32x32xf32> -> vector<32x32xf32>
    %130 = arith.addf %119, %129 : vector<32x32xf32>
    %c10 = arith.constant 10 : index
    %c0_131 = arith.constant 0 : index
    %c0_132 = arith.constant 0 : index
    %131 = vector.load %arg5[%c10, %c0_131, %c0_132] : memref<16x256x32xf32, #tpu.memory_space<vmem>>, vector<1x256x32xf32>
    %132 = vector.shape_cast %131 : vector<1x256x32xf32> to vector<256x32xf32>
    %cst_133 = arith.constant dense<0.000000e+00> : vector<2x32xf32>
    %133 = tpu.matmul %0, %132, %cst_133 {dimension_numbers = #tpu.dot_dimension_numbers<[1], [0], [0], [1], [0, 0, 1, 1], [], []>} : vector<2x256xf32>, vector<256x32xf32>, vector<2x32xf32> -> vector<2x32xf32>
    %c10_134 = arith.constant 10 : index
    %c0_135 = arith.constant 0 : index
    %c0_136 = arith.constant 0 : index
    %134 = vector.load %arg6[%c10_134, %c0_135, %c0_136] : memref<16x1x32xf32, #tpu.memory_space<vmem>>, vector<1x1x32xf32>
    %135 = vector.shape_cast %134 : vector<1x1x32xf32> to vector<1x32xf32>
    %136 = vector.broadcast %135 : vector<1x32xf32> to vector<2x32xf32>
    %137 = arith.addf %133, %136 : vector<2x32xf32>
    %c10_137 = arith.constant 10 : index
    %c0_138 = arith.constant 0 : index
    %c0_139 = arith.constant 0 : index
    %138 = vector.load %arg3[%c10_137, %c0_138, %c0_139] : memref<16x32x2xf32, #tpu.memory_space<vmem>>, vector<1x32x2xf32>
    %139 = vector.shape_cast %138 : vector<1x32x2xf32> to vector<32x2xf32>
    %cst_140 = arith.constant dense<0.000000e+00> : vector<32x32xf32>
    %140 = tpu.matmul %139, %137, %cst_140 {dimension_numbers = #tpu.dot_dimension_numbers<[1], [0], [0], [1], [0, 0, 1, 1], [], []>} : vector<32x2xf32>, vector<2x32xf32>, vector<32x32xf32> -> vector<32x32xf32>
    %141 = arith.addf %130, %140 : vector<32x32xf32>
    %c11 = arith.constant 11 : index
    %c0_141 = arith.constant 0 : index
    %c0_142 = arith.constant 0 : index
    %142 = vector.load %arg5[%c11, %c0_141, %c0_142] : memref<16x256x32xf32, #tpu.memory_space<vmem>>, vector<1x256x32xf32>
    %143 = vector.shape_cast %142 : vector<1x256x32xf32> to vector<256x32xf32>
    %cst_143 = arith.constant dense<0.000000e+00> : vector<2x32xf32>
    %144 = tpu.matmul %0, %143, %cst_143 {dimension_numbers = #tpu.dot_dimension_numbers<[1], [0], [0], [1], [0, 0, 1, 1], [], []>} : vector<2x256xf32>, vector<256x32xf32>, vector<2x32xf32> -> vector<2x32xf32>
    %c11_144 = arith.constant 11 : index
    %c0_145 = arith.constant 0 : index
    %c0_146 = arith.constant 0 : index
    %145 = vector.load %arg6[%c11_144, %c0_145, %c0_146] : memref<16x1x32xf32, #tpu.memory_space<vmem>>, vector<1x1x32xf32>
    %146 = vector.shape_cast %145 : vector<1x1x32xf32> to vector<1x32xf32>
    %147 = vector.broadcast %146 : vector<1x32xf32> to vector<2x32xf32>
    %148 = arith.addf %144, %147 : vector<2x32xf32>
    %c11_147 = arith.constant 11 : index
    %c0_148 = arith.constant 0 : index
    %c0_149 = arith.constant 0 : index
    %149 = vector.load %arg3[%c11_147, %c0_148, %c0_149] : memref<16x32x2xf32, #tpu.memory_space<vmem>>, vector<1x32x2xf32>
    %150 = vector.shape_cast %149 : vector<1x32x2xf32> to vector<32x2xf32>
    %cst_150 = arith.constant dense<0.000000e+00> : vector<32x32xf32>
    %151 = tpu.matmul %150, %148, %cst_150 {dimension_numbers = #tpu.dot_dimension_numbers<[1], [0], [0], [1], [0, 0, 1, 1], [], []>} : vector<32x2xf32>, vector<2x32xf32>, vector<32x32xf32> -> vector<32x32xf32>
    %152 = arith.addf %141, %151 : vector<32x32xf32>
    %c12 = arith.constant 12 : index
    %c0_151 = arith.constant 0 : index
    %c0_152 = arith.constant 0 : index
    %153 = vector.load %arg5[%c12, %c0_151, %c0_152] : memref<16x256x32xf32, #tpu.memory_space<vmem>>, vector<1x256x32xf32>
    %154 = vector.shape_cast %153 : vector<1x256x32xf32> to vector<256x32xf32>
    %cst_153 = arith.constant dense<0.000000e+00> : vector<2x32xf32>
    %155 = tpu.matmul %0, %154, %cst_153 {dimension_numbers = #tpu.dot_dimension_numbers<[1], [0], [0], [1], [0, 0, 1, 1], [], []>} : vector<2x256xf32>, vector<256x32xf32>, vector<2x32xf32> -> vector<2x32xf32>
    %c12_154 = arith.constant 12 : index
    %c0_155 = arith.constant 0 : index
    %c0_156 = arith.constant 0 : index
    %156 = vector.load %arg6[%c12_154, %c0_155, %c0_156] : memref<16x1x32xf32, #tpu.memory_space<vmem>>, vector<1x1x32xf32>
    %157 = vector.shape_cast %156 : vector<1x1x32xf32> to vector<1x32xf32>
    %158 = vector.broadcast %157 : vector<1x32xf32> to vector<2x32xf32>
    %159 = arith.addf %155, %158 : vector<2x32xf32>
    %c12_157 = arith.constant 12 : index
    %c0_158 = arith.constant 0 : index
    %c0_159 = arith.constant 0 : index
    %160 = vector.load %arg3[%c12_157, %c0_158, %c0_159] : memref<16x32x2xf32, #tpu.memory_space<vmem>>, vector<1x32x2xf32>
    %161 = vector.shape_cast %160 : vector<1x32x2xf32> to vector<32x2xf32>
    %cst_160 = arith.constant dense<0.000000e+00> : vector<32x32xf32>
    %162 = tpu.matmul %161, %159, %cst_160 {dimension_numbers = #tpu.dot_dimension_numbers<[1], [0], [0], [1], [0, 0, 1, 1], [], []>} : vector<32x2xf32>, vector<2x32xf32>, vector<32x32xf32> -> vector<32x32xf32>
    %163 = arith.addf %152, %162 : vector<32x32xf32>
    %c13 = arith.constant 13 : index
    %c0_161 = arith.constant 0 : index
    %c0_162 = arith.constant 0 : index
    %164 = vector.load %arg5[%c13, %c0_161, %c0_162] : memref<16x256x32xf32, #tpu.memory_space<vmem>>, vector<1x256x32xf32>
    %165 = vector.shape_cast %164 : vector<1x256x32xf32> to vector<256x32xf32>
    %cst_163 = arith.constant dense<0.000000e+00> : vector<2x32xf32>
    %166 = tpu.matmul %0, %165, %cst_163 {dimension_numbers = #tpu.dot_dimension_numbers<[1], [0], [0], [1], [0, 0, 1, 1], [], []>} : vector<2x256xf32>, vector<256x32xf32>, vector<2x32xf32> -> vector<2x32xf32>
    %c13_164 = arith.constant 13 : index
    %c0_165 = arith.constant 0 : index
    %c0_166 = arith.constant 0 : index
    %167 = vector.load %arg6[%c13_164, %c0_165, %c0_166] : memref<16x1x32xf32, #tpu.memory_space<vmem>>, vector<1x1x32xf32>
    %168 = vector.shape_cast %167 : vector<1x1x32xf32> to vector<1x32xf32>
    %169 = vector.broadcast %168 : vector<1x32xf32> to vector<2x32xf32>
    %170 = arith.addf %166, %169 : vector<2x32xf32>
    %c13_167 = arith.constant 13 : index
    %c0_168 = arith.constant 0 : index
    %c0_169 = arith.constant 0 : index
    %171 = vector.load %arg3[%c13_167, %c0_168, %c0_169] : memref<16x32x2xf32, #tpu.memory_space<vmem>>, vector<1x32x2xf32>
    %172 = vector.shape_cast %171 : vector<1x32x2xf32> to vector<32x2xf32>
    %cst_170 = arith.constant dense<0.000000e+00> : vector<32x32xf32>
    %173 = tpu.matmul %172, %170, %cst_170 {dimension_numbers = #tpu.dot_dimension_numbers<[1], [0], [0], [1], [0, 0, 1, 1], [], []>} : vector<32x2xf32>, vector<2x32xf32>, vector<32x32xf32> -> vector<32x32xf32>
    %174 = arith.addf %163, %173 : vector<32x32xf32>
    %c14 = arith.constant 14 : index
    %c0_171 = arith.constant 0 : index
    %c0_172 = arith.constant 0 : index
    %175 = vector.load %arg5[%c14, %c0_171, %c0_172] : memref<16x256x32xf32, #tpu.memory_space<vmem>>, vector<1x256x32xf32>
    %176 = vector.shape_cast %175 : vector<1x256x32xf32> to vector<256x32xf32>
    %cst_173 = arith.constant dense<0.000000e+00> : vector<2x32xf32>
    %177 = tpu.matmul %0, %176, %cst_173 {dimension_numbers = #tpu.dot_dimension_numbers<[1], [0], [0], [1], [0, 0, 1, 1], [], []>} : vector<2x256xf32>, vector<256x32xf32>, vector<2x32xf32> -> vector<2x32xf32>
    %c14_174 = arith.constant 14 : index
    %c0_175 = arith.constant 0 : index
    %c0_176 = arith.constant 0 : index
    %178 = vector.load %arg6[%c14_174, %c0_175, %c0_176] : memref<16x1x32xf32, #tpu.memory_space<vmem>>, vector<1x1x32xf32>
    %179 = vector.shape_cast %178 : vector<1x1x32xf32> to vector<1x32xf32>
    %180 = vector.broadcast %179 : vector<1x32xf32> to vector<2x32xf32>
    %181 = arith.addf %177, %180 : vector<2x32xf32>
    %c14_177 = arith.constant 14 : index
    %c0_178 = arith.constant 0 : index
    %c0_179 = arith.constant 0 : index
    %182 = vector.load %arg3[%c14_177, %c0_178, %c0_179] : memref<16x32x2xf32, #tpu.memory_space<vmem>>, vector<1x32x2xf32>
    %183 = vector.shape_cast %182 : vector<1x32x2xf32> to vector<32x2xf32>
    %cst_180 = arith.constant dense<0.000000e+00> : vector<32x32xf32>
    %184 = tpu.matmul %183, %181, %cst_180 {dimension_numbers = #tpu.dot_dimension_numbers<[1], [0], [0], [1], [0, 0, 1, 1], [], []>} : vector<32x2xf32>, vector<2x32xf32>, vector<32x32xf32> -> vector<32x32xf32>
    %185 = arith.addf %174, %184 : vector<32x32xf32>
    %c15 = arith.constant 15 : index
    %c0_181 = arith.constant 0 : index
    %c0_182 = arith.constant 0 : index
    %186 = vector.load %arg5[%c15, %c0_181, %c0_182] : memref<16x256x32xf32, #tpu.memory_space<vmem>>, vector<1x256x32xf32>
    %187 = vector.shape_cast %186 : vector<1x256x32xf32> to vector<256x32xf32>
    %cst_183 = arith.constant dense<0.000000e+00> : vector<2x32xf32>
    %188 = tpu.matmul %0, %187, %cst_183 {dimension_numbers = #tpu.dot_dimension_numbers<[1], [0], [0], [1], [0, 0, 1, 1], [], []>} : vector<2x256xf32>, vector<256x32xf32>, vector<2x32xf32> -> vector<2x32xf32>
    %c15_184 = arith.constant 15 : index
    %c0_185 = arith.constant 0 : index
    %c0_186 = arith.constant 0 : index
    %189 = vector.load %arg6[%c15_184, %c0_185, %c0_186] : memref<16x1x32xf32, #tpu.memory_space<vmem>>, vector<1x1x32xf32>
    %190 = vector.shape_cast %189 : vector<1x1x32xf32> to vector<1x32xf32>
    %191 = vector.broadcast %190 : vector<1x32xf32> to vector<2x32xf32>
    %192 = arith.addf %188, %191 : vector<2x32xf32>
    %c15_187 = arith.constant 15 : index
    %c0_188 = arith.constant 0 : index
    %c0_189 = arith.constant 0 : index
    %193 = vector.load %arg3[%c15_187, %c0_188, %c0_189] : memref<16x32x2xf32, #tpu.memory_space<vmem>>, vector<1x32x2xf32>
    %194 = vector.shape_cast %193 : vector<1x32x2xf32> to vector<32x2xf32>
    %cst_190 = arith.constant dense<0.000000e+00> : vector<32x32xf32>
    %195 = tpu.matmul %194, %192, %cst_190 {dimension_numbers = #tpu.dot_dimension_numbers<[1], [0], [0], [1], [0, 0, 1, 1], [], []>} : vector<32x2xf32>, vector<2x32xf32>, vector<32x32xf32> -> vector<32x32xf32>
    %196 = arith.addf %185, %195 : vector<32x32xf32>
    %c0_191 = arith.constant 0 : index
    %c0_192 = arith.constant 0 : index
    %197 = vector.load %arg7[%c0_191, %c0_192] : memref<2x32xf32, #tpu.memory_space<vmem>>, vector<2x32xf32>
    %c0_193 = arith.constant 0 : index
    %c0_194 = arith.constant 0 : index
    %198 = vector.load %arg8[%c0_193, %c0_194] : memref<2x32xf32, #tpu.memory_space<vmem>>, vector<2x32xf32>
    %c0_195 = arith.constant 0 : index
    %c0_196 = arith.constant 0 : index
    %199 = vector.load %arg9[%c0_195, %c0_196] : memref<2x64xf32, #tpu.memory_space<vmem>>, vector<2x64xf32>
    %c0_197 = arith.constant 0 : index
    %c0_198 = arith.constant 0 : index
    %200 = vector.load %arg10[%c0_197, %c0_198] : memref<2x64xf32, #tpu.memory_space<vmem>>, vector<2x64xf32>
    %c0_199 = arith.constant 0 : index
    %c0_200 = arith.constant 0 : index
    %201 = vector.load %arg12[%c0_199, %c0_200] : memref<1x64xf32, #tpu.memory_space<vmem>>, vector<1x64xf32>
    %c0_201 = arith.constant 0 : index
    %c0_202 = arith.constant 0 : index
    %202 = vector.load %arg14[%c0_201, %c0_202] : memref<1x64xf32, #tpu.memory_space<vmem>>, vector<1x64xf32>
    %c0_203 = arith.constant 0 : index
    %c0_204 = arith.constant 0 : index
    %203 = vector.load %arg15[%c0_203, %c0_204] : memref<32x64xf32, #tpu.memory_space<vmem>>, vector<32x64xf32>
    %c0_205 = arith.constant 0 : index
    %c0_206 = arith.constant 0 : index
    %204 = vector.load %arg16[%c0_205, %c0_206] : memref<1x64xf32, #tpu.memory_space<vmem>>, vector<1x64xf32>
    %cst_207 = arith.constant dense<0.000000e+00> : vector<32x64xf32>
    %205 = tpu.matmul %196, %203, %cst_207 {dimension_numbers = #tpu.dot_dimension_numbers<[1], [0], [0], [1], [0, 0, 1, 1], [], []>} : vector<32x32xf32>, vector<32x64xf32>, vector<32x64xf32> -> vector<32x64xf32>
    %206 = vector.broadcast %204 : vector<1x64xf32> to vector<32x64xf32>
    %207 = arith.addf %205, %206 : vector<32x64xf32>
    %cst_208 = arith.constant dense<0.000000e+00> : vector<32xf32>
    %208 = vector.multi_reduction <add>, %196, %cst_208 [0] : vector<32x32xf32> to vector<32xf32>
    %209 = vector.shape_cast %208 : vector<32xf32> to vector<1x32xf32>
    %cst_209 = arith.constant 3.200000e+01 : f32
    %210 = vector.broadcast %cst_209 : f32 to vector<1x32xf32>
    %211 = arith.divf %209, %210 : vector<1x32xf32>
    %212 = arith.mulf %196, %196 : vector<32x32xf32>
    %cst_210 = arith.constant dense<0.000000e+00> : vector<32xf32>
    %213 = vector.multi_reduction <add>, %212, %cst_210 [0] : vector<32x32xf32> to vector<32xf32>
    %214 = vector.shape_cast %213 : vector<32xf32> to vector<1x32xf32>
    %cst_211 = arith.constant 3.200000e+01 : f32
    %215 = vector.broadcast %cst_211 : f32 to vector<1x32xf32>
    %216 = arith.divf %214, %215 : vector<1x32xf32>
    %217 = arith.mulf %211, %211 : vector<1x32xf32>
    %218 = arith.subf %216, %217 : vector<1x32xf32>
    %cst_212 = arith.constant 0.000000e+00 : f32
    %219 = vector.broadcast %cst_212 : f32 to vector<1x32xf32>
    %220 = arith.maximumf %218, %219 : vector<1x32xf32>
    %221 = vector.broadcast %211 : vector<1x32xf32> to vector<32x32xf32>
    %222 = arith.subf %196, %221 : vector<32x32xf32>
    %cst_213 = arith.constant 9.99999974E-6 : f32
    %223 = vector.broadcast %cst_213 : f32 to vector<1x32xf32>
    %224 = arith.addf %220, %223 : vector<1x32xf32>
    %225 = math.rsqrt %224 : vector<1x32xf32>
    %226 = vector.broadcast %225 : vector<1x32xf32> to vector<32x32xf32>
    %227 = arith.mulf %222, %226 : vector<32x32xf32>
    %cst_214 = arith.constant dense<0.000000e+00> : vector<32x32xf32>
    %228 = tpu.matmul %1, %197, %cst_214 {dimension_numbers = #tpu.dot_dimension_numbers<[1], [0], [0], [1], [0, 0, 1, 1], [], []>} : vector<32x2xf32>, vector<2x32xf32>, vector<32x32xf32> -> vector<32x32xf32>
    %229 = arith.mulf %228, %227 : vector<32x32xf32>
    %cst_215 = arith.constant dense<0.000000e+00> : vector<32x32xf32>
    %230 = tpu.matmul %1, %198, %cst_215 {dimension_numbers = #tpu.dot_dimension_numbers<[1], [0], [0], [1], [0, 0, 1, 1], [], []>} : vector<32x2xf32>, vector<2x32xf32>, vector<32x32xf32> -> vector<32x32xf32>
    %231 = arith.addf %229, %230 : vector<32x32xf32>
    %cst_216 = arith.constant 0.000000e+00 : f32
    %232 = vector.broadcast %cst_216 : f32 to vector<32x32xf32>
    %233 = arith.maximumf %231, %232 : vector<32x32xf32>
    %cst_217 = arith.constant dense<0.000000e+00> : vector<32x32xf32>
    %234 = tpu.matmul %3, %233, %cst_217 {dimension_numbers = #tpu.dot_dimension_numbers<[1], [0], [0], [1], [0, 0, 1, 1], [], []>} : vector<32x32xf32>, vector<32x32xf32>, vector<32x32xf32> -> vector<32x32xf32>
    %c0_218 = arith.constant 0 : index
    %c0_219 = arith.constant 0 : index
    %c0_220 = arith.constant 0 : index
    %235 = vector.load %arg11[%c0_218, %c0_219, %c0_220] : memref<9x32x64xf32, #tpu.memory_space<vmem>>, vector<1x32x64xf32>
    %236 = vector.shape_cast %235 : vector<1x32x64xf32> to vector<32x64xf32>
    %cst_221 = arith.constant dense<0.000000e+00> : vector<32x64xf32>
    %237 = tpu.matmul %234, %236, %cst_221 {dimension_numbers = #tpu.dot_dimension_numbers<[1], [0], [0], [1], [0, 0, 1, 1], [], []>} : vector<32x32xf32>, vector<32x64xf32>, vector<32x64xf32> -> vector<32x64xf32>
    %cst_222 = arith.constant dense<0.000000e+00> : vector<32x32xf32>
    %238 = tpu.matmul %5, %233, %cst_222 {dimension_numbers = #tpu.dot_dimension_numbers<[1], [0], [0], [1], [0, 0, 1, 1], [], []>} : vector<32x32xf32>, vector<32x32xf32>, vector<32x32xf32> -> vector<32x32xf32>
    %c1_223 = arith.constant 1 : index
    %c0_224 = arith.constant 0 : index
    %c0_225 = arith.constant 0 : index
    %239 = vector.load %arg11[%c1_223, %c0_224, %c0_225] : memref<9x32x64xf32, #tpu.memory_space<vmem>>, vector<1x32x64xf32>
    %240 = vector.shape_cast %239 : vector<1x32x64xf32> to vector<32x64xf32>
    %cst_226 = arith.constant dense<0.000000e+00> : vector<32x64xf32>
    %241 = tpu.matmul %238, %240, %cst_226 {dimension_numbers = #tpu.dot_dimension_numbers<[1], [0], [0], [1], [0, 0, 1, 1], [], []>} : vector<32x32xf32>, vector<32x64xf32>, vector<32x64xf32> -> vector<32x64xf32>
    %242 = arith.addf %237, %241 : vector<32x64xf32>
    %cst_227 = arith.constant dense<0.000000e+00> : vector<32x32xf32>
    %243 = tpu.matmul %7, %233, %cst_227 {dimension_numbers = #tpu.dot_dimension_numbers<[1], [0], [0], [1], [0, 0, 1, 1], [], []>} : vector<32x32xf32>, vector<32x32xf32>, vector<32x32xf32> -> vector<32x32xf32>
    %c2_228 = arith.constant 2 : index
    %c0_229 = arith.constant 0 : index
    %c0_230 = arith.constant 0 : index
    %244 = vector.load %arg11[%c2_228, %c0_229, %c0_230] : memref<9x32x64xf32, #tpu.memory_space<vmem>>, vector<1x32x64xf32>
    %245 = vector.shape_cast %244 : vector<1x32x64xf32> to vector<32x64xf32>
    %cst_231 = arith.constant dense<0.000000e+00> : vector<32x64xf32>
    %246 = tpu.matmul %243, %245, %cst_231 {dimension_numbers = #tpu.dot_dimension_numbers<[1], [0], [0], [1], [0, 0, 1, 1], [], []>} : vector<32x32xf32>, vector<32x64xf32>, vector<32x64xf32> -> vector<32x64xf32>
    %247 = arith.addf %242, %246 : vector<32x64xf32>
    %cst_232 = arith.constant dense<0.000000e+00> : vector<32x32xf32>
    %248 = tpu.matmul %9, %233, %cst_232 {dimension_numbers = #tpu.dot_dimension_numbers<[1], [0], [0], [1], [0, 0, 1, 1], [], []>} : vector<32x32xf32>, vector<32x32xf32>, vector<32x32xf32> -> vector<32x32xf32>
    %c3_233 = arith.constant 3 : index
    %c0_234 = arith.constant 0 : index
    %c0_235 = arith.constant 0 : index
    %249 = vector.load %arg11[%c3_233, %c0_234, %c0_235] : memref<9x32x64xf32, #tpu.memory_space<vmem>>, vector<1x32x64xf32>
    %250 = vector.shape_cast %249 : vector<1x32x64xf32> to vector<32x64xf32>
    %cst_236 = arith.constant dense<0.000000e+00> : vector<32x64xf32>
    %251 = tpu.matmul %248, %250, %cst_236 {dimension_numbers = #tpu.dot_dimension_numbers<[1], [0], [0], [1], [0, 0, 1, 1], [], []>} : vector<32x32xf32>, vector<32x64xf32>, vector<32x64xf32> -> vector<32x64xf32>
    %252 = arith.addf %247, %251 : vector<32x64xf32>
    %cst_237 = arith.constant dense<0.000000e+00> : vector<32x32xf32>
    %253 = tpu.matmul %11, %233, %cst_237 {dimension_numbers = #tpu.dot_dimension_numbers<[1], [0], [0], [1], [0, 0, 1, 1], [], []>} : vector<32x32xf32>, vector<32x32xf32>, vector<32x32xf32> -> vector<32x32xf32>
    %c4_238 = arith.constant 4 : index
    %c0_239 = arith.constant 0 : index
    %c0_240 = arith.constant 0 : index
    %254 = vector.load %arg11[%c4_238, %c0_239, %c0_240] : memref<9x32x64xf32, #tpu.memory_space<vmem>>, vector<1x32x64xf32>
    %255 = vector.shape_cast %254 : vector<1x32x64xf32> to vector<32x64xf32>
    %cst_241 = arith.constant dense<0.000000e+00> : vector<32x64xf32>
    %256 = tpu.matmul %253, %255, %cst_241 {dimension_numbers = #tpu.dot_dimension_numbers<[1], [0], [0], [1], [0, 0, 1, 1], [], []>} : vector<32x32xf32>, vector<32x64xf32>, vector<32x64xf32> -> vector<32x64xf32>
    %257 = arith.addf %252, %256 : vector<32x64xf32>
    %cst_242 = arith.constant dense<0.000000e+00> : vector<32x32xf32>
    %258 = tpu.matmul %13, %233, %cst_242 {dimension_numbers = #tpu.dot_dimension_numbers<[1], [0], [0], [1], [0, 0, 1, 1], [], []>} : vector<32x32xf32>, vector<32x32xf32>, vector<32x32xf32> -> vector<32x32xf32>
    %c5_243 = arith.constant 5 : index
    %c0_244 = arith.constant 0 : index
    %c0_245 = arith.constant 0 : index
    %259 = vector.load %arg11[%c5_243, %c0_244, %c0_245] : memref<9x32x64xf32, #tpu.memory_space<vmem>>, vector<1x32x64xf32>
    %260 = vector.shape_cast %259 : vector<1x32x64xf32> to vector<32x64xf32>
    %cst_246 = arith.constant dense<0.000000e+00> : vector<32x64xf32>
    %261 = tpu.matmul %258, %260, %cst_246 {dimension_numbers = #tpu.dot_dimension_numbers<[1], [0], [0], [1], [0, 0, 1, 1], [], []>} : vector<32x32xf32>, vector<32x64xf32>, vector<32x64xf32> -> vector<32x64xf32>
    %262 = arith.addf %257, %261 : vector<32x64xf32>
    %cst_247 = arith.constant dense<0.000000e+00> : vector<32x32xf32>
    %263 = tpu.matmul %15, %233, %cst_247 {dimension_numbers = #tpu.dot_dimension_numbers<[1], [0], [0], [1], [0, 0, 1, 1], [], []>} : vector<32x32xf32>, vector<32x32xf32>, vector<32x32xf32> -> vector<32x32xf32>
    %c6_248 = arith.constant 6 : index
    %c0_249 = arith.constant 0 : index
    %c0_250 = arith.constant 0 : index
    %264 = vector.load %arg11[%c6_248, %c0_249, %c0_250] : memref<9x32x64xf32, #tpu.memory_space<vmem>>, vector<1x32x64xf32>
    %265 = vector.shape_cast %264 : vector<1x32x64xf32> to vector<32x64xf32>
    %cst_251 = arith.constant dense<0.000000e+00> : vector<32x64xf32>
    %266 = tpu.matmul %263, %265, %cst_251 {dimension_numbers = #tpu.dot_dimension_numbers<[1], [0], [0], [1], [0, 0, 1, 1], [], []>} : vector<32x32xf32>, vector<32x64xf32>, vector<32x64xf32> -> vector<32x64xf32>
    %267 = arith.addf %262, %266 : vector<32x64xf32>
    %cst_252 = arith.constant dense<0.000000e+00> : vector<32x32xf32>
    %268 = tpu.matmul %17, %233, %cst_252 {dimension_numbers = #tpu.dot_dimension_numbers<[1], [0], [0], [1], [0, 0, 1, 1], [], []>} : vector<32x32xf32>, vector<32x32xf32>, vector<32x32xf32> -> vector<32x32xf32>
    %c7_253 = arith.constant 7 : index
    %c0_254 = arith.constant 0 : index
    %c0_255 = arith.constant 0 : index
    %269 = vector.load %arg11[%c7_253, %c0_254, %c0_255] : memref<9x32x64xf32, #tpu.memory_space<vmem>>, vector<1x32x64xf32>
    %270 = vector.shape_cast %269 : vector<1x32x64xf32> to vector<32x64xf32>
    %cst_256 = arith.constant dense<0.000000e+00> : vector<32x64xf32>
    %271 = tpu.matmul %268, %270, %cst_256 {dimension_numbers = #tpu.dot_dimension_numbers<[1], [0], [0], [1], [0, 0, 1, 1], [], []>} : vector<32x32xf32>, vector<32x64xf32>, vector<32x64xf32> -> vector<32x64xf32>
    %272 = arith.addf %267, %271 : vector<32x64xf32>
    %cst_257 = arith.constant dense<0.000000e+00> : vector<32x32xf32>
    %273 = tpu.matmul %19, %233, %cst_257 {dimension_numbers = #tpu.dot_dimension_numbers<[1], [0], [0], [1], [0, 0, 1, 1], [], []>} : vector<32x32xf32>, vector<32x32xf32>, vector<32x32xf32> -> vector<32x32xf32>
    %c8_258 = arith.constant 8 : index
    %c0_259 = arith.constant 0 : index
    %c0_260 = arith.constant 0 : index
    %274 = vector.load %arg11[%c8_258, %c0_259, %c0_260] : memref<9x32x64xf32, #tpu.memory_space<vmem>>, vector<1x32x64xf32>
    %275 = vector.shape_cast %274 : vector<1x32x64xf32> to vector<32x64xf32>
    %cst_261 = arith.constant dense<0.000000e+00> : vector<32x64xf32>
    %276 = tpu.matmul %273, %275, %cst_261 {dimension_numbers = #tpu.dot_dimension_numbers<[1], [0], [0], [1], [0, 0, 1, 1], [], []>} : vector<32x32xf32>, vector<32x64xf32>, vector<32x64xf32> -> vector<32x64xf32>
    %277 = arith.addf %272, %276 : vector<32x64xf32>
    %278 = vector.broadcast %201 : vector<1x64xf32> to vector<32x64xf32>
    %279 = arith.addf %277, %278 : vector<32x64xf32>
    %cst_262 = arith.constant dense<0.000000e+00> : vector<64xf32>
    %280 = vector.multi_reduction <add>, %279, %cst_262 [0] : vector<32x64xf32> to vector<64xf32>
    %281 = vector.shape_cast %280 : vector<64xf32> to vector<1x64xf32>
    %cst_263 = arith.constant 3.200000e+01 : f32
    %282 = vector.broadcast %cst_263 : f32 to vector<1x64xf32>
    %283 = arith.divf %281, %282 : vector<1x64xf32>
    %284 = arith.mulf %279, %279 : vector<32x64xf32>
    %cst_264 = arith.constant dense<0.000000e+00> : vector<64xf32>
    %285 = vector.multi_reduction <add>, %284, %cst_264 [0] : vector<32x64xf32> to vector<64xf32>
    %286 = vector.shape_cast %285 : vector<64xf32> to vector<1x64xf32>
    %cst_265 = arith.constant 3.200000e+01 : f32
    %287 = vector.broadcast %cst_265 : f32 to vector<1x64xf32>
    %288 = arith.divf %286, %287 : vector<1x64xf32>
    %289 = arith.mulf %283, %283 : vector<1x64xf32>
    %290 = arith.subf %288, %289 : vector<1x64xf32>
    %cst_266 = arith.constant 0.000000e+00 : f32
    %291 = vector.broadcast %cst_266 : f32 to vector<1x64xf32>
    %292 = arith.maximumf %290, %291 : vector<1x64xf32>
    %293 = vector.broadcast %283 : vector<1x64xf32> to vector<32x64xf32>
    %294 = arith.subf %279, %293 : vector<32x64xf32>
    %cst_267 = arith.constant 9.99999974E-6 : f32
    %295 = vector.broadcast %cst_267 : f32 to vector<1x64xf32>
    %296 = arith.addf %292, %295 : vector<1x64xf32>
    %297 = math.rsqrt %296 : vector<1x64xf32>
    %298 = vector.broadcast %297 : vector<1x64xf32> to vector<32x64xf32>
    %299 = arith.mulf %294, %298 : vector<32x64xf32>
    %cst_268 = arith.constant dense<0.000000e+00> : vector<32x64xf32>
    %300 = tpu.matmul %1, %199, %cst_268 {dimension_numbers = #tpu.dot_dimension_numbers<[1], [0], [0], [1], [0, 0, 1, 1], [], []>} : vector<32x2xf32>, vector<2x64xf32>, vector<32x64xf32> -> vector<32x64xf32>
    %301 = arith.mulf %300, %299 : vector<32x64xf32>
    %cst_269 = arith.constant dense<0.000000e+00> : vector<32x64xf32>
    %302 = tpu.matmul %1, %200, %cst_269 {dimension_numbers = #tpu.dot_dimension_numbers<[1], [0], [0], [1], [0, 0, 1, 1], [], []>} : vector<32x2xf32>, vector<2x64xf32>, vector<32x64xf32> -> vector<32x64xf32>
    %303 = arith.addf %301, %302 : vector<32x64xf32>
    %cst_270 = arith.constant 0.000000e+00 : f32
    %304 = vector.broadcast %cst_270 : f32 to vector<32x64xf32>
    %305 = arith.maximumf %303, %304 : vector<32x64xf32>
    %cst_271 = arith.constant dense<0.000000e+00> : vector<32x64xf32>
    %306 = tpu.matmul %3, %305, %cst_271 {dimension_numbers = #tpu.dot_dimension_numbers<[1], [0], [0], [1], [0, 0, 1, 1], [], []>} : vector<32x32xf32>, vector<32x64xf32>, vector<32x64xf32> -> vector<32x64xf32>
    %c0_272 = arith.constant 0 : index
    %c0_273 = arith.constant 0 : index
    %c0_274 = arith.constant 0 : index
    %307 = vector.load %arg13[%c0_272, %c0_273, %c0_274] : memref<9x64x64xf32, #tpu.memory_space<vmem>>, vector<1x64x64xf32>
    %308 = vector.shape_cast %307 : vector<1x64x64xf32> to vector<64x64xf32>
    %cst_275 = arith.constant dense<0.000000e+00> : vector<32x64xf32>
    %309 = tpu.matmul %306, %308, %cst_275 {dimension_numbers = #tpu.dot_dimension_numbers<[1], [0], [0], [1], [0, 0, 1, 1], [], []>} : vector<32x64xf32>, vector<64x64xf32>, vector<32x64xf32> -> vector<32x64xf32>
    %cst_276 = arith.constant dense<0.000000e+00> : vector<32x64xf32>
    %310 = tpu.matmul %5, %305, %cst_276 {dimension_numbers = #tpu.dot_dimension_numbers<[1], [0], [0], [1], [0, 0, 1, 1], [], []>} : vector<32x32xf32>, vector<32x64xf32>, vector<32x64xf32> -> vector<32x64xf32>
    %c1_277 = arith.constant 1 : index
    %c0_278 = arith.constant 0 : index
    %c0_279 = arith.constant 0 : index
    %311 = vector.load %arg13[%c1_277, %c0_278, %c0_279] : memref<9x64x64xf32, #tpu.memory_space<vmem>>, vector<1x64x64xf32>
    %312 = vector.shape_cast %311 : vector<1x64x64xf32> to vector<64x64xf32>
    %cst_280 = arith.constant dense<0.000000e+00> : vector<32x64xf32>
    %313 = tpu.matmul %310, %312, %cst_280 {dimension_numbers = #tpu.dot_dimension_numbers<[1], [0], [0], [1], [0, 0, 1, 1], [], []>} : vector<32x64xf32>, vector<64x64xf32>, vector<32x64xf32> -> vector<32x64xf32>
    %314 = arith.addf %309, %313 : vector<32x64xf32>
    %cst_281 = arith.constant dense<0.000000e+00> : vector<32x64xf32>
    %315 = tpu.matmul %7, %305, %cst_281 {dimension_numbers = #tpu.dot_dimension_numbers<[1], [0], [0], [1], [0, 0, 1, 1], [], []>} : vector<32x32xf32>, vector<32x64xf32>, vector<32x64xf32> -> vector<32x64xf32>
    %c2_282 = arith.constant 2 : index
    %c0_283 = arith.constant 0 : index
    %c0_284 = arith.constant 0 : index
    %316 = vector.load %arg13[%c2_282, %c0_283, %c0_284] : memref<9x64x64xf32, #tpu.memory_space<vmem>>, vector<1x64x64xf32>
    %317 = vector.shape_cast %316 : vector<1x64x64xf32> to vector<64x64xf32>
    %cst_285 = arith.constant dense<0.000000e+00> : vector<32x64xf32>
    %318 = tpu.matmul %315, %317, %cst_285 {dimension_numbers = #tpu.dot_dimension_numbers<[1], [0], [0], [1], [0, 0, 1, 1], [], []>} : vector<32x64xf32>, vector<64x64xf32>, vector<32x64xf32> -> vector<32x64xf32>
    %319 = arith.addf %314, %318 : vector<32x64xf32>
    %cst_286 = arith.constant dense<0.000000e+00> : vector<32x64xf32>
    %320 = tpu.matmul %9, %305, %cst_286 {dimension_numbers = #tpu.dot_dimension_numbers<[1], [0], [0], [1], [0, 0, 1, 1], [], []>} : vector<32x32xf32>, vector<32x64xf32>, vector<32x64xf32> -> vector<32x64xf32>
    %c3_287 = arith.constant 3 : index
    %c0_288 = arith.constant 0 : index
    %c0_289 = arith.constant 0 : index
    %321 = vector.load %arg13[%c3_287, %c0_288, %c0_289] : memref<9x64x64xf32, #tpu.memory_space<vmem>>, vector<1x64x64xf32>
    %322 = vector.shape_cast %321 : vector<1x64x64xf32> to vector<64x64xf32>
    %cst_290 = arith.constant dense<0.000000e+00> : vector<32x64xf32>
    %323 = tpu.matmul %320, %322, %cst_290 {dimension_numbers = #tpu.dot_dimension_numbers<[1], [0], [0], [1], [0, 0, 1, 1], [], []>} : vector<32x64xf32>, vector<64x64xf32>, vector<32x64xf32> -> vector<32x64xf32>
    %324 = arith.addf %319, %323 : vector<32x64xf32>
    %cst_291 = arith.constant dense<0.000000e+00> : vector<32x64xf32>
    %325 = tpu.matmul %11, %305, %cst_291 {dimension_numbers = #tpu.dot_dimension_numbers<[1], [0], [0], [1], [0, 0, 1, 1], [], []>} : vector<32x32xf32>, vector<32x64xf32>, vector<32x64xf32> -> vector<32x64xf32>
    %c4_292 = arith.constant 4 : index
    %c0_293 = arith.constant 0 : index
    %c0_294 = arith.constant 0 : index
    %326 = vector.load %arg13[%c4_292, %c0_293, %c0_294] : memref<9x64x64xf32, #tpu.memory_space<vmem>>, vector<1x64x64xf32>
    %327 = vector.shape_cast %326 : vector<1x64x64xf32> to vector<64x64xf32>
    %cst_295 = arith.constant dense<0.000000e+00> : vector<32x64xf32>
    %328 = tpu.matmul %325, %327, %cst_295 {dimension_numbers = #tpu.dot_dimension_numbers<[1], [0], [0], [1], [0, 0, 1, 1], [], []>} : vector<32x64xf32>, vector<64x64xf32>, vector<32x64xf32> -> vector<32x64xf32>
    %329 = arith.addf %324, %328 : vector<32x64xf32>
    %cst_296 = arith.constant dense<0.000000e+00> : vector<32x64xf32>
    %330 = tpu.matmul %13, %305, %cst_296 {dimension_numbers = #tpu.dot_dimension_numbers<[1], [0], [0], [1], [0, 0, 1, 1], [], []>} : vector<32x32xf32>, vector<32x64xf32>, vector<32x64xf32> -> vector<32x64xf32>
    %c5_297 = arith.constant 5 : index
    %c0_298 = arith.constant 0 : index
    %c0_299 = arith.constant 0 : index
    %331 = vector.load %arg13[%c5_297, %c0_298, %c0_299] : memref<9x64x64xf32, #tpu.memory_space<vmem>>, vector<1x64x64xf32>
    %332 = vector.shape_cast %331 : vector<1x64x64xf32> to vector<64x64xf32>
    %cst_300 = arith.constant dense<0.000000e+00> : vector<32x64xf32>
    %333 = tpu.matmul %330, %332, %cst_300 {dimension_numbers = #tpu.dot_dimension_numbers<[1], [0], [0], [1], [0, 0, 1, 1], [], []>} : vector<32x64xf32>, vector<64x64xf32>, vector<32x64xf32> -> vector<32x64xf32>
    %334 = arith.addf %329, %333 : vector<32x64xf32>
    %cst_301 = arith.constant dense<0.000000e+00> : vector<32x64xf32>
    %335 = tpu.matmul %15, %305, %cst_301 {dimension_numbers = #tpu.dot_dimension_numbers<[1], [0], [0], [1], [0, 0, 1, 1], [], []>} : vector<32x32xf32>, vector<32x64xf32>, vector<32x64xf32> -> vector<32x64xf32>
    %c6_302 = arith.constant 6 : index
    %c0_303 = arith.constant 0 : index
    %c0_304 = arith.constant 0 : index
    %336 = vector.load %arg13[%c6_302, %c0_303, %c0_304] : memref<9x64x64xf32, #tpu.memory_space<vmem>>, vector<1x64x64xf32>
    %337 = vector.shape_cast %336 : vector<1x64x64xf32> to vector<64x64xf32>
    %cst_305 = arith.constant dense<0.000000e+00> : vector<32x64xf32>
    %338 = tpu.matmul %335, %337, %cst_305 {dimension_numbers = #tpu.dot_dimension_numbers<[1], [0], [0], [1], [0, 0, 1, 1], [], []>} : vector<32x64xf32>, vector<64x64xf32>, vector<32x64xf32> -> vector<32x64xf32>
    %339 = arith.addf %334, %338 : vector<32x64xf32>
    %cst_306 = arith.constant dense<0.000000e+00> : vector<32x64xf32>
    %340 = tpu.matmul %17, %305, %cst_306 {dimension_numbers = #tpu.dot_dimension_numbers<[1], [0], [0], [1], [0, 0, 1, 1], [], []>} : vector<32x32xf32>, vector<32x64xf32>, vector<32x64xf32> -> vector<32x64xf32>
    %c7_307 = arith.constant 7 : index
    %c0_308 = arith.constant 0 : index
    %c0_309 = arith.constant 0 : index
    %341 = vector.load %arg13[%c7_307, %c0_308, %c0_309] : memref<9x64x64xf32, #tpu.memory_space<vmem>>, vector<1x64x64xf32>
    %342 = vector.shape_cast %341 : vector<1x64x64xf32> to vector<64x64xf32>
    %cst_310 = arith.constant dense<0.000000e+00> : vector<32x64xf32>
    %343 = tpu.matmul %340, %342, %cst_310 {dimension_numbers = #tpu.dot_dimension_numbers<[1], [0], [0], [1], [0, 0, 1, 1], [], []>} : vector<32x64xf32>, vector<64x64xf32>, vector<32x64xf32> -> vector<32x64xf32>
    %344 = arith.addf %339, %343 : vector<32x64xf32>
    %cst_311 = arith.constant dense<0.000000e+00> : vector<32x64xf32>
    %345 = tpu.matmul %19, %305, %cst_311 {dimension_numbers = #tpu.dot_dimension_numbers<[1], [0], [0], [1], [0, 0, 1, 1], [], []>} : vector<32x32xf32>, vector<32x64xf32>, vector<32x64xf32> -> vector<32x64xf32>
    %c8_312 = arith.constant 8 : index
    %c0_313 = arith.constant 0 : index
    %c0_314 = arith.constant 0 : index
    %346 = vector.load %arg13[%c8_312, %c0_313, %c0_314] : memref<9x64x64xf32, #tpu.memory_space<vmem>>, vector<1x64x64xf32>
    %347 = vector.shape_cast %346 : vector<1x64x64xf32> to vector<64x64xf32>
    %cst_315 = arith.constant dense<0.000000e+00> : vector<32x64xf32>
    %348 = tpu.matmul %345, %347, %cst_315 {dimension_numbers = #tpu.dot_dimension_numbers<[1], [0], [0], [1], [0, 0, 1, 1], [], []>} : vector<32x64xf32>, vector<64x64xf32>, vector<32x64xf32> -> vector<32x64xf32>
    %349 = arith.addf %344, %348 : vector<32x64xf32>
    %350 = vector.broadcast %202 : vector<1x64xf32> to vector<32x64xf32>
    %351 = arith.addf %349, %350 : vector<32x64xf32>
    %352 = arith.addf %207, %351 : vector<32x64xf32>
    %c0_316 = arith.constant 0 : index
    %c0_317 = arith.constant 0 : index
    %353 = vector.load %arg17[%c0_316, %c0_317] : memref<2x64xf32, #tpu.memory_space<vmem>>, vector<2x64xf32>
    %c0_318 = arith.constant 0 : index
    %c0_319 = arith.constant 0 : index
    %354 = vector.load %arg18[%c0_318, %c0_319] : memref<2x64xf32, #tpu.memory_space<vmem>>, vector<2x64xf32>
    %c0_320 = arith.constant 0 : index
    %c0_321 = arith.constant 0 : index
    %355 = vector.load %arg19[%c0_320, %c0_321] : memref<2x64xf32, #tpu.memory_space<vmem>>, vector<2x64xf32>
    %c0_322 = arith.constant 0 : index
    %c0_323 = arith.constant 0 : index
    %356 = vector.load %arg20[%c0_322, %c0_323] : memref<2x64xf32, #tpu.memory_space<vmem>>, vector<2x64xf32>
    %c0_324 = arith.constant 0 : index
    %c0_325 = arith.constant 0 : index
    %357 = vector.load %arg22[%c0_324, %c0_325] : memref<1x64xf32, #tpu.memory_space<vmem>>, vector<1x64xf32>
    %c0_326 = arith.constant 0 : index
    %c0_327 = arith.constant 0 : index
    %358 = vector.load %arg24[%c0_326, %c0_327] : memref<1x64xf32, #tpu.memory_space<vmem>>, vector<1x64xf32>
    %cst_328 = arith.constant dense<0.000000e+00> : vector<64xf32>
    %359 = vector.multi_reduction <add>, %352, %cst_328 [0] : vector<32x64xf32> to vector<64xf32>
    %360 = vector.shape_cast %359 : vector<64xf32> to vector<1x64xf32>
    %cst_329 = arith.constant 3.200000e+01 : f32
    %361 = vector.broadcast %cst_329 : f32 to vector<1x64xf32>
    %362 = arith.divf %360, %361 : vector<1x64xf32>
    %363 = arith.mulf %352, %352 : vector<32x64xf32>
    %cst_330 = arith.constant dense<0.000000e+00> : vector<64xf32>
    %364 = vector.multi_reduction <add>, %363, %cst_330 [0] : vector<32x64xf32> to vector<64xf32>
    %365 = vector.shape_cast %364 : vector<64xf32> to vector<1x64xf32>
    %cst_331 = arith.constant 3.200000e+01 : f32
    %366 = vector.broadcast %cst_331 : f32 to vector<1x64xf32>
    %367 = arith.divf %365, %366 : vector<1x64xf32>
    %368 = arith.mulf %362, %362 : vector<1x64xf32>
    %369 = arith.subf %367, %368 : vector<1x64xf32>
    %cst_332 = arith.constant 0.000000e+00 : f32
    %370 = vector.broadcast %cst_332 : f32 to vector<1x64xf32>
    %371 = arith.maximumf %369, %370 : vector<1x64xf32>
    %372 = vector.broadcast %362 : vector<1x64xf32> to vector<32x64xf32>
    %373 = arith.subf %352, %372 : vector<32x64xf32>
    %cst_333 = arith.constant 9.99999974E-6 : f32
    %374 = vector.broadcast %cst_333 : f32 to vector<1x64xf32>
    %375 = arith.addf %371, %374 : vector<1x64xf32>
    %376 = math.rsqrt %375 : vector<1x64xf32>
    %377 = vector.broadcast %376 : vector<1x64xf32> to vector<32x64xf32>
    %378 = arith.mulf %373, %377 : vector<32x64xf32>
    %cst_334 = arith.constant dense<0.000000e+00> : vector<32x64xf32>
    %379 = tpu.matmul %1, %353, %cst_334 {dimension_numbers = #tpu.dot_dimension_numbers<[1], [0], [0], [1], [0, 0, 1, 1], [], []>} : vector<32x2xf32>, vector<2x64xf32>, vector<32x64xf32> -> vector<32x64xf32>
    %380 = arith.mulf %379, %378 : vector<32x64xf32>
    %cst_335 = arith.constant dense<0.000000e+00> : vector<32x64xf32>
    %381 = tpu.matmul %1, %354, %cst_335 {dimension_numbers = #tpu.dot_dimension_numbers<[1], [0], [0], [1], [0, 0, 1, 1], [], []>} : vector<32x2xf32>, vector<2x64xf32>, vector<32x64xf32> -> vector<32x64xf32>
    %382 = arith.addf %380, %381 : vector<32x64xf32>
    %cst_336 = arith.constant 0.000000e+00 : f32
    %383 = vector.broadcast %cst_336 : f32 to vector<32x64xf32>
    %384 = arith.maximumf %382, %383 : vector<32x64xf32>
    %cst_337 = arith.constant dense<0.000000e+00> : vector<32x64xf32>
    %385 = tpu.matmul %3, %384, %cst_337 {dimension_numbers = #tpu.dot_dimension_numbers<[1], [0], [0], [1], [0, 0, 1, 1], [], []>} : vector<32x32xf32>, vector<32x64xf32>, vector<32x64xf32> -> vector<32x64xf32>
    %c0_338 = arith.constant 0 : index
    %c0_339 = arith.constant 0 : index
    %c0_340 = arith.constant 0 : index
    %386 = vector.load %arg21[%c0_338, %c0_339, %c0_340] : memref<9x64x64xf32, #tpu.memory_space<vmem>>, vector<1x64x64xf32>
    %387 = vector.shape_cast %386 : vector<1x64x64xf32> to vector<64x64xf32>
    %cst_341 = arith.constant dense<0.000000e+00> : vector<32x64xf32>
    %388 = tpu.matmul %385, %387, %cst_341 {dimension_numbers = #tpu.dot_dimension_numbers<[1], [0], [0], [1], [0, 0, 1, 1], [], []>} : vector<32x64xf32>, vector<64x64xf32>, vector<32x64xf32> -> vector<32x64xf32>
    %cst_342 = arith.constant dense<0.000000e+00> : vector<32x64xf32>
    %389 = tpu.matmul %5, %384, %cst_342 {dimension_numbers = #tpu.dot_dimension_numbers<[1], [0], [0], [1], [0, 0, 1, 1], [], []>} : vector<32x32xf32>, vector<32x64xf32>, vector<32x64xf32> -> vector<32x64xf32>
    %c1_343 = arith.constant 1 : index
    %c0_344 = arith.constant 0 : index
    %c0_345 = arith.constant 0 : index
    %390 = vector.load %arg21[%c1_343, %c0_344, %c0_345] : memref<9x64x64xf32, #tpu.memory_space<vmem>>, vector<1x64x64xf32>
    %391 = vector.shape_cast %390 : vector<1x64x64xf32> to vector<64x64xf32>
    %cst_346 = arith.constant dense<0.000000e+00> : vector<32x64xf32>
    %392 = tpu.matmul %389, %391, %cst_346 {dimension_numbers = #tpu.dot_dimension_numbers<[1], [0], [0], [1], [0, 0, 1, 1], [], []>} : vector<32x64xf32>, vector<64x64xf32>, vector<32x64xf32> -> vector<32x64xf32>
    %393 = arith.addf %388, %392 : vector<32x64xf32>
    %cst_347 = arith.constant dense<0.000000e+00> : vector<32x64xf32>
    %394 = tpu.matmul %7, %384, %cst_347 {dimension_numbers = #tpu.dot_dimension_numbers<[1], [0], [0], [1], [0, 0, 1, 1], [], []>} : vector<32x32xf32>, vector<32x64xf32>, vector<32x64xf32> -> vector<32x64xf32>
    %c2_348 = arith.constant 2 : index
    %c0_349 = arith.constant 0 : index
    %c0_350 = arith.constant 0 : index
    %395 = vector.load %arg21[%c2_348, %c0_349, %c0_350] : memref<9x64x64xf32, #tpu.memory_space<vmem>>, vector<1x64x64xf32>
    %396 = vector.shape_cast %395 : vector<1x64x64xf32> to vector<64x64xf32>
    %cst_351 = arith.constant dense<0.000000e+00> : vector<32x64xf32>
    %397 = tpu.matmul %394, %396, %cst_351 {dimension_numbers = #tpu.dot_dimension_numbers<[1], [0], [0], [1], [0, 0, 1, 1], [], []>} : vector<32x64xf32>, vector<64x64xf32>, vector<32x64xf32> -> vector<32x64xf32>
    %398 = arith.addf %393, %397 : vector<32x64xf32>
    %cst_352 = arith.constant dense<0.000000e+00> : vector<32x64xf32>
    %399 = tpu.matmul %9, %384, %cst_352 {dimension_numbers = #tpu.dot_dimension_numbers<[1], [0], [0], [1], [0, 0, 1, 1], [], []>} : vector<32x32xf32>, vector<32x64xf32>, vector<32x64xf32> -> vector<32x64xf32>
    %c3_353 = arith.constant 3 : index
    %c0_354 = arith.constant 0 : index
    %c0_355 = arith.constant 0 : index
    %400 = vector.load %arg21[%c3_353, %c0_354, %c0_355] : memref<9x64x64xf32, #tpu.memory_space<vmem>>, vector<1x64x64xf32>
    %401 = vector.shape_cast %400 : vector<1x64x64xf32> to vector<64x64xf32>
    %cst_356 = arith.constant dense<0.000000e+00> : vector<32x64xf32>
    %402 = tpu.matmul %399, %401, %cst_356 {dimension_numbers = #tpu.dot_dimension_numbers<[1], [0], [0], [1], [0, 0, 1, 1], [], []>} : vector<32x64xf32>, vector<64x64xf32>, vector<32x64xf32> -> vector<32x64xf32>
    %403 = arith.addf %398, %402 : vector<32x64xf32>
    %cst_357 = arith.constant dense<0.000000e+00> : vector<32x64xf32>
    %404 = tpu.matmul %11, %384, %cst_357 {dimension_numbers = #tpu.dot_dimension_numbers<[1], [0], [0], [1], [0, 0, 1, 1], [], []>} : vector<32x32xf32>, vector<32x64xf32>, vector<32x64xf32> -> vector<32x64xf32>
    %c4_358 = arith.constant 4 : index
    %c0_359 = arith.constant 0 : index
    %c0_360 = arith.constant 0 : index
    %405 = vector.load %arg21[%c4_358, %c0_359, %c0_360] : memref<9x64x64xf32, #tpu.memory_space<vmem>>, vector<1x64x64xf32>
    %406 = vector.shape_cast %405 : vector<1x64x64xf32> to vector<64x64xf32>
    %cst_361 = arith.constant dense<0.000000e+00> : vector<32x64xf32>
    %407 = tpu.matmul %404, %406, %cst_361 {dimension_numbers = #tpu.dot_dimension_numbers<[1], [0], [0], [1], [0, 0, 1, 1], [], []>} : vector<32x64xf32>, vector<64x64xf32>, vector<32x64xf32> -> vector<32x64xf32>
    %408 = arith.addf %403, %407 : vector<32x64xf32>
    %cst_362 = arith.constant dense<0.000000e+00> : vector<32x64xf32>
    %409 = tpu.matmul %13, %384, %cst_362 {dimension_numbers = #tpu.dot_dimension_numbers<[1], [0], [0], [1], [0, 0, 1, 1], [], []>} : vector<32x32xf32>, vector<32x64xf32>, vector<32x64xf32> -> vector<32x64xf32>
    %c5_363 = arith.constant 5 : index
    %c0_364 = arith.constant 0 : index
    %c0_365 = arith.constant 0 : index
    %410 = vector.load %arg21[%c5_363, %c0_364, %c0_365] : memref<9x64x64xf32, #tpu.memory_space<vmem>>, vector<1x64x64xf32>
    %411 = vector.shape_cast %410 : vector<1x64x64xf32> to vector<64x64xf32>
    %cst_366 = arith.constant dense<0.000000e+00> : vector<32x64xf32>
    %412 = tpu.matmul %409, %411, %cst_366 {dimension_numbers = #tpu.dot_dimension_numbers<[1], [0], [0], [1], [0, 0, 1, 1], [], []>} : vector<32x64xf32>, vector<64x64xf32>, vector<32x64xf32> -> vector<32x64xf32>
    %413 = arith.addf %408, %412 : vector<32x64xf32>
    %cst_367 = arith.constant dense<0.000000e+00> : vector<32x64xf32>
    %414 = tpu.matmul %15, %384, %cst_367 {dimension_numbers = #tpu.dot_dimension_numbers<[1], [0], [0], [1], [0, 0, 1, 1], [], []>} : vector<32x32xf32>, vector<32x64xf32>, vector<32x64xf32> -> vector<32x64xf32>
    %c6_368 = arith.constant 6 : index
    %c0_369 = arith.constant 0 : index
    %c0_370 = arith.constant 0 : index
    %415 = vector.load %arg21[%c6_368, %c0_369, %c0_370] : memref<9x64x64xf32, #tpu.memory_space<vmem>>, vector<1x64x64xf32>
    %416 = vector.shape_cast %415 : vector<1x64x64xf32> to vector<64x64xf32>
    %cst_371 = arith.constant dense<0.000000e+00> : vector<32x64xf32>
    %417 = tpu.matmul %414, %416, %cst_371 {dimension_numbers = #tpu.dot_dimension_numbers<[1], [0], [0], [1], [0, 0, 1, 1], [], []>} : vector<32x64xf32>, vector<64x64xf32>, vector<32x64xf32> -> vector<32x64xf32>
    %418 = arith.addf %413, %417 : vector<32x64xf32>
    %cst_372 = arith.constant dense<0.000000e+00> : vector<32x64xf32>
    %419 = tpu.matmul %17, %384, %cst_372 {dimension_numbers = #tpu.dot_dimension_numbers<[1], [0], [0], [1], [0, 0, 1, 1], [], []>} : vector<32x32xf32>, vector<32x64xf32>, vector<32x64xf32> -> vector<32x64xf32>
    %c7_373 = arith.constant 7 : index
    %c0_374 = arith.constant 0 : index
    %c0_375 = arith.constant 0 : index
    %420 = vector.load %arg21[%c7_373, %c0_374, %c0_375] : memref<9x64x64xf32, #tpu.memory_space<vmem>>, vector<1x64x64xf32>
    %421 = vector.shape_cast %420 : vector<1x64x64xf32> to vector<64x64xf32>
    %cst_376 = arith.constant dense<0.000000e+00> : vector<32x64xf32>
    %422 = tpu.matmul %419, %421, %cst_376 {dimension_numbers = #tpu.dot_dimension_numbers<[1], [0], [0], [1], [0, 0, 1, 1], [], []>} : vector<32x64xf32>, vector<64x64xf32>, vector<32x64xf32> -> vector<32x64xf32>
    %423 = arith.addf %418, %422 : vector<32x64xf32>
    %cst_377 = arith.constant dense<0.000000e+00> : vector<32x64xf32>
    %424 = tpu.matmul %19, %384, %cst_377 {dimension_numbers = #tpu.dot_dimension_numbers<[1], [0], [0], [1], [0, 0, 1, 1], [], []>} : vector<32x32xf32>, vector<32x64xf32>, vector<32x64xf32> -> vector<32x64xf32>
    %c8_378 = arith.constant 8 : index
    %c0_379 = arith.constant 0 : index
    %c0_380 = arith.constant 0 : index
    %425 = vector.load %arg21[%c8_378, %c0_379, %c0_380] : memref<9x64x64xf32, #tpu.memory_space<vmem>>, vector<1x64x64xf32>
    %426 = vector.shape_cast %425 : vector<1x64x64xf32> to vector<64x64xf32>
    %cst_381 = arith.constant dense<0.000000e+00> : vector<32x64xf32>
    %427 = tpu.matmul %424, %426, %cst_381 {dimension_numbers = #tpu.dot_dimension_numbers<[1], [0], [0], [1], [0, 0, 1, 1], [], []>} : vector<32x64xf32>, vector<64x64xf32>, vector<32x64xf32> -> vector<32x64xf32>
    %428 = arith.addf %423, %427 : vector<32x64xf32>
    %429 = vector.broadcast %357 : vector<1x64xf32> to vector<32x64xf32>
    %430 = arith.addf %428, %429 : vector<32x64xf32>
    %cst_382 = arith.constant dense<0.000000e+00> : vector<64xf32>
    %431 = vector.multi_reduction <add>, %430, %cst_382 [0] : vector<32x64xf32> to vector<64xf32>
    %432 = vector.shape_cast %431 : vector<64xf32> to vector<1x64xf32>
    %cst_383 = arith.constant 3.200000e+01 : f32
    %433 = vector.broadcast %cst_383 : f32 to vector<1x64xf32>
    %434 = arith.divf %432, %433 : vector<1x64xf32>
    %435 = arith.mulf %430, %430 : vector<32x64xf32>
    %cst_384 = arith.constant dense<0.000000e+00> : vector<64xf32>
    %436 = vector.multi_reduction <add>, %435, %cst_384 [0] : vector<32x64xf32> to vector<64xf32>
    %437 = vector.shape_cast %436 : vector<64xf32> to vector<1x64xf32>
    %cst_385 = arith.constant 3.200000e+01 : f32
    %438 = vector.broadcast %cst_385 : f32 to vector<1x64xf32>
    %439 = arith.divf %437, %438 : vector<1x64xf32>
    %440 = arith.mulf %434, %434 : vector<1x64xf32>
    %441 = arith.subf %439, %440 : vector<1x64xf32>
    %cst_386 = arith.constant 0.000000e+00 : f32
    %442 = vector.broadcast %cst_386 : f32 to vector<1x64xf32>
    %443 = arith.maximumf %441, %442 : vector<1x64xf32>
    %444 = vector.broadcast %434 : vector<1x64xf32> to vector<32x64xf32>
    %445 = arith.subf %430, %444 : vector<32x64xf32>
    %cst_387 = arith.constant 9.99999974E-6 : f32
    %446 = vector.broadcast %cst_387 : f32 to vector<1x64xf32>
    %447 = arith.addf %443, %446 : vector<1x64xf32>
    %448 = math.rsqrt %447 : vector<1x64xf32>
    %449 = vector.broadcast %448 : vector<1x64xf32> to vector<32x64xf32>
    %450 = arith.mulf %445, %449 : vector<32x64xf32>
    %cst_388 = arith.constant dense<0.000000e+00> : vector<32x64xf32>
    %451 = tpu.matmul %1, %355, %cst_388 {dimension_numbers = #tpu.dot_dimension_numbers<[1], [0], [0], [1], [0, 0, 1, 1], [], []>} : vector<32x2xf32>, vector<2x64xf32>, vector<32x64xf32> -> vector<32x64xf32>
    %452 = arith.mulf %451, %450 : vector<32x64xf32>
    %cst_389 = arith.constant dense<0.000000e+00> : vector<32x64xf32>
    %453 = tpu.matmul %1, %356, %cst_389 {dimension_numbers = #tpu.dot_dimension_numbers<[1], [0], [0], [1], [0, 0, 1, 1], [], []>} : vector<32x2xf32>, vector<2x64xf32>, vector<32x64xf32> -> vector<32x64xf32>
    %454 = arith.addf %452, %453 : vector<32x64xf32>
    %cst_390 = arith.constant 0.000000e+00 : f32
    %455 = vector.broadcast %cst_390 : f32 to vector<32x64xf32>
    %456 = arith.maximumf %454, %455 : vector<32x64xf32>
    %cst_391 = arith.constant dense<0.000000e+00> : vector<32x64xf32>
    %457 = tpu.matmul %3, %456, %cst_391 {dimension_numbers = #tpu.dot_dimension_numbers<[1], [0], [0], [1], [0, 0, 1, 1], [], []>} : vector<32x32xf32>, vector<32x64xf32>, vector<32x64xf32> -> vector<32x64xf32>
    %c0_392 = arith.constant 0 : index
    %c0_393 = arith.constant 0 : index
    %c0_394 = arith.constant 0 : index
    %458 = vector.load %arg23[%c0_392, %c0_393, %c0_394] : memref<9x64x64xf32, #tpu.memory_space<vmem>>, vector<1x64x64xf32>
    %459 = vector.shape_cast %458 : vector<1x64x64xf32> to vector<64x64xf32>
    %cst_395 = arith.constant dense<0.000000e+00> : vector<32x64xf32>
    %460 = tpu.matmul %457, %459, %cst_395 {dimension_numbers = #tpu.dot_dimension_numbers<[1], [0], [0], [1], [0, 0, 1, 1], [], []>} : vector<32x64xf32>, vector<64x64xf32>, vector<32x64xf32> -> vector<32x64xf32>
    %cst_396 = arith.constant dense<0.000000e+00> : vector<32x64xf32>
    %461 = tpu.matmul %5, %456, %cst_396 {dimension_numbers = #tpu.dot_dimension_numbers<[1], [0], [0], [1], [0, 0, 1, 1], [], []>} : vector<32x32xf32>, vector<32x64xf32>, vector<32x64xf32> -> vector<32x64xf32>
    %c1_397 = arith.constant 1 : index
    %c0_398 = arith.constant 0 : index
    %c0_399 = arith.constant 0 : index
    %462 = vector.load %arg23[%c1_397, %c0_398, %c0_399] : memref<9x64x64xf32, #tpu.memory_space<vmem>>, vector<1x64x64xf32>
    %463 = vector.shape_cast %462 : vector<1x64x64xf32> to vector<64x64xf32>
    %cst_400 = arith.constant dense<0.000000e+00> : vector<32x64xf32>
    %464 = tpu.matmul %461, %463, %cst_400 {dimension_numbers = #tpu.dot_dimension_numbers<[1], [0], [0], [1], [0, 0, 1, 1], [], []>} : vector<32x64xf32>, vector<64x64xf32>, vector<32x64xf32> -> vector<32x64xf32>
    %465 = arith.addf %460, %464 : vector<32x64xf32>
    %cst_401 = arith.constant dense<0.000000e+00> : vector<32x64xf32>
    %466 = tpu.matmul %7, %456, %cst_401 {dimension_numbers = #tpu.dot_dimension_numbers<[1], [0], [0], [1], [0, 0, 1, 1], [], []>} : vector<32x32xf32>, vector<32x64xf32>, vector<32x64xf32> -> vector<32x64xf32>
    %c2_402 = arith.constant 2 : index
    %c0_403 = arith.constant 0 : index
    %c0_404 = arith.constant 0 : index
    %467 = vector.load %arg23[%c2_402, %c0_403, %c0_404] : memref<9x64x64xf32, #tpu.memory_space<vmem>>, vector<1x64x64xf32>
    %468 = vector.shape_cast %467 : vector<1x64x64xf32> to vector<64x64xf32>
    %cst_405 = arith.constant dense<0.000000e+00> : vector<32x64xf32>
    %469 = tpu.matmul %466, %468, %cst_405 {dimension_numbers = #tpu.dot_dimension_numbers<[1], [0], [0], [1], [0, 0, 1, 1], [], []>} : vector<32x64xf32>, vector<64x64xf32>, vector<32x64xf32> -> vector<32x64xf32>
    %470 = arith.addf %465, %469 : vector<32x64xf32>
    %cst_406 = arith.constant dense<0.000000e+00> : vector<32x64xf32>
    %471 = tpu.matmul %9, %456, %cst_406 {dimension_numbers = #tpu.dot_dimension_numbers<[1], [0], [0], [1], [0, 0, 1, 1], [], []>} : vector<32x32xf32>, vector<32x64xf32>, vector<32x64xf32> -> vector<32x64xf32>
    %c3_407 = arith.constant 3 : index
    %c0_408 = arith.constant 0 : index
    %c0_409 = arith.constant 0 : index
    %472 = vector.load %arg23[%c3_407, %c0_408, %c0_409] : memref<9x64x64xf32, #tpu.memory_space<vmem>>, vector<1x64x64xf32>
    %473 = vector.shape_cast %472 : vector<1x64x64xf32> to vector<64x64xf32>
    %cst_410 = arith.constant dense<0.000000e+00> : vector<32x64xf32>
    %474 = tpu.matmul %471, %473, %cst_410 {dimension_numbers = #tpu.dot_dimension_numbers<[1], [0], [0], [1], [0, 0, 1, 1], [], []>} : vector<32x64xf32>, vector<64x64xf32>, vector<32x64xf32> -> vector<32x64xf32>
    %475 = arith.addf %470, %474 : vector<32x64xf32>
    %cst_411 = arith.constant dense<0.000000e+00> : vector<32x64xf32>
    %476 = tpu.matmul %11, %456, %cst_411 {dimension_numbers = #tpu.dot_dimension_numbers<[1], [0], [0], [1], [0, 0, 1, 1], [], []>} : vector<32x32xf32>, vector<32x64xf32>, vector<32x64xf32> -> vector<32x64xf32>
    %c4_412 = arith.constant 4 : index
    %c0_413 = arith.constant 0 : index
    %c0_414 = arith.constant 0 : index
    %477 = vector.load %arg23[%c4_412, %c0_413, %c0_414] : memref<9x64x64xf32, #tpu.memory_space<vmem>>, vector<1x64x64xf32>
    %478 = vector.shape_cast %477 : vector<1x64x64xf32> to vector<64x64xf32>
    %cst_415 = arith.constant dense<0.000000e+00> : vector<32x64xf32>
    %479 = tpu.matmul %476, %478, %cst_415 {dimension_numbers = #tpu.dot_dimension_numbers<[1], [0], [0], [1], [0, 0, 1, 1], [], []>} : vector<32x64xf32>, vector<64x64xf32>, vector<32x64xf32> -> vector<32x64xf32>
    %480 = arith.addf %475, %479 : vector<32x64xf32>
    %cst_416 = arith.constant dense<0.000000e+00> : vector<32x64xf32>
    %481 = tpu.matmul %13, %456, %cst_416 {dimension_numbers = #tpu.dot_dimension_numbers<[1], [0], [0], [1], [0, 0, 1, 1], [], []>} : vector<32x32xf32>, vector<32x64xf32>, vector<32x64xf32> -> vector<32x64xf32>
    %c5_417 = arith.constant 5 : index
    %c0_418 = arith.constant 0 : index
    %c0_419 = arith.constant 0 : index
    %482 = vector.load %arg23[%c5_417, %c0_418, %c0_419] : memref<9x64x64xf32, #tpu.memory_space<vmem>>, vector<1x64x64xf32>
    %483 = vector.shape_cast %482 : vector<1x64x64xf32> to vector<64x64xf32>
    %cst_420 = arith.constant dense<0.000000e+00> : vector<32x64xf32>
    %484 = tpu.matmul %481, %483, %cst_420 {dimension_numbers = #tpu.dot_dimension_numbers<[1], [0], [0], [1], [0, 0, 1, 1], [], []>} : vector<32x64xf32>, vector<64x64xf32>, vector<32x64xf32> -> vector<32x64xf32>
    %485 = arith.addf %480, %484 : vector<32x64xf32>
    %cst_421 = arith.constant dense<0.000000e+00> : vector<32x64xf32>
    %486 = tpu.matmul %15, %456, %cst_421 {dimension_numbers = #tpu.dot_dimension_numbers<[1], [0], [0], [1], [0, 0, 1, 1], [], []>} : vector<32x32xf32>, vector<32x64xf32>, vector<32x64xf32> -> vector<32x64xf32>
    %c6_422 = arith.constant 6 : index
    %c0_423 = arith.constant 0 : index
    %c0_424 = arith.constant 0 : index
    %487 = vector.load %arg23[%c6_422, %c0_423, %c0_424] : memref<9x64x64xf32, #tpu.memory_space<vmem>>, vector<1x64x64xf32>
    %488 = vector.shape_cast %487 : vector<1x64x64xf32> to vector<64x64xf32>
    %cst_425 = arith.constant dense<0.000000e+00> : vector<32x64xf32>
    %489 = tpu.matmul %486, %488, %cst_425 {dimension_numbers = #tpu.dot_dimension_numbers<[1], [0], [0], [1], [0, 0, 1, 1], [], []>} : vector<32x64xf32>, vector<64x64xf32>, vector<32x64xf32> -> vector<32x64xf32>
    %490 = arith.addf %485, %489 : vector<32x64xf32>
    %cst_426 = arith.constant dense<0.000000e+00> : vector<32x64xf32>
    %491 = tpu.matmul %17, %456, %cst_426 {dimension_numbers = #tpu.dot_dimension_numbers<[1], [0], [0], [1], [0, 0, 1, 1], [], []>} : vector<32x32xf32>, vector<32x64xf32>, vector<32x64xf32> -> vector<32x64xf32>
    %c7_427 = arith.constant 7 : index
    %c0_428 = arith.constant 0 : index
    %c0_429 = arith.constant 0 : index
    %492 = vector.load %arg23[%c7_427, %c0_428, %c0_429] : memref<9x64x64xf32, #tpu.memory_space<vmem>>, vector<1x64x64xf32>
    %493 = vector.shape_cast %492 : vector<1x64x64xf32> to vector<64x64xf32>
    %cst_430 = arith.constant dense<0.000000e+00> : vector<32x64xf32>
    %494 = tpu.matmul %491, %493, %cst_430 {dimension_numbers = #tpu.dot_dimension_numbers<[1], [0], [0], [1], [0, 0, 1, 1], [], []>} : vector<32x64xf32>, vector<64x64xf32>, vector<32x64xf32> -> vector<32x64xf32>
    %495 = arith.addf %490, %494 : vector<32x64xf32>
    %cst_431 = arith.constant dense<0.000000e+00> : vector<32x64xf32>
    %496 = tpu.matmul %19, %456, %cst_431 {dimension_numbers = #tpu.dot_dimension_numbers<[1], [0], [0], [1], [0, 0, 1, 1], [], []>} : vector<32x32xf32>, vector<32x64xf32>, vector<32x64xf32> -> vector<32x64xf32>
    %c8_432 = arith.constant 8 : index
    %c0_433 = arith.constant 0 : index
    %c0_434 = arith.constant 0 : index
    %497 = vector.load %arg23[%c8_432, %c0_433, %c0_434] : memref<9x64x64xf32, #tpu.memory_space<vmem>>, vector<1x64x64xf32>
    %498 = vector.shape_cast %497 : vector<1x64x64xf32> to vector<64x64xf32>
    %cst_435 = arith.constant dense<0.000000e+00> : vector<32x64xf32>
    %499 = tpu.matmul %496, %498, %cst_435 {dimension_numbers = #tpu.dot_dimension_numbers<[1], [0], [0], [1], [0, 0, 1, 1], [], []>} : vector<32x64xf32>, vector<64x64xf32>, vector<32x64xf32> -> vector<32x64xf32>
    %500 = arith.addf %495, %499 : vector<32x64xf32>
    %501 = vector.broadcast %358 : vector<1x64xf32> to vector<32x64xf32>
    %502 = arith.addf %500, %501 : vector<32x64xf32>
    %503 = arith.addf %352, %502 : vector<32x64xf32>
    %c0_436 = arith.constant 0 : index
    %c0_437 = arith.constant 0 : index
    %504 = vector.load %arg25[%c0_436, %c0_437] : memref<2x64xf32, #tpu.memory_space<vmem>>, vector<2x64xf32>
    %c0_438 = arith.constant 0 : index
    %c0_439 = arith.constant 0 : index
    %505 = vector.load %arg26[%c0_438, %c0_439] : memref<2x64xf32, #tpu.memory_space<vmem>>, vector<2x64xf32>
    %c0_440 = arith.constant 0 : index
    %c0_441 = arith.constant 0 : index
    %506 = vector.load %arg27[%c0_440, %c0_441] : memref<2x32xf32, #tpu.memory_space<vmem>>, vector<2x32xf32>
    %c0_442 = arith.constant 0 : index
    %c0_443 = arith.constant 0 : index
    %507 = vector.load %arg28[%c0_442, %c0_443] : memref<2x32xf32, #tpu.memory_space<vmem>>, vector<2x32xf32>
    %c0_444 = arith.constant 0 : index
    %c0_445 = arith.constant 0 : index
    %508 = vector.load %arg30[%c0_444, %c0_445] : memref<1x32xf32, #tpu.memory_space<vmem>>, vector<1x32xf32>
    %c0_446 = arith.constant 0 : index
    %c0_447 = arith.constant 0 : index
    %509 = vector.load %arg32[%c0_446, %c0_447] : memref<1x32xf32, #tpu.memory_space<vmem>>, vector<1x32xf32>
    %c0_448 = arith.constant 0 : index
    %c0_449 = arith.constant 0 : index
    %510 = vector.load %arg33[%c0_448, %c0_449] : memref<64x32xf32, #tpu.memory_space<vmem>>, vector<64x32xf32>
    %c0_450 = arith.constant 0 : index
    %c0_451 = arith.constant 0 : index
    %511 = vector.load %arg34[%c0_450, %c0_451] : memref<1x32xf32, #tpu.memory_space<vmem>>, vector<1x32xf32>
    %cst_452 = arith.constant dense<0.000000e+00> : vector<32x32xf32>
    %512 = tpu.matmul %503, %510, %cst_452 {dimension_numbers = #tpu.dot_dimension_numbers<[1], [0], [0], [1], [0, 0, 1, 1], [], []>} : vector<32x64xf32>, vector<64x32xf32>, vector<32x32xf32> -> vector<32x32xf32>
    %513 = vector.broadcast %511 : vector<1x32xf32> to vector<32x32xf32>
    %514 = arith.addf %512, %513 : vector<32x32xf32>
    %cst_453 = arith.constant dense<0.000000e+00> : vector<64xf32>
    %515 = vector.multi_reduction <add>, %503, %cst_453 [0] : vector<32x64xf32> to vector<64xf32>
    %516 = vector.shape_cast %515 : vector<64xf32> to vector<1x64xf32>
    %cst_454 = arith.constant 3.200000e+01 : f32
    %517 = vector.broadcast %cst_454 : f32 to vector<1x64xf32>
    %518 = arith.divf %516, %517 : vector<1x64xf32>
    %519 = arith.mulf %503, %503 : vector<32x64xf32>
    %cst_455 = arith.constant dense<0.000000e+00> : vector<64xf32>
    %520 = vector.multi_reduction <add>, %519, %cst_455 [0] : vector<32x64xf32> to vector<64xf32>
    %521 = vector.shape_cast %520 : vector<64xf32> to vector<1x64xf32>
    %cst_456 = arith.constant 3.200000e+01 : f32
    %522 = vector.broadcast %cst_456 : f32 to vector<1x64xf32>
    %523 = arith.divf %521, %522 : vector<1x64xf32>
    %524 = arith.mulf %518, %518 : vector<1x64xf32>
    %525 = arith.subf %523, %524 : vector<1x64xf32>
    %cst_457 = arith.constant 0.000000e+00 : f32
    %526 = vector.broadcast %cst_457 : f32 to vector<1x64xf32>
    %527 = arith.maximumf %525, %526 : vector<1x64xf32>
    %528 = vector.broadcast %518 : vector<1x64xf32> to vector<32x64xf32>
    %529 = arith.subf %503, %528 : vector<32x64xf32>
    %cst_458 = arith.constant 9.99999974E-6 : f32
    %530 = vector.broadcast %cst_458 : f32 to vector<1x64xf32>
    %531 = arith.addf %527, %530 : vector<1x64xf32>
    %532 = math.rsqrt %531 : vector<1x64xf32>
    %533 = vector.broadcast %532 : vector<1x64xf32> to vector<32x64xf32>
    %534 = arith.mulf %529, %533 : vector<32x64xf32>
    %cst_459 = arith.constant dense<0.000000e+00> : vector<32x64xf32>
    %535 = tpu.matmul %1, %504, %cst_459 {dimension_numbers = #tpu.dot_dimension_numbers<[1], [0], [0], [1], [0, 0, 1, 1], [], []>} : vector<32x2xf32>, vector<2x64xf32>, vector<32x64xf32> -> vector<32x64xf32>
    %536 = arith.mulf %535, %534 : vector<32x64xf32>
    %cst_460 = arith.constant dense<0.000000e+00> : vector<32x64xf32>
    %537 = tpu.matmul %1, %505, %cst_460 {dimension_numbers = #tpu.dot_dimension_numbers<[1], [0], [0], [1], [0, 0, 1, 1], [], []>} : vector<32x2xf32>, vector<2x64xf32>, vector<32x64xf32> -> vector<32x64xf32>
    %538 = arith.addf %536, %537 : vector<32x64xf32>
    %cst_461 = arith.constant 0.000000e+00 : f32
    %539 = vector.broadcast %cst_461 : f32 to vector<32x64xf32>
    %540 = arith.maximumf %538, %539 : vector<32x64xf32>
    %cst_462 = arith.constant dense<0.000000e+00> : vector<32x64xf32>
    %541 = tpu.matmul %3, %540, %cst_462 {dimension_numbers = #tpu.dot_dimension_numbers<[1], [0], [0], [1], [0, 0, 1, 1], [], []>} : vector<32x32xf32>, vector<32x64xf32>, vector<32x64xf32> -> vector<32x64xf32>
    %c0_463 = arith.constant 0 : index
    %c0_464 = arith.constant 0 : index
    %c0_465 = arith.constant 0 : index
    %542 = vector.load %arg29[%c0_463, %c0_464, %c0_465] : memref<9x64x32xf32, #tpu.memory_space<vmem>>, vector<1x64x32xf32>
    %543 = vector.shape_cast %542 : vector<1x64x32xf32> to vector<64x32xf32>
    %cst_466 = arith.constant dense<0.000000e+00> : vector<32x32xf32>
    %544 = tpu.matmul %541, %543, %cst_466 {dimension_numbers = #tpu.dot_dimension_numbers<[1], [0], [0], [1], [0, 0, 1, 1], [], []>} : vector<32x64xf32>, vector<64x32xf32>, vector<32x32xf32> -> vector<32x32xf32>
    %cst_467 = arith.constant dense<0.000000e+00> : vector<32x64xf32>
    %545 = tpu.matmul %5, %540, %cst_467 {dimension_numbers = #tpu.dot_dimension_numbers<[1], [0], [0], [1], [0, 0, 1, 1], [], []>} : vector<32x32xf32>, vector<32x64xf32>, vector<32x64xf32> -> vector<32x64xf32>
    %c1_468 = arith.constant 1 : index
    %c0_469 = arith.constant 0 : index
    %c0_470 = arith.constant 0 : index
    %546 = vector.load %arg29[%c1_468, %c0_469, %c0_470] : memref<9x64x32xf32, #tpu.memory_space<vmem>>, vector<1x64x32xf32>
    %547 = vector.shape_cast %546 : vector<1x64x32xf32> to vector<64x32xf32>
    %cst_471 = arith.constant dense<0.000000e+00> : vector<32x32xf32>
    %548 = tpu.matmul %545, %547, %cst_471 {dimension_numbers = #tpu.dot_dimension_numbers<[1], [0], [0], [1], [0, 0, 1, 1], [], []>} : vector<32x64xf32>, vector<64x32xf32>, vector<32x32xf32> -> vector<32x32xf32>
    %549 = arith.addf %544, %548 : vector<32x32xf32>
    %cst_472 = arith.constant dense<0.000000e+00> : vector<32x64xf32>
    %550 = tpu.matmul %7, %540, %cst_472 {dimension_numbers = #tpu.dot_dimension_numbers<[1], [0], [0], [1], [0, 0, 1, 1], [], []>} : vector<32x32xf32>, vector<32x64xf32>, vector<32x64xf32> -> vector<32x64xf32>
    %c2_473 = arith.constant 2 : index
    %c0_474 = arith.constant 0 : index
    %c0_475 = arith.constant 0 : index
    %551 = vector.load %arg29[%c2_473, %c0_474, %c0_475] : memref<9x64x32xf32, #tpu.memory_space<vmem>>, vector<1x64x32xf32>
    %552 = vector.shape_cast %551 : vector<1x64x32xf32> to vector<64x32xf32>
    %cst_476 = arith.constant dense<0.000000e+00> : vector<32x32xf32>
    %553 = tpu.matmul %550, %552, %cst_476 {dimension_numbers = #tpu.dot_dimension_numbers<[1], [0], [0], [1], [0, 0, 1, 1], [], []>} : vector<32x64xf32>, vector<64x32xf32>, vector<32x32xf32> -> vector<32x32xf32>
    %554 = arith.addf %549, %553 : vector<32x32xf32>
    %cst_477 = arith.constant dense<0.000000e+00> : vector<32x64xf32>
    %555 = tpu.matmul %9, %540, %cst_477 {dimension_numbers = #tpu.dot_dimension_numbers<[1], [0], [0], [1], [0, 0, 1, 1], [], []>} : vector<32x32xf32>, vector<32x64xf32>, vector<32x64xf32> -> vector<32x64xf32>
    %c3_478 = arith.constant 3 : index
    %c0_479 = arith.constant 0 : index
    %c0_480 = arith.constant 0 : index
    %556 = vector.load %arg29[%c3_478, %c0_479, %c0_480] : memref<9x64x32xf32, #tpu.memory_space<vmem>>, vector<1x64x32xf32>
    %557 = vector.shape_cast %556 : vector<1x64x32xf32> to vector<64x32xf32>
    %cst_481 = arith.constant dense<0.000000e+00> : vector<32x32xf32>
    %558 = tpu.matmul %555, %557, %cst_481 {dimension_numbers = #tpu.dot_dimension_numbers<[1], [0], [0], [1], [0, 0, 1, 1], [], []>} : vector<32x64xf32>, vector<64x32xf32>, vector<32x32xf32> -> vector<32x32xf32>
    %559 = arith.addf %554, %558 : vector<32x32xf32>
    %cst_482 = arith.constant dense<0.000000e+00> : vector<32x64xf32>
    %560 = tpu.matmul %11, %540, %cst_482 {dimension_numbers = #tpu.dot_dimension_numbers<[1], [0], [0], [1], [0, 0, 1, 1], [], []>} : vector<32x32xf32>, vector<32x64xf32>, vector<32x64xf32> -> vector<32x64xf32>
    %c4_483 = arith.constant 4 : index
    %c0_484 = arith.constant 0 : index
    %c0_485 = arith.constant 0 : index
    %561 = vector.load %arg29[%c4_483, %c0_484, %c0_485] : memref<9x64x32xf32, #tpu.memory_space<vmem>>, vector<1x64x32xf32>
    %562 = vector.shape_cast %561 : vector<1x64x32xf32> to vector<64x32xf32>
    %cst_486 = arith.constant dense<0.000000e+00> : vector<32x32xf32>
    %563 = tpu.matmul %560, %562, %cst_486 {dimension_numbers = #tpu.dot_dimension_numbers<[1], [0], [0], [1], [0, 0, 1, 1], [], []>} : vector<32x64xf32>, vector<64x32xf32>, vector<32x32xf32> -> vector<32x32xf32>
    %564 = arith.addf %559, %563 : vector<32x32xf32>
    %cst_487 = arith.constant dense<0.000000e+00> : vector<32x64xf32>
    %565 = tpu.matmul %13, %540, %cst_487 {dimension_numbers = #tpu.dot_dimension_numbers<[1], [0], [0], [1], [0, 0, 1, 1], [], []>} : vector<32x32xf32>, vector<32x64xf32>, vector<32x64xf32> -> vector<32x64xf32>
    %c5_488 = arith.constant 5 : index
    %c0_489 = arith.constant 0 : index
    %c0_490 = arith.constant 0 : index
    %566 = vector.load %arg29[%c5_488, %c0_489, %c0_490] : memref<9x64x32xf32, #tpu.memory_space<vmem>>, vector<1x64x32xf32>
    %567 = vector.shape_cast %566 : vector<1x64x32xf32> to vector<64x32xf32>
    %cst_491 = arith.constant dense<0.000000e+00> : vector<32x32xf32>
    %568 = tpu.matmul %565, %567, %cst_491 {dimension_numbers = #tpu.dot_dimension_numbers<[1], [0], [0], [1], [0, 0, 1, 1], [], []>} : vector<32x64xf32>, vector<64x32xf32>, vector<32x32xf32> -> vector<32x32xf32>
    %569 = arith.addf %564, %568 : vector<32x32xf32>
    %cst_492 = arith.constant dense<0.000000e+00> : vector<32x64xf32>
    %570 = tpu.matmul %15, %540, %cst_492 {dimension_numbers = #tpu.dot_dimension_numbers<[1], [0], [0], [1], [0, 0, 1, 1], [], []>} : vector<32x32xf32>, vector<32x64xf32>, vector<32x64xf32> -> vector<32x64xf32>
    %c6_493 = arith.constant 6 : index
    %c0_494 = arith.constant 0 : index
    %c0_495 = arith.constant 0 : index
    %571 = vector.load %arg29[%c6_493, %c0_494, %c0_495] : memref<9x64x32xf32, #tpu.memory_space<vmem>>, vector<1x64x32xf32>
    %572 = vector.shape_cast %571 : vector<1x64x32xf32> to vector<64x32xf32>
    %cst_496 = arith.constant dense<0.000000e+00> : vector<32x32xf32>
    %573 = tpu.matmul %570, %572, %cst_496 {dimension_numbers = #tpu.dot_dimension_numbers<[1], [0], [0], [1], [0, 0, 1, 1], [], []>} : vector<32x64xf32>, vector<64x32xf32>, vector<32x32xf32> -> vector<32x32xf32>
    %574 = arith.addf %569, %573 : vector<32x32xf32>
    %cst_497 = arith.constant dense<0.000000e+00> : vector<32x64xf32>
    %575 = tpu.matmul %17, %540, %cst_497 {dimension_numbers = #tpu.dot_dimension_numbers<[1], [0], [0], [1], [0, 0, 1, 1], [], []>} : vector<32x32xf32>, vector<32x64xf32>, vector<32x64xf32> -> vector<32x64xf32>
    %c7_498 = arith.constant 7 : index
    %c0_499 = arith.constant 0 : index
    %c0_500 = arith.constant 0 : index
    %576 = vector.load %arg29[%c7_498, %c0_499, %c0_500] : memref<9x64x32xf32, #tpu.memory_space<vmem>>, vector<1x64x32xf32>
    %577 = vector.shape_cast %576 : vector<1x64x32xf32> to vector<64x32xf32>
    %cst_501 = arith.constant dense<0.000000e+00> : vector<32x32xf32>
    %578 = tpu.matmul %575, %577, %cst_501 {dimension_numbers = #tpu.dot_dimension_numbers<[1], [0], [0], [1], [0, 0, 1, 1], [], []>} : vector<32x64xf32>, vector<64x32xf32>, vector<32x32xf32> -> vector<32x32xf32>
    %579 = arith.addf %574, %578 : vector<32x32xf32>
    %cst_502 = arith.constant dense<0.000000e+00> : vector<32x64xf32>
    %580 = tpu.matmul %19, %540, %cst_502 {dimension_numbers = #tpu.dot_dimension_numbers<[1], [0], [0], [1], [0, 0, 1, 1], [], []>} : vector<32x32xf32>, vector<32x64xf32>, vector<32x64xf32> -> vector<32x64xf32>
    %c8_503 = arith.constant 8 : index
    %c0_504 = arith.constant 0 : index
    %c0_505 = arith.constant 0 : index
    %581 = vector.load %arg29[%c8_503, %c0_504, %c0_505] : memref<9x64x32xf32, #tpu.memory_space<vmem>>, vector<1x64x32xf32>
    %582 = vector.shape_cast %581 : vector<1x64x32xf32> to vector<64x32xf32>
    %cst_506 = arith.constant dense<0.000000e+00> : vector<32x32xf32>
    %583 = tpu.matmul %580, %582, %cst_506 {dimension_numbers = #tpu.dot_dimension_numbers<[1], [0], [0], [1], [0, 0, 1, 1], [], []>} : vector<32x64xf32>, vector<64x32xf32>, vector<32x32xf32> -> vector<32x32xf32>
    %584 = arith.addf %579, %583 : vector<32x32xf32>
    %585 = vector.broadcast %508 : vector<1x32xf32> to vector<32x32xf32>
    %586 = arith.addf %584, %585 : vector<32x32xf32>
    %cst_507 = arith.constant dense<0.000000e+00> : vector<32xf32>
    %587 = vector.multi_reduction <add>, %586, %cst_507 [0] : vector<32x32xf32> to vector<32xf32>
    %588 = vector.shape_cast %587 : vector<32xf32> to vector<1x32xf32>
    %cst_508 = arith.constant 3.200000e+01 : f32
    %589 = vector.broadcast %cst_508 : f32 to vector<1x32xf32>
    %590 = arith.divf %588, %589 : vector<1x32xf32>
    %591 = arith.mulf %586, %586 : vector<32x32xf32>
    %cst_509 = arith.constant dense<0.000000e+00> : vector<32xf32>
    %592 = vector.multi_reduction <add>, %591, %cst_509 [0] : vector<32x32xf32> to vector<32xf32>
    %593 = vector.shape_cast %592 : vector<32xf32> to vector<1x32xf32>
    %cst_510 = arith.constant 3.200000e+01 : f32
    %594 = vector.broadcast %cst_510 : f32 to vector<1x32xf32>
    %595 = arith.divf %593, %594 : vector<1x32xf32>
    %596 = arith.mulf %590, %590 : vector<1x32xf32>
    %597 = arith.subf %595, %596 : vector<1x32xf32>
    %cst_511 = arith.constant 0.000000e+00 : f32
    %598 = vector.broadcast %cst_511 : f32 to vector<1x32xf32>
    %599 = arith.maximumf %597, %598 : vector<1x32xf32>
    %600 = vector.broadcast %590 : vector<1x32xf32> to vector<32x32xf32>
    %601 = arith.subf %586, %600 : vector<32x32xf32>
    %cst_512 = arith.constant 9.99999974E-6 : f32
    %602 = vector.broadcast %cst_512 : f32 to vector<1x32xf32>
    %603 = arith.addf %599, %602 : vector<1x32xf32>
    %604 = math.rsqrt %603 : vector<1x32xf32>
    %605 = vector.broadcast %604 : vector<1x32xf32> to vector<32x32xf32>
    %606 = arith.mulf %601, %605 : vector<32x32xf32>
    %cst_513 = arith.constant dense<0.000000e+00> : vector<32x32xf32>
    %607 = tpu.matmul %1, %506, %cst_513 {dimension_numbers = #tpu.dot_dimension_numbers<[1], [0], [0], [1], [0, 0, 1, 1], [], []>} : vector<32x2xf32>, vector<2x32xf32>, vector<32x32xf32> -> vector<32x32xf32>
    %608 = arith.mulf %607, %606 : vector<32x32xf32>
    %cst_514 = arith.constant dense<0.000000e+00> : vector<32x32xf32>
    %609 = tpu.matmul %1, %507, %cst_514 {dimension_numbers = #tpu.dot_dimension_numbers<[1], [0], [0], [1], [0, 0, 1, 1], [], []>} : vector<32x2xf32>, vector<2x32xf32>, vector<32x32xf32> -> vector<32x32xf32>
    %610 = arith.addf %608, %609 : vector<32x32xf32>
    %cst_515 = arith.constant 0.000000e+00 : f32
    %611 = vector.broadcast %cst_515 : f32 to vector<32x32xf32>
    %612 = arith.maximumf %610, %611 : vector<32x32xf32>
    %cst_516 = arith.constant dense<0.000000e+00> : vector<32x32xf32>
    %613 = tpu.matmul %3, %612, %cst_516 {dimension_numbers = #tpu.dot_dimension_numbers<[1], [0], [0], [1], [0, 0, 1, 1], [], []>} : vector<32x32xf32>, vector<32x32xf32>, vector<32x32xf32> -> vector<32x32xf32>
    %c0_517 = arith.constant 0 : index
    %c0_518 = arith.constant 0 : index
    %c0_519 = arith.constant 0 : index
    %614 = vector.load %arg31[%c0_517, %c0_518, %c0_519] : memref<9x32x32xf32, #tpu.memory_space<vmem>>, vector<1x32x32xf32>
    %615 = vector.shape_cast %614 : vector<1x32x32xf32> to vector<32x32xf32>
    %cst_520 = arith.constant dense<0.000000e+00> : vector<32x32xf32>
    %616 = tpu.matmul %613, %615, %cst_520 {dimension_numbers = #tpu.dot_dimension_numbers<[1], [0], [0], [1], [0, 0, 1, 1], [], []>} : vector<32x32xf32>, vector<32x32xf32>, vector<32x32xf32> -> vector<32x32xf32>
    %cst_521 = arith.constant dense<0.000000e+00> : vector<32x32xf32>
    %617 = tpu.matmul %5, %612, %cst_521 {dimension_numbers = #tpu.dot_dimension_numbers<[1], [0], [0], [1], [0, 0, 1, 1], [], []>} : vector<32x32xf32>, vector<32x32xf32>, vector<32x32xf32> -> vector<32x32xf32>
    %c1_522 = arith.constant 1 : index
    %c0_523 = arith.constant 0 : index
    %c0_524 = arith.constant 0 : index
    %618 = vector.load %arg31[%c1_522, %c0_523, %c0_524] : memref<9x32x32xf32, #tpu.memory_space<vmem>>, vector<1x32x32xf32>
    %619 = vector.shape_cast %618 : vector<1x32x32xf32> to vector<32x32xf32>
    %cst_525 = arith.constant dense<0.000000e+00> : vector<32x32xf32>
    %620 = tpu.matmul %617, %619, %cst_525 {dimension_numbers = #tpu.dot_dimension_numbers<[1], [0], [0], [1], [0, 0, 1, 1], [], []>} : vector<32x32xf32>, vector<32x32xf32>, vector<32x32xf32> -> vector<32x32xf32>
    %621 = arith.addf %616, %620 : vector<32x32xf32>
    %cst_526 = arith.constant dense<0.000000e+00> : vector<32x32xf32>
    %622 = tpu.matmul %7, %612, %cst_526 {dimension_numbers = #tpu.dot_dimension_numbers<[1], [0], [0], [1], [0, 0, 1, 1], [], []>} : vector<32x32xf32>, vector<32x32xf32>, vector<32x32xf32> -> vector<32x32xf32>
    %c2_527 = arith.constant 2 : index
    %c0_528 = arith.constant 0 : index
    %c0_529 = arith.constant 0 : index
    %623 = vector.load %arg31[%c2_527, %c0_528, %c0_529] : memref<9x32x32xf32, #tpu.memory_space<vmem>>, vector<1x32x32xf32>
    %624 = vector.shape_cast %623 : vector<1x32x32xf32> to vector<32x32xf32>
    %cst_530 = arith.constant dense<0.000000e+00> : vector<32x32xf32>
    %625 = tpu.matmul %622, %624, %cst_530 {dimension_numbers = #tpu.dot_dimension_numbers<[1], [0], [0], [1], [0, 0, 1, 1], [], []>} : vector<32x32xf32>, vector<32x32xf32>, vector<32x32xf32> -> vector<32x32xf32>
    %626 = arith.addf %621, %625 : vector<32x32xf32>
    %cst_531 = arith.constant dense<0.000000e+00> : vector<32x32xf32>
    %627 = tpu.matmul %9, %612, %cst_531 {dimension_numbers = #tpu.dot_dimension_numbers<[1], [0], [0], [1], [0, 0, 1, 1], [], []>} : vector<32x32xf32>, vector<32x32xf32>, vector<32x32xf32> -> vector<32x32xf32>
    %c3_532 = arith.constant 3 : index
    %c0_533 = arith.constant 0 : index
    %c0_534 = arith.constant 0 : index
    %628 = vector.load %arg31[%c3_532, %c0_533, %c0_534] : memref<9x32x32xf32, #tpu.memory_space<vmem>>, vector<1x32x32xf32>
    %629 = vector.shape_cast %628 : vector<1x32x32xf32> to vector<32x32xf32>
    %cst_535 = arith.constant dense<0.000000e+00> : vector<32x32xf32>
    %630 = tpu.matmul %627, %629, %cst_535 {dimension_numbers = #tpu.dot_dimension_numbers<[1], [0], [0], [1], [0, 0, 1, 1], [], []>} : vector<32x32xf32>, vector<32x32xf32>, vector<32x32xf32> -> vector<32x32xf32>
    %631 = arith.addf %626, %630 : vector<32x32xf32>
    %cst_536 = arith.constant dense<0.000000e+00> : vector<32x32xf32>
    %632 = tpu.matmul %11, %612, %cst_536 {dimension_numbers = #tpu.dot_dimension_numbers<[1], [0], [0], [1], [0, 0, 1, 1], [], []>} : vector<32x32xf32>, vector<32x32xf32>, vector<32x32xf32> -> vector<32x32xf32>
    %c4_537 = arith.constant 4 : index
    %c0_538 = arith.constant 0 : index
    %c0_539 = arith.constant 0 : index
    %633 = vector.load %arg31[%c4_537, %c0_538, %c0_539] : memref<9x32x32xf32, #tpu.memory_space<vmem>>, vector<1x32x32xf32>
    %634 = vector.shape_cast %633 : vector<1x32x32xf32> to vector<32x32xf32>
    %cst_540 = arith.constant dense<0.000000e+00> : vector<32x32xf32>
    %635 = tpu.matmul %632, %634, %cst_540 {dimension_numbers = #tpu.dot_dimension_numbers<[1], [0], [0], [1], [0, 0, 1, 1], [], []>} : vector<32x32xf32>, vector<32x32xf32>, vector<32x32xf32> -> vector<32x32xf32>
    %636 = arith.addf %631, %635 : vector<32x32xf32>
    %cst_541 = arith.constant dense<0.000000e+00> : vector<32x32xf32>
    %637 = tpu.matmul %13, %612, %cst_541 {dimension_numbers = #tpu.dot_dimension_numbers<[1], [0], [0], [1], [0, 0, 1, 1], [], []>} : vector<32x32xf32>, vector<32x32xf32>, vector<32x32xf32> -> vector<32x32xf32>
    %c5_542 = arith.constant 5 : index
    %c0_543 = arith.constant 0 : index
    %c0_544 = arith.constant 0 : index
    %638 = vector.load %arg31[%c5_542, %c0_543, %c0_544] : memref<9x32x32xf32, #tpu.memory_space<vmem>>, vector<1x32x32xf32>
    %639 = vector.shape_cast %638 : vector<1x32x32xf32> to vector<32x32xf32>
    %cst_545 = arith.constant dense<0.000000e+00> : vector<32x32xf32>
    %640 = tpu.matmul %637, %639, %cst_545 {dimension_numbers = #tpu.dot_dimension_numbers<[1], [0], [0], [1], [0, 0, 1, 1], [], []>} : vector<32x32xf32>, vector<32x32xf32>, vector<32x32xf32> -> vector<32x32xf32>
    %641 = arith.addf %636, %640 : vector<32x32xf32>
    %cst_546 = arith.constant dense<0.000000e+00> : vector<32x32xf32>
    %642 = tpu.matmul %15, %612, %cst_546 {dimension_numbers = #tpu.dot_dimension_numbers<[1], [0], [0], [1], [0, 0, 1, 1], [], []>} : vector<32x32xf32>, vector<32x32xf32>, vector<32x32xf32> -> vector<32x32xf32>
    %c6_547 = arith.constant 6 : index
    %c0_548 = arith.constant 0 : index
    %c0_549 = arith.constant 0 : index
    %643 = vector.load %arg31[%c6_547, %c0_548, %c0_549] : memref<9x32x32xf32, #tpu.memory_space<vmem>>, vector<1x32x32xf32>
    %644 = vector.shape_cast %643 : vector<1x32x32xf32> to vector<32x32xf32>
    %cst_550 = arith.constant dense<0.000000e+00> : vector<32x32xf32>
    %645 = tpu.matmul %642, %644, %cst_550 {dimension_numbers = #tpu.dot_dimension_numbers<[1], [0], [0], [1], [0, 0, 1, 1], [], []>} : vector<32x32xf32>, vector<32x32xf32>, vector<32x32xf32> -> vector<32x32xf32>
    %646 = arith.addf %641, %645 : vector<32x32xf32>
    %cst_551 = arith.constant dense<0.000000e+00> : vector<32x32xf32>
    %647 = tpu.matmul %17, %612, %cst_551 {dimension_numbers = #tpu.dot_dimension_numbers<[1], [0], [0], [1], [0, 0, 1, 1], [], []>} : vector<32x32xf32>, vector<32x32xf32>, vector<32x32xf32> -> vector<32x32xf32>
    %c7_552 = arith.constant 7 : index
    %c0_553 = arith.constant 0 : index
    %c0_554 = arith.constant 0 : index
    %648 = vector.load %arg31[%c7_552, %c0_553, %c0_554] : memref<9x32x32xf32, #tpu.memory_space<vmem>>, vector<1x32x32xf32>
    %649 = vector.shape_cast %648 : vector<1x32x32xf32> to vector<32x32xf32>
    %cst_555 = arith.constant dense<0.000000e+00> : vector<32x32xf32>
    %650 = tpu.matmul %647, %649, %cst_555 {dimension_numbers = #tpu.dot_dimension_numbers<[1], [0], [0], [1], [0, 0, 1, 1], [], []>} : vector<32x32xf32>, vector<32x32xf32>, vector<32x32xf32> -> vector<32x32xf32>
    %651 = arith.addf %646, %650 : vector<32x32xf32>
    %cst_556 = arith.constant dense<0.000000e+00> : vector<32x32xf32>
    %652 = tpu.matmul %19, %612, %cst_556 {dimension_numbers = #tpu.dot_dimension_numbers<[1], [0], [0], [1], [0, 0, 1, 1], [], []>} : vector<32x32xf32>, vector<32x32xf32>, vector<32x32xf32> -> vector<32x32xf32>
    %c8_557 = arith.constant 8 : index
    %c0_558 = arith.constant 0 : index
    %c0_559 = arith.constant 0 : index
    %653 = vector.load %arg31[%c8_557, %c0_558, %c0_559] : memref<9x32x32xf32, #tpu.memory_space<vmem>>, vector<1x32x32xf32>
    %654 = vector.shape_cast %653 : vector<1x32x32xf32> to vector<32x32xf32>
    %cst_560 = arith.constant dense<0.000000e+00> : vector<32x32xf32>
    %655 = tpu.matmul %652, %654, %cst_560 {dimension_numbers = #tpu.dot_dimension_numbers<[1], [0], [0], [1], [0, 0, 1, 1], [], []>} : vector<32x32xf32>, vector<32x32xf32>, vector<32x32xf32> -> vector<32x32xf32>
    %656 = arith.addf %651, %655 : vector<32x32xf32>
    %657 = vector.broadcast %509 : vector<1x32xf32> to vector<32x32xf32>
    %658 = arith.addf %656, %657 : vector<32x32xf32>
    %659 = arith.addf %514, %658 : vector<32x32xf32>
    %c0_561 = arith.constant 0 : index
    %c0_562 = arith.constant 0 : index
    %660 = vector.load %arg36[%c0_561, %c0_562] : memref<1x256xf32, #tpu.memory_space<vmem>>, vector<1x256xf32>
    %cst_563 = arith.constant 0.000000e+00 : f32
    %661 = vector.broadcast %cst_563 : f32 to vector<2x256xf32>
    %c0_564 = arith.constant 0 : index
    %c0_565 = arith.constant 0 : index
    %c0_566 = arith.constant 0 : index
    %662 = vector.load %arg4[%c0_564, %c0_565, %c0_566] : memref<16x2x32xf32, #tpu.memory_space<vmem>>, vector<1x2x32xf32>
    %663 = vector.shape_cast %662 : vector<1x2x32xf32> to vector<2x32xf32>
    %cst_567 = arith.constant dense<0.000000e+00> : vector<2x32xf32>
    %664 = tpu.matmul %663, %659, %cst_567 {dimension_numbers = #tpu.dot_dimension_numbers<[1], [0], [0], [1], [0, 0, 1, 1], [], []>} : vector<2x32xf32>, vector<32x32xf32>, vector<2x32xf32> -> vector<2x32xf32>
    %c0_568 = arith.constant 0 : index
    %c0_569 = arith.constant 0 : index
    %c0_570 = arith.constant 0 : index
    %665 = vector.load %arg35[%c0_568, %c0_569, %c0_570] : memref<16x32x256xf32, #tpu.memory_space<vmem>>, vector<1x32x256xf32>
    %666 = vector.shape_cast %665 : vector<1x32x256xf32> to vector<32x256xf32>
    %cst_571 = arith.constant dense<0.000000e+00> : vector<2x256xf32>
    %667 = tpu.matmul %664, %666, %cst_571 {dimension_numbers = #tpu.dot_dimension_numbers<[1], [0], [0], [1], [0, 0, 1, 1], [], []>} : vector<2x32xf32>, vector<32x256xf32>, vector<2x256xf32> -> vector<2x256xf32>
    %668 = arith.addf %661, %667 : vector<2x256xf32>
    %c1_572 = arith.constant 1 : index
    %c0_573 = arith.constant 0 : index
    %c0_574 = arith.constant 0 : index
    %669 = vector.load %arg4[%c1_572, %c0_573, %c0_574] : memref<16x2x32xf32, #tpu.memory_space<vmem>>, vector<1x2x32xf32>
    %670 = vector.shape_cast %669 : vector<1x2x32xf32> to vector<2x32xf32>
    %cst_575 = arith.constant dense<0.000000e+00> : vector<2x32xf32>
    %671 = tpu.matmul %670, %659, %cst_575 {dimension_numbers = #tpu.dot_dimension_numbers<[1], [0], [0], [1], [0, 0, 1, 1], [], []>} : vector<2x32xf32>, vector<32x32xf32>, vector<2x32xf32> -> vector<2x32xf32>
    %c1_576 = arith.constant 1 : index
    %c0_577 = arith.constant 0 : index
    %c0_578 = arith.constant 0 : index
    %672 = vector.load %arg35[%c1_576, %c0_577, %c0_578] : memref<16x32x256xf32, #tpu.memory_space<vmem>>, vector<1x32x256xf32>
    %673 = vector.shape_cast %672 : vector<1x32x256xf32> to vector<32x256xf32>
    %cst_579 = arith.constant dense<0.000000e+00> : vector<2x256xf32>
    %674 = tpu.matmul %671, %673, %cst_579 {dimension_numbers = #tpu.dot_dimension_numbers<[1], [0], [0], [1], [0, 0, 1, 1], [], []>} : vector<2x32xf32>, vector<32x256xf32>, vector<2x256xf32> -> vector<2x256xf32>
    %675 = arith.addf %668, %674 : vector<2x256xf32>
    %c2_580 = arith.constant 2 : index
    %c0_581 = arith.constant 0 : index
    %c0_582 = arith.constant 0 : index
    %676 = vector.load %arg4[%c2_580, %c0_581, %c0_582] : memref<16x2x32xf32, #tpu.memory_space<vmem>>, vector<1x2x32xf32>
    %677 = vector.shape_cast %676 : vector<1x2x32xf32> to vector<2x32xf32>
    %cst_583 = arith.constant dense<0.000000e+00> : vector<2x32xf32>
    %678 = tpu.matmul %677, %659, %cst_583 {dimension_numbers = #tpu.dot_dimension_numbers<[1], [0], [0], [1], [0, 0, 1, 1], [], []>} : vector<2x32xf32>, vector<32x32xf32>, vector<2x32xf32> -> vector<2x32xf32>
    %c2_584 = arith.constant 2 : index
    %c0_585 = arith.constant 0 : index
    %c0_586 = arith.constant 0 : index
    %679 = vector.load %arg35[%c2_584, %c0_585, %c0_586] : memref<16x32x256xf32, #tpu.memory_space<vmem>>, vector<1x32x256xf32>
    %680 = vector.shape_cast %679 : vector<1x32x256xf32> to vector<32x256xf32>
    %cst_587 = arith.constant dense<0.000000e+00> : vector<2x256xf32>
    %681 = tpu.matmul %678, %680, %cst_587 {dimension_numbers = #tpu.dot_dimension_numbers<[1], [0], [0], [1], [0, 0, 1, 1], [], []>} : vector<2x32xf32>, vector<32x256xf32>, vector<2x256xf32> -> vector<2x256xf32>
    %682 = arith.addf %675, %681 : vector<2x256xf32>
    %c3_588 = arith.constant 3 : index
    %c0_589 = arith.constant 0 : index
    %c0_590 = arith.constant 0 : index
    %683 = vector.load %arg4[%c3_588, %c0_589, %c0_590] : memref<16x2x32xf32, #tpu.memory_space<vmem>>, vector<1x2x32xf32>
    %684 = vector.shape_cast %683 : vector<1x2x32xf32> to vector<2x32xf32>
    %cst_591 = arith.constant dense<0.000000e+00> : vector<2x32xf32>
    %685 = tpu.matmul %684, %659, %cst_591 {dimension_numbers = #tpu.dot_dimension_numbers<[1], [0], [0], [1], [0, 0, 1, 1], [], []>} : vector<2x32xf32>, vector<32x32xf32>, vector<2x32xf32> -> vector<2x32xf32>
    %c3_592 = arith.constant 3 : index
    %c0_593 = arith.constant 0 : index
    %c0_594 = arith.constant 0 : index
    %686 = vector.load %arg35[%c3_592, %c0_593, %c0_594] : memref<16x32x256xf32, #tpu.memory_space<vmem>>, vector<1x32x256xf32>
    %687 = vector.shape_cast %686 : vector<1x32x256xf32> to vector<32x256xf32>
    %cst_595 = arith.constant dense<0.000000e+00> : vector<2x256xf32>
    %688 = tpu.matmul %685, %687, %cst_595 {dimension_numbers = #tpu.dot_dimension_numbers<[1], [0], [0], [1], [0, 0, 1, 1], [], []>} : vector<2x32xf32>, vector<32x256xf32>, vector<2x256xf32> -> vector<2x256xf32>
    %689 = arith.addf %682, %688 : vector<2x256xf32>
    %c4_596 = arith.constant 4 : index
    %c0_597 = arith.constant 0 : index
    %c0_598 = arith.constant 0 : index
    %690 = vector.load %arg4[%c4_596, %c0_597, %c0_598] : memref<16x2x32xf32, #tpu.memory_space<vmem>>, vector<1x2x32xf32>
    %691 = vector.shape_cast %690 : vector<1x2x32xf32> to vector<2x32xf32>
    %cst_599 = arith.constant dense<0.000000e+00> : vector<2x32xf32>
    %692 = tpu.matmul %691, %659, %cst_599 {dimension_numbers = #tpu.dot_dimension_numbers<[1], [0], [0], [1], [0, 0, 1, 1], [], []>} : vector<2x32xf32>, vector<32x32xf32>, vector<2x32xf32> -> vector<2x32xf32>
    %c4_600 = arith.constant 4 : index
    %c0_601 = arith.constant 0 : index
    %c0_602 = arith.constant 0 : index
    %693 = vector.load %arg35[%c4_600, %c0_601, %c0_602] : memref<16x32x256xf32, #tpu.memory_space<vmem>>, vector<1x32x256xf32>
    %694 = vector.shape_cast %693 : vector<1x32x256xf32> to vector<32x256xf32>
    %cst_603 = arith.constant dense<0.000000e+00> : vector<2x256xf32>
    %695 = tpu.matmul %692, %694, %cst_603 {dimension_numbers = #tpu.dot_dimension_numbers<[1], [0], [0], [1], [0, 0, 1, 1], [], []>} : vector<2x32xf32>, vector<32x256xf32>, vector<2x256xf32> -> vector<2x256xf32>
    %696 = arith.addf %689, %695 : vector<2x256xf32>
    %c5_604 = arith.constant 5 : index
    %c0_605 = arith.constant 0 : index
    %c0_606 = arith.constant 0 : index
    %697 = vector.load %arg4[%c5_604, %c0_605, %c0_606] : memref<16x2x32xf32, #tpu.memory_space<vmem>>, vector<1x2x32xf32>
    %698 = vector.shape_cast %697 : vector<1x2x32xf32> to vector<2x32xf32>
    %cst_607 = arith.constant dense<0.000000e+00> : vector<2x32xf32>
    %699 = tpu.matmul %698, %659, %cst_607 {dimension_numbers = #tpu.dot_dimension_numbers<[1], [0], [0], [1], [0, 0, 1, 1], [], []>} : vector<2x32xf32>, vector<32x32xf32>, vector<2x32xf32> -> vector<2x32xf32>
    %c5_608 = arith.constant 5 : index
    %c0_609 = arith.constant 0 : index
    %c0_610 = arith.constant 0 : index
    %700 = vector.load %arg35[%c5_608, %c0_609, %c0_610] : memref<16x32x256xf32, #tpu.memory_space<vmem>>, vector<1x32x256xf32>
    %701 = vector.shape_cast %700 : vector<1x32x256xf32> to vector<32x256xf32>
    %cst_611 = arith.constant dense<0.000000e+00> : vector<2x256xf32>
    %702 = tpu.matmul %699, %701, %cst_611 {dimension_numbers = #tpu.dot_dimension_numbers<[1], [0], [0], [1], [0, 0, 1, 1], [], []>} : vector<2x32xf32>, vector<32x256xf32>, vector<2x256xf32> -> vector<2x256xf32>
    %703 = arith.addf %696, %702 : vector<2x256xf32>
    %c6_612 = arith.constant 6 : index
    %c0_613 = arith.constant 0 : index
    %c0_614 = arith.constant 0 : index
    %704 = vector.load %arg4[%c6_612, %c0_613, %c0_614] : memref<16x2x32xf32, #tpu.memory_space<vmem>>, vector<1x2x32xf32>
    %705 = vector.shape_cast %704 : vector<1x2x32xf32> to vector<2x32xf32>
    %cst_615 = arith.constant dense<0.000000e+00> : vector<2x32xf32>
    %706 = tpu.matmul %705, %659, %cst_615 {dimension_numbers = #tpu.dot_dimension_numbers<[1], [0], [0], [1], [0, 0, 1, 1], [], []>} : vector<2x32xf32>, vector<32x32xf32>, vector<2x32xf32> -> vector<2x32xf32>
    %c6_616 = arith.constant 6 : index
    %c0_617 = arith.constant 0 : index
    %c0_618 = arith.constant 0 : index
    %707 = vector.load %arg35[%c6_616, %c0_617, %c0_618] : memref<16x32x256xf32, #tpu.memory_space<vmem>>, vector<1x32x256xf32>
    %708 = vector.shape_cast %707 : vector<1x32x256xf32> to vector<32x256xf32>
    %cst_619 = arith.constant dense<0.000000e+00> : vector<2x256xf32>
    %709 = tpu.matmul %706, %708, %cst_619 {dimension_numbers = #tpu.dot_dimension_numbers<[1], [0], [0], [1], [0, 0, 1, 1], [], []>} : vector<2x32xf32>, vector<32x256xf32>, vector<2x256xf32> -> vector<2x256xf32>
    %710 = arith.addf %703, %709 : vector<2x256xf32>
    %c7_620 = arith.constant 7 : index
    %c0_621 = arith.constant 0 : index
    %c0_622 = arith.constant 0 : index
    %711 = vector.load %arg4[%c7_620, %c0_621, %c0_622] : memref<16x2x32xf32, #tpu.memory_space<vmem>>, vector<1x2x32xf32>
    %712 = vector.shape_cast %711 : vector<1x2x32xf32> to vector<2x32xf32>
    %cst_623 = arith.constant dense<0.000000e+00> : vector<2x32xf32>
    %713 = tpu.matmul %712, %659, %cst_623 {dimension_numbers = #tpu.dot_dimension_numbers<[1], [0], [0], [1], [0, 0, 1, 1], [], []>} : vector<2x32xf32>, vector<32x32xf32>, vector<2x32xf32> -> vector<2x32xf32>
    %c7_624 = arith.constant 7 : index
    %c0_625 = arith.constant 0 : index
    %c0_626 = arith.constant 0 : index
    %714 = vector.load %arg35[%c7_624, %c0_625, %c0_626] : memref<16x32x256xf32, #tpu.memory_space<vmem>>, vector<1x32x256xf32>
    %715 = vector.shape_cast %714 : vector<1x32x256xf32> to vector<32x256xf32>
    %cst_627 = arith.constant dense<0.000000e+00> : vector<2x256xf32>
    %716 = tpu.matmul %713, %715, %cst_627 {dimension_numbers = #tpu.dot_dimension_numbers<[1], [0], [0], [1], [0, 0, 1, 1], [], []>} : vector<2x32xf32>, vector<32x256xf32>, vector<2x256xf32> -> vector<2x256xf32>
    %717 = arith.addf %710, %716 : vector<2x256xf32>
    %c8_628 = arith.constant 8 : index
    %c0_629 = arith.constant 0 : index
    %c0_630 = arith.constant 0 : index
    %718 = vector.load %arg4[%c8_628, %c0_629, %c0_630] : memref<16x2x32xf32, #tpu.memory_space<vmem>>, vector<1x2x32xf32>
    %719 = vector.shape_cast %718 : vector<1x2x32xf32> to vector<2x32xf32>
    %cst_631 = arith.constant dense<0.000000e+00> : vector<2x32xf32>
    %720 = tpu.matmul %719, %659, %cst_631 {dimension_numbers = #tpu.dot_dimension_numbers<[1], [0], [0], [1], [0, 0, 1, 1], [], []>} : vector<2x32xf32>, vector<32x32xf32>, vector<2x32xf32> -> vector<2x32xf32>
    %c8_632 = arith.constant 8 : index
    %c0_633 = arith.constant 0 : index
    %c0_634 = arith.constant 0 : index
    %721 = vector.load %arg35[%c8_632, %c0_633, %c0_634] : memref<16x32x256xf32, #tpu.memory_space<vmem>>, vector<1x32x256xf32>
    %722 = vector.shape_cast %721 : vector<1x32x256xf32> to vector<32x256xf32>
    %cst_635 = arith.constant dense<0.000000e+00> : vector<2x256xf32>
    %723 = tpu.matmul %720, %722, %cst_635 {dimension_numbers = #tpu.dot_dimension_numbers<[1], [0], [0], [1], [0, 0, 1, 1], [], []>} : vector<2x32xf32>, vector<32x256xf32>, vector<2x256xf32> -> vector<2x256xf32>
    %724 = arith.addf %717, %723 : vector<2x256xf32>
    %c9_636 = arith.constant 9 : index
    %c0_637 = arith.constant 0 : index
    %c0_638 = arith.constant 0 : index
    %725 = vector.load %arg4[%c9_636, %c0_637, %c0_638] : memref<16x2x32xf32, #tpu.memory_space<vmem>>, vector<1x2x32xf32>
    %726 = vector.shape_cast %725 : vector<1x2x32xf32> to vector<2x32xf32>
    %cst_639 = arith.constant dense<0.000000e+00> : vector<2x32xf32>
    %727 = tpu.matmul %726, %659, %cst_639 {dimension_numbers = #tpu.dot_dimension_numbers<[1], [0], [0], [1], [0, 0, 1, 1], [], []>} : vector<2x32xf32>, vector<32x32xf32>, vector<2x32xf32> -> vector<2x32xf32>
    %c9_640 = arith.constant 9 : index
    %c0_641 = arith.constant 0 : index
    %c0_642 = arith.constant 0 : index
    %728 = vector.load %arg35[%c9_640, %c0_641, %c0_642] : memref<16x32x256xf32, #tpu.memory_space<vmem>>, vector<1x32x256xf32>
    %729 = vector.shape_cast %728 : vector<1x32x256xf32> to vector<32x256xf32>
    %cst_643 = arith.constant dense<0.000000e+00> : vector<2x256xf32>
    %730 = tpu.matmul %727, %729, %cst_643 {dimension_numbers = #tpu.dot_dimension_numbers<[1], [0], [0], [1], [0, 0, 1, 1], [], []>} : vector<2x32xf32>, vector<32x256xf32>, vector<2x256xf32> -> vector<2x256xf32>
    %731 = arith.addf %724, %730 : vector<2x256xf32>
    %c10_644 = arith.constant 10 : index
    %c0_645 = arith.constant 0 : index
    %c0_646 = arith.constant 0 : index
    %732 = vector.load %arg4[%c10_644, %c0_645, %c0_646] : memref<16x2x32xf32, #tpu.memory_space<vmem>>, vector<1x2x32xf32>
    %733 = vector.shape_cast %732 : vector<1x2x32xf32> to vector<2x32xf32>
    %cst_647 = arith.constant dense<0.000000e+00> : vector<2x32xf32>
    %734 = tpu.matmul %733, %659, %cst_647 {dimension_numbers = #tpu.dot_dimension_numbers<[1], [0], [0], [1], [0, 0, 1, 1], [], []>} : vector<2x32xf32>, vector<32x32xf32>, vector<2x32xf32> -> vector<2x32xf32>
    %c10_648 = arith.constant 10 : index
    %c0_649 = arith.constant 0 : index
    %c0_650 = arith.constant 0 : index
    %735 = vector.load %arg35[%c10_648, %c0_649, %c0_650] : memref<16x32x256xf32, #tpu.memory_space<vmem>>, vector<1x32x256xf32>
    %736 = vector.shape_cast %735 : vector<1x32x256xf32> to vector<32x256xf32>
    %cst_651 = arith.constant dense<0.000000e+00> : vector<2x256xf32>
    %737 = tpu.matmul %734, %736, %cst_651 {dimension_numbers = #tpu.dot_dimension_numbers<[1], [0], [0], [1], [0, 0, 1, 1], [], []>} : vector<2x32xf32>, vector<32x256xf32>, vector<2x256xf32> -> vector<2x256xf32>
    %738 = arith.addf %731, %737 : vector<2x256xf32>
    %c11_652 = arith.constant 11 : index
    %c0_653 = arith.constant 0 : index
    %c0_654 = arith.constant 0 : index
    %739 = vector.load %arg4[%c11_652, %c0_653, %c0_654] : memref<16x2x32xf32, #tpu.memory_space<vmem>>, vector<1x2x32xf32>
    %740 = vector.shape_cast %739 : vector<1x2x32xf32> to vector<2x32xf32>
    %cst_655 = arith.constant dense<0.000000e+00> : vector<2x32xf32>
    %741 = tpu.matmul %740, %659, %cst_655 {dimension_numbers = #tpu.dot_dimension_numbers<[1], [0], [0], [1], [0, 0, 1, 1], [], []>} : vector<2x32xf32>, vector<32x32xf32>, vector<2x32xf32> -> vector<2x32xf32>
    %c11_656 = arith.constant 11 : index
    %c0_657 = arith.constant 0 : index
    %c0_658 = arith.constant 0 : index
    %742 = vector.load %arg35[%c11_656, %c0_657, %c0_658] : memref<16x32x256xf32, #tpu.memory_space<vmem>>, vector<1x32x256xf32>
    %743 = vector.shape_cast %742 : vector<1x32x256xf32> to vector<32x256xf32>
    %cst_659 = arith.constant dense<0.000000e+00> : vector<2x256xf32>
    %744 = tpu.matmul %741, %743, %cst_659 {dimension_numbers = #tpu.dot_dimension_numbers<[1], [0], [0], [1], [0, 0, 1, 1], [], []>} : vector<2x32xf32>, vector<32x256xf32>, vector<2x256xf32> -> vector<2x256xf32>
    %745 = arith.addf %738, %744 : vector<2x256xf32>
    %c12_660 = arith.constant 12 : index
    %c0_661 = arith.constant 0 : index
    %c0_662 = arith.constant 0 : index
    %746 = vector.load %arg4[%c12_660, %c0_661, %c0_662] : memref<16x2x32xf32, #tpu.memory_space<vmem>>, vector<1x2x32xf32>
    %747 = vector.shape_cast %746 : vector<1x2x32xf32> to vector<2x32xf32>
    %cst_663 = arith.constant dense<0.000000e+00> : vector<2x32xf32>
    %748 = tpu.matmul %747, %659, %cst_663 {dimension_numbers = #tpu.dot_dimension_numbers<[1], [0], [0], [1], [0, 0, 1, 1], [], []>} : vector<2x32xf32>, vector<32x32xf32>, vector<2x32xf32> -> vector<2x32xf32>
    %c12_664 = arith.constant 12 : index
    %c0_665 = arith.constant 0 : index
    %c0_666 = arith.constant 0 : index
    %749 = vector.load %arg35[%c12_664, %c0_665, %c0_666] : memref<16x32x256xf32, #tpu.memory_space<vmem>>, vector<1x32x256xf32>
    %750 = vector.shape_cast %749 : vector<1x32x256xf32> to vector<32x256xf32>
    %cst_667 = arith.constant dense<0.000000e+00> : vector<2x256xf32>
    %751 = tpu.matmul %748, %750, %cst_667 {dimension_numbers = #tpu.dot_dimension_numbers<[1], [0], [0], [1], [0, 0, 1, 1], [], []>} : vector<2x32xf32>, vector<32x256xf32>, vector<2x256xf32> -> vector<2x256xf32>
    %752 = arith.addf %745, %751 : vector<2x256xf32>
    %c13_668 = arith.constant 13 : index
    %c0_669 = arith.constant 0 : index
    %c0_670 = arith.constant 0 : index
    %753 = vector.load %arg4[%c13_668, %c0_669, %c0_670] : memref<16x2x32xf32, #tpu.memory_space<vmem>>, vector<1x2x32xf32>
    %754 = vector.shape_cast %753 : vector<1x2x32xf32> to vector<2x32xf32>
    %cst_671 = arith.constant dense<0.000000e+00> : vector<2x32xf32>
    %755 = tpu.matmul %754, %659, %cst_671 {dimension_numbers = #tpu.dot_dimension_numbers<[1], [0], [0], [1], [0, 0, 1, 1], [], []>} : vector<2x32xf32>, vector<32x32xf32>, vector<2x32xf32> -> vector<2x32xf32>
    %c13_672 = arith.constant 13 : index
    %c0_673 = arith.constant 0 : index
    %c0_674 = arith.constant 0 : index
    %756 = vector.load %arg35[%c13_672, %c0_673, %c0_674] : memref<16x32x256xf32, #tpu.memory_space<vmem>>, vector<1x32x256xf32>
    %757 = vector.shape_cast %756 : vector<1x32x256xf32> to vector<32x256xf32>
    %cst_675 = arith.constant dense<0.000000e+00> : vector<2x256xf32>
    %758 = tpu.matmul %755, %757, %cst_675 {dimension_numbers = #tpu.dot_dimension_numbers<[1], [0], [0], [1], [0, 0, 1, 1], [], []>} : vector<2x32xf32>, vector<32x256xf32>, vector<2x256xf32> -> vector<2x256xf32>
    %759 = arith.addf %752, %758 : vector<2x256xf32>
    %c14_676 = arith.constant 14 : index
    %c0_677 = arith.constant 0 : index
    %c0_678 = arith.constant 0 : index
    %760 = vector.load %arg4[%c14_676, %c0_677, %c0_678] : memref<16x2x32xf32, #tpu.memory_space<vmem>>, vector<1x2x32xf32>
    %761 = vector.shape_cast %760 : vector<1x2x32xf32> to vector<2x32xf32>
    %cst_679 = arith.constant dense<0.000000e+00> : vector<2x32xf32>
    %762 = tpu.matmul %761, %659, %cst_679 {dimension_numbers = #tpu.dot_dimension_numbers<[1], [0], [0], [1], [0, 0, 1, 1], [], []>} : vector<2x32xf32>, vector<32x32xf32>, vector<2x32xf32> -> vector<2x32xf32>
    %c14_680 = arith.constant 14 : index
    %c0_681 = arith.constant 0 : index
    %c0_682 = arith.constant 0 : index
    %763 = vector.load %arg35[%c14_680, %c0_681, %c0_682] : memref<16x32x256xf32, #tpu.memory_space<vmem>>, vector<1x32x256xf32>
    %764 = vector.shape_cast %763 : vector<1x32x256xf32> to vector<32x256xf32>
    %cst_683 = arith.constant dense<0.000000e+00> : vector<2x256xf32>
    %765 = tpu.matmul %762, %764, %cst_683 {dimension_numbers = #tpu.dot_dimension_numbers<[1], [0], [0], [1], [0, 0, 1, 1], [], []>} : vector<2x32xf32>, vector<32x256xf32>, vector<2x256xf32> -> vector<2x256xf32>
    %766 = arith.addf %759, %765 : vector<2x256xf32>
    %c15_684 = arith.constant 15 : index
    %c0_685 = arith.constant 0 : index
    %c0_686 = arith.constant 0 : index
    %767 = vector.load %arg4[%c15_684, %c0_685, %c0_686] : memref<16x2x32xf32, #tpu.memory_space<vmem>>, vector<1x2x32xf32>
    %768 = vector.shape_cast %767 : vector<1x2x32xf32> to vector<2x32xf32>
    %cst_687 = arith.constant dense<0.000000e+00> : vector<2x32xf32>
    %769 = tpu.matmul %768, %659, %cst_687 {dimension_numbers = #tpu.dot_dimension_numbers<[1], [0], [0], [1], [0, 0, 1, 1], [], []>} : vector<2x32xf32>, vector<32x32xf32>, vector<2x32xf32> -> vector<2x32xf32>
    %c15_688 = arith.constant 15 : index
    %c0_689 = arith.constant 0 : index
    %c0_690 = arith.constant 0 : index
    %770 = vector.load %arg35[%c15_688, %c0_689, %c0_690] : memref<16x32x256xf32, #tpu.memory_space<vmem>>, vector<1x32x256xf32>
    %771 = vector.shape_cast %770 : vector<1x32x256xf32> to vector<32x256xf32>
    %cst_691 = arith.constant dense<0.000000e+00> : vector<2x256xf32>
    %772 = tpu.matmul %769, %771, %cst_691 {dimension_numbers = #tpu.dot_dimension_numbers<[1], [0], [0], [1], [0, 0, 1, 1], [], []>} : vector<2x32xf32>, vector<32x256xf32>, vector<2x256xf32> -> vector<2x256xf32>
    %773 = arith.addf %766, %772 : vector<2x256xf32>
    %774 = vector.broadcast %660 : vector<1x256xf32> to vector<2x256xf32>
    %775 = arith.addf %773, %774 : vector<2x256xf32>
    %776 = math.tanh %775 : vector<2x256xf32>
    %cst_692 = arith.constant 1.000000e-01 : f32
    %777 = vector.broadcast %cst_692 : f32 to vector<2x256xf32>
    %778 = arith.mulf %777, %776 : vector<2x256xf32>
    %779 = arith.addf %0, %778 : vector<2x256xf32>
    %c0_693 = arith.constant 0 : index
    %c0_694 = arith.constant 0 : index
    %780 = vector.load %arg37[%c0_693, %c0_694] : memref<2x256xf32, #tpu.memory_space<vmem>>, vector<2x256xf32>
    tpu.vector_store %arg37[%c0_693, %c0_694], %779 {strides = array<i32>} : memref<2x256xf32, #tpu.memory_space<vmem>>, vector<2x256xf32>,
    return
  }
}

</mosaic_0001>

<bundles_post_ra>
// kernel: _lambda_.1
= control target key start
LH: loop header
LB: loop body
LE: loop exit
PB: predicated region body
PF: predicated region fallthrough
CT: control target
= control target key end

     0   :  { %s10995_s6 = smov 1   ;;  %s10996_s10 = smov 2   ;;  %s13412_s0 = inlined_call_operand.smem [shape: u32[38], index: -1, kind: input, shape index: {}] }
   0x1   :  { %s11074_s5 = sld [smem:[%s13412_s0]]   ;;  %s10997_s14 = smov 3  }
   0x2   :  { %s11079_s9 = sld [smem:[%s13412_s0 + %s10995_s6]]   ;;  %s10998_s18 = smov 4  }
   0x3   :  { %s11084_s13 = sld [smem:[%s13412_s0 + %s10996_s10]]   ;;  %s10999_s22 = smov 5  }
   0x4   :  { %s11089_s17 = sld [smem:[%s13412_s0 + %s10997_s14]]   ;;  %s11000_s26 = smov 6  }
   0x5   :  { %s11094_s21 = sld [smem:[%s13412_s0 + %s10998_s18]]   ;;  %s11001_s30 = smov 7  }
   0x6   :  { %s11099_s25 = sld [smem:[%s13412_s0 + %s10999_s22]]   ;;  %s11002_s4 = smov 8  }
   0x7   :  { %s11104_s29 = sld [smem:[%s13412_s0 + %s11000_s26]]   ;;  %s11003_s10 = smov 9  }
   0x8   :  { %s11109_s3 = sld [smem:[%s13412_s0 + %s11001_s30]]   ;;  %s11004_s15 = smov 10  }
   0x9   :  { %s11114_s8 = sld [smem:[%s13412_s0 + %s11002_s4]]   ;;  %s11005_s20 = smov 11  }
   0xa   :  { %s11119_s14 = sld [smem:[%s13412_s0 + %s11003_s10]]   ;;  %s11006_s26 = smov 12  }
   0xb   :  { %s11124_s19 = sld [smem:[%s13412_s0 + %s11004_s15]]   ;;  %s11007_s1 = smov 13  }
   0xc   :  { %s11129_s24 = sld [smem:[%s13412_s0 + %s11005_s20]]   ;;  %s11008_s7 = smov 14  }
   0xd   :  { %13491 = sst [smem:[#allocation56_spill]] %s11104_s29  ;;  %s11009_s15 = smov 15  }
   0xe   :  { %13492 = sst [smem:[#allocation57_spill]] %s11109_s3  ;;  %s11010_s22 = smov 16  }
   0xf   :  { %13493 = sst [smem:[#allocation58_spill]] %s11114_s8  ;;  %s11011_s28 = smov 17  }
  0x10   :  { %13494 = sst [smem:[#allocation59_spill]] %s11119_s14 }
  0x11   :  { %13495 = sst [smem:[#allocation60_spill]] %s11124_s19 }
  0x12   :  { %s11134_s30 = sld [smem:[%s13412_s0 + %s11006_s26]]  }
  0x13   :  { %s11139_s6 = sld [smem:[%s13412_s0 + %s11007_s1]]  }
  0x14   :  { %s11144_s12 = sld [smem:[%s13412_s0 + %s11008_s7]]   ;;  %s11012_s7 = smov 18  }
  0x15   :  { %s11149_s20 = sld [smem:[%s13412_s0 + %s11009_s15]]   ;;  %s11013_s15 = smov 19  }
  0x16   :  { %s11154_s27 = sld [smem:[%s13412_s0 + %s11010_s22]]   ;;  %s11014_s22 = smov 20  }
  0x17   :  { %s11159_s4 = sld [smem:[%s13412_s0 + %s11011_s28]]   ;;  %s11015_s28 = smov 21  }
  0x18   :  { %13496 = sst [smem:[#allocation61_spill]] %s11134_s30 }
  0x19   :  { %s11164_s14 = sld [smem:[%s13412_s0 + %s11012_s7]]   ;;  %s11016_s7 = smov 22  }
  0x1a   :  { %13497 = sst [smem:[#allocation62_spill]] %s11144_s12 }
  0x1b   :  { %s11169_s19 = sld [smem:[%s13412_s0 + %s11013_s15]]   ;;  %s11017_s15 = smov 23  }
  0x1c   :  { %13498 = sst [smem:[#allocation63_spill]] %s11154_s27 }
  0x1d   :  { %13499 = sst [smem:[#allocation64_spill]] %s11159_s4 }
  0x1e   :  { %s11174_s8 = sld [smem:[%s13412_s0 + %s11014_s22]]   ;;  %s11018_s22 = smov 24  }
  0x1f   :  { %13500 = sst [smem:[#allocation65_spill]] %s11164_s14 }
  0x20   :  { %s11179_s4 = sld [smem:[%s13412_s0 + %s11015_s28]]   ;;  %s11019_s28 = smov 25  }
  0x21   :  { %13501 = sst [smem:[#allocation66_spill]] %s11169_s19 }
  0x22   :  { %s11184_s14 = sld [smem:[%s13412_s0 + %s11016_s7]]   ;;  %s11020_s7 = smov 26  }
  0x23   :  { %s11189_s19 = sld [smem:[%s13412_s0 + %s11017_s15]]   ;;  %s11021_s15 = smov 27  }
  0x24   :  { %13502 = sst [smem:[#allocation67_spill]] %s11174_s8 }
  0x25   :  { %s11194_s8 = sld [smem:[%s13412_s0 + %s11018_s22]]   ;;  %s11022_s22 = smov 28  }
  0x26   :  { %s11199_s3 = sld [smem:[%s13412_s0 + %s11019_s28]]   ;;  %s11023_s28 = smov 29  }
  0x27   :  { %s11209_s27 = sld [smem:[%s13412_s0 + %s11021_s15]]   ;;  %s11025_s15 = smov 31  }
  0x28   :  { %13503 = sst [smem:[#allocation68_spill]] %s11184_s14 }
  0x29   :  { %s11204_s14 = sld [smem:[%s13412_s0 + %s11020_s7]]   ;;  %s11024_s7 = smov 30  }
  0x2b   :  { %13504 = sst [smem:[#allocation69_spill]] %s11194_s8 }
  0x2c   :  { %13505 = sst [smem:[#allocation70_spill]] %s11199_s3 }
  0x2d   :  { %13507 = sst [smem:[#allocation72_spill]] %s11209_s27 }
  0x2e   :  { %s11214_s8 = sld [smem:[%s13412_s0 + %s11022_s22]]   ;;  %s11026_s22 = smov 32  }
  0x2f   :  { %13506 = sst [smem:[#allocation71_spill]] %s11204_s14 }
  0x30   :  { %s11219_s3 = sld [smem:[%s13412_s0 + %s11023_s28]]   ;;  %s11027_s28 = smov 33  }
  0x31   :  { %s11224_s14 = sld [smem:[%s13412_s0 + %s11024_s7]]   ;;  %s11028_s7 = smov 34  }
  0x32   :  { %s11229_s27 = sld [smem:[%s13412_s0 + %s11025_s15]]   ;;  %s11029_s15 = smov 35  }
  0x33   :  { %s11239_s12 = sld [smem:[%s13412_s0 + %s11027_s28]]   ;;  %s11031_s28 = smov 37  }
  0x34   :  { %13508 = sst [smem:[#allocation73_spill]] %s11214_s8 }
  0x35   :  { %s11234_s8 = sld [smem:[%s13412_s0 + %s11026_s22]]   ;;  %s11030_s22 = smov 36  }
  0x36   :  { %s11249_s30 = sld [smem:[%s13412_s0 + %s11029_s15]]  }
  0x37   :  { %13509 = sst [smem:[#allocation74_spill]] %s11224_s14 }
  0x38   :  { %s11244_s14 = sld [smem:[%s13412_s0 + %s11028_s7]]  }
  0x39   :  { %s11259_s29 = sld [smem:[%s13412_s0 + %s11031_s28]]  }
  0x3b   :  { %13510 = sst [smem:[#allocation75_spill]] %s11234_s8 }
  0x3c   :  { %s11254_s8 = sld [smem:[%s13412_s0 + %s11030_s22]]  }
  0x3d   :  { %80 = vsyncpa [#allocation3], 0 }
  0x3e   :  { %81 = vsyncpa [#allocation6], 0 }
  0x3f   :  { %82 = vsyncpa [#allocation9], 0 }
  0x40   :  { %83 = vsyncpa [#allocation12], 0 }
  0x41   :  { %84 = vsyncpa [#allocation15], 0 }
  0x42   :  { %85 = vsyncpa [#allocation18], 0 }
  0x43   :  { %86 = vsyncpa [#allocation21], 0 }
  0x44   :  { %87 = vsyncpa [#allocation24], 0 }
  0x45   :  { %88 = vsyncpa [#allocation27], 0 }
  0x46   :  { %89 = vsyncpa [#allocation30], 0 }
  0x47   :  { %90 = vsyncpa [#allocation33], 0 }
  0x48   :  { %91 = vsyncpa [#allocation36], 0 }
  0x49   :  { %92 = vsyncpa [#allocation39], 0  ;;  %s109_s7 = sshll.u32 %s11079_s9, 4  ;;  %s110_s7 = int_to_ptr.hbm [resolvable:$true] %s109_s7 }
  0x4a   :  { %93 = vsyncpa [#allocation4], 0  ;;  %s11032_s0 = smov [#allocation5]   ;;  %s135_s11 = sshll.u32 %s11089_s17, 4  ;;  %s136_s11 = int_to_ptr.hbm [resolvable:$true] %s135_s11 }
  0x4b   :  { %s111_s10 = sshll.u32 %s11032_s0, 4  ;;  %s10343_s15 = sshra.s32 %s110_s7, 4  ;;  %s112_s10 = int_to_ptr.vmem [resolvable:$true] %s111_s10  ;;  %s10344_s15 = int_to_ptr.hbm [resolvable:$true] %s10343_s15 }
  0x4c   :  { %s10345_s16 = scalar_lea.hbm %s10344_s15, 32  ;;  %s10347_s18 = scalar_lea.hbm %s11079_s9, 32 }
  0x4d   :  { %p10346_p0 = scmp.ne.s32.totalorder %s10344_s15, %s10345_s16  ;;  %p10348_p1 = scmp.lt.s32.totalorder %s10344_s15, %s11079_s9 }
  0x4e   :  { %p10349_p2 = scmp.lt.s32.totalorder %s10347_s18, %s10345_s16 }
  0x50   :  { %p10350_p3 = por %p10349_p2, %p10348_p1 }
  0x52   :  { %p10351_p4 = pnand %p10350_p3, %p10346_p0 }
  0x54   :  { %10354 = shalt.err (!%p10351_p4)
}
  0x55   :  { %s11033_s22 = smov 128   ;;  %s11034_s23 = smov 8  }
  0x56   :  { %117 = dma.hbm_to_vmem [thread:$0]  %s110_s7, 512, %s112_s10, [#allocation6], %s11033_s22, %s11033_s22, %s11034_s23  }
  0x57   :  { %s11035_s26 = smov [#allocation8]   ;;  %s161_s1 = sshll.u32 %s11099_s25, 4  ;;  %s11269_s1 = int_to_ptr.hbm [resolvable:$true] %s161_s1 }
  0x58   :  { %s137_s28 = sshll.u32 %s11035_s26, 4  ;;  %s10367_s9 = sshra.s32 %s136_s11, 4  ;;  %s138_s28 = int_to_ptr.vmem [resolvable:$true] %s137_s28  ;;  %s10368_s9 = int_to_ptr.hbm [resolvable:$true] %s10367_s9 }
  0x59   :  { %s10369_s2 = scalar_lea.hbm %s10368_s9, 512  ;;  %s10371_s0 = scalar_lea.hbm %s11089_s17, 512 }
  0x5a   :  { %p10370_p5 = scmp.ne.s32.totalorder %s10368_s9, %s10369_s2  ;;  %p10372_p6 = scmp.lt.s32.totalorder %s10368_s9, %s11089_s17 }
  0x5b   :  { %p10373_p7 = scmp.lt.s32.totalorder %s10371_s0, %s10369_s2 }
  0x5d   :  { %p10374_p8 = por %p10373_p7, %p10372_p6 }
  0x5f   :  { %p10375_p9 = pnand %p10374_p8, %p10370_p5 }
  0x61   :  { %10378 = shalt.err (!%p10375_p9)
}
  0x62   :  { %143 = dma.hbm_to_vmem [thread:$0]  %s136_s11, 8192, %s138_s28, [#allocation9], %s11033_s22, %s11033_s22, %s11034_s23  }
  0x63   :  { %s195_s7 = sshll.u32 %s11129_s24, 4  ;;  %s11036_s10 = smov [#allocation11]   ;;  %s11277_s7 = int_to_ptr.hbm [resolvable:$true] %s195_s7 }
  0x64   :  { %s163_s15 = sshll.u32 %s11036_s10, 4  ;;  %s10391_s16 = sshra.s32 %s11269_s1, 4  ;;  %s164_s15 = int_to_ptr.vmem [resolvable:$true] %s163_s15  ;;  %s10392_s16 = int_to_ptr.hbm [resolvable:$true] %s10391_s16 }
  0x65   :  { %s10393_s17 = scalar_lea.hbm %s10392_s16, 4096  ;;  %s10395_s18 = scalar_lea.hbm %s11099_s25, 4096 }
  0x66   :  { %p10394_p10 = scmp.ne.s32.totalorder %s10392_s16, %s10393_s17  ;;  %p10396_p11 = scmp.lt.s32.totalorder %s10392_s16, %s11099_s25 }
  0x67   :  { %p10397_p12 = scmp.lt.s32.totalorder %s10395_s18, %s10393_s17 }
  0x69   :  { %p10398_p13 = por %p10397_p12, %p10396_p11 }
  0x6b   :  { %p10399_p0 = pnand %p10398_p13, %p10394_p10 }
  0x6d   :  { %10402 = shalt.err (!%p10399_p0)
}
  0x6e   :  { %169 = dma.hbm_to_vmem [thread:$0]  %s11269_s1, 65536, %s164_s15, [#allocation12], %s11033_s22, %s11033_s22, %s11034_s23  }
  0x6f   :  { %s11037_s11 = smov [#allocation14]   ;;  %s219_s28 = sshll.u32 %s11139_s6, 4  ;;  %s11287_s28 = int_to_ptr.hbm [resolvable:$true] %s219_s28 }
  0x70   :  { %s197_s26 = sshll.u32 %s11037_s11, 4  ;;  %s10415_s25 = sshra.s32 %s11277_s7, 4  ;;  %s198_s26 = int_to_ptr.vmem [resolvable:$true] %s197_s26  ;;  %s10416_s25 = int_to_ptr.hbm [resolvable:$true] %s10415_s25 }
  0x71   :  { %s10417_s9 = scalar_lea.hbm %s10416_s25, 288  ;;  %s10419_s2 = scalar_lea.hbm %s11129_s24, 288 }
  0x72   :  { %p10418_p1 = scmp.ne.s32.totalorder %s10416_s25, %s10417_s9  ;;  %p10420_p2 = scmp.lt.s32.totalorder %s10416_s25, %s11129_s24 }
  0x73   :  { %p10421_p3 = scmp.lt.s32.totalorder %s10419_s2, %s10417_s9 }
  0x75   :  { %p10422_p4 = por %p10421_p3, %p10420_p2 }
  0x77   :  { %p10423_p5 = pnand %p10422_p4, %p10418_p1 }
  0x79   :  { %10426 = shalt.err (!%p10423_p5)
}
  0x7a   :  { %203 = dma.hbm_to_vmem [thread:$0]  %s11277_s7, 4608, %s198_s26, [#allocation15], %s11033_s22, %s11033_s22, %s11034_s23  }
  0x7b   :  { %s243_s1 = sshll.u32 %s11149_s20, 4  ;;  %s11038_s0 = smov [#allocation17]   ;;  %s11297_s1 = int_to_ptr.hbm [resolvable:$true] %s243_s1 }
  0x7c   :  { %s221_s10 = sshll.u32 %s11038_s0, 4  ;;  %s10439_s24 = sshra.s32 %s11287_s28, 4  ;;  %s222_s10 = int_to_ptr.vmem [resolvable:$true] %s221_s10  ;;  %s10440_s24 = int_to_ptr.hbm [resolvable:$true] %s10439_s24 }
  0x7d   :  { %s10441_s15 = scalar_lea.hbm %s10440_s24, 576  ;;  %s10443_s16 = scalar_lea.hbm %s11139_s6, 576 }
  0x7e   :  { %p10442_p6 = scmp.ne.s32.totalorder %s10440_s24, %s10441_s15  ;;  %p10444_p7 = scmp.lt.s32.totalorder %s10440_s24, %s11139_s6 }
  0x7f   :  { %p10445_p8 = scmp.lt.s32.totalorder %s10443_s16, %s10441_s15 }
  0x81   :  { %p10446_p9 = por %p10445_p8, %p10444_p7 }
  0x83   :  { %p10447_p10 = pnand %p10446_p9, %p10442_p6 }
  0x85   :  { %10450 = shalt.err (!%p10447_p10)
}
  0x86   :  { %227 = dma.hbm_to_vmem [thread:$0]  %s11287_s28, 9216, %s222_s10, [#allocation18], %s11033_s22, %s11033_s22, %s11034_s23  }
  0x87   :  { %s11039_s7 = smov [#allocation20]   ;;  %s275_s18 = sshll.u32 %s11179_s4, 4  ;;  %s11307_s18 = int_to_ptr.hbm [resolvable:$true] %s275_s18 }
  0x88   :  { %s245_s17 = sshll.u32 %s11039_s7, 4  ;;  %s10463_s6 = sshra.s32 %s11297_s1, 4  ;;  %s246_s17 = int_to_ptr.vmem [resolvable:$true] %s245_s17  ;;  %s10464_s6 = int_to_ptr.hbm [resolvable:$true] %s10463_s6 }
  0x89   :  { %s10465_s11 = scalar_lea.hbm %s10464_s6, 32  ;;  %s10467_s26 = scalar_lea.hbm %s11149_s20, 32 }
  0x8a   :  { %p10466_p11 = scmp.ne.s32.totalorder %s10464_s6, %s10465_s11  ;;  %p10468_p12 = scmp.lt.s32.totalorder %s10464_s6, %s11149_s20 }
  0x8b   :  { %p10469_p13 = scmp.lt.s32.totalorder %s10467_s26, %s10465_s11 }
  0x8d   :  { %p10470_p0 = por %p10469_p13, %p10468_p12 }
  0x8f   :  { %p10471_p1 = pnand %p10470_p0, %p10466_p11 }
  0x91   :  { %10474 = shalt.err (!%p10471_p1)
}
  0x92   :  { %251 = dma.hbm_to_vmem [thread:$0]  %s11297_s1, 512, %s246_s17, [#allocation21], %s11033_s22, %s11033_s22, %s11034_s23  }
  0x93   :  { %s299_s28 = sshll.u32 %s11189_s19, 4  ;;  %s11040_s25 = smov [#allocation23]   ;;  %s11317_s28 = int_to_ptr.hbm [resolvable:$true] %s299_s28 }
  0x94   :  { %s277_s9 = sshll.u32 %s11040_s25, 4  ;;  %s10487_s20 = sshra.s32 %s11307_s18, 4  ;;  %s278_s9 = int_to_ptr.vmem [resolvable:$true] %s277_s9  ;;  %s10488_s20 = int_to_ptr.hbm [resolvable:$true] %s10487_s20 }
  0x95   :  { %s10489_s2 = scalar_lea.hbm %s10488_s20, 576  ;;  %s10491_s0 = scalar_lea.hbm %s11179_s4, 576 }
  0x96   :  { %p10490_p2 = scmp.ne.s32.totalorder %s10488_s20, %s10489_s2  ;;  %p10492_p3 = scmp.lt.s32.totalorder %s10488_s20, %s11179_s4 }
  0x97   :  { %p10493_p4 = scmp.lt.s32.totalorder %s10491_s0, %s10489_s2 }
  0x99   :  { %p10494_p5 = por %p10493_p4, %p10492_p3 }
  0x9b   :  { %p10495_p6 = pnand %p10494_p5, %p10490_p2 }
  0x9d   :  { %10498 = shalt.err (!%p10495_p6)
}
  0x9e   :  { %283 = dma.hbm_to_vmem [thread:$0]  %s11307_s18, 9216, %s278_s9, [#allocation24], %s11033_s22, %s11033_s22, %s11034_s23  }
  0x9f   :  { %s11041_s1 = smov [#allocation26]   ;;  %s331_s24 = sshll.u32 %s11219_s3, 4  ;;  %s11327_s24 = int_to_ptr.hbm [resolvable:$true] %s331_s24 }
  0xa0   :  { %s301_s10 = sshll.u32 %s11041_s1, 4  ;;  %s10511_s4 = sshra.s32 %s11317_s28, 4  ;;  %s302_s10 = int_to_ptr.vmem [resolvable:$true] %s301_s10  ;;  %s10512_s4 = int_to_ptr.hbm [resolvable:$true] %s10511_s4 }
  0xa1   :  { %s10513_s15 = scalar_lea.hbm %s10512_s4, 576  ;;  %s10515_s16 = scalar_lea.hbm %s11189_s19, 576 }
  0xa2   :  { %p10514_p7 = scmp.ne.s32.totalorder %s10512_s4, %s10513_s15  ;;  %p10516_p8 = scmp.lt.s32.totalorder %s10512_s4, %s11189_s19 }
  0xa3   :  { %p10517_p9 = scmp.lt.s32.totalorder %s10515_s16, %s10513_s15 }
  0xa5   :  { %p10518_p10 = por %p10517_p9, %p10516_p8 }
  0xa7   :  { %p10519_p11 = pnand %p10518_p10, %p10514_p7 }
  0xa9   :  { %10522 = shalt.err (!%p10519_p11)
}
  0xaa   :  { %307 = dma.hbm_to_vmem [thread:$0]  %s11317_s28, 9216, %s302_s10, [#allocation27], %s11033_s22, %s11033_s22, %s11034_s23  }
  0xab   :  { %s355_s7 = sshll.u32 %s11229_s27, 4  ;;  %s11042_s17 = smov [#allocation29]   ;;  %s11337_s7 = int_to_ptr.hbm [resolvable:$true] %s355_s7 }
  0xac   :  { %s333_s18 = sshll.u32 %s11042_s17, 4  ;;  %s10535_s19 = sshra.s32 %s11327_s24, 4  ;;  %s334_s18 = int_to_ptr.vmem [resolvable:$true] %s333_s18  ;;  %s10536_s19 = int_to_ptr.hbm [resolvable:$true] %s10535_s19 }
  0xad   :  { %s10537_s6 = scalar_lea.hbm %s10536_s19, 576  ;;  %s10539_s11 = scalar_lea.hbm %s11219_s3, 576 }
  0xae   :  { %p10538_p12 = scmp.ne.s32.totalorder %s10536_s19, %s10537_s6  ;;  %p10540_p13 = scmp.lt.s32.totalorder %s10536_s19, %s11219_s3 }
  0xaf   :  { %p10541_p0 = scmp.lt.s32.totalorder %s10539_s11, %s10537_s6 }
  0xb1   :  { %p10542_p1 = por %p10541_p0, %p10540_p13 }
  0xb3   :  { %p10543_p2 = pnand %p10542_p1, %p10538_p12 }
  0xb5   :  { %10546 = shalt.err (!%p10543_p2)
}
  0xb6   :  { %339 = dma.hbm_to_vmem [thread:$0]  %s11327_s24, 9216, %s334_s18, [#allocation30], %s11033_s22, %s11033_s22, %s11034_s23  }
  0xb7   :  { %s11043_s26 = smov [#allocation32]   ;;  %s379_s25 = sshll.u32 %s11239_s12, 4  ;;  %s11347_s25 = int_to_ptr.hbm [resolvable:$true] %s379_s25 }
  0xb8   :  { %s357_s28 = sshll.u32 %s11043_s26, 4  ;;  %s10559_s3 = sshra.s32 %s11337_s7, 4  ;;  %s358_s28 = int_to_ptr.vmem [resolvable:$true] %s357_s28  ;;  %s10560_s3 = int_to_ptr.hbm [resolvable:$true] %s10559_s3 }
  0xb9   :  { %s10561_s9 = scalar_lea.hbm %s10560_s3, 288  ;;  %s10563_s20 = scalar_lea.hbm %s11229_s27, 288 }
  0xba   :  { %p10562_p3 = scmp.ne.s32.totalorder %s10560_s3, %s10561_s9  ;;  %p10564_p4 = scmp.lt.s32.totalorder %s10560_s3, %s11229_s27 }
  0xbb   :  { %p10565_p5 = scmp.lt.s32.totalorder %s10563_s20, %s10561_s9 }
  0xbd   :  { %p10566_p6 = por %p10565_p5, %p10564_p4 }
  0xbf   :  { %p10567_p7 = pnand %p10566_p6, %p10562_p3 }
  0xc1   :  { %10570 = shalt.err (!%p10567_p7)
}
  0xc2   :  { %363 = dma.hbm_to_vmem [thread:$0]  %s11337_s7, 4608, %s358_s28, [#allocation33], %s11033_s22, %s11033_s22, %s11034_s23  }
  0xc3   :  { %s11044_s2 = smov [#allocation35]   ;;  %s403_s1 = sshll.u32 %s11249_s30, 4  ;;  %s11357_s1 = int_to_ptr.hbm [resolvable:$true] %s403_s1 }
  0xc4   :  { %s381_s0 = sshll.u32 %s11044_s2, 4  ;;  %s10583_s27 = sshra.s32 %s11347_s25, 4  ;;  %s382_s0 = int_to_ptr.vmem [resolvable:$true] %s381_s0  ;;  %s10584_s27 = int_to_ptr.hbm [resolvable:$true] %s10583_s27 }
  0xc5   :  { %s10585_s10 = scalar_lea.hbm %s10584_s27, 64  ;;  %s10587_s24 = scalar_lea.hbm %s11239_s12, 64 }
  0xc6   :  { %p10586_p8 = scmp.ne.s32.totalorder %s10584_s27, %s10585_s10  ;;  %p10588_p9 = scmp.lt.s32.totalorder %s10584_s27, %s11239_s12 }
  0xc7   :  { %p10589_p10 = scmp.lt.s32.totalorder %s10587_s24, %s10585_s10 }
  0xc9   :  { %p10590_p11 = por %p10589_p10, %p10588_p9 }
  0xcb   :  { %p10591_p12 = pnand %p10590_p11, %p10586_p8 }
  0xcd   :  { %10594 = shalt.err (!%p10591_p12)
}
  0xce   :  { %387 = dma.hbm_to_vmem [thread:$0]  %s11347_s25, 1024, %s382_s0, [#allocation36], %s11033_s22, %s11033_s22, %s11034_s23  }
  0xcf   :  { %s11045_s4 = smov [#allocation38]   ;;  %s99_s16 = sshll.u32 %s11074_s5, 4  ;;  %s11367_s16 = int_to_ptr.hbm [resolvable:$true] %s99_s16 }
  0xd0   :  { %s405_s15 = sshll.u32 %s11045_s4, 4  ;;  %s10607_s12 = sshra.s32 %s11357_s1, 4  ;;  %s406_s15 = int_to_ptr.vmem [resolvable:$true] %s405_s15  ;;  %s10608_s12 = int_to_ptr.hbm [resolvable:$true] %s10607_s12 }
  0xd1   :  { %s10609_s7 = scalar_lea.hbm %s10608_s12, 1024  ;;  %s10611_s17 = scalar_lea.hbm %s11249_s30, 1024 }
  0xd2   :  { %p10610_p13 = scmp.ne.s32.totalorder %s10608_s12, %s10609_s7  ;;  %p10612_p0 = scmp.lt.s32.totalorder %s10608_s12, %s11249_s30 }
  0xd3   :  { %p10613_p1 = scmp.lt.s32.totalorder %s10611_s17, %s10609_s7 }
  0xd5   :  { %p10614_p2 = por %p10613_p1, %p10612_p0 }
  0xd7   :  { %p10615_p3 = pnand %p10614_p2, %p10610_p13 }
  0xd9   :  { %10618 = shalt.err (!%p10615_p3)
}
  0xda   :  { %s11046_s18 = smov 256   ;;  %s11047_s19 = smov 16  }
  0xdb   :  { %411 = dma.hbm_to_vmem [thread:$0]  %s11357_s1, 16384, %s406_s15, [#allocation39], %s11046_s18, %s11046_s18, %s11047_s19  }
  0xdc   :  { %s122_s6 = sshll.u32 %s11084_s13, 4  ;;  %s11048_s11 = smov [#allocation2]   ;;  %s11375_s6 = int_to_ptr.hbm [resolvable:$true] %s122_s6 }
  0xdd   :  { %s101_s26 = sshll.u32 %s11048_s11, 4  ;;  %s10631_s30 = sshra.s32 %s11367_s16, 4  ;;  %s102_s26 = int_to_ptr.vmem [resolvable:$true] %s101_s26  ;;  %s10632_s30 = int_to_ptr.hbm [resolvable:$true] %s10631_s30 }
  0xde   :  { %s10633_s28 = scalar_lea.hbm %s10632_s30, 4  ;;  %s10635_s25 = scalar_lea.hbm %s11074_s5, 4 }
  0xdf   :  { %p10634_p4 = scmp.ne.s32.totalorder %s10632_s30, %s10633_s28  ;;  %p10636_p5 = scmp.lt.s32.totalorder %s10632_s30, %s11074_s5 }
  0xe0   :  { %p10637_p6 = scmp.lt.s32.totalorder %s10635_s25, %s10633_s28 }
  0xe2   :  { %p10638_p7 = por %p10637_p6, %p10636_p5 }
  0xe4   :  { %p10639_p8 = pnand %p10638_p7, %p10634_p4 }
  0xe6   :  { %10642 = shalt.err (!%p10639_p8)
}
  0xe7   :  { %104 = dma.hbm_to_vmem [thread:$0]  %s11367_s16, 64, %s102_s26, [#allocation3]  }
  0xe8   :  { %s11049_s3 = smov [#allocation7]   ;;  %s148_s20 = sshll.u32 %s11094_s21, 4  ;;  %s11382_s20 = int_to_ptr.hbm [resolvable:$true] %s148_s20 }
  0xe9   :  { %s124_s9 = sshll.u32 %s11049_s3, 4  ;;  %s10655_s2 = sshra.s32 %s11375_s6, 4  ;;  %s125_s9 = int_to_ptr.vmem [resolvable:$true] %s124_s9  ;;  %s10656_s2 = int_to_ptr.hbm [resolvable:$true] %s10655_s2 }
  0xea   :  { %s10657_s0 = scalar_lea.hbm %s10656_s2, 288  ;;  %s10659_s5 = scalar_lea.hbm %s11084_s13, 288 }
  0xeb   :  { %p10658_p9 = scmp.ne.s32.totalorder %s10656_s2, %s10657_s0  ;;  %p10660_p10 = scmp.lt.s32.totalorder %s10656_s2, %s11084_s13 }
  0xec   :  { %p10661_p11 = scmp.lt.s32.totalorder %s10659_s5, %s10657_s0 }
  0xee   :  { %p10662_p12 = por %p10661_p11, %p10660_p10 }
  0xf0   :  { %p10663_p13 = pnand %p10662_p12, %p10658_p9 }
  0xf2   :  { %10666 = shalt.err (!%p10663_p13)
}
  0xf3   :  { %s13511_s1 = sld [smem:[#allocation56_spill]]  ;;  %s11050_s27 = smov [#allocation10]  }
  0xf4   :  { %130 = dma.hbm_to_vmem [thread:$0]  %s11375_s6, 4608, %s125_s9, [#allocation6], %s11033_s22, %s11033_s22, %s11034_s23  }
  0xf5   :  { %s150_s10 = sshll.u32 %s11050_s27, 4  ;;  %s10679_s4 = sshra.s32 %s11382_s20, 4  ;;  %s151_s10 = int_to_ptr.vmem [resolvable:$true] %s150_s10  ;;  %s10680_s4 = int_to_ptr.hbm [resolvable:$true] %s10679_s4 }
  0xf6   :  { %s10681_s13 = scalar_lea.hbm %s10680_s4, 32  ;;  %s10683_s15 = scalar_lea.hbm %s11094_s21, 32 }
  0xf7   :  { %p10682_p0 = scmp.ne.s32.totalorder %s10680_s4, %s10681_s13  ;;  %p10684_p1 = scmp.lt.s32.totalorder %s10680_s4, %s11094_s21 }
  0xf8   :  { %p10685_p2 = scmp.lt.s32.totalorder %s10683_s15, %s10681_s13 }
  0xf9   :  { %s174_s24 = sshll.u32 %s13511_s1, 4  ;;  %s175_s24 = int_to_ptr.hbm [resolvable:$true] %s174_s24 }
  0xfa   :  { %p10686_p3 = por %p10685_p2, %p10684_p1 }
  0xfc   :  { %p10687_p4 = pnand %p10686_p3, %p10682_p0 }
  0xfe   :  { %10690 = shalt.err (!%p10687_p4)
}
  0xff   :  { %s11051_s16 = smov 32   ;;  %s13512_s12 = sld [smem:[#allocation61_spill]] }
 0x100   :  { %s11052_s22 = smov 2   ;;  %s11053_s23 = smov [#allocation13]  }
 0x101   :  { %156 = dma.hbm_to_vmem [thread:$0]  %s11382_s20, 512, %s151_s10, [#allocation9], %s11051_s16, %s11051_s16, %s11052_s22  }
 0x102   :  { %s176_s7 = sshll.u32 %s11053_s23, 4  ;;  %s10703_s18 = sshra.s32 %s175_s24, 4  ;;  %s177_s7 = int_to_ptr.vmem [resolvable:$true] %s176_s7  ;;  %s10704_s18 = int_to_ptr.hbm [resolvable:$true] %s10703_s18 }
 0x103   :  { %s10705_s6 = scalar_lea.hbm %s10704_s18, 16  ;;  %s10707_s21 = scalar_lea.hbm %s13511_s1, 16 }
 0x104   :  { %p10706_p5 = scmp.ne.s32.totalorder %s10704_s18, %s10705_s6  ;;  %p10708_p6 = scmp.lt.s32.totalorder %s10704_s18, %s13511_s1 }
 0x105   :  { %s209_s17 = sshll.u32 %s13512_s12, 4  ;;  %p10709_p7 = scmp.lt.s32.totalorder %s10707_s21, %s10705_s6  ;;  %s210_s17 = int_to_ptr.hbm [resolvable:$true] %s209_s17 }
 0x107   :  { %p10710_p8 = por %p10709_p7, %p10708_p6 }
 0x109   :  { %p10711_p9 = pnand %p10710_p8, %p10706_p5 }
 0x10b   :  { %10714 = shalt.err (!%p10711_p9)
}
 0x10c   :  { %s11054_s11 = smov 1   ;;  %s13513_s26 = sld [smem:[#allocation62_spill]] }
 0x10d   :  { %182 = dma.hbm_to_vmem [thread:$0]  %s175_s24, 256, %s177_s7, [#allocation12], %s11047_s19, %s11047_s19, %s11054_s11  }
 0x10e   :  { %s11055_s30 = smov [#allocation16]   ;;  %s10727_s3 = sshra.s32 %s210_s17, 4  ;;  %s10728_s3 = int_to_ptr.hbm [resolvable:$true] %s10727_s3 }
 0x10f   :  { %s211_s28 = sshll.u32 %s11055_s30, 4  ;;  %s10729_s9 = scalar_lea.hbm %s10728_s3, 1  ;;  %s212_s28 = int_to_ptr.vmem [resolvable:$true] %s211_s28 }
 0x110   :  { %p10730_p10 = scmp.ne.s32.totalorder %s10728_s3, %s10729_s9  ;;  %s10731_s20 = scalar_lea.hbm %s13512_s12, 1 }
 0x111   :  { %p10732_p11 = scmp.lt.s32.totalorder %s10728_s3, %s13512_s12  ;;  %p10733_p12 = scmp.lt.s32.totalorder %s10731_s20, %s10729_s9 }
 0x112   :  { %s233_s25 = sshll.u32 %s13513_s26, 4  ;;  %s234_s25 = int_to_ptr.hbm [resolvable:$true] %s233_s25 }
 0x113   :  { %p10734_p13 = por %p10733_p12, %p10732_p11 }
 0x115   :  { %p10735_p0 = pnand %p10734_p13, %p10730_p10 }
 0x117   :  { %10738 = shalt.err (!%p10735_p0)
}
 0x118   :  { %214 = dma.hbm_to_vmem [thread:$0]  %s210_s17, 16, %s212_s28, [#allocation15]  }
 0x119   :  { %s13514_s2 = sld [smem:[#allocation63_spill]]  ;;  %s11056_s0 = smov [#allocation19]  }
 0x11a   :  { %s235_s5 = sshll.u32 %s11056_s0, 4  ;;  %s10751_s1 = sshra.s32 %s234_s25, 4  ;;  %s236_s5 = int_to_ptr.vmem [resolvable:$true] %s235_s5  ;;  %s10752_s1 = int_to_ptr.hbm [resolvable:$true] %s10751_s1 }
 0x11b   :  { %s10753_s27 = scalar_lea.hbm %s10752_s1, 1  ;;  %s10755_s10 = scalar_lea.hbm %s13513_s26, 1 }
 0x11c   :  { %p10754_p1 = scmp.ne.s32.totalorder %s10752_s1, %s10753_s27  ;;  %p10756_p2 = scmp.lt.s32.totalorder %s10752_s1, %s13513_s26 }
 0x11d   :  { %p10757_p3 = scmp.lt.s32.totalorder %s10755_s10, %s10753_s27 }
 0x11f   :  { %s257_s19 = sshll.u32 %s13514_s2, 4  ;;  %p10758_p4 = por %p10757_p3, %p10756_p2  ;;  %s258_s19 = int_to_ptr.hbm [resolvable:$true] %s257_s19 }
 0x121   :  { %p10759_p5 = pnand %p10758_p4, %p10754_p1 }
 0x123   :  { %10762 = shalt.err (!%p10759_p5)
}
 0x124   :  { %238 = dma.hbm_to_vmem [thread:$0]  %s234_s25, 16, %s236_s5, [#allocation18]  }
 0x125   :  { %s13515_s24 = sld [smem:[#allocation68_spill]]  ;;  %s11057_s4 = smov [#allocation22]  }
 0x126   :  { %s259_s13 = sshll.u32 %s11057_s4, 4  ;;  %s10775_s16 = sshra.s32 %s258_s19, 4  ;;  %s260_s13 = int_to_ptr.vmem [resolvable:$true] %s259_s13  ;;  %s10776_s16 = int_to_ptr.hbm [resolvable:$true] %s10775_s16 }
 0x127   :  { %s10777_s12 = scalar_lea.hbm %s10776_s16, 1  ;;  %s10779_s22 = scalar_lea.hbm %s13514_s2, 1 }
 0x128   :  { %p10778_p6 = scmp.ne.s32.totalorder %s10776_s16, %s10777_s12  ;;  %p10780_p7 = scmp.lt.s32.totalorder %s10776_s16, %s13514_s2 }
 0x129   :  { %p10781_p8 = scmp.lt.s32.totalorder %s10779_s22, %s10777_s12 }
 0x12b   :  { %s289_s15 = sshll.u32 %s13515_s24, 4  ;;  %p10782_p9 = por %p10781_p8, %p10780_p7  ;;  %s290_s15 = int_to_ptr.hbm [resolvable:$true] %s289_s15 }
 0x12d   :  { %p10783_p10 = pnand %p10782_p9, %p10778_p6 }
 0x12f   :  { %10786 = shalt.err (!%p10783_p10)
}
 0x130   :  { %262 = dma.hbm_to_vmem [thread:$0]  %s258_s19, 16, %s260_s13, [#allocation21]  }
 0x131   :  { %s13516_s23 = sld [smem:[#allocation69_spill]]  ;;  %s11058_s17 = smov [#allocation25]  }
 0x132   :  { %s291_s18 = sshll.u32 %s11058_s17, 4  ;;  %s10799_s6 = sshra.s32 %s290_s15, 4  ;;  %s292_s18 = int_to_ptr.vmem [resolvable:$true] %s291_s18  ;;  %s10800_s6 = int_to_ptr.hbm [resolvable:$true] %s10799_s6 }
 0x133   :  { %s10801_s21 = scalar_lea.hbm %s10800_s6, 1  ;;  %s10803_s11 = scalar_lea.hbm %s13515_s24, 1 }
 0x134   :  { %p10802_p11 = scmp.ne.s32.totalorder %s10800_s6, %s10801_s21  ;;  %p10804_p12 = scmp.lt.s32.totalorder %s10800_s6, %s13515_s24 }
 0x135   :  { %p10805_p13 = scmp.lt.s32.totalorder %s10803_s11, %s10801_s21 }
 0x137   :  { %s313_s7 = sshll.u32 %s13516_s23, 4  ;;  %p10806_p0 = por %p10805_p13, %p10804_p12  ;;  %s314_s7 = int_to_ptr.hbm [resolvable:$true] %s313_s7 }
 0x139   :  { %p10807_p1 = pnand %p10806_p0, %p10802_p11 }
 0x13b   :  { %10810 = shalt.err (!%p10807_p1)
}
 0x13c   :  { %294 = dma.hbm_to_vmem [thread:$0]  %s290_s15, 16, %s292_s18, [#allocation24]  }
 0x13d   :  { %s13517_s26 = sld [smem:[#allocation74_spill]]  ;;  %s11059_s30 = smov [#allocation28]  }
 0x13e   :  { %s315_s28 = sshll.u32 %s11059_s30, 4  ;;  %s10823_s3 = sshra.s32 %s314_s7, 4  ;;  %s316_s28 = int_to_ptr.vmem [resolvable:$true] %s315_s28  ;;  %s10824_s3 = int_to_ptr.hbm [resolvable:$true] %s10823_s3 }
 0x13f   :  { %s10825_s9 = scalar_lea.hbm %s10824_s3, 1  ;;  %s10827_s20 = scalar_lea.hbm %s13516_s23, 1 }
 0x140   :  { %p10826_p2 = scmp.ne.s32.totalorder %s10824_s3, %s10825_s9  ;;  %p10828_p3 = scmp.lt.s32.totalorder %s10824_s3, %s13516_s23 }
 0x141   :  { %p10829_p4 = scmp.lt.s32.totalorder %s10827_s20, %s10825_s9 }
 0x143   :  { %s345_s25 = sshll.u32 %s13517_s26, 4  ;;  %p10830_p5 = por %p10829_p4, %p10828_p3  ;;  %s346_s25 = int_to_ptr.hbm [resolvable:$true] %s345_s25 }
 0x145   :  { %p10831_p6 = pnand %p10830_p5, %p10826_p2 }
 0x147   :  { %10834 = shalt.err (!%p10831_p6)
}
 0x148   :  { %318 = dma.hbm_to_vmem [thread:$0]  %s314_s7, 16, %s316_s28, [#allocation27]  }
 0x149   :  { %s13518_s2 = sld [smem:[#allocation75_spill]]  ;;  %s11060_s0 = smov [#allocation31]  }
 0x14a   :  { %s347_s5 = sshll.u32 %s11060_s0, 4  ;;  %s10847_s1 = sshra.s32 %s346_s25, 4  ;;  %s348_s5 = int_to_ptr.vmem [resolvable:$true] %s347_s5  ;;  %s10848_s1 = int_to_ptr.hbm [resolvable:$true] %s10847_s1 }
 0x14b   :  { %s10849_s27 = scalar_lea.hbm %s10848_s1, 1  ;;  %s10851_s10 = scalar_lea.hbm %s13517_s26, 1 }
 0x14c   :  { %p10850_p7 = scmp.ne.s32.totalorder %s10848_s1, %s10849_s27  ;;  %p10852_p8 = scmp.lt.s32.totalorder %s10848_s1, %s13517_s26 }
 0x14d   :  { %p10853_p9 = scmp.lt.s32.totalorder %s10851_s10, %s10849_s27 }
 0x14f   :  { %s369_s19 = sshll.u32 %s13518_s2, 4  ;;  %p10854_p10 = por %p10853_p9, %p10852_p8  ;;  %s370_s19 = int_to_ptr.hbm [resolvable:$true] %s369_s19 }
 0x151   :  { %p10855_p11 = pnand %p10854_p10, %p10850_p7 }
 0x153   :  { %10858 = shalt.err (!%p10855_p11)
}
 0x154   :  { %350 = dma.hbm_to_vmem [thread:$0]  %s346_s25, 16, %s348_s5, [#allocation30]  }
 0x155   :  { %s11061_s24 = smov [#allocation34]   ;;  %s393_s13 = sshll.u32 %s11244_s14, 4  ;;  %s394_s13 = int_to_ptr.hbm [resolvable:$true] %s393_s13 }
 0x156   :  { %s371_s4 = sshll.u32 %s11061_s24, 4  ;;  %s10871_s15 = sshra.s32 %s370_s19, 4  ;;  %s372_s4 = int_to_ptr.vmem [resolvable:$true] %s371_s4  ;;  %s10872_s15 = int_to_ptr.hbm [resolvable:$true] %s10871_s15 }
 0x157   :  { %s10873_s16 = scalar_lea.hbm %s10872_s15, 1  ;;  %s10875_s12 = scalar_lea.hbm %s13518_s2, 1 }
 0x158   :  { %p10874_p12 = scmp.ne.s32.totalorder %s10872_s15, %s10873_s16  ;;  %p10876_p13 = scmp.lt.s32.totalorder %s10872_s15, %s13518_s2 }
 0x159   :  { %p10877_p0 = scmp.lt.s32.totalorder %s10875_s12, %s10873_s16 }
 0x15b   :  { %p10878_p1 = por %p10877_p0, %p10876_p13 }
 0x15d   :  { %p10879_p2 = pnand %p10878_p1, %p10874_p12 }
 0x15f   :  { %10882 = shalt.err (!%p10879_p2)
}
 0x160   :  { %374 = dma.hbm_to_vmem [thread:$0]  %s370_s19, 16, %s372_s4, [#allocation33]  }
 0x161   :  { %s417_s22 = sshll.u32 %s11254_s8, 4  ;;  %s11062_s23 = smov [#allocation37]   ;;  %s418_s22 = int_to_ptr.hbm [resolvable:$true] %s417_s22 }
 0x162   :  { %s395_s7 = sshll.u32 %s11062_s23, 4  ;;  %s10895_s17 = sshra.s32 %s394_s13, 4  ;;  %s396_s7 = int_to_ptr.vmem [resolvable:$true] %s395_s7  ;;  %s10896_s17 = int_to_ptr.hbm [resolvable:$true] %s10895_s17 }
 0x163   :  { %s10897_s18 = scalar_lea.hbm %s10896_s17, 1  ;;  %s10899_s6 = scalar_lea.hbm %s11244_s14, 1 }
 0x164   :  { %p10898_p3 = scmp.ne.s32.totalorder %s10896_s17, %s10897_s18  ;;  %p10900_p4 = scmp.lt.s32.totalorder %s10896_s17, %s11244_s14 }
 0x165   :  { %p10901_p5 = scmp.lt.s32.totalorder %s10899_s6, %s10897_s18 }
 0x167   :  { %p10902_p6 = por %p10901_p5, %p10900_p4 }
 0x169   :  { %p10903_p7 = pnand %p10902_p6, %p10898_p3 }
 0x16b   :  { %10906 = shalt.err (!%p10903_p7)
}
 0x16c   :  { %398 = dma.hbm_to_vmem [thread:$0]  %s394_s13, 16, %s396_s7, [#allocation36]  }
 0x16d   :  { %s11063_s21 = smov [#allocation40]   ;;  %s10919_s26 = sshra.s32 %s418_s22, 4  ;;  %s10920_s26 = int_to_ptr.hbm [resolvable:$true] %s10919_s26 }
 0x16e   :  { %s419_s11 = sshll.u32 %s11063_s21, 4  ;;  %s10921_s30 = scalar_lea.hbm %s10920_s26, 2  ;;  %s420_s11 = int_to_ptr.vmem [resolvable:$true] %s419_s11 }
 0x16f   :  { %p10922_p8 = scmp.ne.s32.totalorder %s10920_s26, %s10921_s30  ;;  %s10923_s28 = scalar_lea.hbm %s11254_s8, 2 }
 0x170   :  { %p10924_p9 = scmp.lt.s32.totalorder %s10920_s26, %s11254_s8  ;;  %p10925_p10 = scmp.lt.s32.totalorder %s10923_s28, %s10921_s30 }
 0x172   :  { %p10926_p11 = por %p10925_p10, %p10924_p9 }
 0x174   :  { %p10927_p12 = pnand %p10926_p11, %p10922_p8 }
 0x176   :  { %10930 = shalt.err (!%p10927_p12)
}
 0x177   :  { %422 = dma.hbm_to_vmem [thread:$0]  %s418_s22, 32, %s420_s11, [#allocation39]  }
 0x178   :  { %10967 = dma.done.wait [#allocation3], 64  }
 0x179   :  { %10968 = vsyncadd [#allocation3], 4294967232 }
 0x17a   :  { %10969 = dma.done.wait [#allocation6], 5120  }
 0x17b   :  { %10970 = vsyncadd [#allocation6], 4294962176 }
 0x17c   :  { %10971 = dma.done.wait [#allocation9], 8704  }
 0x17d   :  { %10972 = vsyncadd [#allocation9], 4294958592 }
 0x17e   :  { %10973 = dma.done.wait [#allocation12], 65792  }
 0x17f   :  { %10974 = vsyncadd [#allocation12], 4294901504 }
 0x180   :  { %10975 = dma.done.wait [#allocation15], 4624  }
 0x181   :  { %10976 = vsyncadd [#allocation15], 4294962672 }
 0x182   :  { %10977 = dma.done.wait [#allocation18], 9232  }
 0x183   :  { %10978 = vsyncadd [#allocation18], 4294958064 }
 0x184   :  { %10979 = dma.done.wait [#allocation21], 528  }
 0x185   :  { %10980 = vsyncadd [#allocation21], 4294966768 }
 0x186   :  { %10981 = dma.done.wait [#allocation24], 9232  }
 0x187   :  { %10982 = vsyncadd [#allocation24], 4294958064 }
 0x188   :  { %10983 = dma.done.wait [#allocation27], 9232  }
 0x189   :  { %10984 = vsyncadd [#allocation27], 4294958064 }
 0x18a   :  { %10985 = dma.done.wait [#allocation30], 9232  }
 0x18b   :  { %10986 = vsyncadd [#allocation30], 4294958064 }
 0x18c   :  { %10987 = dma.done.wait [#allocation33], 4624  }
 0x18d   :  { %10988 = vsyncadd [#allocation33], 4294962672 }
 0x18e   :  { %10989 = dma.done.wait [#allocation36], 1040  }
 0x18f   :  { %10990 = vsyncadd [#allocation36], 4294966256 }
 0x190   :  { %10991 = dma.done.wait [#allocation39], 16416  }
 0x191   :  { %10992 = vsyncadd [#allocation39], 4294950880  ;;  %v587_v0 = vld [vmem:[#allocation11 + $0x78] sm:$0xff]  ;;  %v586_v2 = vld [vmem:[#allocation11 + $0x70] sm:$0xff]  ;;  %vm759_vm0 = vcmask 1041408   ;;  %vm746_vm1 = vcmask 15360  }
 0x192   :  { %v674_v1 = vld [vmem:[#allocation11 + $0x178] sm:$0xff]  ;;  %614 = vmatpush.msra.mxu0 %v587_v0  ;;  %v673_v4 = vld [vmem:[#allocation11 + $0x170] sm:$0xff]  ;;  %v585_v6 = vld [vmem:[#allocation11 + $0x68] sm:$0xff]  ;;  %s13522_s8 = sld [smem:[#allocation57_spill]]  ;;  %vm2754_vm2 = vcmask 261120   ;;  %vm3762_vm7 = vcmask 523264  }
 0x193   :  { %701 = vmatpush.msra.mxu2 %v674_v1  ;;  %v603_v3 = vld [vmem:[#allocation11 + $0xf8] sm:$0xff]  ;;  %v602_v7 = vld [vmem:[#allocation11 + $0xf0] sm:$0xff]  ;;  %v672_v8 = vld [vmem:[#allocation11 + $0x168] sm:$0xff]  ;;  %s13523_s14 = sld [smem:[#allocation58_spill]]  ;;  %s11065_s10 = smov [#allocation41]  }
 0x194   :  { %v690_v5 = vld [vmem:[#allocation11 + $0x1f8] sm:$0xff]  ;;  %634 = vmatpush.msra.mxu1 %v603_v3  ;;  %615 = vmatpush.msra.mxu0 %v586_v2  ;;  %v689_v9 = vld [vmem:[#allocation11 + $0x1f0] sm:$0xff]  ;;  %v601_v10 = vld [vmem:[#allocation11 + $0xe8] sm:$0xff]  ;;  %s13553_s25 = sld [smem:[#allocation60_spill]]  ;;  %s9461_s24 = sshll.u32 %s11065_s10, 4  ;;  %s9462_s24 = int_to_ptr.vmem [resolvable:$true] %s9461_s24 }
 0x195   :  { %721 = vmatpush.msra.mxu3 %v690_v5  ;;  %702 = vmatpush.msra.mxu2 %v673_v4  ;;  %v584_v11 = vld [vmem:[#allocation11 + $0x60] sm:$0xff]  ;;  %v688_v13 = vld [vmem:[#allocation11 + $0x1e8] sm:$0xff]  ;;  %v583_v16 = vld [vmem:[#allocation11 + $0x58] sm:$0xff]  ;;  %s13554_s3 = sld [smem:[#allocation59_spill]]  ;;  %s9463_s4 = sshll.u32 %s11259_s29, 4  ;;  %s9464_s4 = int_to_ptr.hbm [resolvable:$true] %s9463_s4 }
 0x196   :  { %635 = vmatpush.msra.mxu1 %v602_v7  ;;  %v671_v12 = vld [vmem:[#allocation11 + $0x160] sm:$0xff]  ;;  %616 = vmatpush.msra.mxu0 %v585_v6  ;;  %v670_v17 = vld [vmem:[#allocation11 + $0x158] sm:$0xff]  ;;  %v582_v20 = vld [vmem:[#allocation11 + $0x50] sm:$0xff]  ;;  %s13578_s9 = sld [smem:[#allocation65_spill]]  ;;  %s10955_s13 = sshra.s32 %s9464_s4, 4  ;;  %s10956_s13 = int_to_ptr.hbm [resolvable:$true] %s10955_s13 }
 0x197   :  { %722 = vmatpush.msra.mxu3 %v689_v9  ;;  %703 = vmatpush.msra.mxu2 %v672_v8  ;;  %v600_v14 = vld [vmem:[#allocation11 + $0xe0] sm:$0xff]  ;;  %v599_v18 = vld [vmem:[#allocation11 + $0xd8] sm:$0xff]  ;;  %v669_v21 = vld [vmem:[#allocation11 + $0x150] sm:$0xff]  ;;  %s13579_s20 = sld [smem:[#allocation64_spill]]  ;;  %s10957_s15 = scalar_lea.hbm %s10956_s13, 4 }
 0x198   :  { %v687_v15 = vld [vmem:[#allocation11 + $0x1e0] sm:$0xff]  ;;  %636 = vmatpush.msra.mxu1 %v601_v10  ;;  %617 = vmatpush.msra.mxu0 %v584_v11  ;;  %v686_v19 = vld [vmem:[#allocation11 + $0x1d8] sm:$0xff]  ;;  %v598_v22 = vld [vmem:[#allocation11 + $0xd0] sm:$0xff]  ;;  %s13607_s2 = sld [smem:[#allocation67_spill]]  ;;  %p10958_p13 = scmp.ne.s32.totalorder %s10956_s13, %s10957_s15 }
 0x199   :  { %723 = vmatpush.msra.mxu3 %v688_v13  ;;  %704 = vmatpush.msra.mxu2 %v671_v12  ;;  %v685_v23 = vld [vmem:[#allocation11 + $0x1d0] sm:$0xff]  ;;  %v581_v24 = vld [vmem:[#allocation11 + $0x48] sm:$0xff]  ;;  %v580_v28 = vld [vmem:[#allocation11 + $0x40] sm:$0xff]  ;;  %s13608_s19 = sld [smem:[#allocation66_spill]]  ;;  %s10959_s16 = scalar_lea.hbm %s11259_s29, 4 }
 0x19a   :  { %637 = vmatpush.msra.mxu1 %v600_v14  ;;  %618 = vmatpush.msra.mxu0 %v583_v16  ;;  %v668_v25 = vld [vmem:[#allocation11 + $0x148] sm:$0xff]  ;;  %v667_v29 = vld [vmem:[#allocation11 + $0x140] sm:$0xff]  ;;  %v579_v32 = vld [vmem:[#allocation11 + $0x38] sm:$0xff]  ;;  %s13628_s0 = sld [smem:[#allocation70_spill]]  ;;  %p10960_p0 = scmp.lt.s32.totalorder %s10956_s13, %s11259_s29 }
 0x19b   :  { %724 = vmatpush.msra.mxu3 %v687_v15  ;;  %705 = vmatpush.msra.mxu2 %v670_v17  ;;  %v597_v26 = vld [vmem:[#allocation11 + $0xc8] sm:$0xff]  ;;  %v596_v30 = vld [vmem:[#allocation11 + $0xc0] sm:$0xff]  ;;  %v666_v33 = vld [vmem:[#allocation11 + $0x138] sm:$0xff]  ;;  %s13629_s5 = sld [smem:[#allocation71_spill]]  ;;  %p10961_p1 = scmp.lt.s32.totalorder %s10959_s16, %s10957_s15 }
 0x19c   :  { %638 = vmatpush.msra.mxu1 %v599_v18  ;;  %619 = vmatpush.msra.mxu0 %v582_v20  ;;  %v684_v27 = vld [vmem:[#allocation11 + $0x1c8] sm:$0xff]  ;;  %v683_v31 = vld [vmem:[#allocation11 + $0x1c0] sm:$0xff]  ;;  %v595_v34 = vld [vmem:[#allocation11 + $0xb8] sm:$0xff]  ;;  %s13657_s1 = sld [smem:[#allocation72_spill]] }
 0x19d   :  { %725 = vmatpush.msra.mxu3 %v686_v19  ;;  %706 = vmatpush.msra.mxu2 %v669_v21  ;;  %v682_v35 = vld [vmem:[#allocation11 + $0x1b8] sm:$0xff]  ;;  %v578_v36 = vld [vmem:[#allocation11 + $0x30] sm:$0xff]  ;;  %v577_v40 = vld [vmem:[#allocation11 + $0x28] sm:$0xff]  ;;  %s13658_s27 = sld [smem:[#allocation73_spill]]  ;;  %p10962_p2 = por %p10961_p1, %p10960_p0 }
 0x19e   :  { %639 = vmatpush.msra.mxu1 %v598_v22  ;;  %620 = vmatpush.msra.mxu0 %v581_v24  ;;  %v665_v37 = vld [vmem:[#allocation11 + $0x130] sm:$0xff]  ;;  %v664_v41 = vld [vmem:[#allocation11 + $0x128] sm:$0xff]  ;;  %v576_v44 = vld [vmem:[#allocation11 + $0x20] sm:$0xff] }
 0x19f   :  { %726 = vmatpush.msra.mxu3 %v685_v23  ;;  %707 = vmatpush.msra.mxu2 %v668_v25  ;;  %v594_v38 = vld [vmem:[#allocation11 + $0xb0] sm:$0xff]  ;;  %v593_v42 = vld [vmem:[#allocation11 + $0xa8] sm:$0xff]  ;;  %v663_v45 = vld [vmem:[#allocation11 + $0x120] sm:$0xff]  ;;  %p10963_p3 = pnand %p10962_p2, %p10958_p13 }
 0x1a0   :  { %640 = vmatpush.msra.mxu1 %v597_v26  ;;  %621 = vmatpush.msra.mxu0 %v580_v28  ;;  %v681_v39 = vld [vmem:[#allocation11 + $0x1b0] sm:$0xff]  ;;  %v680_v43 = vld [vmem:[#allocation11 + $0x1a8] sm:$0xff]  ;;  %v11427_v46 = vld [vmem:[#allocation2] sm:$0xf] }
 0x1a1   :  { %727 = vmatpush.msra.mxu3 %v684_v27  ;;  %708 = vmatpush.msra.mxu2 %v667_v29  ;;  %13519 = vst [vmem:[#allocation76_spill] sm:$0xff] %v11427_v46  ;;  %v592_v47 = vld [vmem:[#allocation11 + $0xa0] sm:$0xff]  ;;  %v575_v49 = vld [vmem:[#allocation11 + $0x18] sm:$0xff]  ;;  %v574_v53 = vld [vmem:[#allocation11 + $0x10] sm:$0xff] }
 0x1a2   :  { %641 = vmatpush.msra.mxu1 %v596_v30  ;;  %622 = vmatpush.msra.mxu0 %v579_v32  ;;  %v679_v48 = vld [vmem:[#allocation11 + $0x1a0] sm:$0xff]  ;;  %609 = vst [vmem:[#allocation1] ss:$4 sm:$0xff] %v11427_v46  ;;  %v662_v50 = vld [vmem:[#allocation11 + $0x118] sm:$0xff]  ;;  %v661_v54 = vld [vmem:[#allocation11 + $0x110] sm:$0xff] }
 0x1a3   :  { %728 = vmatpush.msra.mxu3 %v683_v31  ;;  %709 = vmatpush.msra.mxu2 %v666_v33  ;;  %v591_v51 = vld [vmem:[#allocation11 + $0x98] sm:$0xff]  ;;  %v590_v55 = vld [vmem:[#allocation11 + $0x90] sm:$0xff]  ;;  %v573_v57 = vld [vmem:[#allocation11 + $0x8] sm:$0xff] }
 0x1a4   :  { %642 = vmatpush.msra.mxu1 %v595_v34  ;;  %623 = vmatpush.msra.mxu0 %v578_v36  ;;  %v678_v52 = vld [vmem:[#allocation11 + $0x198] sm:$0xff]  ;;  %v677_v56 = vld [vmem:[#allocation11 + $0x190] sm:$0xff]  ;;  %v660_v58 = vld [vmem:[#allocation11 + $0x108] sm:$0xff] }
 0x1a5   :  { %729 = vmatpush.msra.mxu3 %v682_v35  ;;  %710 = vmatpush.msra.mxu2 %v665_v37  ;;  %v572_v59 = vld [vmem:[#allocation11] sm:$0xff]  ;;  %v589_v60 = vld [vmem:[#allocation11 + $0x88] sm:$0xff]  ;;  %v852_v3 = vld [vmem:[#allocation11 + $0x278] sm:$0xff] }
 0x1a6   :  { %643 = vmatpush.msra.mxu1 %v594_v38  ;;  %624 = vmatpush.msra.mxu0 %v577_v40  ;;  %v659_v61 = vld [vmem:[#allocation11 + $0x100] sm:$0xff]  ;;  %v676_v62 = vld [vmem:[#allocation11 + $0x188] sm:$0xff]  ;;  %v868_v4 = vld [vmem:[#allocation11 + $0x2f8] sm:$0xff] }
 0x1a7   :  { %730 = vmatpush.msra.mxu3 %v681_v39  ;;  %711 = vmatpush.msra.mxu2 %v664_v41  ;;  %v588_v1 = vld [vmem:[#allocation11 + $0x80] sm:$0xff]  ;;  %v851_v5 = vld [vmem:[#allocation11 + $0x270] sm:$0xff]  ;;  %v850_v6 = vld [vmem:[#allocation11 + $0x268] sm:$0xff] }
 0x1a8   :  { %644 = vmatpush.msra.mxu1 %v593_v42  ;;  %625 = vmatpush.msra.mxu0 %v576_v44  ;;  %v675_v2 = vld [vmem:[#allocation11 + $0x180] sm:$0xff]  ;;  %v867_v7 = vld [vmem:[#allocation11 + $0x2f0] sm:$0xff]  ;;  %v866_v8 = vld [vmem:[#allocation11 + $0x2e8] sm:$0xff] }
 0x1a9   :  { %731 = vmatpush.msra.mxu3 %v680_v43  ;;  %712 = vmatpush.msra.mxu2 %v663_v45  ;;  %v610_v63 = vld.sshfl [vmem:[#allocation1] sm:$0xff pattern:$0x73625140]  ;;  %v611_v0 = vld.sshfl [vmem:[#allocation1 + $0x8] sm:$0xff pattern:$0x73625140] }
 0x1aa   :  { %645 = vmatpush.msra.mxu1 %v592_v47  ;;  %626 = vmatpush.msra.mxu0 %v575_v49  ;;  %696 = vst [vmem:[#allocation1] ss:$4 sm:$0xff] %v11427_v46  ;;  %v849_v9 = vld [vmem:[#allocation11 + $0x260] sm:$0xff]  ;;  %v848_v13 = vld [vmem:[#allocation11 + $0x258] sm:$0xff]  ;;  %v847_v15 = vld [vmem:[#allocation11 + $0x250] sm:$0xff] }
 0x1ab   :  { %732 = vmatpush.msra.mxu3 %v679_v48  ;;  %713 = vmatpush.msra.mxu2 %v662_v50  ;;  %v865_v10 = vld [vmem:[#allocation11 + $0x2e0] sm:$0xff]  ;;  %v864_v14 = vld [vmem:[#allocation11 + $0x2d8] sm:$0xff]  ;;  %v863_v16 = vld [vmem:[#allocation11 + $0x2d0] sm:$0xff] }
 0x1ac   :  { %646 = vmatpush.msra.mxu1 %v591_v51  ;;  %627 = vmatpush.msra.mxu0 %v574_v53  ;;  %v846_v17 = vld [vmem:[#allocation11 + $0x248] sm:$0xff]  ;;  %v845_v21 = vld [vmem:[#allocation11 + $0x240] sm:$0xff]  ;;  %v844_v23 = vld [vmem:[#allocation11 + $0x238] sm:$0xff] }
 0x1ad   :  { %733 = vmatpush.msra.mxu3 %v678_v52  ;;  %714 = vmatpush.msra.mxu2 %v661_v54  ;;  %v862_v18 = vld [vmem:[#allocation11 + $0x2c8] sm:$0xff]  ;;  %v861_v22 = vld [vmem:[#allocation11 + $0x2c0] sm:$0xff]  ;;  %v860_v24 = vld [vmem:[#allocation11 + $0x2b8] sm:$0xff] }
 0x1ae   :  { %647 = vmatpush.msra.mxu1 %v590_v55  ;;  %628 = vmatpush.msra.mxu0 %v573_v57  ;;  %v843_v25 = vld [vmem:[#allocation11 + $0x230] sm:$0xff]  ;;  %v842_v27 = vld [vmem:[#allocation11 + $0x228] sm:$0xff]  ;;  %v841_v29 = vld [vmem:[#allocation11 + $0x220] sm:$0xff] }
 0x1af   :  { %734 = vmatpush.msra.mxu3 %v677_v56  ;;  %715 = vmatpush.msra.mxu2 %v660_v58  ;;  %v859_v26 = vld [vmem:[#allocation11 + $0x2b0] sm:$0xff]  ;;  %v858_v28 = vld [vmem:[#allocation11 + $0x2a8] sm:$0xff]  ;;  %v857_v30 = vld [vmem:[#allocation11 + $0x2a0] sm:$0xff] }
 0x1b0   :  { %648 = vmatpush.msra.mxu1 %v589_v60  ;;  %629 = vmatpush.msra.mxu0 %v572_v59  ;;  %v840_v31 = vld [vmem:[#allocation11 + $0x218] sm:$0xff]  ;;  %v839_v33 = vld [vmem:[#allocation11 + $0x210] sm:$0xff]  ;;  %v838_v35 = vld [vmem:[#allocation11 + $0x208] sm:$0xff] }
 0x1b1   :  { %735 = vmatpush.msra.mxu3 %v676_v62  ;;  %716 = vmatpush.msra.mxu2 %v659_v61  ;;  %v697_v11 = vld.sshfl [vmem:[#allocation1] sm:$0xff pattern:$0x73625140]  ;;  %v698_v12 = vld.sshfl [vmem:[#allocation1 + $0x8] sm:$0xff pattern:$0x73625140] }
 0x1b2   :  { %630 = vmatmul.f32.vlgmr.msra.gmra.mxu0 %v610_v63  ;;  %649 = vmatpush.msra.mxu1 %v588_v1  ;;  %874 = vst [vmem:[#allocation1] ss:$4 sm:$0xff] %v11427_v46  ;;  %v856_v32 = vld [vmem:[#allocation11 + $0x298] sm:$0xff]  ;;  %v855_v34 = vld [vmem:[#allocation11 + $0x290] sm:$0xff]  ;;  %v854_v36 = vld [vmem:[#allocation11 + $0x288] sm:$0xff] }
 0x1b3   :  { %736 = vmatpush.msra.mxu3 %v675_v2  ;;  %879 = vmatpush.msrb.mxu2 %v852_v3  ;;  %v837_v37 = vld [vmem:[#allocation11 + $0x200] sm:$0xff]  ;;  %v1004_v39 = vld [vmem:[#allocation11 + $0x3f8] sm:$0xff]  ;;  %v1003_v40 = vld [vmem:[#allocation11 + $0x3f0] sm:$0xff] }
 0x1b4   :  { %650 = vmatmul.f32.vlgmr.msra.gmra.mxu1 %v611_v0  ;;  %717 = vmatmul.f32.vlgmr.msra.gmra.mxu2 %v697_v11  ;;  %v853_v38 = vld [vmem:[#allocation11 + $0x280] sm:$0xff]  ;;  %v1002_v41 = vld [vmem:[#allocation11 + $0x3e8] sm:$0xff]  ;;  %v1000_v43 = vld [vmem:[#allocation11 + $0x3d8] sm:$0xff] }
 0x1b5   :  { %899 = vmatpush.msrb.mxu3 %v868_v4  ;;  %880 = vmatpush.msrb.mxu2 %v851_v5  ;;  %v1001_v42 = vld [vmem:[#allocation11 + $0x3e0] sm:$0xff]  ;;  %v999_v44 = vld [vmem:[#allocation11 + $0x3d0] sm:$0xff]  ;;  %v998_v45 = vld [vmem:[#allocation11 + $0x3c8] sm:$0xff] }
 0x1b6   :  { %737 = vmatmul.f32.vlgmr.msra.gmra.mxu3 %v698_v12  ;;  %v997_v47 = vld [vmem:[#allocation11 + $0x3c0] sm:$0xff]  ;;  %v996_v48 = vld [vmem:[#allocation11 + $0x3b8] sm:$0xff]  ;;  %v995_v49 = vld [vmem:[#allocation11 + $0x3b0] sm:$0xff] }
 0x1b7   :  { %900 = vmatpush.msrb.mxu3 %v867_v7  ;;  %881 = vmatpush.msrb.mxu2 %v850_v6  ;;  %v994_v50 = vld [vmem:[#allocation11 + $0x3a8] sm:$0xff]  ;;  %v993_v51 = vld [vmem:[#allocation11 + $0x3a0] sm:$0xff]  ;;  %v992_v53 = vld [vmem:[#allocation11 + $0x398] sm:$0xff] }
 0x1b8   :  { %v10221_v52 = vld [vmem:[#allocation13] ss:$0 sm:$0xff]  ;;  %v991_v56 = vld [vmem:[#allocation11 + $0x390] sm:$0xff]  ;;  %v990_v58 = vld [vmem:[#allocation11 + $0x388] sm:$0xff] }
 0x1b9   :  { %901 = vmatpush.msrb.mxu3 %v866_v8  ;;  %882 = vmatpush.msrb.mxu2 %v849_v9  ;;  %v875_v19 = vld.sshfl [vmem:[#allocation1] sm:$0xff pattern:$0x73625140]  ;;  %v876_v20 = vld.sshfl [vmem:[#allocation1 + $0x8] sm:$0xff pattern:$0x73625140] }
 0x1ba   :  { %1010 = vst [vmem:[#allocation1] ss:$4 sm:$0xff] %v11427_v46  ;;  %v654_v60 = vld [vmem:[#allocation8] sm:$0xff]  ;;  %v988_v62 = vld [vmem:[#allocation11 + $0x378] sm:$0xff]  ;;  %v987_v0 = vld [vmem:[#allocation11 + $0x370] sm:$0xff] }
 0x1bb   :  { %902 = vmatpush.msrb.mxu3 %v865_v10  ;;  %883 = vmatpush.msrb.mxu2 %v848_v13  ;;  %v989_v61 = vld [vmem:[#allocation11 + $0x380] sm:$0xff]  ;;  %v986_v2 = vld [vmem:[#allocation11 + $0x368] sm:$0xff]  ;;  %v984_v9 = vld [vmem:[#allocation11 + $0x358] sm:$0xff] }
 0x1bc   :  { %v10222_v1 = vld [vmem:[#allocation13 + $0x1] ss:$0 sm:$0xff]  ;;  %v655_v7 = vld [vmem:[#allocation8 + $0x8] sm:$0xff]  ;;  %v983_v12 = vld [vmem:[#allocation11 + $0x350] sm:$0xff] }
 0x1bd   :  { %903 = vmatpush.msrb.mxu3 %v864_v14  ;;  %884 = vmatpush.msrb.mxu2 %v847_v15  ;;  %v985_v4 = vld [vmem:[#allocation11 + $0x360] sm:$0xff]  ;;  %v982_v13 = vld [vmem:[#allocation11 + $0x348] sm:$0xff]  ;;  %v656_v15 = vld [vmem:[#allocation8 + $0x10] sm:$0xff] }
 0x1be   :  { %v742_v11 = vld [vmem:[#allocation8 + $0x20] sm:$0xff] }
 0x1bf   :  { %904 = vmatpush.msrb.mxu3 %v863_v16  ;;  %885 = vmatpush.msrb.mxu2 %v846_v17  ;;  %v981_v14 = vld [vmem:[#allocation11 + $0x340] sm:$0xff]  ;;  %v980_v16 = vld [vmem:[#allocation11 + $0x338] sm:$0xff]  ;;  %v743_v17 = vld [vmem:[#allocation8 + $0x28] sm:$0xff] }
 0x1c1   :  { %905 = vmatpush.msrb.mxu3 %v862_v18  ;;  %886 = vmatpush.msrb.mxu2 %v845_v21  ;;  %v1012_v63 = vld.sshfl [vmem:[#allocation1 + $0x8] sm:$0xff pattern:$0x73625140]  ;;  %v1011_v3 = vld.sshfl [vmem:[#allocation1] sm:$0xff pattern:$0x73625140] }
 0x1c2   :  { %1146 = vst [vmem:[#allocation1] ss:$4 sm:$0xff] %v11427_v46  ;;  %v979_v18 = vld [vmem:[#allocation11 + $0x330] sm:$0xff]  ;;  %v657_v21 = vld [vmem:[#allocation8 + $0x18] sm:$0xff] }
 0x1c3   :  { %906 = vmatpush.msrb.mxu3 %v861_v22  ;;  %887 = vmatpush.msrb.mxu2 %v844_v23  ;;  %v976_v22 = vld [vmem:[#allocation11 + $0x318] sm:$0xff]  ;;  %v744_v23 = vld [vmem:[#allocation8 + $0x30] sm:$0xff] }
 0x1c5   :  { %907 = vmatpush.msrb.mxu3 %v860_v24  ;;  %888 = vmatpush.msrb.mxu2 %v843_v25  ;;  %v975_v24 = vld [vmem:[#allocation11 + $0x310] sm:$0xff]  ;;  %v974_v25 = vld [vmem:[#allocation11 + $0x308] sm:$0xff] }
 0x1c7   :  { %908 = vmatpush.msrb.mxu3 %v859_v26  ;;  %889 = vmatpush.msrb.mxu2 %v842_v27  ;;  %v973_v26 = vld [vmem:[#allocation11 + $0x300] sm:$0xff] }
 0x1c8   :  { %v10223_v27 = vld [vmem:[#allocation13 + $0x2] ss:$0 sm:$0xff] }
 0x1c9   :  { %909 = vmatpush.msrb.mxu3 %v858_v28  ;;  %890 = vmatpush.msrb.mxu2 %v841_v29  ;;  %v1140_v28 = vld [vmem:[#allocation11 + $0x4f8] sm:$0xff] }
 0x1ca   :  { %v745_v29 = vld [vmem:[#allocation8 + $0x38] sm:$0xff] }
 0x1cb   :  { %910 = vmatpush.msrb.mxu3 %v857_v30  ;;  %891 = vmatpush.msrb.mxu2 %v840_v31  ;;  %v1139_v30 = vld [vmem:[#allocation11 + $0x4f0] sm:$0xff] }
 0x1cd   :  { %911 = vmatpush.msrb.mxu3 %v856_v32  ;;  %892 = vmatpush.msrb.mxu2 %v839_v33 }
 0x1cf   :  { %912 = vmatpush.msrb.mxu3 %v855_v34  ;;  %893 = vmatpush.msrb.mxu2 %v838_v35  ;;  %v1138_v34 = vld [vmem:[#allocation11 + $0x4e8] sm:$0xff] }
 0x1d1   :  { %913 = vmatpush.msrb.mxu3 %v854_v36  ;;  %894 = vmatpush.msrb.mxu2 %v837_v37  ;;  %v1124_v36 = vld [vmem:[#allocation11 + $0x478] sm:$0xff]  ;;  %v1137_v37 = vld [vmem:[#allocation11 + $0x4e0] sm:$0xff] }
 0x1d2   :  { %895 = vmatmul.f32.vlgmr.msrb.gmra.mxu2 %v875_v19  ;;  %v978_v19 = vld [vmem:[#allocation11 + $0x328] sm:$0xff] }
 0x1d3   :  { %914 = vmatpush.msrb.mxu3 %v853_v38  ;;  %1035 = vmatpush.msra.mxu2 %v1004_v39  ;;  %v1123_v38 = vld [vmem:[#allocation11 + $0x470] sm:$0xff]  ;;  %v1136_v39 = vld [vmem:[#allocation11 + $0x4d8] sm:$0xff] }
 0x1d4   :  { %915 = vmatmul.f32.vlgmr.msrb.gmra.mxu3 %v876_v20  ;;  %v977_v20 = vld [vmem:[#allocation11 + $0x320] sm:$0xff] }
 0x1d5   :  { %1036 = vmatpush.msra.mxu2 %v1003_v40  ;;  %v920_v40 = vld [vmem:[#allocation8 + $0x40] sm:$0xff] }
 0x1d7   :  { %1037 = vmatpush.msra.mxu2 %v1002_v41  ;;  %v1135_v41 = vld [vmem:[#allocation11 + $0x4d0] sm:$0xff] }
 0x1d9   :  { %1038 = vmatpush.msra.mxu2 %v1001_v42  ;;  %v1122_v42 = vld [vmem:[#allocation11 + $0x468] sm:$0xff] }
 0x1db   :  { %1039 = vmatpush.msra.mxu2 %v1000_v43  ;;  %v1121_v43 = vld [vmem:[#allocation11 + $0x460] sm:$0xff] }
 0x1dd   :  { %1040 = vmatpush.msra.mxu2 %v999_v44  ;;  %v1134_v44 = vld [vmem:[#allocation11 + $0x4c8] sm:$0xff] }
 0x1df   :  { %1041 = vmatpush.msra.mxu2 %v998_v45  ;;  %v1147_v45 = vld.sshfl [vmem:[#allocation1] sm:$0xff pattern:$0x73625140] }
 0x1e1   :  { %1042 = vmatpush.msra.mxu2 %v997_v47  ;;  %v1148_v47 = vld.sshfl [vmem:[#allocation1 + $0x8] sm:$0xff pattern:$0x73625140] }
 0x1e2   :  { %1282 = vst [vmem:[#allocation1] ss:$4 sm:$0xff] %v11427_v46 }
 0x1e3   :  { %1043 = vmatpush.msra.mxu2 %v996_v48  ;;  %v1133_v48 = vld [vmem:[#allocation11 + $0x4c0] sm:$0xff] }
 0x1e5   :  { %1044 = vmatpush.msra.mxu2 %v995_v49  ;;  %v1120_v49 = vld [vmem:[#allocation11 + $0x458] sm:$0xff] }
 0x1e7   :  { %1045 = vmatpush.msra.mxu2 %v994_v50  ;;  %v1132_v50 = vld [vmem:[#allocation11 + $0x4b8] sm:$0xff] }
 0x1e9   :  { %1046 = vmatpush.msra.mxu2 %v993_v51  ;;  %v1119_v51 = vld [vmem:[#allocation11 + $0x450] sm:$0xff] }
 0x1eb   :  { %1047 = vmatpush.msra.mxu2 %v992_v53  ;;  %v1131_v53 = vld [vmem:[#allocation11 + $0x4b0] sm:$0xff] }
 0x1ed   :  { %1048 = vmatpush.msra.mxu2 %v991_v56  ;;  %v1117_v56 = vld [vmem:[#allocation11 + $0x440] sm:$0xff] }
 0x1ef   :  { %1049 = vmatpush.msra.mxu2 %v990_v58  ;;  %v1116_v58 = vld [vmem:[#allocation11 + $0x438] sm:$0xff] }
 0x1f1   :  { %1050 = vmatpush.msra.mxu2 %v989_v61  ;;  %v922_v61 = vld [vmem:[#allocation8 + $0x50] sm:$0xff] }
 0x1f2   :  { %1051 = vmatmul.f32.vlgmr.msra.gmra.mxu2 %v1012_v63  ;;  %v1114_v63 = vld [vmem:[#allocation11 + $0x428] sm:$0xff] }
 0x22f   :  { %v631_v54 = vpop.f32.mrf.mxu0 }
 0x230   :  { %v632_v55 = vadd.f32 %v10221_v52, %v631_v54  ;;  %v921_v52 = vld [vmem:[#allocation8 + $0x48] sm:$0xff] }
 0x231   :  { %v651_v57 = vpop.f32.mrf.mxu1  ;;  %v1118_v54 = vld [vmem:[#allocation11 + $0x448] sm:$0xff] }
 0x232   :  { %v652_v59 = vadd.f32 %v651_v57, %v632_v55  ;;  %v1130_v55 = vld [vmem:[#allocation11 + $0x4a8] sm:$0xff]  ;;  %v1129_v57 = vld [vmem:[#allocation11 + $0x4a0] sm:$0xff] }
 0x234   :  { %9527 = vmatpush.msk.msrb.mxu1 %vm759_vm0, %v652_v59  ;;  %v1128_v59 = vld [vmem:[#allocation11 + $0x498] sm:$0xff] }
 0x235   :  { %9528 = vmatmul.msk.f32.vlgmr.msrb.gmra.mxu1 %vm746_vm1, %v654_v60  ;;  %v1115_v60 = vld [vmem:[#allocation11 + $0x430] sm:$0xff] }
 0x236   :  { %1015 = vmatpush.msra.mxu1 %v988_v62  ;;  %v1127_v62 = vld [vmem:[#allocation11 + $0x490] sm:$0xff] }
 0x237   :  { %v718_v5 = vpop.f32.mrf.mxu2 }
 0x238   :  { %1016 = vmatpush.msra.mxu1 %v987_v0  ;;  %v719_v8 = vadd.f32 %v10222_v1, %v718_v5  ;;  %v1126_v0 = vld [vmem:[#allocation11 + $0x488] sm:$0xff]  ;;  %v1113_v1 = vld [vmem:[#allocation11 + $0x420] sm:$0xff]  ;;  %v923_v5 = vld [vmem:[#allocation8 + $0x58] sm:$0xff] }
 0x239   :  { %v738_v6 = vpop.f32.mrf.mxu3 }
 0x23a   :  { %1017 = vmatpush.msra.mxu1 %v986_v2  ;;  %v739_v10 = vadd.f32 %v738_v6, %v719_v8  ;;  %v1125_v2 = vld [vmem:[#allocation11 + $0x480] sm:$0xff]  ;;  %v1110_v6 = vld [vmem:[#allocation11 + $0x408] sm:$0xff] }
 0x23c   :  { %1018 = vmatpush.msra.mxu1 %v985_v4  ;;  %9522 = vmatpush.msk.msrb.mxu0 %vm759_vm0, %v739_v10  ;;  %v1111_v4 = vld [vmem:[#allocation11 + $0x410] sm:$0xff] }
 0x23d   :  { %9529 = vmatmul.msk.f32.gmra.mxu1 %vm746_vm1, %v655_v7  ;;  %9523 = vmatmul.msk.f32.vlgmr.msrb.gmra.mxu0 %vm746_vm1, %v742_v11  ;;  %v1109_v7 = vld [vmem:[#allocation11 + $0x400] sm:$0xff] }
 0x23e   :  { %1019 = vmatpush.msra.mxu1 %v984_v9 }
 0x240   :  { %1020 = vmatpush.msra.mxu1 %v983_v12 }
 0x242   :  { %1021 = vmatpush.msra.mxu1 %v982_v13  ;;  %v1276_v13 = vld [vmem:[#allocation11 + $0x5f8] sm:$0xff] }
 0x244   :  { %1022 = vmatpush.msra.mxu1 %v981_v14  ;;  %v1275_v14 = vld [vmem:[#allocation11 + $0x5f0] sm:$0xff] }
 0x245   :  { %9530 = vmatmul.msk.f32.gmra.mxu1 %vm746_vm1, %v656_v15  ;;  %9524 = vmatmul.msk.f32.gmra.mxu0 %vm746_vm1, %v743_v17  ;;  %v1274_v15 = vld [vmem:[#allocation11 + $0x5e8] sm:$0xff] }
 0x246   :  { %1023 = vmatpush.msra.mxu1 %v980_v16  ;;  %v1273_v16 = vld [vmem:[#allocation11 + $0x5e0] sm:$0xff] }
 0x248   :  { %1024 = vmatpush.msra.mxu1 %v979_v18 }
 0x24a   :  { %1025 = vmatpush.msra.mxu1 %v978_v19  ;;  %v1272_v19 = vld [vmem:[#allocation11 + $0x5d8] sm:$0xff] }
 0x24c   :  { %1026 = vmatpush.msra.mxu1 %v977_v20  ;;  %v1271_v20 = vld [vmem:[#allocation11 + $0x5d0] sm:$0xff] }
 0x24d   :  { %9531 = vmatmul.msk.f32.gmra.mxu1 %vm746_vm1, %v657_v21  ;;  %9525 = vmatmul.msk.f32.gmra.mxu0 %vm746_vm1, %v744_v23  ;;  %v10224_v21 = vld [vmem:[#allocation13 + $0x3] ss:$0 sm:$0xff] }
 0x24e   :  { %1027 = vmatpush.msra.mxu1 %v976_v22  ;;  %v1270_v22 = vld [vmem:[#allocation11 + $0x5c8] sm:$0xff]  ;;  %v1269_v23 = vld [vmem:[#allocation11 + $0x5c0] sm:$0xff] }
 0x250   :  { %1028 = vmatpush.msra.mxu1 %v975_v24 }
 0x252   :  { %1029 = vmatpush.msra.mxu1 %v974_v25 }
 0x254   :  { %1030 = vmatpush.msra.mxu1 %v973_v26 }
 0x255   :  { %1031 = vmatmul.f32.vlgmr.msra.gmra.mxu1 %v1011_v3  ;;  %v896_v31 = vpop.f32.mrf.mxu2  ;;  %9526 = vmatmul.msk.f32.gmra.mxu0 %vm746_vm1, %v745_v29  ;;  %v1112_v3 = vld [vmem:[#allocation11 + $0x418] sm:$0xff]  ;;  %v1056_v29 = vld [vmem:[#allocation8 + $0x60] sm:$0xff] }
 0x256   :  { %1171 = vmatpush.msrb.mxu1 %v1140_v28  ;;  %v897_v33 = vadd.f32 %v10223_v27, %v896_v31  ;;  %v1260_v31 = vld [vmem:[#allocation11 + $0x578] sm:$0xff] }
 0x257   :  { %v916_v32 = vpop.f32.mrf.mxu3 }
 0x258   :  { %1172 = vmatpush.msrb.mxu1 %v1139_v30  ;;  %v917_v35 = vadd.f32 %v916_v32, %v897_v33  ;;  %v1268_v30 = vld [vmem:[#allocation11 + $0x5b8] sm:$0xff]  ;;  %v1267_v32 = vld [vmem:[#allocation11 + $0x5b0] sm:$0xff]  ;;  %v1266_v33 = vld [vmem:[#allocation11 + $0x5a8] sm:$0xff] }
 0x25a   :  { %1173 = vmatpush.msrb.mxu1 %v1138_v34  ;;  %9532 = vmatpush.msk.msra.mxu0 %vm759_vm0, %v917_v35  ;;  %v1259_v34 = vld [vmem:[#allocation11 + $0x570] sm:$0xff]  ;;  %v1265_v35 = vld [vmem:[#allocation11 + $0x5a0] sm:$0xff] }
 0x25c   :  { %1151 = vmatpush.msrb.mxu0 %v1124_v36  ;;  %1174 = vmatpush.msrb.mxu1 %v1137_v37  ;;  %v1258_v36 = vld [vmem:[#allocation11 + $0x568] sm:$0xff]  ;;  %v1257_v37 = vld [vmem:[#allocation11 + $0x560] sm:$0xff] }
 0x25d   :  { %9533 = vmatmul.msk.f32.vlgmr.msra.gmra.mxu0 %vm746_vm1, %v920_v40  ;;  %v1264_v40 = vld [vmem:[#allocation11 + $0x598] sm:$0xff] }
 0x25e   :  { %1152 = vmatpush.msrb.mxu0 %v1123_v38  ;;  %1175 = vmatpush.msrb.mxu1 %v1136_v39  ;;  %v1057_v39 = vld [vmem:[#allocation8 + $0x68] sm:$0xff] }
 0x260   :  { %1176 = vmatpush.msrb.mxu1 %v1135_v41  ;;  %1153 = vmatpush.msrb.mxu0 %v1122_v42  ;;  %v1256_v41 = vld [vmem:[#allocation11 + $0x558] sm:$0xff]  ;;  %v1263_v42 = vld [vmem:[#allocation11 + $0x590] sm:$0xff] }
 0x262   :  { %1177 = vmatpush.msrb.mxu1 %v1134_v44  ;;  %1154 = vmatpush.msrb.mxu0 %v1121_v43  ;;  %v1255_v43 = vld [vmem:[#allocation11 + $0x550] sm:$0xff]  ;;  %v1262_v44 = vld [vmem:[#allocation11 + $0x588] sm:$0xff] }
 0x264   :  { %1178 = vmatpush.msrb.mxu1 %v1133_v48  ;;  %1155 = vmatpush.msrb.mxu0 %v1120_v49  ;;  %v1261_v48 = vld [vmem:[#allocation11 + $0x580] sm:$0xff]  ;;  %v1283_v49 = vld.sshfl [vmem:[#allocation1] sm:$0xff pattern:$0x73625140] }
 0x265   :  { %9534 = vmatmul.msk.f32.gmra.mxu0 %vm746_vm1, %v921_v52  ;;  %v1058_v52 = vld [vmem:[#allocation8 + $0x70] sm:$0xff] }
 0x266   :  { %1179 = vmatpush.msrb.mxu1 %v1132_v50  ;;  %1156 = vmatpush.msrb.mxu0 %v1119_v51  ;;  %v1284_v50 = vld.sshfl [vmem:[#allocation1 + $0x8] sm:$0xff pattern:$0x73625140] }
 0x267   :  { %1418 = vst [vmem:[#allocation1] ss:$4 sm:$0xff] %v11427_v46 }
 0x268   :  { %1180 = vmatpush.msrb.mxu1 %v1131_v53  ;;  %1157 = vmatpush.msrb.mxu0 %v1118_v54  ;;  %v1252_v53 = vld [vmem:[#allocation11 + $0x538] sm:$0xff]  ;;  %v1251_v54 = vld [vmem:[#allocation11 + $0x530] sm:$0xff] }
 0x26a   :  { %1181 = vmatpush.msrb.mxu1 %v1130_v55  ;;  %1158 = vmatpush.msrb.mxu0 %v1117_v56  ;;  %v1250_v55 = vld [vmem:[#allocation11 + $0x528] sm:$0xff]  ;;  %v1249_v56 = vld [vmem:[#allocation11 + $0x520] sm:$0xff] }
 0x26c   :  { %1182 = vmatpush.msrb.mxu1 %v1129_v57  ;;  %1159 = vmatpush.msrb.mxu0 %v1116_v58  ;;  %v1059_v58 = vld [vmem:[#allocation8 + $0x78] sm:$0xff] }
 0x26d   :  { %9535 = vmatmul.msk.f32.gmra.mxu0 %vm746_vm1, %v922_v61  ;;  %v1246_v61 = vld [vmem:[#allocation11 + $0x508] sm:$0xff] }
 0x26e   :  { %1183 = vmatpush.msrb.mxu1 %v1128_v59  ;;  %1160 = vmatpush.msrb.mxu0 %v1115_v60  ;;  %v1248_v59 = vld [vmem:[#allocation11 + $0x518] sm:$0xff]  ;;  %v1247_v60 = vld [vmem:[#allocation11 + $0x510] sm:$0xff] }
 0x270   :  { %1184 = vmatpush.msrb.mxu1 %v1127_v62  ;;  %1161 = vmatpush.msrb.mxu0 %v1114_v63  ;;  %v1245_v62 = vld [vmem:[#allocation11 + $0x500] sm:$0xff] }
 0x272   :  { %1185 = vmatpush.msrb.mxu1 %v1126_v0  ;;  %1162 = vmatpush.msrb.mxu0 %v1113_v1  ;;  %v1412_v0 = vld [vmem:[#allocation11 + $0x6f8] sm:$0xff]  ;;  %v1411_v1 = vld [vmem:[#allocation11 + $0x6f0] sm:$0xff] }
 0x274   :  { %1186 = vmatpush.msrb.mxu1 %v1125_v2  ;;  %1163 = vmatpush.msrb.mxu0 %v1112_v3  ;;  %v10225_v2 = vld [vmem:[#allocation13 + $0x4] ss:$0 sm:$0xff]  ;;  %v1410_v3 = vld [vmem:[#allocation11 + $0x6e8] sm:$0xff] }
 0x275   :  { %1187 = vmatmul.f32.vlgmr.msrb.gmra.mxu1 %v1148_v47  ;;  %9536 = vmatmul.msk.f32.gmra.mxu0 %vm746_vm1, %v923_v5  ;;  %v1052_v25 = vpop.f32.mrf.mxu2  ;;  %v1253_v47 = vld [vmem:[#allocation11 + $0x540] sm:$0xff] }
 0x276   :  { %1164 = vmatpush.msrb.mxu0 %v1111_v4  ;;  %v1409_v4 = vld [vmem:[#allocation11 + $0x6e0] sm:$0xff] }
 0x278   :  { %1165 = vmatpush.msrb.mxu0 %v1110_v6 }
 0x27a   :  { %1166 = vmatpush.msrb.mxu0 %v1109_v7 }
 0x27c   :  { %1307 = vmatpush.msra.mxu0 %v1276_v13  ;;  %v1408_v13 = vld [vmem:[#allocation11 + $0x6d8] sm:$0xff] }
 0x27d   :  { %1167 = vmatmul.f32.vlgmr.msrb.gmra.mxu0 %v1147_v45  ;;  %v1254_v45 = vld [vmem:[#allocation11 + $0x548] sm:$0xff] }
 0x27e   :  { %1308 = vmatpush.msra.mxu0 %v1275_v14 }
 0x280   :  { %1309 = vmatpush.msra.mxu0 %v1274_v15  ;;  %v1192_v15 = vld [vmem:[#allocation8 + $0x80] sm:$0xff] }
 0x282   :  { %1310 = vmatpush.msra.mxu0 %v1273_v16  ;;  %v1407_v16 = vld [vmem:[#allocation11 + $0x6d0] sm:$0xff] }
 0x284   :  { %1311 = vmatpush.msra.mxu0 %v1272_v19  ;;  %v1396_v19 = vld [vmem:[#allocation11 + $0x678] sm:$0xff] }
 0x286   :  { %1312 = vmatpush.msra.mxu0 %v1271_v20  ;;  %v1395_v20 = vld [vmem:[#allocation11 + $0x670] sm:$0xff] }
 0x288   :  { %1313 = vmatpush.msra.mxu0 %v1270_v22  ;;  %v1419_v22 = vld.sshfl [vmem:[#allocation1] sm:$0xff pattern:$0x73625140] }
 0x28a   :  { %1314 = vmatpush.msra.mxu0 %v1269_v23  ;;  %v1420_v23 = vld.sshfl [vmem:[#allocation1 + $0x8] sm:$0xff pattern:$0x73625140] }
 0x28b   :  { %1554 = vst [vmem:[#allocation1] ss:$4 sm:$0xff] %v11427_v46 }
 0x28c   :  { %1315 = vmatpush.msra.mxu0 %v1268_v30  ;;  %v1403_v30 = vld [vmem:[#allocation11 + $0x6b0] sm:$0xff] }
 0x28e   :  { %1316 = vmatpush.msra.mxu0 %v1267_v32  ;;  %v1402_v32 = vld [vmem:[#allocation11 + $0x6a8] sm:$0xff] }
 0x290   :  { %1317 = vmatpush.msra.mxu0 %v1266_v33  ;;  %v1391_v33 = vld [vmem:[#allocation11 + $0x650] sm:$0xff] }
 0x292   :  { %1318 = vmatpush.msra.mxu0 %v1265_v35  ;;  %v1390_v35 = vld [vmem:[#allocation11 + $0x648] sm:$0xff] }
 0x294   :  { %1319 = vmatpush.msra.mxu0 %v1264_v40  ;;  %v1399_v40 = vld [vmem:[#allocation11 + $0x690] sm:$0xff] }
 0x296   :  { %1320 = vmatpush.msra.mxu0 %v1263_v42  ;;  %v1398_v42 = vld [vmem:[#allocation11 + $0x688] sm:$0xff] }
 0x298   :  { %1321 = vmatpush.msra.mxu0 %v1262_v44  ;;  %v1397_v44 = vld [vmem:[#allocation11 + $0x680] sm:$0xff] }
 0x29a   :  { %1322 = vmatpush.msra.mxu0 %v1261_v48  ;;  %v1195_v48 = vld [vmem:[#allocation8 + $0x98] sm:$0xff] }
 0x29b   :  { %1323 = vmatmul.f32.vlgmr.msra.gmra.mxu0 %v1284_v50  ;;  %v1383_v50 = vld [vmem:[#allocation11 + $0x610] sm:$0xff] }
 0x2b2   :  { %v11450_v8 = vpop.f32.mrf.mxu1 }
 0x2ba   :  { %v11452_v9 = vpop.f32.mrf.mxu1  ;;  %v11454_v10 = vpop.f32.mrf.mxu0 }
 0x2c2   :  { %v11456_v11 = vpop.f32.mrf.mxu1  ;;  %v11458_v12 = vpop.f32.mrf.mxu0 }
 0x2ca   :  { %v11460_v17 = vpop.f32.mrf.mxu1  ;;  %v11462_v18 = vpop.f32.mrf.mxu0 }
 0x2d2   :  { %v1032_v24 = vpop.f32.mrf.mxu1  ;;  %v11464_v27 = vpop.f32.mrf.mxu0 }
 0x2d3   :  { %v1033_v26 = vadd.f32 %v10224_v21, %v1032_v24  ;;  %v1406_v21 = vld [vmem:[#allocation11 + $0x6c8] sm:$0xff]  ;;  %v1405_v24 = vld [vmem:[#allocation11 + $0x6c0] sm:$0xff] }
 0x2d5   :  { %v1053_v28 = vadd.f32 %v1052_v25, %v1033_v26  ;;  %v1394_v25 = vld [vmem:[#allocation11 + $0x668] sm:$0xff]  ;;  %v1404_v26 = vld [vmem:[#allocation11 + $0x6b8] sm:$0xff] }
 0x2d7   :  { %9537 = vmatpush.msk.msra.mxu3 %vm759_vm0, %v1053_v28  ;;  %v1393_v28 = vld [vmem:[#allocation11 + $0x660] sm:$0xff] }
 0x2d8   :  { %9538 = vmatmul.msk.f32.vlgmr.msra.gmra.mxu3 %vm746_vm1, %v1056_v29  ;;  %v1193_v29 = vld [vmem:[#allocation8 + $0x88] sm:$0xff] }
 0x2d9   :  { %1287 = vmatpush.msrb.mxu3 %v1260_v31  ;;  %v1392_v31 = vld [vmem:[#allocation11 + $0x658] sm:$0xff] }
 0x2da   :  { %v11468_v38 = vpop.f32.mrf.mxu0 }
 0x2db   :  { %1288 = vmatpush.msrb.mxu3 %v1259_v34  ;;  %v1401_v34 = vld [vmem:[#allocation11 + $0x6a0] sm:$0xff] }
 0x2dd   :  { %1289 = vmatpush.msrb.mxu3 %v1258_v36  ;;  %v1400_v36 = vld [vmem:[#allocation11 + $0x698] sm:$0xff] }
 0x2df   :  { %1290 = vmatpush.msrb.mxu3 %v1257_v37  ;;  %v1389_v37 = vld [vmem:[#allocation11 + $0x640] sm:$0xff] }
 0x2e0   :  { %9539 = vmatmul.msk.f32.gmra.mxu3 %vm746_vm1, %v1057_v39  ;;  %v1194_v39 = vld [vmem:[#allocation8 + $0x90] sm:$0xff] }
 0x2e1   :  { %1291 = vmatpush.msrb.mxu3 %v1256_v41  ;;  %v1388_v41 = vld [vmem:[#allocation11 + $0x638] sm:$0xff] }
 0x2e2   :  { %v11471_v51 = vpop.f32.mrf.mxu0 }
 0x2e3   :  { %1292 = vmatpush.msrb.mxu3 %v1255_v43  ;;  %v1387_v43 = vld [vmem:[#allocation11 + $0x630] sm:$0xff] }
 0x2e5   :  { %1293 = vmatpush.msrb.mxu3 %v1254_v45  ;;  %v1386_v45 = vld [vmem:[#allocation11 + $0x628] sm:$0xff] }
 0x2e7   :  { %1294 = vmatpush.msrb.mxu3 %v1253_v47  ;;  %v1385_v47 = vld [vmem:[#allocation11 + $0x620] sm:$0xff] }
 0x2e8   :  { %9540 = vmatmul.msk.f32.gmra.mxu3 %vm746_vm1, %v1058_v52  ;;  %v1382_v52 = vld [vmem:[#allocation11 + $0x608] sm:$0xff] }
 0x2e9   :  { %1295 = vmatpush.msrb.mxu3 %v1252_v53  ;;  %v1381_v53 = vld [vmem:[#allocation11 + $0x600] sm:$0xff] }
 0x2ea   :  { %v11475_v57 = vpop.f32.mrf.mxu0 }
 0x2eb   :  { %1296 = vmatpush.msrb.mxu3 %v1251_v54 }
 0x2ed   :  { %1297 = vmatpush.msrb.mxu3 %v1250_v55  ;;  %v1548_v55 = vld [vmem:[#allocation11 + $0x7f8] sm:$0xff] }
 0x2ef   :  { %1298 = vmatpush.msrb.mxu3 %v1249_v56  ;;  %v1547_v56 = vld [vmem:[#allocation11 + $0x7f0] sm:$0xff] }
 0x2f0   :  { %9541 = vmatmul.msk.f32.gmra.mxu3 %vm746_vm1, %v1059_v58 }
 0x2f1   :  { %1299 = vmatpush.msrb.mxu3 %v1248_v59  ;;  %v1546_v59 = vld [vmem:[#allocation11 + $0x7e8] sm:$0xff] }
 0x2f2   :  { %v11478_v63 = vpop.f32.mrf.mxu0  ;;  %v1188_v6 = vpop.f32.mrf.mxu1 }
 0x2f3   :  { %1300 = vmatpush.msrb.mxu3 %v1247_v60  ;;  %v1545_v60 = vld [vmem:[#allocation11 + $0x7e0] sm:$0xff] }
 0x2f5   :  { %1301 = vmatpush.msrb.mxu3 %v1246_v61  ;;  %v1544_v61 = vld [vmem:[#allocation11 + $0x7d8] sm:$0xff] }
 0x2f7   :  { %1302 = vmatpush.msrb.mxu3 %v1245_v62  ;;  %v1543_v62 = vld [vmem:[#allocation11 + $0x7d0] sm:$0xff] }
 0x2f8   :  { %1303 = vmatmul.f32.vlgmr.msrb.gmra.mxu3 %v1283_v49  ;;  %v1384_v49 = vld [vmem:[#allocation11 + $0x618] sm:$0xff] }
 0x2f9   :  { %1443 = vmatpush.msra.mxu3 %v1412_v0 }
 0x2fa   :  { %v1168_v5 = vpop.f32.mrf.mxu0 }
 0x2fb   :  { %1444 = vmatpush.msra.mxu3 %v1411_v1  ;;  %v1169_v7 = vadd.f32 %v10225_v2, %v1168_v5  ;;  %v1542_v1 = vld [vmem:[#allocation11 + $0x7c8] sm:$0xff]  ;;  %v1541_v2 = vld [vmem:[#allocation11 + $0x7c0] sm:$0xff] }
 0x2fd   :  { %1445 = vmatpush.msra.mxu3 %v1410_v3  ;;  %v1189_v14 = vadd.f32 %v1188_v6, %v1169_v7  ;;  %v1540_v3 = vld [vmem:[#allocation11 + $0x7b8] sm:$0xff]  ;;  %v1538_v6 = vld [vmem:[#allocation11 + $0x7a8] sm:$0xff]  ;;  %v1537_v7 = vld [vmem:[#allocation11 + $0x7a0] sm:$0xff] }
 0x2ff   :  { %1446 = vmatpush.msra.mxu3 %v1409_v4  ;;  %9542 = vmatpush.msk.msrb.mxu2 %vm759_vm0, %v1189_v14  ;;  %v1539_v4 = vld [vmem:[#allocation11 + $0x7b0] sm:$0xff]  ;;  %v1536_v14 = vld [vmem:[#allocation11 + $0x798] sm:$0xff] }
 0x300   :  { %9543 = vmatmul.msk.f32.vlgmr.msrb.gmra.mxu2 %vm746_vm1, %v1192_v15  ;;  %v1535_v15 = vld [vmem:[#allocation11 + $0x790] sm:$0xff] }
 0x301   :  { %1447 = vmatpush.msra.mxu3 %v1408_v13  ;;  %1423 = vmatpush.msra.mxu2 %v1396_v19  ;;  %v10226_v13 = vld [vmem:[#allocation13 + $0x5] ss:$0 sm:$0xff] }
 0x303   :  { %1448 = vmatpush.msra.mxu3 %v1407_v16  ;;  %1424 = vmatpush.msra.mxu2 %v1395_v20 }
 0x305   :  { %1449 = vmatpush.msra.mxu3 %v1406_v21  ;;  %1425 = vmatpush.msra.mxu2 %v1394_v25  ;;  %v1533_v25 = vld [vmem:[#allocation11 + $0x780] sm:$0xff] }
 0x307   :  { %1450 = vmatpush.msra.mxu3 %v1405_v24  ;;  %1426 = vmatpush.msra.mxu2 %v1393_v28  ;;  %v1532_v24 = vld [vmem:[#allocation11 + $0x778] sm:$0xff]  ;;  %v1531_v28 = vld [vmem:[#allocation11 + $0x770] sm:$0xff] }
 0x308   :  { %9544 = vmatmul.msk.f32.gmra.mxu2 %vm746_vm1, %v1193_v29  ;;  %v1530_v29 = vld [vmem:[#allocation11 + $0x768] sm:$0xff] }
 0x309   :  { %1451 = vmatpush.msra.mxu3 %v1404_v26  ;;  %1427 = vmatpush.msra.mxu2 %v1392_v31  ;;  %v1556_v26 = vld.sshfl [vmem:[#allocation1 + $0x8] sm:$0xff pattern:$0x73625140]  ;;  %v1555_v31 = vld.sshfl [vmem:[#allocation1] sm:$0xff pattern:$0x73625140] }
 0x30a   :  { %1690 = vst [vmem:[#allocation1] ss:$4 sm:$0xff] %v11427_v46 }
 0x30b   :  { %1452 = vmatpush.msra.mxu3 %v1403_v30  ;;  %1428 = vmatpush.msra.mxu2 %v1391_v33  ;;  %v1529_v30 = vld [vmem:[#allocation11 + $0x760] sm:$0xff]  ;;  %v1329_v33 = vld [vmem:[#allocation8 + $0xa8] sm:$0xff] }
 0x30d   :  { %1453 = vmatpush.msra.mxu3 %v1402_v32  ;;  %1429 = vmatpush.msra.mxu2 %v1390_v35  ;;  %v1527_v35 = vld [vmem:[#allocation11 + $0x750] sm:$0xff] }
 0x30f   :  { %1454 = vmatpush.msra.mxu3 %v1401_v34  ;;  %1430 = vmatpush.msra.mxu2 %v1389_v37  ;;  %v1528_v34 = vld [vmem:[#allocation11 + $0x758] sm:$0xff]  ;;  %v1525_v37 = vld [vmem:[#allocation11 + $0x740] sm:$0xff] }
 0x310   :  { %9545 = vmatmul.msk.f32.gmra.mxu2 %vm746_vm1, %v1194_v39 }
 0x311   :  { %1455 = vmatpush.msra.mxu3 %v1400_v36  ;;  %1431 = vmatpush.msra.mxu2 %v1388_v41  ;;  %v1526_v36 = vld [vmem:[#allocation11 + $0x748] sm:$0xff]  ;;  %v1524_v41 = vld [vmem:[#allocation11 + $0x738] sm:$0xff] }
 0x313   :  { %1456 = vmatpush.msra.mxu3 %v1399_v40  ;;  %1432 = vmatpush.msra.mxu2 %v1387_v43  ;;  %v1330_v40 = vld [vmem:[#allocation8 + $0xb0] sm:$0xff]  ;;  %v1522_v43 = vld [vmem:[#allocation11 + $0x728] sm:$0xff] }
 0x315   :  { %1457 = vmatpush.msra.mxu3 %v1398_v42  ;;  %1433 = vmatpush.msra.mxu2 %v1386_v45  ;;  %v1523_v42 = vld [vmem:[#allocation11 + $0x730] sm:$0xff] }
 0x317   :  { %1458 = vmatpush.msra.mxu3 %v1397_v44  ;;  %1434 = vmatpush.msra.mxu2 %v1385_v47  ;;  %v1521_v44 = vld [vmem:[#allocation11 + $0x720] sm:$0xff]  ;;  %v1331_v47 = vld [vmem:[#allocation8 + $0xb8] sm:$0xff] }
 0x318   :  { %1459 = vmatmul.f32.vlgmr.msra.gmra.mxu3 %v1420_v23  ;;  %9546 = vmatmul.msk.f32.gmra.mxu2 %vm746_vm1, %v1195_v48  ;;  %v1324_v19 = vpop.f32.mrf.mxu0  ;;  %v1534_v23 = vld [vmem:[#allocation11 + $0x788] sm:$0xff]  ;;  %v1520_v48 = vld [vmem:[#allocation11 + $0x718] sm:$0xff] }
 0x319   :  { %1435 = vmatpush.msra.mxu2 %v1384_v49  ;;  %v1519_v49 = vld [vmem:[#allocation11 + $0x710] sm:$0xff] }
 0x31b   :  { %1436 = vmatpush.msra.mxu2 %v1383_v50  ;;  %v1518_v50 = vld [vmem:[#allocation11 + $0x708] sm:$0xff] }
 0x31d   :  { %1437 = vmatpush.msra.mxu2 %v1382_v52  ;;  %v1517_v52 = vld [vmem:[#allocation11 + $0x700] sm:$0xff] }
 0x31f   :  { %1438 = vmatpush.msra.mxu2 %v1381_v53 }
 0x320   :  { %1439 = vmatmul.f32.vlgmr.msra.gmra.mxu2 %v1419_v22  ;;  %v1328_v22 = vld [vmem:[#allocation8 + $0xa0] sm:$0xff] }
 0x321   :  { %1579 = vmatpush.msrb.mxu2 %v1548_v55  ;;  %v1684_v55 = vld [vmem:[#allocation11 + $0x8f8] sm:$0xff] }
 0x323   :  { %1580 = vmatpush.msrb.mxu2 %v1547_v56  ;;  %v1683_v56 = vld [vmem:[#allocation11 + $0x8f0] sm:$0xff] }
 0x325   :  { %1581 = vmatpush.msrb.mxu2 %v1546_v59  ;;  %v10227_v59 = vld [vmem:[#allocation13 + $0x6] ss:$0 sm:$0xff] }
 0x327   :  { %1582 = vmatpush.msrb.mxu2 %v1545_v60  ;;  %v1682_v60 = vld [vmem:[#allocation11 + $0x8e8] sm:$0xff] }
 0x329   :  { %1583 = vmatpush.msrb.mxu2 %v1544_v61  ;;  %v1681_v61 = vld [vmem:[#allocation11 + $0x8e0] sm:$0xff] }
 0x32b   :  { %1584 = vmatpush.msrb.mxu2 %v1543_v62 }
 0x32d   :  { %1585 = vmatpush.msrb.mxu2 %v1542_v1 }
 0x32f   :  { %1586 = vmatpush.msrb.mxu2 %v1541_v2 }
 0x331   :  { %1587 = vmatpush.msrb.mxu2 %v1540_v3  ;;  %v1680_v3 = vld [vmem:[#allocation11 + $0x8d8] sm:$0xff] }
 0x333   :  { %1588 = vmatpush.msrb.mxu2 %v1539_v4 }
 0x335   :  { %1589 = vmatpush.msrb.mxu2 %v1538_v6  ;;  %v1464_v6 = vld [vmem:[#allocation8 + $0xc0] sm:$0xff] }
 0x337   :  { %1590 = vmatpush.msrb.mxu2 %v1537_v7  ;;  %v1679_v7 = vld [vmem:[#allocation11 + $0x8d0] sm:$0xff] }
 0x339   :  { %1591 = vmatpush.msrb.mxu2 %v1536_v14  ;;  %v1667_v14 = vld [vmem:[#allocation11 + $0x870] sm:$0xff] }
 0x33b   :  { %1592 = vmatpush.msrb.mxu2 %v1535_v15  ;;  %v1678_v15 = vld [vmem:[#allocation11 + $0x8c8] sm:$0xff] }
 0x33d   :  { %1593 = vmatpush.msrb.mxu2 %v1534_v23  ;;  %v1665_v23 = vld [vmem:[#allocation11 + $0x860] sm:$0xff] }
 0x33f   :  { %1594 = vmatpush.msrb.mxu2 %v1533_v25  ;;  %v1675_v25 = vld [vmem:[#allocation11 + $0x8b0] sm:$0xff] }
 0x340   :  { %1595 = vmatmul.f32.vlgmr.msrb.gmra.mxu2 %v1556_v26  ;;  %v1664_v26 = vld [vmem:[#allocation11 + $0x858] sm:$0xff] }
 0x35b   :  { %v11486_v54 = vpop.f32.mrf.mxu3 }
 0x363   :  { %v11488_v58 = vpop.f32.mrf.mxu3 }
 0x36b   :  { %v11490_v0 = vpop.f32.mrf.mxu3 }
 0x373   :  { %v11492_v5 = vpop.f32.mrf.mxu3 }
 0x37b   :  { %v1304_v16 = vpop.f32.mrf.mxu3 }
 0x37c   :  { %v1305_v20 = vadd.f32 %v10226_v13, %v1304_v16  ;;  %v1668_v13 = vld [vmem:[#allocation11 + $0x878] sm:$0xff] }
 0x37d   :  { %v1691_v16 = vld.sshfl [vmem:[#allocation1] sm:$0xff pattern:$0x73625140] }
 0x37e   :  { %v1325_v21 = vadd.f32 %v1324_v19, %v1305_v20  ;;  %v1692_v19 = vld.sshfl [vmem:[#allocation1 + $0x8] sm:$0xff pattern:$0x73625140] }
 0x37f   :  { %v1677_v20 = vld [vmem:[#allocation11 + $0x8c0] sm:$0xff]  ;;  %1826 = vst [vmem:[#allocation1] ss:$4 sm:$0xff] %v11427_v46 }
 0x380   :  { %9547 = vmatpush.msk.msra.mxu1 %vm759_vm0, %v1325_v21  ;;  %v1666_v21 = vld [vmem:[#allocation11 + $0x868] sm:$0xff] }
 0x381   :  { %9548 = vmatmul.msk.f32.vlgmr.msra.gmra.mxu1 %vm746_vm1, %v1328_v22  ;;  %v1676_v22 = vld [vmem:[#allocation11 + $0x8b8] sm:$0xff] }
 0x382   :  { %1559 = vmatpush.msrb.mxu1 %v1532_v24  ;;  %v1465_v24 = vld [vmem:[#allocation8 + $0xc8] sm:$0xff] }
 0x383   :  { %v11496_v32 = vpop.f32.mrf.mxu2 }
 0x384   :  { %1560 = vmatpush.msrb.mxu1 %v1531_v28  ;;  %v1674_v28 = vld [vmem:[#allocation11 + $0x8a8] sm:$0xff] }
 0x386   :  { %1561 = vmatpush.msrb.mxu1 %v1530_v29  ;;  %v1663_v29 = vld [vmem:[#allocation11 + $0x850] sm:$0xff] }
 0x388   :  { %1562 = vmatpush.msrb.mxu1 %v1529_v30  ;;  %v1673_v30 = vld [vmem:[#allocation11 + $0x8a0] sm:$0xff] }
 0x389   :  { %9549 = vmatmul.msk.f32.gmra.mxu1 %vm746_vm1, %v1329_v33  ;;  %v1672_v33 = vld [vmem:[#allocation11 + $0x898] sm:$0xff] }
 0x38a   :  { %1563 = vmatpush.msrb.mxu1 %v1528_v34  ;;  %v1661_v34 = vld [vmem:[#allocation11 + $0x840] sm:$0xff] }
 0x38b   :  { %v11500_v39 = vpop.f32.mrf.mxu2 }
 0x38c   :  { %1564 = vmatpush.msrb.mxu1 %v1527_v35  ;;  %v1466_v35 = vld [vmem:[#allocation8 + $0xd0] sm:$0xff] }
 0x38e   :  { %1565 = vmatpush.msrb.mxu1 %v1526_v36  ;;  %v1671_v36 = vld [vmem:[#allocation11 + $0x890] sm:$0xff] }
 0x390   :  { %1566 = vmatpush.msrb.mxu1 %v1525_v37  ;;  %v1660_v37 = vld [vmem:[#allocation11 + $0x838] sm:$0xff] }
 0x391   :  { %9550 = vmatmul.msk.f32.gmra.mxu1 %vm746_vm1, %v1330_v40  ;;  %v1670_v40 = vld [vmem:[#allocation11 + $0x888] sm:$0xff] }
 0x392   :  { %1567 = vmatpush.msrb.mxu1 %v1524_v41  ;;  %v1659_v41 = vld [vmem:[#allocation11 + $0x830] sm:$0xff] }
 0x393   :  { %v11503_v45 = vpop.f32.mrf.mxu2 }
 0x394   :  { %1568 = vmatpush.msrb.mxu1 %v1523_v42  ;;  %v1669_v42 = vld [vmem:[#allocation11 + $0x880] sm:$0xff] }
 0x396   :  { %1569 = vmatpush.msrb.mxu1 %v1522_v43  ;;  %v1658_v43 = vld [vmem:[#allocation11 + $0x828] sm:$0xff] }
 0x398   :  { %1570 = vmatpush.msrb.mxu1 %v1521_v44  ;;  %v1657_v44 = vld [vmem:[#allocation11 + $0x820] sm:$0xff] }
 0x399   :  { %9551 = vmatmul.msk.f32.gmra.mxu1 %vm746_vm1, %v1331_v47  ;;  %v1467_v47 = vld [vmem:[#allocation8 + $0xd8] sm:$0xff] }
 0x39a   :  { %1571 = vmatpush.msrb.mxu1 %v1520_v48  ;;  %v1656_v48 = vld [vmem:[#allocation11 + $0x818] sm:$0xff] }
 0x39b   :  { %v11506_v53 = vpop.f32.mrf.mxu2  ;;  %v1460_v1 = vpop.f32.mrf.mxu3 }
 0x39c   :  { %1572 = vmatpush.msrb.mxu1 %v1519_v49  ;;  %v1655_v49 = vld [vmem:[#allocation11 + $0x810] sm:$0xff] }
 0x39e   :  { %1573 = vmatpush.msrb.mxu1 %v1518_v50  ;;  %v1654_v50 = vld [vmem:[#allocation11 + $0x808] sm:$0xff] }
 0x3a0   :  { %1574 = vmatpush.msrb.mxu1 %v1517_v52  ;;  %v1653_v52 = vld [vmem:[#allocation11 + $0x800] sm:$0xff] }
 0x3a1   :  { %1575 = vmatmul.f32.vlgmr.msrb.gmra.mxu1 %v1555_v31  ;;  %v1662_v31 = vld [vmem:[#allocation11 + $0x848] sm:$0xff] }
 0x3a2   :  { %1715 = vmatpush.msra.mxu1 %v1684_v55 }
 0x3a3   :  { %v1440_v62 = vpop.f32.mrf.mxu2 }
 0x3a4   :  { %1716 = vmatpush.msra.mxu1 %v1683_v56  ;;  %v1441_v2 = vadd.f32 %v10227_v59, %v1440_v62  ;;  %v1818_v62 = vld [vmem:[#allocation11 + $0x9e8] sm:$0xff] }
 0x3a6   :  { %1717 = vmatpush.msra.mxu1 %v1682_v60  ;;  %v1461_v4 = vadd.f32 %v1460_v1, %v1441_v2  ;;  %v1820_v60 = vld [vmem:[#allocation11 + $0x9f8] sm:$0xff]  ;;  %v1817_v1 = vld [vmem:[#allocation11 + $0x9e0] sm:$0xff] }
 0x3a8   :  { %1718 = vmatpush.msra.mxu1 %v1681_v61  ;;  %9552 = vmatpush.msk.msrb.mxu0 %vm759_vm0, %v1461_v4  ;;  %v1819_v61 = vld [vmem:[#allocation11 + $0x9f0] sm:$0xff] }
 0x3a9   :  { %9553 = vmatmul.msk.f32.vlgmr.msrb.gmra.mxu0 %vm746_vm1, %v1464_v6  ;;  %v1815_v4 = vld [vmem:[#allocation11 + $0x9d0] sm:$0xff]  ;;  %v10228_v6 = vld [vmem:[#allocation13 + $0x7] ss:$0 sm:$0xff] }
 0x3aa   :  { %1719 = vmatpush.msra.mxu1 %v1680_v3  ;;  %1695 = vmatpush.msra.mxu0 %v1668_v13  ;;  %v1816_v3 = vld [vmem:[#allocation11 + $0x9d8] sm:$0xff]  ;;  %v1813_v13 = vld [vmem:[#allocation11 + $0x9c0] sm:$0xff] }
 0x3ac   :  { %1720 = vmatpush.msra.mxu1 %v1679_v7  ;;  %1696 = vmatpush.msra.mxu0 %v1667_v14  ;;  %v1814_v7 = vld [vmem:[#allocation11 + $0x9c8] sm:$0xff] }
 0x3ae   :  { %1721 = vmatpush.msra.mxu1 %v1678_v15  ;;  %1697 = vmatpush.msra.mxu0 %v1666_v21  ;;  %v1812_v21 = vld [vmem:[#allocation11 + $0x9b8] sm:$0xff] }
 0x3b0   :  { %1722 = vmatpush.msra.mxu1 %v1677_v20  ;;  %1698 = vmatpush.msra.mxu0 %v1665_v23  ;;  %v1600_v20 = vld [vmem:[#allocation8 + $0xe0] sm:$0xff]  ;;  %v1811_v23 = vld [vmem:[#allocation11 + $0x9b0] sm:$0xff] }
 0x3b1   :  { %9554 = vmatmul.msk.f32.gmra.mxu0 %vm746_vm1, %v1465_v24  ;;  %v1810_v24 = vld [vmem:[#allocation11 + $0x9a8] sm:$0xff] }
 0x3b2   :  { %1723 = vmatpush.msra.mxu1 %v1676_v22  ;;  %1699 = vmatpush.msra.mxu0 %v1664_v26  ;;  %v1804_v22 = vld [vmem:[#allocation11 + $0x978] sm:$0xff]  ;;  %v1809_v26 = vld [vmem:[#allocation11 + $0x9a0] sm:$0xff] }
 0x3b4   :  { %1724 = vmatpush.msra.mxu1 %v1675_v25  ;;  %1700 = vmatpush.msra.mxu0 %v1663_v29  ;;  %v1803_v25 = vld [vmem:[#allocation11 + $0x970] sm:$0xff]  ;;  %v1801_v29 = vld [vmem:[#allocation11 + $0x960] sm:$0xff] }
 0x3b6   :  { %1725 = vmatpush.msra.mxu1 %v1674_v28  ;;  %1701 = vmatpush.msra.mxu0 %v1662_v31  ;;  %v1802_v28 = vld [vmem:[#allocation11 + $0x968] sm:$0xff] }
 0x3b7   :  { %v1601_v31 = vld [vmem:[#allocation8 + $0xe8] sm:$0xff] }
 0x3b8   :  { %1726 = vmatpush.msra.mxu1 %v1673_v30  ;;  %1702 = vmatpush.msra.mxu0 %v1661_v34  ;;  %v1800_v34 = vld [vmem:[#allocation11 + $0x958] sm:$0xff] }
 0x3b9   :  { %9555 = vmatmul.msk.f32.gmra.mxu0 %vm746_vm1, %v1466_v35  ;;  %v1807_v35 = vld [vmem:[#allocation11 + $0x990] sm:$0xff] }
 0x3ba   :  { %1727 = vmatpush.msra.mxu1 %v1672_v33  ;;  %1703 = vmatpush.msra.mxu0 %v1660_v37  ;;  %v1808_v33 = vld [vmem:[#allocation11 + $0x998] sm:$0xff]  ;;  %v1806_v37 = vld [vmem:[#allocation11 + $0x988] sm:$0xff] }
 0x3bc   :  { %1728 = vmatpush.msra.mxu1 %v1671_v36  ;;  %1704 = vmatpush.msra.mxu0 %v1659_v41  ;;  %v1799_v36 = vld [vmem:[#allocation11 + $0x950] sm:$0xff]  ;;  %v1797_v41 = vld [vmem:[#allocation11 + $0x940] sm:$0xff] }
 0x3be   :  { %1729 = vmatpush.msra.mxu1 %v1670_v40  ;;  %1705 = vmatpush.msra.mxu0 %v1658_v43  ;;  %v1798_v40 = vld [vmem:[#allocation11 + $0x948] sm:$0xff]  ;;  %v1827_v43 = vld.sshfl [vmem:[#allocation1] sm:$0xff pattern:$0x73625140] }
 0x3c0   :  { %1730 = vmatpush.msra.mxu1 %v1669_v42  ;;  %1706 = vmatpush.msra.mxu0 %v1657_v44  ;;  %v1805_v42 = vld [vmem:[#allocation11 + $0x980] sm:$0xff] }
 0x3c1   :  { %1731 = vmatmul.f32.vlgmr.msra.gmra.mxu1 %v1692_v19  ;;  %9556 = vmatmul.msk.f32.gmra.mxu0 %vm746_vm1, %v1467_v47  ;;  %v1828_v44 = vld.sshfl [vmem:[#allocation1 + $0x8] sm:$0xff pattern:$0x73625140] }
 0x3c2   :  { %1707 = vmatpush.msra.mxu0 %v1656_v48  ;;  %v1602_v48 = vld [vmem:[#allocation8 + $0xf0] sm:$0xff]  ;;  %1962 = vst [vmem:[#allocation1] ss:$4 sm:$0xff] %v11427_v46 }
 0x3c3   :  { %v1596_v15 = vpop.f32.mrf.mxu2 }
 0x3c4   :  { %1708 = vmatpush.msra.mxu0 %v1655_v49  ;;  %v1796_v49 = vld [vmem:[#allocation11 + $0x938] sm:$0xff] }
 0x3c6   :  { %1709 = vmatpush.msra.mxu0 %v1654_v50  ;;  %v1795_v50 = vld [vmem:[#allocation11 + $0x930] sm:$0xff] }
 0x3c8   :  { %1710 = vmatpush.msra.mxu0 %v1653_v52  ;;  %v1794_v52 = vld [vmem:[#allocation11 + $0x928] sm:$0xff] }
 0x3c9   :  { %1711 = vmatmul.f32.vlgmr.msra.gmra.mxu0 %v1691_v16 }
 0x3ca   :  { %1851 = vmatpush.msrb.mxu0 %v1820_v60  ;;  %v1793_v60 = vld [vmem:[#allocation11 + $0x920] sm:$0xff] }
 0x3cc   :  { %1852 = vmatpush.msrb.mxu0 %v1819_v61 }
 0x3ce   :  { %1853 = vmatpush.msrb.mxu0 %v1818_v62  ;;  %v1603_v62 = vld [vmem:[#allocation8 + $0xf8] sm:$0xff] }
 0x3d0   :  { %1854 = vmatpush.msrb.mxu0 %v1817_v1  ;;  %v1792_v1 = vld [vmem:[#allocation11 + $0x918] sm:$0xff] }
 0x3d2   :  { %1855 = vmatpush.msrb.mxu0 %v1816_v3  ;;  %v1791_v3 = vld [vmem:[#allocation11 + $0x910] sm:$0xff] }
 0x3d4   :  { %1856 = vmatpush.msrb.mxu0 %v1815_v4  ;;  %v1790_v4 = vld [vmem:[#allocation11 + $0x908] sm:$0xff] }
 0x3d6   :  { %1857 = vmatpush.msrb.mxu0 %v1814_v7 }
 0x3d8   :  { %1858 = vmatpush.msrb.mxu0 %v1813_v13  ;;  %v1956_v13 = vld [vmem:[#allocation11 + $0xaf8] sm:$0xff] }
 0x3da   :  { %1859 = vmatpush.msrb.mxu0 %v1812_v21 }
 0x3dc   :  { %1860 = vmatpush.msrb.mxu0 %v1811_v23  ;;  %v1952_v23 = vld [vmem:[#allocation11 + $0xad8] sm:$0xff] }
 0x3de   :  { %1861 = vmatpush.msrb.mxu0 %v1810_v24 }
 0x3e0   :  { %1862 = vmatpush.msrb.mxu0 %v1809_v26  ;;  %v1951_v26 = vld [vmem:[#allocation11 + $0xad0] sm:$0xff] }
 0x3e2   :  { %1863 = vmatpush.msrb.mxu0 %v1808_v33  ;;  %v1963_v33 = vld.sshfl [vmem:[#allocation1] sm:$0xff pattern:$0x73625140] }
 0x3e4   :  { %1864 = vmatpush.msrb.mxu0 %v1807_v35  ;;  %v1949_v35 = vld [vmem:[#allocation11 + $0xac0] sm:$0xff] }
 0x3e6   :  { %1865 = vmatpush.msrb.mxu0 %v1806_v37  ;;  %v1948_v37 = vld [vmem:[#allocation11 + $0xab8] sm:$0xff] }
 0x3e8   :  { %1866 = vmatpush.msrb.mxu0 %v1805_v42  ;;  %v1947_v42 = vld [vmem:[#allocation11 + $0xab0] sm:$0xff] }
 0x3e9   :  { %1867 = vmatmul.f32.vlgmr.msrb.gmra.mxu0 %v1828_v44  ;;  %v1946_v44 = vld [vmem:[#allocation11 + $0xaa8] sm:$0xff] }
 0x3fe   :  { %v11514_v55 = vpop.f32.mrf.mxu1 }
 0x406   :  { %v11516_v56 = vpop.f32.mrf.mxu1 }
 0x40e   :  { %v11518_v59 = vpop.f32.mrf.mxu1 }
 0x416   :  { %v11520_v2 = vpop.f32.mrf.mxu1 }
 0x41e   :  { %v1576_v14 = vpop.f32.mrf.mxu1 }
 0x41f   :  { %v1577_v16 = vadd.f32 %v10228_v6, %v1576_v14  ;;  %v1789_v6 = vld [vmem:[#allocation11 + $0x900] sm:$0xff]  ;;  %v1955_v14 = vld [vmem:[#allocation11 + $0xaf0] sm:$0xff] }
 0x421   :  { %v1597_v19 = vadd.f32 %v1596_v15, %v1577_v16  ;;  %v10229_v15 = vld [vmem:[#allocation13 + $0x8] ss:$0 sm:$0xff] }
 0x422   :  { %v1954_v16 = vld [vmem:[#allocation11 + $0xae8] sm:$0xff] }
 0x423   :  { %9557 = vmatpush.msk.msrb.mxu3 %vm759_vm0, %v1597_v19  ;;  %v1953_v19 = vld [vmem:[#allocation11 + $0xae0] sm:$0xff] }
 0x424   :  { %9558 = vmatmul.msk.f32.vlgmr.msrb.gmra.mxu3 %vm746_vm1, %v1600_v20 }
 0x425   :  { %1831 = vmatpush.msra.mxu3 %v1804_v22 }
 0x426   :  { %v11524_v30 = vpop.f32.mrf.mxu0 }
 0x427   :  { %1832 = vmatpush.msra.mxu3 %v1803_v25  ;;  %v1736_v25 = vld [vmem:[#allocation8 + $0x100] sm:$0xff] }
 0x429   :  { %1833 = vmatpush.msra.mxu3 %v1802_v28  ;;  %v1940_v28 = vld [vmem:[#allocation11 + $0xa78] sm:$0xff] }
 0x42b   :  { %1834 = vmatpush.msra.mxu3 %v1801_v29  ;;  %v1939_v29 = vld [vmem:[#allocation11 + $0xa70] sm:$0xff] }
 0x42c   :  { %9559 = vmatmul.msk.f32.gmra.mxu3 %vm746_vm1, %v1601_v31  ;;  %v1950_v31 = vld [vmem:[#allocation11 + $0xac8] sm:$0xff] }
 0x42d   :  { %1835 = vmatpush.msra.mxu3 %v1800_v34  ;;  %v1964_v34 = vld.sshfl [vmem:[#allocation1 + $0x8] sm:$0xff pattern:$0x73625140] }
 0x42e   :  { %v11527_v47 = vpop.f32.mrf.mxu0  ;;  %2098 = vst [vmem:[#allocation1] ss:$4 sm:$0xff] %v11427_v46 }
 0x42f   :  { %1836 = vmatpush.msra.mxu3 %v1799_v36  ;;  %v1938_v36 = vld [vmem:[#allocation11 + $0xa68] sm:$0xff] }
 0x431   :  { %1837 = vmatpush.msra.mxu3 %v1798_v40  ;;  %v1937_v40 = vld [vmem:[#allocation11 + $0xa60] sm:$0xff] }
 0x433   :  { %1838 = vmatpush.msra.mxu3 %v1797_v41  ;;  %v1737_v41 = vld [vmem:[#allocation8 + $0x108] sm:$0xff] }
 0x434   :  { %9560 = vmatmul.msk.f32.gmra.mxu3 %vm746_vm1, %v1602_v48  ;;  %v1935_v48 = vld [vmem:[#allocation11 + $0xa50] sm:$0xff] }
 0x435   :  { %1839 = vmatpush.msra.mxu3 %v1796_v49  ;;  %v1945_v49 = vld [vmem:[#allocation11 + $0xaa0] sm:$0xff] }
 0x436   :  { %v11531_v61 = vpop.f32.mrf.mxu0 }
 0x437   :  { %1840 = vmatpush.msra.mxu3 %v1795_v50  ;;  %v1934_v50 = vld [vmem:[#allocation11 + $0xa48] sm:$0xff] }
 0x439   :  { %1841 = vmatpush.msra.mxu3 %v1794_v52  ;;  %v1944_v52 = vld [vmem:[#allocation11 + $0xa98] sm:$0xff] }
 0x43b   :  { %1842 = vmatpush.msra.mxu3 %v1793_v60  ;;  %v1933_v60 = vld [vmem:[#allocation11 + $0xa40] sm:$0xff] }
 0x43c   :  { %9561 = vmatmul.msk.f32.gmra.mxu3 %vm746_vm1, %v1603_v62  ;;  %v1738_v62 = vld [vmem:[#allocation8 + $0x110] sm:$0xff] }
 0x43d   :  { %1843 = vmatpush.msra.mxu3 %v1792_v1  ;;  %v1943_v1 = vld [vmem:[#allocation11 + $0xa90] sm:$0xff] }
 0x43e   :  { %v11534_v7 = vpop.f32.mrf.mxu0  ;;  %v1732_v21 = vpop.f32.mrf.mxu1 }
 0x43f   :  { %1844 = vmatpush.msra.mxu3 %v1791_v3  ;;  %v1932_v3 = vld [vmem:[#allocation11 + $0xa38] sm:$0xff] }
 0x441   :  { %1845 = vmatpush.msra.mxu3 %v1790_v4  ;;  %v1942_v4 = vld [vmem:[#allocation11 + $0xa88] sm:$0xff] }
 0x443   :  { %1846 = vmatpush.msra.mxu3 %v1789_v6  ;;  %v1931_v6 = vld [vmem:[#allocation11 + $0xa30] sm:$0xff] }
 0x444   :  { %1847 = vmatmul.f32.vlgmr.msra.gmra.mxu3 %v1827_v43  ;;  %v1936_v43 = vld [vmem:[#allocation11 + $0xa58] sm:$0xff] }
 0x445   :  { %1987 = vmatpush.msrb.mxu3 %v1956_v13  ;;  %v1941_v13 = vld [vmem:[#allocation11 + $0xa80] sm:$0xff] }
 0x446   :  { %v1712_v20 = vpop.f32.mrf.mxu0 }
 0x447   :  { %1988 = vmatpush.msrb.mxu3 %v1955_v14  ;;  %v1713_v22 = vadd.f32 %v10229_v15, %v1712_v20  ;;  %v1930_v14 = vld [vmem:[#allocation11 + $0xa28] sm:$0xff]  ;;  %v1929_v15 = vld [vmem:[#allocation11 + $0xa20] sm:$0xff]  ;;  %v1927_v20 = vld [vmem:[#allocation11 + $0xa10] sm:$0xff] }
 0x449   :  { %1989 = vmatpush.msrb.mxu3 %v1954_v16  ;;  %v1733_v24 = vadd.f32 %v1732_v21, %v1713_v22  ;;  %v1739_v16 = vld [vmem:[#allocation8 + $0x118] sm:$0xff]  ;;  %v1926_v21 = vld [vmem:[#allocation11 + $0xa08] sm:$0xff]  ;;  %v1925_v22 = vld [vmem:[#allocation11 + $0xa00] sm:$0xff] }
 0x44b   :  { %1990 = vmatpush.msrb.mxu3 %v1953_v19  ;;  %9562 = vmatpush.msk.msra.mxu2 %vm759_vm0, %v1733_v24  ;;  %v1928_v19 = vld [vmem:[#allocation11 + $0xa18] sm:$0xff] }
 0x44c   :  { %9563 = vmatmul.msk.f32.vlgmr.msra.gmra.mxu2 %vm746_vm1, %v1736_v25  ;;  %v2092_v24 = vld [vmem:[#allocation11 + $0xbf8] sm:$0xff]  ;;  %v2091_v25 = vld [vmem:[#allocation11 + $0xbf0] sm:$0xff] }
 0x44d   :  { %1991 = vmatpush.msrb.mxu3 %v1952_v23  ;;  %1967 = vmatpush.msrb.mxu2 %v1940_v28  ;;  %v2090_v28 = vld [vmem:[#allocation11 + $0xbe8] sm:$0xff] }
 0x44f   :  { %1992 = vmatpush.msrb.mxu3 %v1951_v26  ;;  %1968 = vmatpush.msrb.mxu2 %v1939_v29  ;;  %v2089_v29 = vld [vmem:[#allocation11 + $0xbe0] sm:$0xff] }
 0x451   :  { %1993 = vmatpush.msrb.mxu3 %v1950_v31  ;;  %1969 = vmatpush.msrb.mxu2 %v1938_v36  ;;  %v2088_v31 = vld [vmem:[#allocation11 + $0xbd8] sm:$0xff]  ;;  %v2086_v36 = vld [vmem:[#allocation11 + $0xbc8] sm:$0xff] }
 0x453   :  { %1994 = vmatpush.msrb.mxu3 %v1949_v35  ;;  %1970 = vmatpush.msrb.mxu2 %v1937_v40  ;;  %v2083_v40 = vld [vmem:[#allocation11 + $0xbb0] sm:$0xff] }
 0x454   :  { %9564 = vmatmul.msk.f32.gmra.mxu2 %vm746_vm1, %v1737_v41 }
 0x455   :  { %1995 = vmatpush.msrb.mxu3 %v1948_v37  ;;  %1971 = vmatpush.msrb.mxu2 %v1936_v43  ;;  %v2084_v37 = vld [vmem:[#allocation11 + $0xbb8] sm:$0xff]  ;;  %v2081_v43 = vld [vmem:[#allocation11 + $0xba0] sm:$0xff] }
 0x457   :  { %1996 = vmatpush.msrb.mxu3 %v1947_v42  ;;  %1972 = vmatpush.msrb.mxu2 %v1935_v48  ;;  %v2082_v42 = vld [vmem:[#allocation11 + $0xba8] sm:$0xff]  ;;  %v2080_v48 = vld [vmem:[#allocation11 + $0xb98] sm:$0xff] }
 0x459   :  { %1997 = vmatpush.msrb.mxu3 %v1946_v44  ;;  %1973 = vmatpush.msrb.mxu2 %v1934_v50  ;;  %v10230_v44 = vld [vmem:[#allocation13 + $0x9] ss:$0 sm:$0xff] }
 0x45b   :  { %1998 = vmatpush.msrb.mxu3 %v1945_v49  ;;  %1974 = vmatpush.msrb.mxu2 %v1933_v60  ;;  %v2079_v49 = vld [vmem:[#allocation11 + $0xb90] sm:$0xff] }
 0x45c   :  { %9565 = vmatmul.msk.f32.gmra.mxu2 %vm746_vm1, %v1738_v62 }
 0x45d   :  { %1999 = vmatpush.msrb.mxu3 %v1944_v52  ;;  %1975 = vmatpush.msrb.mxu2 %v1932_v3  ;;  %v2078_v3 = vld [vmem:[#allocation11 + $0xb88] sm:$0xff] }
 0x45f   :  { %2000 = vmatpush.msrb.mxu3 %v1943_v1  ;;  %1976 = vmatpush.msrb.mxu2 %v1931_v6  ;;  %v1872_v1 = vld [vmem:[#allocation8 + $0x120] sm:$0xff] }
 0x460   :  { %v2077_v6 = vld [vmem:[#allocation11 + $0xb80] sm:$0xff] }
 0x461   :  { %2001 = vmatpush.msrb.mxu3 %v1942_v4  ;;  %1977 = vmatpush.msrb.mxu2 %v1930_v14  ;;  %v2076_v4 = vld [vmem:[#allocation11 + $0xb78] sm:$0xff]  ;;  %v2075_v14 = vld [vmem:[#allocation11 + $0xb70] sm:$0xff] }
 0x463   :  { %2002 = vmatpush.msrb.mxu3 %v1941_v13  ;;  %1978 = vmatpush.msrb.mxu2 %v1929_v15  ;;  %v2100_v13 = vld.sshfl [vmem:[#allocation1 + $0x8] sm:$0xff pattern:$0x73625140]  ;;  %v2074_v15 = vld [vmem:[#allocation11 + $0xb68] sm:$0xff] }
 0x464   :  { %2003 = vmatmul.f32.vlgmr.msrb.gmra.mxu3 %v1964_v34  ;;  %9566 = vmatmul.msk.f32.gmra.mxu2 %vm746_vm1, %v1739_v16  ;;  %v2087_v34 = vld [vmem:[#allocation11 + $0xbd0] sm:$0xff]  ;;  %v2073_v16 = vld [vmem:[#allocation11 + $0xb60] sm:$0xff] }
 0x465   :  { %1979 = vmatpush.msrb.mxu2 %v1928_v19  ;;  %v2099_v19 = vld.sshfl [vmem:[#allocation1] sm:$0xff pattern:$0x73625140] }
 0x466   :  { %v1868_v52 = vpop.f32.mrf.mxu0  ;;  %2234 = vst [vmem:[#allocation1] ss:$4 sm:$0xff] %v11427_v46 }
 0x467   :  { %1980 = vmatpush.msrb.mxu2 %v1927_v20 }
 0x469   :  { %1981 = vmatpush.msrb.mxu2 %v1926_v21  ;;  %v1873_v21 = vld [vmem:[#allocation8 + $0x128] sm:$0xff] }
 0x46b   :  { %1982 = vmatpush.msrb.mxu2 %v1925_v22  ;;  %v2072_v22 = vld [vmem:[#allocation11 + $0xb58] sm:$0xff] }
 0x46c   :  { %1983 = vmatmul.f32.vlgmr.msrb.gmra.mxu2 %v1963_v33  ;;  %v2085_v33 = vld [vmem:[#allocation11 + $0xbc0] sm:$0xff] }
 0x46d   :  { %2123 = vmatpush.msra.mxu2 %v2092_v24  ;;  %v2071_v24 = vld [vmem:[#allocation11 + $0xb50] sm:$0xff] }
 0x46f   :  { %2124 = vmatpush.msra.mxu2 %v2091_v25  ;;  %v2070_v25 = vld [vmem:[#allocation11 + $0xb48] sm:$0xff] }
 0x471   :  { %2125 = vmatpush.msra.mxu2 %v2090_v28  ;;  %v2069_v28 = vld [vmem:[#allocation11 + $0xb40] sm:$0xff] }
 0x473   :  { %2126 = vmatpush.msra.mxu2 %v2089_v29 }
 0x475   :  { %2127 = vmatpush.msra.mxu2 %v2088_v31  ;;  %v1874_v31 = vld [vmem:[#allocation8 + $0x130] sm:$0xff] }
 0x477   :  { %2128 = vmatpush.msra.mxu2 %v2087_v34  ;;  %v2068_v34 = vld [vmem:[#allocation11 + $0xb38] sm:$0xff] }
 0x479   :  { %2129 = vmatpush.msra.mxu2 %v2086_v36  ;;  %v2067_v36 = vld [vmem:[#allocation11 + $0xb30] sm:$0xff] }
 0x47b   :  { %2130 = vmatpush.msra.mxu2 %v2085_v33  ;;  %v2066_v33 = vld [vmem:[#allocation11 + $0xb28] sm:$0xff] }
 0x47d   :  { %2131 = vmatpush.msra.mxu2 %v2084_v37  ;;  %v2065_v37 = vld [vmem:[#allocation11 + $0xb20] sm:$0xff] }
 0x47f   :  { %2132 = vmatpush.msra.mxu2 %v2083_v40 }
 0x481   :  { %2133 = vmatpush.msra.mxu2 %v2082_v42  ;;  %v1875_v42 = vld [vmem:[#allocation8 + $0x138] sm:$0xff] }
 0x483   :  { %2134 = vmatpush.msra.mxu2 %v2081_v43  ;;  %v2064_v43 = vld [vmem:[#allocation11 + $0xb18] sm:$0xff] }
 0x485   :  { %2135 = vmatpush.msra.mxu2 %v2080_v48  ;;  %v2062_v48 = vld [vmem:[#allocation11 + $0xb08] sm:$0xff] }
 0x487   :  { %2136 = vmatpush.msra.mxu2 %v2079_v49  ;;  %v2061_v49 = vld [vmem:[#allocation11 + $0xb00] sm:$0xff] }
 0x489   :  { %2137 = vmatpush.msra.mxu2 %v2078_v3  ;;  %v2225_v3 = vld [vmem:[#allocation11 + $0xce0] sm:$0xff] }
 0x48b   :  { %2138 = vmatpush.msra.mxu2 %v2077_v6 }
 0x48c   :  { %2139 = vmatmul.f32.vlgmr.msra.gmra.mxu2 %v2100_v13 }
 0x4a7   :  { %v11542_v23 = vpop.f32.mrf.mxu3 }
 0x4af   :  { %v11544_v26 = vpop.f32.mrf.mxu3 }
 0x4b7   :  { %v11546_v35 = vpop.f32.mrf.mxu3 }
 0x4bf   :  { %v11548_v41 = vpop.f32.mrf.mxu3 }
 0x4c7   :  { %v1848_v50 = vpop.f32.mrf.mxu3 }
 0x4c8   :  { %v1849_v60 = vadd.f32 %v10230_v44, %v1848_v50  ;;  %v2063_v44 = vld [vmem:[#allocation11 + $0xb10] sm:$0xff] }
 0x4ca   :  { %v1869_v62 = vadd.f32 %v1868_v52, %v1849_v60  ;;  %v2228_v52 = vld [vmem:[#allocation11 + $0xcf8] sm:$0xff]  ;;  %v2227_v60 = vld [vmem:[#allocation11 + $0xcf0] sm:$0xff] }
 0x4cc   :  { %9567 = vmatpush.msk.msrb.mxu1 %vm759_vm0, %v1869_v62  ;;  %v10231_v62 = vld [vmem:[#allocation13 + $0xa] ss:$0 sm:$0xff] }
 0x4cd   :  { %9568 = vmatmul.msk.f32.vlgmr.msrb.gmra.mxu1 %vm746_vm1, %v1872_v1  ;;  %v2226_v1 = vld [vmem:[#allocation11 + $0xce8] sm:$0xff] }
 0x4ce   :  { %2103 = vmatpush.msra.mxu1 %v2076_v4 }
 0x4cf   :  { %v11552_v20 = vpop.f32.mrf.mxu2 }
 0x4d0   :  { %2104 = vmatpush.msra.mxu1 %v2075_v14  ;;  %v2224_v14 = vld [vmem:[#allocation11 + $0xcd8] sm:$0xff] }
 0x4d2   :  { %2105 = vmatpush.msra.mxu1 %v2074_v15 }
 0x4d4   :  { %2106 = vmatpush.msra.mxu1 %v2073_v16  ;;  %v2008_v16 = vld [vmem:[#allocation8 + $0x140] sm:$0xff] }
 0x4d5   :  { %9569 = vmatmul.msk.f32.gmra.mxu1 %vm746_vm1, %v1873_v21  ;;  %v2223_v21 = vld [vmem:[#allocation11 + $0xcd0] sm:$0xff] }
 0x4d6   :  { %2107 = vmatpush.msra.mxu1 %v2072_v22  ;;  %v2212_v22 = vld [vmem:[#allocation11 + $0xc78] sm:$0xff] }
 0x4d7   :  { %v11556_v29 = vpop.f32.mrf.mxu2 }
 0x4d8   :  { %2108 = vmatpush.msra.mxu1 %v2071_v24  ;;  %v2222_v24 = vld [vmem:[#allocation11 + $0xcc8] sm:$0xff] }
 0x4da   :  { %2109 = vmatpush.msra.mxu1 %v2070_v25  ;;  %v2235_v25 = vld.sshfl [vmem:[#allocation1] sm:$0xff pattern:$0x73625140] }
 0x4dc   :  { %2110 = vmatpush.msra.mxu1 %v2069_v28  ;;  %v2236_v28 = vld.sshfl [vmem:[#allocation1 + $0x8] sm:$0xff pattern:$0x73625140] }
 0x4dd   :  { %9570 = vmatmul.msk.f32.gmra.mxu1 %vm746_vm1, %v1874_v31  ;;  %v2221_v31 = vld [vmem:[#allocation11 + $0xcc0] sm:$0xff]  ;;  %2370 = vst [vmem:[#allocation1] ss:$4 sm:$0xff] %v11427_v46 }
 0x4de   :  { %2111 = vmatpush.msra.mxu1 %v2068_v34  ;;  %v2210_v34 = vld [vmem:[#allocation11 + $0xc68] sm:$0xff] }
 0x4df   :  { %v11559_v40 = vpop.f32.mrf.mxu2 }
 0x4e0   :  { %2112 = vmatpush.msra.mxu1 %v2067_v36  ;;  %v2220_v36 = vld [vmem:[#allocation11 + $0xcb8] sm:$0xff] }
 0x4e2   :  { %2113 = vmatpush.msra.mxu1 %v2066_v33  ;;  %v2209_v33 = vld [vmem:[#allocation11 + $0xc60] sm:$0xff] }
 0x4e4   :  { %2114 = vmatpush.msra.mxu1 %v2065_v37  ;;  %v2009_v37 = vld [vmem:[#allocation8 + $0x148] sm:$0xff] }
 0x4e5   :  { %9571 = vmatmul.msk.f32.gmra.mxu1 %vm746_vm1, %v1875_v42  ;;  %v2219_v42 = vld [vmem:[#allocation11 + $0xcb0] sm:$0xff] }
 0x4e6   :  { %2115 = vmatpush.msra.mxu1 %v2064_v43  ;;  %v2208_v43 = vld [vmem:[#allocation11 + $0xc58] sm:$0xff] }
 0x4e7   :  { %v11562_v50 = vpop.f32.mrf.mxu2  ;;  %v2004_v6 = vpop.f32.mrf.mxu3 }
 0x4e8   :  { %2116 = vmatpush.msra.mxu1 %v2063_v44  ;;  %v2218_v44 = vld [vmem:[#allocation11 + $0xca8] sm:$0xff] }
 0x4ea   :  { %2117 = vmatpush.msra.mxu1 %v2062_v48  ;;  %v2207_v48 = vld [vmem:[#allocation11 + $0xc50] sm:$0xff] }
 0x4ec   :  { %2118 = vmatpush.msra.mxu1 %v2061_v49  ;;  %v2217_v49 = vld [vmem:[#allocation11 + $0xca0] sm:$0xff] }
 0x4ed   :  { %2119 = vmatmul.f32.vlgmr.msra.gmra.mxu1 %v2099_v19  ;;  %v2211_v19 = vld [vmem:[#allocation11 + $0xc70] sm:$0xff] }
 0x4ee   :  { %2259 = vmatpush.msrb.mxu1 %v2228_v52  ;;  %v2206_v52 = vld [vmem:[#allocation11 + $0xc48] sm:$0xff] }
 0x4ef   :  { %v1984_v4 = vpop.f32.mrf.mxu2 }
 0x4f0   :  { %2260 = vmatpush.msrb.mxu1 %v2227_v60  ;;  %v1985_v13 = vadd.f32 %v10231_v62, %v1984_v4  ;;  %v2216_v60 = vld [vmem:[#allocation11 + $0xc98] sm:$0xff]  ;;  %v2205_v62 = vld [vmem:[#allocation11 + $0xc40] sm:$0xff] }
 0x4f1   :  { %v2204_v4 = vld [vmem:[#allocation11 + $0xc38] sm:$0xff] }
 0x4f2   :  { %2261 = vmatpush.msrb.mxu1 %v2226_v1  ;;  %v2005_v15 = vadd.f32 %v2004_v6, %v1985_v13  ;;  %v2010_v1 = vld [vmem:[#allocation8 + $0x150] sm:$0xff]  ;;  %v2214_v6 = vld [vmem:[#allocation11 + $0xc88] sm:$0xff] }
 0x4f3   :  { %v2203_v13 = vld [vmem:[#allocation11 + $0xc30] sm:$0xff] }
 0x4f4   :  { %2262 = vmatpush.msrb.mxu1 %v2225_v3  ;;  %9572 = vmatpush.msk.msra.mxu0 %vm759_vm0, %v2005_v15  ;;  %v2215_v3 = vld [vmem:[#allocation11 + $0xc90] sm:$0xff]  ;;  %v2202_v15 = vld [vmem:[#allocation11 + $0xc28] sm:$0xff] }
 0x4f5   :  { %9573 = vmatmul.msk.f32.vlgmr.msra.gmra.mxu0 %vm746_vm1, %v2008_v16  ;;  %v2201_v16 = vld [vmem:[#allocation11 + $0xc20] sm:$0xff] }
 0x4f6   :  { %2263 = vmatpush.msrb.mxu1 %v2224_v14  ;;  %2239 = vmatpush.msrb.mxu0 %v2212_v22  ;;  %v2213_v14 = vld [vmem:[#allocation11 + $0xc80] sm:$0xff]  ;;  %v2200_v22 = vld [vmem:[#allocation11 + $0xc18] sm:$0xff] }
 0x4f8   :  { %2264 = vmatpush.msrb.mxu1 %v2223_v21  ;;  %2240 = vmatpush.msrb.mxu0 %v2211_v19  ;;  %v2011_v21 = vld [vmem:[#allocation8 + $0x158] sm:$0xff]  ;;  %v2199_v19 = vld [vmem:[#allocation11 + $0xc10] sm:$0xff] }
 0x4fa   :  { %2265 = vmatpush.msrb.mxu1 %v2222_v24  ;;  %2241 = vmatpush.msrb.mxu0 %v2210_v34  ;;  %v2198_v24 = vld [vmem:[#allocation11 + $0xc08] sm:$0xff] }
 0x4fc   :  { %2266 = vmatpush.msrb.mxu1 %v2221_v31  ;;  %2242 = vmatpush.msrb.mxu0 %v2209_v33  ;;  %v2197_v31 = vld [vmem:[#allocation11 + $0xc00] sm:$0xff] }
 0x4fd   :  { %9574 = vmatmul.msk.f32.gmra.mxu0 %vm746_vm1, %v2009_v37  ;;  %v2364_v37 = vld [vmem:[#allocation11 + $0xdf8] sm:$0xff] }
 0x4fe   :  { %2267 = vmatpush.msrb.mxu1 %v2220_v36  ;;  %2243 = vmatpush.msrb.mxu0 %v2208_v43  ;;  %v2361_v43 = vld [vmem:[#allocation11 + $0xde0] sm:$0xff] }
 0x500   :  { %2268 = vmatpush.msrb.mxu1 %v2219_v42  ;;  %2244 = vmatpush.msrb.mxu0 %v2207_v48  ;;  %v2362_v42 = vld [vmem:[#allocation11 + $0xde8] sm:$0xff]  ;;  %v2360_v48 = vld [vmem:[#allocation11 + $0xdd8] sm:$0xff] }
 0x502   :  { %2269 = vmatpush.msrb.mxu1 %v2218_v44  ;;  %2245 = vmatpush.msrb.mxu0 %v2206_v52  ;;  %v2358_v52 = vld [vmem:[#allocation11 + $0xdc8] sm:$0xff] }
 0x504   :  { %2270 = vmatpush.msrb.mxu1 %v2217_v49  ;;  %2246 = vmatpush.msrb.mxu0 %v2205_v62  ;;  %v2359_v49 = vld [vmem:[#allocation11 + $0xdd0] sm:$0xff] }
 0x505   :  { %9575 = vmatmul.msk.f32.gmra.mxu0 %vm746_vm1, %v2010_v1 }
 0x506   :  { %2271 = vmatpush.msrb.mxu1 %v2216_v60  ;;  %2247 = vmatpush.msrb.mxu0 %v2204_v4  ;;  %v2357_v60 = vld [vmem:[#allocation11 + $0xdc0] sm:$0xff] }
 0x508   :  { %2272 = vmatpush.msrb.mxu1 %v2215_v3  ;;  %2248 = vmatpush.msrb.mxu0 %v2203_v13  ;;  %v2356_v13 = vld [vmem:[#allocation11 + $0xdb8] sm:$0xff] }
 0x50a   :  { %2273 = vmatpush.msrb.mxu1 %v2214_v6  ;;  %2249 = vmatpush.msrb.mxu0 %v2202_v15  ;;  %v2144_v6 = vld [vmem:[#allocation8 + $0x160] sm:$0xff]  ;;  %v2355_v15 = vld [vmem:[#allocation11 + $0xdb0] sm:$0xff] }
 0x50c   :  { %2274 = vmatpush.msrb.mxu1 %v2213_v14  ;;  %2250 = vmatpush.msrb.mxu0 %v2201_v16  ;;  %v2348_v14 = vld [vmem:[#allocation11 + $0xd78] sm:$0xff]  ;;  %v2354_v16 = vld [vmem:[#allocation11 + $0xda8] sm:$0xff] }
 0x50d   :  { %2275 = vmatmul.f32.vlgmr.msrb.gmra.mxu1 %v2236_v28  ;;  %9576 = vmatmul.msk.f32.gmra.mxu0 %vm746_vm1, %v2011_v21  ;;  %v2363_v28 = vld [vmem:[#allocation11 + $0xdf0] sm:$0xff] }
 0x50e   :  { %2251 = vmatpush.msrb.mxu0 %v2200_v22  ;;  %v2347_v21 = vld [vmem:[#allocation11 + $0xd70] sm:$0xff]  ;;  %v2353_v22 = vld [vmem:[#allocation11 + $0xda0] sm:$0xff] }
 0x50f   :  { %v2140_v1 = vpop.f32.mrf.mxu2 }
 0x510   :  { %2252 = vmatpush.msrb.mxu0 %v2199_v19  ;;  %v2346_v19 = vld [vmem:[#allocation11 + $0xd68] sm:$0xff] }
 0x512   :  { %2253 = vmatpush.msrb.mxu0 %v2198_v24  ;;  %v2345_v24 = vld [vmem:[#allocation11 + $0xd60] sm:$0xff] }
 0x514   :  { %2254 = vmatpush.msrb.mxu0 %v2197_v31 }
 0x515   :  { %2255 = vmatmul.f32.vlgmr.msrb.gmra.mxu0 %v2235_v25  ;;  %v10232_v25 = vld [vmem:[#allocation13 + $0xb] ss:$0 sm:$0xff] }
 0x516   :  { %2395 = vmatpush.msra.mxu0 %v2364_v37  ;;  %v2145_v37 = vld [vmem:[#allocation8 + $0x168] sm:$0xff] }
 0x518   :  { %2396 = vmatpush.msra.mxu0 %v2363_v28  ;;  %v2352_v28 = vld [vmem:[#allocation11 + $0xd98] sm:$0xff] }
 0x51a   :  { %2397 = vmatpush.msra.mxu0 %v2362_v42  ;;  %v2344_v42 = vld [vmem:[#allocation11 + $0xd58] sm:$0xff] }
 0x51c   :  { %2398 = vmatpush.msra.mxu0 %v2361_v43  ;;  %v2351_v43 = vld [vmem:[#allocation11 + $0xd90] sm:$0xff] }
 0x51e   :  { %2399 = vmatpush.msra.mxu0 %v2360_v48  ;;  %v2343_v48 = vld [vmem:[#allocation11 + $0xd50] sm:$0xff] }
 0x520   :  { %2400 = vmatpush.msra.mxu0 %v2359_v49  ;;  %v2350_v49 = vld [vmem:[#allocation11 + $0xd88] sm:$0xff] }
 0x522   :  { %2401 = vmatpush.msra.mxu0 %v2358_v52  ;;  %v2341_v52 = vld [vmem:[#allocation11 + $0xd40] sm:$0xff] }
 0x524   :  { %2402 = vmatpush.msra.mxu0 %v2357_v60  ;;  %v2349_v60 = vld [vmem:[#allocation11 + $0xd80] sm:$0xff] }
 0x526   :  { %2403 = vmatpush.msra.mxu0 %v2356_v13  ;;  %v2339_v13 = vld [vmem:[#allocation11 + $0xd30] sm:$0xff] }
 0x528   :  { %2404 = vmatpush.msra.mxu0 %v2355_v15  ;;  %v2337_v15 = vld [vmem:[#allocation11 + $0xd20] sm:$0xff] }
 0x52a   :  { %2405 = vmatpush.msra.mxu0 %v2354_v16 }
 0x52c   :  { %2406 = vmatpush.msra.mxu0 %v2353_v22  ;;  %v2336_v22 = vld [vmem:[#allocation11 + $0xd18] sm:$0xff] }
 0x52e   :  { %2407 = vmatpush.msra.mxu0 %v2352_v28 }
 0x530   :  { %2408 = vmatpush.msra.mxu0 %v2351_v43  ;;  %v2499_v43 = vld [vmem:[#allocation11 + $0xef0] sm:$0xff] }
 0x532   :  { %2409 = vmatpush.msra.mxu0 %v2350_v49  ;;  %v2498_v49 = vld [vmem:[#allocation11 + $0xee8] sm:$0xff] }
 0x534   :  { %2410 = vmatpush.msra.mxu0 %v2349_v60 }
 0x54a   :  { %v11570_v34 = vpop.f32.mrf.mxu1 }
 0x552   :  { %v11572_v36 = vpop.f32.mrf.mxu1 }
 0x55a   :  { %v11574_v33 = vpop.f32.mrf.mxu1 }
 0x562   :  { %v11576_v44 = vpop.f32.mrf.mxu1 }
 0x56a   :  { %v2120_v62 = vpop.f32.mrf.mxu1 }
 0x56b   :  { %v2121_v3 = vadd.f32 %v10232_v25, %v2120_v62  ;;  %v2342_v25 = vld [vmem:[#allocation11 + $0xd48] sm:$0xff]  ;;  %v2371_v62 = vld.sshfl [vmem:[#allocation1] sm:$0xff pattern:$0x73625140] }
 0x56d   :  { %v2141_v4 = vadd.f32 %v2140_v1, %v2121_v3  ;;  %v2372_v1 = vld.sshfl [vmem:[#allocation1 + $0x8] sm:$0xff pattern:$0x73625140] }
 0x56e   :  { %2411 = vmatmul.f32.vlgmr.msra.gmra.mxu0 %v2372_v1  ;;  %2506 = vst [vmem:[#allocation1] ss:$4 sm:$0xff] %v11427_v46 }
 0x56f   :  { %9577 = vmatpush.msk.msra.mxu3 %vm759_vm0, %v2141_v4  ;;  %v2146_v4 = vld [vmem:[#allocation8 + $0x170] sm:$0xff] }
 0x570   :  { %9578 = vmatmul.msk.f32.vlgmr.msra.gmra.mxu3 %vm746_vm1, %v2144_v6  ;;  %v2340_v6 = vld [vmem:[#allocation11 + $0xd38] sm:$0xff] }
 0x571   :  { %2375 = vmatpush.msrb.mxu3 %v2348_v14  ;;  %v2338_v14 = vld [vmem:[#allocation11 + $0xd28] sm:$0xff] }
 0x572   :  { %v11580_v31 = vpop.f32.mrf.mxu0 }
 0x573   :  { %2376 = vmatpush.msrb.mxu3 %v2347_v21  ;;  %v2147_v21 = vld [vmem:[#allocation8 + $0x178] sm:$0xff] }
 0x575   :  { %2377 = vmatpush.msrb.mxu3 %v2346_v19  ;;  %v2335_v19 = vld [vmem:[#allocation11 + $0xd10] sm:$0xff] }
 0x577   :  { %2378 = vmatpush.msrb.mxu3 %v2345_v24  ;;  %v2334_v24 = vld [vmem:[#allocation11 + $0xd08] sm:$0xff] }
 0x578   :  { %9579 = vmatmul.msk.f32.gmra.mxu3 %vm746_vm1, %v2145_v37  ;;  %v2333_v37 = vld [vmem:[#allocation11 + $0xd00] sm:$0xff] }
 0x579   :  { %2379 = vmatpush.msrb.mxu3 %v2344_v42  ;;  %v2500_v42 = vld [vmem:[#allocation11 + $0xef8] sm:$0xff] }
 0x57a   :  { %v11583_v3 = vpop.f32.mrf.mxu0 }
 0x57b   :  { %2380 = vmatpush.msrb.mxu3 %v2343_v48  ;;  %v10233_v48 = vld [vmem:[#allocation13 + $0xc] ss:$0 sm:$0xff] }
 0x57d   :  { %2381 = vmatpush.msrb.mxu3 %v2342_v25  ;;  %v2497_v25 = vld [vmem:[#allocation11 + $0xee0] sm:$0xff] }
 0x57f   :  { %2382 = vmatpush.msrb.mxu3 %v2341_v52 }
 0x580   :  { %9580 = vmatmul.msk.f32.gmra.mxu3 %vm746_vm1, %v2146_v4  ;;  %v2496_v4 = vld [vmem:[#allocation11 + $0xed8] sm:$0xff] }
 0x581   :  { %2383 = vmatpush.msrb.mxu3 %v2340_v6 }
 0x582   :  { %v11587_v16 = vpop.f32.mrf.mxu0 }
 0x583   :  { %2384 = vmatpush.msrb.mxu3 %v2339_v13  ;;  %v2280_v13 = vld [vmem:[#allocation8 + $0x180] sm:$0xff] }
 0x585   :  { %2385 = vmatpush.msrb.mxu3 %v2338_v14  ;;  %v2495_v14 = vld [vmem:[#allocation11 + $0xed0] sm:$0xff] }
 0x587   :  { %2386 = vmatpush.msrb.mxu3 %v2337_v15  ;;  %v2484_v15 = vld [vmem:[#allocation11 + $0xe78] sm:$0xff] }
 0x588   :  { %9581 = vmatmul.msk.f32.gmra.mxu3 %vm746_vm1, %v2147_v21  ;;  %v2494_v21 = vld [vmem:[#allocation11 + $0xec8] sm:$0xff] }
 0x589   :  { %2387 = vmatpush.msrb.mxu3 %v2336_v22  ;;  %v2507_v22 = vld.sshfl [vmem:[#allocation1] sm:$0xff pattern:$0x73625140] }
 0x58a   :  { %v11590_v28 = vpop.f32.mrf.mxu0  ;;  %v2276_v60 = vpop.f32.mrf.mxu1 }
 0x58b   :  { %2388 = vmatpush.msrb.mxu3 %v2335_v19  ;;  %v2508_v19 = vld.sshfl [vmem:[#allocation1 + $0x8] sm:$0xff pattern:$0x73625140] }
 0x58c   :  { %2642 = vst [vmem:[#allocation1] ss:$4 sm:$0xff] %v11427_v46 }
 0x58d   :  { %2389 = vmatpush.msrb.mxu3 %v2334_v24  ;;  %v2493_v24 = vld [vmem:[#allocation11 + $0xec0] sm:$0xff] }
 0x58f   :  { %2390 = vmatpush.msrb.mxu3 %v2333_v37  ;;  %v2482_v37 = vld [vmem:[#allocation11 + $0xe68] sm:$0xff] }
 0x590   :  { %2391 = vmatmul.f32.vlgmr.msrb.gmra.mxu3 %v2371_v62  ;;  %v2483_v62 = vld [vmem:[#allocation11 + $0xe70] sm:$0xff] }
 0x591   :  { %2531 = vmatpush.msra.mxu3 %v2500_v42  ;;  %v2492_v42 = vld [vmem:[#allocation11 + $0xeb8] sm:$0xff] }
 0x592   :  { %v2256_v52 = vpop.f32.mrf.mxu0 }
 0x593   :  { %2532 = vmatpush.msra.mxu3 %v2499_v43  ;;  %v2257_v1 = vadd.f32 %v10233_v48, %v2256_v52  ;;  %v2481_v43 = vld [vmem:[#allocation11 + $0xe60] sm:$0xff]  ;;  %v2281_v48 = vld [vmem:[#allocation8 + $0x188] sm:$0xff] }
 0x594   :  { %v2490_v52 = vld [vmem:[#allocation11 + $0xea8] sm:$0xff] }
 0x595   :  { %2533 = vmatpush.msra.mxu3 %v2498_v49  ;;  %v2277_v6 = vadd.f32 %v2276_v60, %v2257_v1  ;;  %v2491_v49 = vld [vmem:[#allocation11 + $0xeb0] sm:$0xff]  ;;  %v2489_v1 = vld [vmem:[#allocation11 + $0xea0] sm:$0xff] }
 0x596   :  { %v2479_v60 = vld [vmem:[#allocation11 + $0xe50] sm:$0xff] }
 0x597   :  { %2534 = vmatpush.msra.mxu3 %v2497_v25  ;;  %9582 = vmatpush.msk.msrb.mxu2 %vm759_vm0, %v2277_v6  ;;  %v2480_v25 = vld [vmem:[#allocation11 + $0xe58] sm:$0xff] }
 0x598   :  { %9583 = vmatmul.msk.f32.vlgmr.msrb.gmra.mxu2 %vm746_vm1, %v2280_v13  ;;  %v2488_v6 = vld [vmem:[#allocation11 + $0xe98] sm:$0xff]  ;;  %v2477_v13 = vld [vmem:[#allocation11 + $0xe40] sm:$0xff] }
 0x599   :  { %2535 = vmatpush.msra.mxu3 %v2496_v4  ;;  %2511 = vmatpush.msra.mxu2 %v2484_v15  ;;  %v2478_v4 = vld [vmem:[#allocation11 + $0xe48] sm:$0xff]  ;;  %v2487_v15 = vld [vmem:[#allocation11 + $0xe90] sm:$0xff] }
 0x59b   :  { %2536 = vmatpush.msra.mxu3 %v2495_v14  ;;  %2512 = vmatpush.msra.mxu2 %v2483_v62  ;;  %v2282_v14 = vld [vmem:[#allocation8 + $0x190] sm:$0xff]  ;;  %v2476_v62 = vld [vmem:[#allocation11 + $0xe38] sm:$0xff] }
 0x59d   :  { %2537 = vmatpush.msra.mxu3 %v2494_v21  ;;  %2513 = vmatpush.msra.mxu2 %v2482_v37  ;;  %v2486_v21 = vld [vmem:[#allocation11 + $0xe88] sm:$0xff]  ;;  %v2485_v37 = vld [vmem:[#allocation11 + $0xe80] sm:$0xff] }
 0x59f   :  { %2538 = vmatpush.msra.mxu3 %v2493_v24  ;;  %2514 = vmatpush.msra.mxu2 %v2481_v43  ;;  %v2475_v24 = vld [vmem:[#allocation11 + $0xe30] sm:$0xff]  ;;  %v2473_v43 = vld [vmem:[#allocation11 + $0xe20] sm:$0xff] }
 0x5a0   :  { %9584 = vmatmul.msk.f32.gmra.mxu2 %vm746_vm1, %v2281_v48  ;;  %v2283_v48 = vld [vmem:[#allocation8 + $0x198] sm:$0xff] }
 0x5a1   :  { %2539 = vmatpush.msra.mxu3 %v2492_v42  ;;  %2515 = vmatpush.msra.mxu2 %v2480_v25  ;;  %v2474_v42 = vld [vmem:[#allocation11 + $0xe28] sm:$0xff]  ;;  %v2471_v25 = vld [vmem:[#allocation11 + $0xe10] sm:$0xff] }
 0x5a3   :  { %2540 = vmatpush.msra.mxu3 %v2491_v49  ;;  %2516 = vmatpush.msra.mxu2 %v2479_v60  ;;  %v2472_v49 = vld [vmem:[#allocation11 + $0xe18] sm:$0xff]  ;;  %v2469_v60 = vld [vmem:[#allocation11 + $0xe00] sm:$0xff] }
 0x5a5   :  { %2541 = vmatpush.msra.mxu3 %v2490_v52  ;;  %2517 = vmatpush.msra.mxu2 %v2478_v4  ;;  %v2470_v52 = vld [vmem:[#allocation11 + $0xe08] sm:$0xff]  ;;  %v2636_v4 = vld [vmem:[#allocation11 + $0xff8] sm:$0xff] }
 0x5a7   :  { %2542 = vmatpush.msra.mxu3 %v2489_v1  ;;  %2518 = vmatpush.msra.mxu2 %v2477_v13 }
 0x5a8   :  { %9585 = vmatmul.msk.f32.gmra.mxu2 %vm746_vm1, %v2282_v14  ;;  %v2633_v14 = vld [vmem:[#allocation11 + $0xfe0] sm:$0xff] }
 0x5a9   :  { %2543 = vmatpush.msra.mxu3 %v2488_v6  ;;  %2519 = vmatpush.msra.mxu2 %v2476_v62  ;;  %v2635_v6 = vld [vmem:[#allocation11 + $0xff0] sm:$0xff] }
 0x5aa   :  { %v2631_v62 = vld [vmem:[#allocation11 + $0xfd0] sm:$0xff] }
 0x5ab   :  { %2544 = vmatpush.msra.mxu3 %v2487_v15  ;;  %2520 = vmatpush.msra.mxu2 %v2475_v24  ;;  %v2632_v15 = vld [vmem:[#allocation11 + $0xfd8] sm:$0xff]  ;;  %v2630_v24 = vld [vmem:[#allocation11 + $0xfc8] sm:$0xff] }
 0x5ad   :  { %2545 = vmatpush.msra.mxu3 %v2486_v21  ;;  %2521 = vmatpush.msra.mxu2 %v2474_v42  ;;  %v2627_v42 = vld [vmem:[#allocation11 + $0xfb0] sm:$0xff] }
 0x5af   :  { %2546 = vmatpush.msra.mxu3 %v2485_v37  ;;  %2522 = vmatpush.msra.mxu2 %v2473_v43  ;;  %v2628_v37 = vld [vmem:[#allocation11 + $0xfb8] sm:$0xff] }
 0x5b0   :  { %2547 = vmatmul.f32.vlgmr.msra.gmra.mxu3 %v2508_v19  ;;  %9586 = vmatmul.msk.f32.gmra.mxu2 %vm746_vm1, %v2283_v48  ;;  %v2634_v19 = vld [vmem:[#allocation11 + $0xfe8] sm:$0xff] }
 0x5b1   :  { %2523 = vmatpush.msra.mxu2 %v2472_v49  ;;  %v2626_v48 = vld [vmem:[#allocation11 + $0xfa8] sm:$0xff]  ;;  %v2625_v49 = vld [vmem:[#allocation11 + $0xfa0] sm:$0xff] }
 0x5b3   :  { %2524 = vmatpush.msra.mxu2 %v2471_v25  ;;  %v10234_v25 = vld [vmem:[#allocation13 + $0xd] ss:$0 sm:$0xff] }
 0x5b5   :  { %2525 = vmatpush.msra.mxu2 %v2470_v52  ;;  %v2624_v52 = vld [vmem:[#allocation11 + $0xf98] sm:$0xff] }
 0x5b7   :  { %2526 = vmatpush.msra.mxu2 %v2469_v60  ;;  %v2623_v60 = vld [vmem:[#allocation11 + $0xf90] sm:$0xff] }
 0x5b8   :  { %2527 = vmatmul.f32.vlgmr.msra.gmra.mxu2 %v2507_v22  ;;  %v2629_v22 = vld [vmem:[#allocation11 + $0xfc0] sm:$0xff] }
 0x5b9   :  { %2667 = vmatpush.msrb.mxu2 %v2636_v4 }
 0x5bb   :  { %2668 = vmatpush.msrb.mxu2 %v2635_v6 }
 0x5bd   :  { %2669 = vmatpush.msrb.mxu2 %v2634_v19 }
 0x5bf   :  { %2670 = vmatpush.msrb.mxu2 %v2633_v14 }
 0x5c1   :  { %2671 = vmatpush.msrb.mxu2 %v2632_v15  ;;  %v2416_v15 = vld [vmem:[#allocation8 + $0x1a0] sm:$0xff] }
 0x5c3   :  { %2672 = vmatpush.msrb.mxu2 %v2631_v62  ;;  %v2622_v62 = vld [vmem:[#allocation11 + $0xf88] sm:$0xff] }
 0x5c5   :  { %2673 = vmatpush.msrb.mxu2 %v2630_v24  ;;  %v2620_v24 = vld [vmem:[#allocation11 + $0xf78] sm:$0xff] }
 0x5c7   :  { %2674 = vmatpush.msrb.mxu2 %v2629_v22  ;;  %v2621_v22 = vld [vmem:[#allocation11 + $0xf80] sm:$0xff] }
 0x5c9   :  { %2675 = vmatpush.msrb.mxu2 %v2628_v37  ;;  %v2644_v37 = vld.sshfl [vmem:[#allocation1 + $0x8] sm:$0xff pattern:$0x73625140] }
 0x5cb   :  { %2676 = vmatpush.msrb.mxu2 %v2627_v42  ;;  %v2619_v42 = vld [vmem:[#allocation11 + $0xf70] sm:$0xff] }
 0x5cd   :  { %2677 = vmatpush.msrb.mxu2 %v2626_v48  ;;  %v2618_v48 = vld [vmem:[#allocation11 + $0xf68] sm:$0xff] }
 0x5cf   :  { %2678 = vmatpush.msrb.mxu2 %v2625_v49  ;;  %v2617_v49 = vld [vmem:[#allocation11 + $0xf60] sm:$0xff] }
 0x5d1   :  { %2679 = vmatpush.msrb.mxu2 %v2624_v52  ;;  %v2417_v52 = vld [vmem:[#allocation8 + $0x1a8] sm:$0xff] }
 0x5d3   :  { %2680 = vmatpush.msrb.mxu2 %v2623_v60  ;;  %v2616_v60 = vld [vmem:[#allocation11 + $0xf58] sm:$0xff] }
 0x5d5   :  { %2681 = vmatpush.msrb.mxu2 %v2622_v62  ;;  %v2612_v62 = vld [vmem:[#allocation11 + $0xf38] sm:$0xff] }
 0x5d7   :  { %2682 = vmatpush.msrb.mxu2 %v2621_v22  ;;  %v2610_v22 = vld [vmem:[#allocation11 + $0xf28] sm:$0xff] }
 0x5d8   :  { %2683 = vmatmul.f32.vlgmr.msrb.gmra.mxu2 %v2644_v37  ;;  %v2609_v37 = vld [vmem:[#allocation11 + $0xf20] sm:$0xff] }
 0x5eb   :  { %v2412_v6 = vpop.f32.mrf.mxu0 }
 0x5f3   :  { %v11598_v1 = vpop.f32.mrf.mxu3 }
 0x5fb   :  { %v11600_v13 = vpop.f32.mrf.mxu3 }
 0x603   :  { %v11602_v21 = vpop.f32.mrf.mxu3 }
 0x60b   :  { %v11604_v43 = vpop.f32.mrf.mxu3 }
 0x60c   :  { %13520 = vst [vmem:[#allocation77_spill] sm:$0xff] %v11604_v43  ;;  %v2552_v43 = vld [vmem:[#allocation8 + $0x1c0] sm:$0xff] }
 0x613   :  { %v2392_v4 = vpop.f32.mrf.mxu3 }
 0x614   :  { %v2393_v19 = vadd.f32 %v10234_v25, %v2392_v4  ;;  %v2615_v4 = vld [vmem:[#allocation11 + $0xf50] sm:$0xff] }
 0x616   :  { %v2413_v14 = vadd.f32 %v2412_v6, %v2393_v19  ;;  %v2614_v6 = vld [vmem:[#allocation11 + $0xf48] sm:$0xff]  ;;  %v2613_v19 = vld [vmem:[#allocation11 + $0xf40] sm:$0xff] }
 0x618   :  { %9587 = vmatpush.msk.msra.mxu1 %vm759_vm0, %v2413_v14 }
 0x619   :  { %9588 = vmatmul.msk.f32.vlgmr.msra.gmra.mxu1 %vm746_vm1, %v2416_v15  ;;  %v2418_v15 = vld [vmem:[#allocation8 + $0x1b0] sm:$0xff] }
 0x61a   :  { %2647 = vmatpush.msrb.mxu1 %v2620_v24  ;;  %v2611_v24 = vld [vmem:[#allocation11 + $0xf30] sm:$0xff] }
 0x61b   :  { %v11608_v25 = vpop.f32.mrf.mxu2 }
 0x61c   :  { %2648 = vmatpush.msrb.mxu1 %v2619_v42 }
 0x61e   :  { %2649 = vmatpush.msrb.mxu1 %v2618_v48  ;;  %v2419_v48 = vld [vmem:[#allocation8 + $0x1b8] sm:$0xff] }
 0x620   :  { %2650 = vmatpush.msrb.mxu1 %v2617_v49  ;;  %v2608_v49 = vld [vmem:[#allocation11 + $0xf18] sm:$0xff] }
 0x621   :  { %9589 = vmatmul.msk.f32.gmra.mxu1 %vm746_vm1, %v2417_v52  ;;  %v2607_v52 = vld [vmem:[#allocation11 + $0xf10] sm:$0xff] }
 0x622   :  { %2651 = vmatpush.msrb.mxu1 %v2616_v60  ;;  %v2606_v60 = vld [vmem:[#allocation11 + $0xf08] sm:$0xff] }
 0x623   :  { %v11611_v14 = vpop.f32.mrf.mxu2 }
 0x624   :  { %2652 = vmatpush.msrb.mxu1 %v2615_v4  ;;  %v2605_v4 = vld [vmem:[#allocation11 + $0xf00] sm:$0xff] }
 0x626   :  { %2653 = vmatpush.msrb.mxu1 %v2614_v6 }
 0x628   :  { %2654 = vmatpush.msrb.mxu1 %v2613_v19  ;;  %v2643_v19 = vld.sshfl [vmem:[#allocation1] sm:$0xff pattern:$0x73625140] }
 0x629   :  { %9590 = vmatmul.msk.f32.gmra.mxu1 %vm746_vm1, %v2418_v15  ;;  %v10235_v15 = vld [vmem:[#allocation13 + $0xe] ss:$0 sm:$0xff] }
 0x62a   :  { %2655 = vmatpush.msrb.mxu1 %v2612_v62 }
 0x62b   :  { %v11614_v42 = vpop.f32.mrf.mxu2 }
 0x62c   :  { %2656 = vmatpush.msrb.mxu1 %v2611_v24 }
 0x62e   :  { %2657 = vmatpush.msrb.mxu1 %v2610_v22 }
 0x630   :  { %2658 = vmatpush.msrb.mxu1 %v2609_v37  ;;  %v2553_v37 = vld [vmem:[#allocation8 + $0x1c8] sm:$0xff] }
 0x631   :  { %9591 = vmatmul.msk.f32.gmra.mxu1 %vm746_vm1, %v2419_v48  ;;  %v2554_v48 = vld [vmem:[#allocation8 + $0x1d0] sm:$0xff] }
 0x632   :  { %2659 = vmatpush.msrb.mxu1 %v2608_v49  ;;  %v2555_v49 = vld [vmem:[#allocation8 + $0x1d8] sm:$0xff] }
 0x633   :  { %v11617_v6 = vpop.f32.mrf.mxu2  ;;  %v2548_v24 = vpop.f32.mrf.mxu3 }
 0x634   :  { %2660 = vmatpush.msrb.mxu1 %v2607_v52  ;;  %13521 = vst [vmem:[#allocation78_spill] sm:$0xff] %v11617_v6  ;;  %v2741_v6 = vld [vmem:[%s13523_s14] sm:$0x3] }
 0x635   :  { %9611 = vmatpush.msk.msra.mxu2 %vm759_vm0, %v2741_v6  ;;  %v2690_v6 = vld [vmem:[#allocation8 + $0x1f0] sm:$0xff] }
 0x636   :  { %2661 = vmatpush.msrb.mxu1 %v2606_v60 }
 0x638   :  { %2662 = vmatpush.msrb.mxu1 %v2605_v4 }
 0x639   :  { %2663 = vmatmul.f32.vlgmr.msrb.gmra.mxu1 %v2643_v19 }
 0x63b   :  { %v2528_v62 = vpop.f32.mrf.mxu2 }
 0x63c   :  { %v2529_v22 = vadd.f32 %v10235_v15, %v2528_v62 }
 0x63e   :  { %v2549_v46 = vadd.f32 %v2548_v24, %v2529_v22  ;;  %v2688_v22 = vld [vmem:[#allocation8 + $0x1e0] sm:$0xff] }
 0x640   :  { %9592 = vmatpush.msk.msrb.mxu0 %vm759_vm0, %v2549_v46 }
 0x641   :  { %9593 = vmatmul.msk.f32.vlgmr.msrb.gmra.mxu0 %vm746_vm1, %v2552_v43  ;;  %v10236_v43 = vld [vmem:[#allocation13 + $0xf] ss:$0 sm:$0xff] }
 0x649   :  { %9594 = vmatmul.msk.f32.gmra.mxu0 %vm746_vm1, %v2553_v37  ;;  %v2740_v37 = vld [vmem:[%s13522_s8] sm:$0x3] }
 0x64a   :  { %9606 = vmatpush.msk.msra.mxu0 %vm759_vm0, %v2740_v37  ;;  %v2747_v37 = vld [vmem:[#allocation20 + $0x8] sm:$0xff] }
 0x651   :  { %9595 = vmatmul.msk.f32.gmra.mxu0 %vm746_vm1, %v2554_v48  ;;  %v11634_v48 = vld [vmem:[#allocation5] sm:$0xff] }
 0x652   :  { %13524 = vst [vmem:[#allocation79_spill] sm:$0xff] %v11634_v48  ;;  %9612 = vmatmul.msk.f32.vlgmr.msra.gmra.mxu2 %vm746_vm1, %v11634_v48 }
 0x659   :  { %9596 = vmatmul.msk.f32.gmra.mxu0 %vm746_vm1, %v2555_v49  ;;  %v2749_v49 = vld [vmem:[#allocation20 + $0x18] sm:$0xff] }
 0x65a   :  { %2779 = vmatpush.msra.mxu1 %v2749_v49  ;;  %v825_v49 = vadd.f32 %v11450_v8, %v11454_v10 }
 0x65b   :  { %v2684_v15 = vpop.f32.mrf.mxu2 }
 0x661   :  { %9607 = vmatmul.msk.f32.vlgmr.msra.gmra.mxu0 %vm746_vm1, %v11634_v48 }
 0x696   :  { %v11624_v52 = vpop.f32.mrf.mxu1 }
 0x69e   :  { %v11626_v60 = vpop.f32.mrf.mxu1 }
 0x6a6   :  { %v11628_v4 = vpop.f32.mrf.mxu1 }
 0x6ae   :  { %v11630_v46 = vpop.f32.mrf.mxu1 }
 0x6b6   :  { %v2664_v19 = vpop.f32.mrf.mxu1 }
 0x6b7   :  { %v2665_v62 = vadd.f32 %v10236_v43, %v2664_v19  ;;  %v2748_v43 = vld [vmem:[#allocation20 + $0x10] sm:$0xff] }
 0x6b8   :  { %2780 = vmatpush.msra.mxu1 %v2748_v43  ;;  %v2689_v19 = vld [vmem:[#allocation8 + $0x1e8] sm:$0xff]  ;;  %v2746_v43 = vld [vmem:[#allocation20] sm:$0xff] }
 0x6b9   :  { %v2685_v24 = vadd.f32 %v2684_v15, %v2665_v62  ;;  %v11644_v15 = vld [vmem:[#allocation5 + $0x8] sm:$0xff]  ;;  %v11651_v62 = vld [vmem:[#allocation5 + $0x10] sm:$0xff] }
 0x6ba   :  { %13525 = vst [vmem:[#allocation80_spill] sm:$0xff] %v11644_v15  ;;  %9613 = vmatmul.msk.f32.gmra.mxu2 %vm746_vm1, %v11644_v15  ;;  %9608 = vmatmul.msk.f32.gmra.mxu0 %vm746_vm1, %v11644_v15 }
 0x6bb   :  { %9597 = vmatpush.msk.msrb.mxu3 %vm759_vm0, %v2685_v24  ;;  %13526 = vst [vmem:[#allocation81_spill] sm:$0xff] %v11651_v62  ;;  %v2691_v24 = vld [vmem:[#allocation8 + $0x1f8] sm:$0xff]  ;;  %2781 = vmatpush.msra.mxu1 %v2747_v37 }
 0x6bc   :  { %9598 = vmatmul.msk.f32.vlgmr.msrb.gmra.mxu3 %vm746_vm1, %v2688_v22  ;;  %v11658_v22 = vld [vmem:[#allocation5 + $0x18] sm:$0xff] }
 0x6bd   :  { %13527 = vst [vmem:[#allocation82_spill] sm:$0xff] %v11658_v22  ;;  %2782 = vmatpush.msra.mxu1 %v2746_v43 }
 0x6c2   :  { %9614 = vmatmul.msk.f32.gmra.mxu2 %vm746_vm1, %v11651_v62  ;;  %9609 = vmatmul.msk.f32.gmra.mxu0 %vm746_vm1, %v11651_v62 }
 0x6c4   :  { %9599 = vmatmul.msk.f32.gmra.mxu3 %vm746_vm1, %v2689_v19  ;;  %v968_v19 = vadd.f32 %v11468_v38, %v825_v49 }
 0x6ca   :  { %9615 = vmatmul.msk.f32.gmra.mxu2 %vm746_vm1, %v11658_v22  ;;  %9610 = vmatmul.msk.f32.gmra.mxu0 %vm746_vm1, %v11658_v22 }
 0x6cc   :  { %9600 = vmatmul.msk.f32.gmra.mxu3 %vm746_vm1, %v2690_v6  ;;  %v1104_v6 = vadd.f32 %v11486_v54, %v968_v19  ;;  %v831_v54 = vadd.f32 %v11456_v11, %v11462_v18 }
 0x6ce   :  { %v1240_v62 = vadd.f32 %v11496_v32, %v1104_v6 }
 0x6d0   :  { %v1376_v15 = vadd.f32 %v11514_v55, %v1240_v62 }
 0x6d2   :  { %v1512_v48 = vadd.f32 %v11524_v30, %v1376_v15 }
 0x6d4   :  { %9601 = vmatmul.msk.f32.gmra.mxu3 %vm746_vm1, %v2691_v24  ;;  %v828_v24 = vadd.f32 %v11452_v9, %v11458_v12  ;;  %v1648_v10 = vadd.f32 %v11542_v23, %v1512_v48  ;;  %v2588_v12 = vpop.f32.mrf.mxu0 }
 0x6d6   :  { %v969_v22 = vadd.f32 %v11471_v51, %v828_v24  ;;  %v1784_v37 = vadd.f32 %v11552_v20, %v1648_v10  ;;  %v970_v51 = vadd.f32 %v11475_v57, %v831_v54 }
 0x6d8   :  { %v1105_v8 = vadd.f32 %v11488_v58, %v969_v22  ;;  %v1920_v9 = vadd.f32 %v11570_v34, %v1784_v37  ;;  %v1106_v30 = vadd.f32 %v11490_v0, %v970_v51 }
 0x6da   :  { %v1241_v38 = vadd.f32 %v11500_v39, %v1105_v8  ;;  %v2056_v58 = vadd.f32 %v11580_v31, %v1920_v9  ;;  %v1242_v20 = vadd.f32 %v11503_v45, %v1106_v30 }
 0x6dc   :  { %v1377_v32 = vadd.f32 %v11516_v56, %v1241_v38  ;;  %v2192_v23 = vadd.f32 %v11598_v1, %v2056_v58  ;;  %v834_v56 = vadd.f32 %v11460_v17, %v11464_v27  ;;  %v1378_v57 = vadd.f32 %v11518_v59, %v1242_v20  ;;  %v2591_v1 = vpop.f32.mrf.mxu0 }
 0x6de   :  { %v1513_v55 = vadd.f32 %v11527_v47, %v1377_v32  ;;  %v2328_v18 = vadd.f32 %v11608_v25, %v2192_v23  ;;  %v971_v0 = vadd.f32 %v11478_v63, %v834_v56 }
 0x6e0   :  { %v1649_v39 = vadd.f32 %v11544_v26, %v1513_v55  ;;  %v2464_v34 = vadd.f32 %v11624_v52, %v2328_v18  ;;  %v1514_v26 = vadd.f32 %v11531_v61, %v1378_v57 }
 0x6e2   :  { %v1785_v11 = vadd.f32 %v11556_v29, %v1649_v39  ;;  %v2600_v45 = vadd.f32 %v2588_v12, %v2464_v34  ;;  %v1107_v29 = vadd.f32 %v11492_v5, %v971_v0  ;;  %v1650_v17 = vadd.f32 %v11546_v35, %v1514_v26 }
 0x6e4   :  { %v1921_v47 = vadd.f32 %v11572_v36, %v1785_v11  ;;  %v1243_v36 = vadd.f32 %v11506_v53, %v1107_v29  ;;  %v1786_v63 = vadd.f32 %v11559_v40, %v1650_v17 }
 0x6e6   :  { %v2057_v31 = vadd.f32 %v11583_v3, %v1921_v47  ;;  %v1379_v3 = vadd.f32 %v11520_v2, %v1243_v36  ;;  %v1922_v5 = vadd.f32 %v11574_v33, %v1786_v63 }
 0x6e8   :  { %v2193_v27 = vadd.f32 %v11600_v13, %v2057_v31  ;;  %v1515_v35 = vadd.f32 %v11534_v7, %v1379_v3  ;;  %v2058_v13 = vadd.f32 %v11587_v16, %v1922_v5 }
 0x6ea   :  { %v2329_v61 = vadd.f32 %v11611_v14, %v2193_v27  ;;  %v1651_v53 = vadd.f32 %v11548_v41, %v1515_v35  ;;  %v2194_v40 = vadd.f32 %v11602_v21, %v2058_v13  ;;  %v2594_v14 = vpop.f32.mrf.mxu0  ;;  %v11064_v41 = vmov 32.0   ;;  %v13528_v21 = vld [vmem:[#allocation77_spill] sm:$0xff] }
 0x6eb   :  { %10245 = vrcp.f32 %v11064_v41 }
 0x6ec   :  { %v2465_v52 = vadd.f32 %v11626_v60, %v2329_v61  ;;  %v1787_v22 = vadd.f32 %v11562_v50, %v1651_v53  ;;  %v2330_v2 = vadd.f32 %v11614_v42, %v2194_v40  ;;  %v13529_v50 = vld [vmem:[#allocation78_spill] sm:$0xff]  ;;  %v3034_v40 = vld [vmem:[#allocation14 + $0x30] sm:$0xff] }
 0x6ee   :  { %v2601_v48 = vadd.f32 %v2591_v1, %v2465_v52  ;;  %v1923_v7 = vadd.f32 %v11576_v44, %v1787_v22  ;;  %v2466_v33 = vadd.f32 %v11628_v4, %v2330_v2  ;;  %v2925_v52 = vpop.f32.mrf.mxu2  ;;  %v3032_v2 = vld [vmem:[#allocation14 + $0x20] sm:$0xff] }
 0x6f0   :  { %v2059_v16 = vadd.f32 %v11590_v28, %v1923_v7  ;;  %v2602_v60 = vadd.f32 %v2594_v14, %v2466_v33  ;;  %v3033_v14 = vld [vmem:[#allocation14 + $0x28] sm:$0xff] }
 0x6f1   :  { %v10246_v44 = vpop.eup %10245 }
 0x6f2   :  { %v2195_v49 = vadd.f32 %v13528_v21, %v2059_v16  ;;  %v2597_v42 = vpop.f32.mrf.mxu0  ;;  %v2810_v9 = vmul.f32 32.0, %v10246_v44  ;;  %vm2814_vm3 = vweird.f32 %v10246_v44 }
 0x6f4   :  { %v2331_v6 = vadd.f32 %v13529_v50, %v2195_v49  ;;  %v2811_v11 = vsub.f32 1.0, %v2810_v9 }
 0x6f6   :  { %v2467_v28 = vadd.f32 %v11630_v46, %v2331_v6  ;;  %v2812_v0 = vmul.f32 %v10246_v44, %v2811_v11 }
 0x6f8   :  { %v2603_v38 = vadd.f32 %v2597_v42, %v2467_v28  ;;  %v2813_v29 = vadd.f32 %v10246_v44, %v2812_v0  ;;  %v11811_v0 = vld [vmem:[#allocation7 + $0x30] sm:$0xff] }
 0x6fa   :  { %v11757_v63 = vsel %vm2814_vm3, %v10246_v44, %v2813_v29  ;;  %v2889_v61 = vpop.f32.mrf.mxu0  ;;  %v11837_v29 = vld [vmem:[#allocation7 + $0x50] sm:$0xff] }
 0x737   :  { %v2892_v33 = vpop.f32.mrf.mxu0 }
 0x73d   :  { %v2928_v41 = vpop.f32.mrf.mxu2 }
 0x73f   :  { %v2724_v25 = vpop.f32.mrf.mxu3  ;;  %v2895_v49 = vpop.f32.mrf.mxu0 }
 0x740   :  { %v11703_v59 = vadd.f32 %v2724_v25, %v2600_v45 }
 0x742   :  { %9602 = vmatmul.msk.f32.vlgmr.msra.gmra.mxu1 %vm2754_vm2, %v11703_v59  ;;  %v2817_v4 = vmul.f32 %v11703_v59, %v11703_v59  ;;  %v2796_v37 = vsel %vm2754_vm2, %v11703_v59, 0.0 }
 0x744   :  { %v2821_v51 = vsel %vm2754_vm2, %v2817_v4, 0.0 }
 0x745   :  { %v2931_v50 = vpop.f32.mrf.mxu2 }
 0x747   :  { %v2727_v15 = vpop.f32.mrf.mxu3 }
 0x748   :  { %v11717_v62 = vadd.f32 %v2727_v15, %v2601_v48  ;;  %v3035_v48 = vld [vmem:[#allocation14 + $0x38] sm:$0xff] }
 0x749   :  { %3060 = vmatpush.msrb.mxu0 %v3035_v48  ;;  %v3163_v48 = vld [vmem:[#allocation14 + $0x58] sm:$0xff] }
 0x74a   :  { %9603 = vmatmul.msk.f32.gmra.mxu1 %vm2754_vm2, %v11717_v62  ;;  %v2818_v24 = vmul.f32 %v11717_v62, %v11717_v62  ;;  %v2797_v8 = vsel %vm2754_vm2, %v11717_v62, 0.0 }
 0x74b   :  { %v2798_v46 = vadd.f32 %v2797_v8, %v2796_v37  ;;  %3061 = vmatpush.msrb.mxu0 %v3034_v40  ;;  %v3161_v40 = vld [vmem:[#allocation14 + $0x48] sm:$0xff] }
 0x74c   :  { %v2822_v54 = vsel %vm2754_vm2, %v2818_v24, 0.0 }
 0x74d   :  { %v2823_v30 = vadd.f32 %v2822_v54, %v2821_v51  ;;  %3062 = vmatpush.msrb.mxu0 %v3033_v14 }
 0x74f   :  { %v2730_v43 = vpop.f32.mrf.mxu3  ;;  %3063 = vmatpush.msrb.mxu0 %v3032_v2 }
 0x750   :  { %v11727_v19 = vadd.f32 %v2730_v43, %v2602_v60 }
 0x752   :  { %9604 = vmatmul.msk.f32.gmra.mxu1 %vm2754_vm2, %v11727_v19  ;;  %v2819_v10 = vmul.f32 %v11727_v19, %v11727_v19  ;;  %v2799_v32 = vsel %vm2754_vm2, %v11727_v19, 0.0 }
 0x753   :  { %v2800_v39 = vadd.f32 %v2799_v32, %v2798_v46  ;;  %v2934_v46 = vpop.f32.mrf.mxu2 }
 0x754   :  { %v2824_v55 = vsel %vm2754_vm2, %v2819_v10, 0.0 }
 0x755   :  { %v2825_v18 = vadd.f32 %v2824_v55, %v2823_v30 }
 0x757   :  { %v2733_v12 = vpop.f32.mrf.mxu3 }
 0x758   :  { %v11748_v58 = vadd.f32 %v2733_v12, %v2603_v38  ;;  %v2898_v38 = vpop.f32.mrf.mxu0 }
 0x75a   :  { %v2801_v23 = vsel %vm2754_vm2, %v11748_v58, 0.0  ;;  %v2820_v20 = vmul.f32 %v11748_v58, %v11748_v58  ;;  %9605 = vmatmul.msk.f32.gmra.mxu1 %vm2754_vm2, %v11748_v58 }
 0x75b   :  { %v2802_v56 = vadd.f32 %v2801_v23, %v2800_v39 }
 0x75c   :  { %v2826_v57 = vsel %vm2754_vm2, %v2820_v20, 0.0 }
 0x75d   :  { %v2803_v47 = vrot.slane %v2802_v56, 4  ;;  %v2827_v34 = vadd.f32 %v2826_v57, %v2825_v18  ;;  %v11781_v18 = vld [vmem:[#allocation7] sm:$0xff]  ;;  %v11796_v57 = vld [vmem:[#allocation7 + $0x8] sm:$0xff] }
 0x75f   :  { %v2804_v26 = vadd.f32 %v2803_v47, %v2802_v56  ;;  %v2828_v31 = vrot.slane %v2827_v34, 4  ;;  %v11784_v56 = vld [vmem:[#allocation7 + $0x20] sm:$0xff]  ;;  %v11798_v47 = vld [vmem:[#allocation7 + $0x28] sm:$0xff] }
 0x761   :  { %v2805_v45 = vrot.slane %v2804_v26, 2  ;;  %v2829_v1 = vadd.f32 %v2828_v31, %v2827_v34  ;;  %v11809_v34 = vld [vmem:[#allocation7 + $0x10] sm:$0xff]  ;;  %v11819_v31 = vld [vmem:[#allocation7 + $0x38] sm:$0xff] }
 0x763   :  { %v2806_v25 = vadd.f32 %v2805_v45, %v2804_v26  ;;  %v2830_v17 = vrot.slane %v2829_v1, 2  ;;  %v11817_v26 = vld [vmem:[#allocation7 + $0x18] sm:$0xff]  ;;  %v11825_v45 = vld [vmem:[#allocation7 + $0x40] sm:$0xff] }
 0x765   :  { %v2807_v27 = vrot.slane %v2806_v25, 1  ;;  %v2831_v36 = vadd.f32 %v2830_v17, %v2829_v1  ;;  %v11832_v1 = vld [vmem:[#allocation7 + $0x48] sm:$0xff]  ;;  %v11845_v17 = vld [vmem:[#allocation7 + $0x80] sm:$0xff] }
 0x767   :  { %v2808_v3 = vadd.f32 %v2807_v27, %v2806_v25  ;;  %v2832_v5 = vrot.slane %v2831_v36, 1  ;;  %v11841_v25 = vld [vmem:[#allocation7 + $0x58] sm:$0xff] }
 0x769   :  { %v2833_v35 = vadd.f32 %v2832_v5, %v2831_v36  ;;  %v2816_v13 = vmul.f32 %v11757_v63, %v2808_v3  ;;  %v2989_v36 = vld [vmem:[#allocation14 + $0x18] sm:$0xff]  ;;  %v2987_v5 = vld [vmem:[#allocation14 + $0x8] sm:$0xff] }
 0x76a   :  { %3101 = vmatpush.msrb.mxu2 %v2989_v36 }
 0x76b   :  { %v2834_v53 = vmul.f32 %v2833_v35, %v11757_v63  ;;  %v2835_v15 = vmul.f32 %v2816_v13, %v2816_v13  ;;  %v2838_v44 = vsub.f32 %v11703_v59, %v2816_v13  ;;  %v2839_v28 = vsub.f32 %v11717_v62, %v2816_v13 }
 0x76c   :  { %v2840_v4 = vsub.f32 %v11727_v19, %v2816_v13  ;;  %v2841_v8 = vsub.f32 %v11748_v58, %v2816_v13 }
 0x76d   :  { %v2836_v22 = vsub.f32 %v2834_v53, %v2835_v15  ;;  %v3162_v15 = vld [vmem:[#allocation14 + $0x50] sm:$0xff] }
 0x76f   :  { %v2837_v7 = vmax.f32 %v2836_v22, 0.0  ;;  %v3160_v22 = vld [vmem:[#allocation14 + $0x40] sm:$0xff] }
 0x771   :  { %v2842_v16 = vadd.f32 1e-05, %v2837_v7  ;;  %v11868_v7 = vld [vmem:[#allocation7 + $0x88] sm:$0xff] }
 0x773   :  { %10247 = vrsqrt.f32 %v2842_v16  ;;  %vm2849_vm5 = vweird.f32 %v2842_v16 }
 0x779   :  { %v10248_v60 = vpop.eup %10247 }
 0x77a   :  { %v2844_v21 = vmul.f32 %v10248_v60, %v2842_v16  ;;  %vm2850_vm4 = vweird.f32 %v10248_v60 }
 0x77b   :  { %vm2851_vm6 = vmor %vm2849_vm5, %vm2850_vm4 }
 0x77c   :  { %v2845_v43 = vmul.f32 %v10248_v60, %v2844_v21 }
 0x77e   :  { %v2846_v6 = vmul.f32 0.5, %v2845_v43 }
 0x780   :  { %v2847_v42 = vsub.f32 1.5, %v2846_v6  ;;  %v11889_v6 = vld [vmem:[#allocation7 + $0xc0] sm:$0xff] }
 0x782   :  { %v2848_v24 = vmul.f32 %v10248_v60, %v2847_v42 }
 0x784   :  { %v2852_v10 = vsel %vm2851_vm6, %v10248_v60, %v2848_v24  ;;  %v11896_v24 = vld [vmem:[#allocation7 + $0x68] sm:$0xff] }
 0x785   :  { %v2853_v37 = vmul.f32 %v2852_v10, %v2838_v44  ;;  %v2854_v54 = vmul.f32 %v2852_v10, %v2839_v28  ;;  %v2855_v32 = vmul.f32 %v2852_v10, %v2840_v4  ;;  %v2856_v9 = vmul.f32 %v2852_v10, %v2841_v8  ;;  %13535 = vst [vmem:[#allocation86_spill] sm:$0xff] %v11896_v24  ;;  %v11902_v44 = vld [vmem:[#allocation7 + $0xc8] sm:$0xff]  ;;  %v11906_v4 = vld [vmem:[#allocation7 + $0x70] sm:$0xff] }
 0x786   :  { %13536 = vst [vmem:[#allocation87_spill] sm:$0xff] %v11902_v44  ;;  %v11911_v8 = vld [vmem:[#allocation7 + $0xd0] sm:$0xff] }
 0x787   :  { %v2902_v12 = vmul.f32 %v2892_v33, %v2854_v54  ;;  %v2903_v51 = vmul.f32 %v2895_v49, %v2855_v32  ;;  %v2904_v55 = vmul.f32 %v2898_v38, %v2856_v9  ;;  %v2901_v30 = vmul.f32 %v2889_v61, %v2853_v37  ;;  %v2988_v61 = vld [vmem:[#allocation14 + $0x10] sm:$0xff]  ;;  %v11880_v49 = vld [vmem:[#allocation7 + $0x98] sm:$0xff]  ;;  %13537 = vst [vmem:[#allocation88_spill] sm:$0xff] %v11906_v4 }
 0x788   :  { %3102 = vmatpush.msrb.mxu2 %v2988_v61  ;;  %13538 = vst [vmem:[#allocation89_spill] sm:$0xff] %v11911_v8  ;;  %v11915_v38 = vld [vmem:[#allocation7 + $0x78] sm:$0xff]  ;;  %v11924_v32 = vld [vmem:[#allocation7 + $0xa0] sm:$0xff]  ;;  %v3251_v61 = vld [vmem:[#allocation14 + $0x60] sm:$0xff] }
 0x789   :  { %v2939_v39 = vadd.f32 %v2931_v50, %v2903_v51  ;;  %v2940_v59 = vadd.f32 %v2934_v46, %v2904_v55  ;;  %v2938_v23 = vadd.f32 %v2928_v41, %v2902_v12  ;;  %v2937_v62 = vadd.f32 %v2925_v52, %v2901_v30  ;;  %v2986_v52 = vld [vmem:[#allocation14] sm:$0xff]  ;;  %v11884_v50 = vld [vmem:[#allocation7 + $0x60] sm:$0xff]  ;;  %13539 = vst [vmem:[#allocation90_spill] sm:$0xff] %v11915_v38  ;;  %v11920_v37 = vld [vmem:[#allocation7 + $0xd8] sm:$0xff] }
 0x78a   :  { %3103 = vmatpush.msrb.mxu2 %v2987_v5  ;;  %v11874_v41 = vld [vmem:[#allocation7 + $0x90] sm:$0xff]  ;;  %13534 = vst [vmem:[#allocation85_spill] sm:$0xff] %v11884_v50  ;;  %v11929_v9 = vld [vmem:[#allocation7 + $0x100] sm:$0xff]  ;;  %v11933_v46 = vld [vmem:[#allocation7 + $0xa8] sm:$0xff] }
 0x78b   :  { %v11765_v20 = vmax.f32 %v2940_v59, 0.0  ;;  %v11767_v19 = vmax.f32 %v2939_v39, 0.0  ;;  %v11772_v58 = vmax.f32 %v2938_v23, 0.0  ;;  %v11777_v11 = vmax.f32 %v2937_v62, 0.0  ;;  %13540 = vst [vmem:[#allocation91_spill] sm:$0xff] %v11920_v37  ;;  %v11937_v12 = vld [vmem:[#allocation7 + $0x108] sm:$0xff] }
 0x78c   :  { %3104 = vmatpush.msrb.mxu2 %v2986_v52  ;;  %13541 = vst [vmem:[#allocation92_spill] sm:$0xff] %v11924_v32  ;;  %v11941_v51 = vld [vmem:[#allocation7 + $0xb0] sm:$0xff]  ;;  %v11949_v30 = vld [vmem:[#allocation7 + $0xb8] sm:$0xff]  ;;  %v11957_v59 = vld [vmem:[#allocation7 + $0xe0] sm:$0xff] }
 0x78d   :  { %2969 = vmatpush.msra.mxu3 %v11765_v20  ;;  %3014 = vmatpush.msrb.mxu1 %v11765_v20  ;;  %13542 = vst [vmem:[#allocation93_spill] sm:$0xff] %v11929_v9  ;;  %v11945_v55 = vld [vmem:[#allocation7 + $0x110] sm:$0xff]  ;;  %v11953_v39 = vld [vmem:[#allocation7 + $0x118] sm:$0xff]  ;;  %v11961_v23 = vld [vmem:[#allocation7 + $0xe8] sm:$0xff] }
 0x78e   :  { %3233 = vmatpush.msra.mxu0 %v11765_v20  ;;  %13543 = vst [vmem:[#allocation94_spill] sm:$0xff] %v11933_v46  ;;  %v11969_v62 = vld [vmem:[#allocation7 + $0xf8] sm:$0xff]  ;;  %v3345_v5 = vld [vmem:[#allocation14 + $0x98] sm:$0xff]  ;;  %v3344_v52 = vld [vmem:[#allocation14 + $0x90] sm:$0xff] }
 0x78f   :  { %2970 = vmatpush.msra.mxu3 %v11767_v19  ;;  %3015 = vmatpush.msrb.mxu1 %v11767_v19  ;;  %13544 = vst [vmem:[#allocation95_spill] sm:$0xff] %v11937_v12 }
 0x790   :  { %3234 = vmatpush.msra.mxu0 %v11767_v19  ;;  %13545 = vst [vmem:[#allocation96_spill] sm:$0xff] %v11941_v51 }
 0x791   :  { %2971 = vmatpush.msra.mxu3 %v11772_v58  ;;  %3016 = vmatpush.msrb.mxu1 %v11772_v58  ;;  %13546 = vst [vmem:[#allocation97_spill] sm:$0xff] %v11945_v55 }
 0x792   :  { %3235 = vmatpush.msra.mxu0 %v11772_v58  ;;  %13547 = vst [vmem:[#allocation98_spill] sm:$0xff] %v11949_v30 }
 0x793   :  { %2972 = vmatpush.msra.mxu3 %v11777_v11  ;;  %3017 = vmatpush.msrb.mxu1 %v11777_v11  ;;  %13548 = vst [vmem:[#allocation99_spill] sm:$0xff] %v11953_v39 }
 0x794   :  { %3236 = vmatpush.msra.mxu0 %v11777_v11  ;;  %9616 = vmatmul.msk.f32.vlgmr.msra.gmra.mxu3 %vm2754_vm2, %v11781_v18  ;;  %13549 = vst [vmem:[#allocation100_spill] sm:$0xff] %v11957_v59 }
 0x795   :  { %9620 = vmatmul.msk.f32.vlgmr.msrb.gmra.mxu1 %vm2754_vm2, %v11784_v56  ;;  %3142 = vmatpush.msrb.mxu3 %v11765_v20  ;;  %13550 = vst [vmem:[#allocation101_spill] sm:$0xff] %v11961_v23 }
 0x796   :  { %3188 = vmatpush.msra.mxu1 %v3163_v48  ;;  %13552 = vst [vmem:[#allocation103_spill] sm:$0xff] %v11969_v62  ;;  %v3343_v48 = vld [vmem:[#allocation14 + $0x88] sm:$0xff] }
 0x797   :  { %3143 = vmatpush.msrb.mxu3 %v11767_v19 }
 0x798   :  { %3189 = vmatpush.msra.mxu1 %v3162_v15 }
 0x799   :  { %3144 = vmatpush.msrb.mxu3 %v11772_v58 }
 0x79a   :  { %3190 = vmatpush.msra.mxu1 %v3161_v40  ;;  %v3342_v40 = vld [vmem:[#allocation14 + $0x80] sm:$0xff] }
 0x79b   :  { %3145 = vmatpush.msrb.mxu3 %v11777_v11 }
 0x79c   :  { %9617 = vmatmul.msk.f32.gmra.mxu3 %vm2754_vm2, %v11796_v57  ;;  %3191 = vmatpush.msra.mxu1 %v3160_v22 }
 0x79d   :  { %3324 = vmatpush.msra.mxu3 %v11765_v20  ;;  %9621 = vmatmul.msk.f32.gmra.mxu1 %vm2754_vm2, %v11798_v47 }
 0x79e   :  { %3370 = vmatpush.msrb.mxu1 %v3345_v5 }
 0x79f   :  { %3325 = vmatpush.msra.mxu3 %v11767_v19 }
 0x7a0   :  { %3371 = vmatpush.msrb.mxu1 %v3344_v52 }
 0x7a1   :  { %3326 = vmatpush.msra.mxu3 %v11772_v58 }
 0x7a2   :  { %3372 = vmatpush.msrb.mxu1 %v3343_v48 }
 0x7a3   :  { %3327 = vmatpush.msra.mxu3 %v11777_v11 }
 0x7a4   :  { %9618 = vmatmul.msk.f32.gmra.mxu3 %vm2754_vm2, %v11809_v34  ;;  %3373 = vmatpush.msrb.mxu1 %v3342_v40  ;;  %v3618_v40 = vld [vmem:[#allocation14 + $0xf8] sm:$0xff] }
 0x7a5   :  { %9622 = vmatmul.msk.f32.gmra.mxu1 %vm2754_vm2, %v11811_v0 }
 0x7ac   :  { %9619 = vmatmul.msk.f32.gmra.mxu3 %vm2754_vm2, %v11817_v26 }
 0x7ad   :  { %9623 = vmatmul.msk.f32.gmra.mxu1 %vm2754_vm2, %v11819_v31 }
 0x7b4   :  { %9632 = vmatmul.msk.f32.vlgmr.msrb.gmra.mxu3 %vm2754_vm2, %v11825_v45 }
 0x7b5   :  { %3506 = vmatpush.msrb.mxu3 %v11765_v20 }
 0x7b7   :  { %3507 = vmatpush.msrb.mxu3 %v11767_v19 }
 0x7b9   :  { %3508 = vmatpush.msrb.mxu3 %v11772_v58 }
 0x7bb   :  { %3509 = vmatpush.msrb.mxu3 %v11777_v11 }
 0x7bc   :  { %9633 = vmatmul.msk.f32.gmra.mxu3 %vm2754_vm2, %v11832_v1 }
 0x7bf   :  { %v11853_v27 = vpop.f32.mrf.mxu1 }
 0x7c0   :  { %13530 = vst [vmem:[#allocation77_spill] sm:$0xff] %v11853_v27 }
 0x7c4   :  { %9634 = vmatmul.msk.f32.gmra.mxu3 %vm2754_vm2, %v11837_v29 }
 0x7c7   :  { %v11855_v3 = vpop.f32.mrf.mxu1 }
 0x7c8   :  { %13531 = vst [vmem:[#allocation78_spill] sm:$0xff] %v11855_v3 }
 0x7cc   :  { %9635 = vmatmul.msk.f32.gmra.mxu3 %vm2754_vm2, %v11841_v25 }
 0x7cf   :  { %v11857_v35 = vpop.f32.mrf.mxu1 }
 0x7d0   :  { %13532 = vst [vmem:[#allocation83_spill] sm:$0xff] %v11857_v35 }
 0x7d4   :  { %9648 = vmatmul.msk.f32.vlgmr.msra.gmra.mxu3 %vm2754_vm2, %v11845_v17 }
 0x7d5   :  { %3688 = vmatpush.msra.mxu3 %v11765_v20 }
 0x7d7   :  { %3689 = vmatpush.msra.mxu3 %v11767_v19  ;;  %v11859_v13 = vpop.f32.mrf.mxu1 }
 0x7d8   :  { %13533 = vst [vmem:[#allocation84_spill] sm:$0xff] %v11859_v13 }
 0x7d9   :  { %3690 = vmatpush.msra.mxu3 %v11772_v58 }
 0x7db   :  { %3691 = vmatpush.msra.mxu3 %v11777_v11 }
 0x7dc   :  { %9649 = vmatmul.msk.f32.gmra.mxu3 %vm2754_vm2, %v11868_v7 }
 0x7e4   :  { %9650 = vmatmul.msk.f32.gmra.mxu3 %vm2754_vm2, %v11874_v41 }
 0x7ec   :  { %9651 = vmatmul.msk.f32.gmra.mxu3 %vm2754_vm2, %v11880_v49 }
 0x7f4   :  { %9664 = vmatmul.msk.f32.vlgmr.msrb.gmra.mxu3 %vm2754_vm2, %v11889_v6 }
 0x7fc   :  { %9665 = vmatmul.msk.f32.gmra.mxu3 %vm2754_vm2, %v11902_v44 }
 0x804   :  { %9666 = vmatmul.msk.f32.gmra.mxu3 %vm2754_vm2, %v11911_v8 }
 0x80c   :  { %9667 = vmatmul.msk.f32.gmra.mxu3 %vm2754_vm2, %v11920_v37 }
 0x812   :  { %v3019_v53 = vpop.f32.mrf.mxu1 }
 0x813   :  { %9624 = vmatmul.msk.f32.vlgmr.msrb.gmra.mxu0 %vm2754_vm2, %v3019_v53 }
 0x814   :  { %3415 = vmatpush.msrb.mxu0 %v11765_v20  ;;  %9680 = vmatmul.msk.f32.vlgmr.msra.gmra.mxu3 %vm2754_vm2, %v11929_v9 }
 0x816   :  { %3416 = vmatpush.msrb.mxu0 %v11767_v19 }
 0x817   :  { %v2974_v14 = vpop.f32.mrf.mxu3 }
 0x818   :  { %3417 = vmatpush.msrb.mxu0 %v11772_v58  ;;  %9628 = vmatmul.msk.f32.vlgmr.msrb.gmra.mxu2 %vm2754_vm2, %v2974_v14 }
 0x81a   :  { %3418 = vmatpush.msrb.mxu0 %v11777_v11  ;;  %v3022_v2 = vpop.f32.mrf.mxu1 }
 0x81b   :  { %9625 = vmatmul.msk.f32.gmra.mxu0 %vm2754_vm2, %v3022_v2 }
 0x81c   :  { %9681 = vmatmul.msk.f32.gmra.mxu3 %vm2754_vm2, %v11937_v12 }
 0x81f   :  { %v2977_v33 = vpop.f32.mrf.mxu3 }
 0x820   :  { %9629 = vmatmul.msk.f32.gmra.mxu2 %vm2754_vm2, %v2977_v33 }
 0x822   :  { %v3025_v16 = vpop.f32.mrf.mxu1 }
 0x823   :  { %9626 = vmatmul.msk.f32.gmra.mxu0 %vm2754_vm2, %v3025_v16  ;;  %v3436_v16 = vld [vmem:[#allocation14 + $0xb8] sm:$0xff] }
 0x824   :  { %9682 = vmatmul.msk.f32.gmra.mxu3 %vm2754_vm2, %v11945_v55 }
 0x827   :  { %v2980_v60 = vpop.f32.mrf.mxu3 }
 0x828   :  { %9630 = vmatmul.msk.f32.gmra.mxu2 %vm2754_vm2, %v2980_v60  ;;  %v3435_v60 = vld [vmem:[#allocation14 + $0xb0] sm:$0xff] }
 0x82a   :  { %v3028_v21 = vpop.f32.mrf.mxu1 }
 0x82b   :  { %9627 = vmatmul.msk.f32.gmra.mxu0 %vm2754_vm2, %v3028_v21  ;;  %v3434_v21 = vld [vmem:[#allocation14 + $0xa8] sm:$0xff] }
 0x82c   :  { %9683 = vmatmul.msk.f32.gmra.mxu3 %vm2754_vm2, %v11953_v39 }
 0x82f   :  { %v2983_v43 = vpop.f32.mrf.mxu3 }
 0x830   :  { %9631 = vmatmul.msk.f32.gmra.mxu2 %vm2754_vm2, %v2983_v43 }
 0x833   :  { %9640 = vmatmul.msk.f32.vlgmr.msra.gmra.mxu0 %vm2754_vm2, %v11884_v50 }
 0x834   :  { %3597 = vmatpush.msra.mxu0 %v11765_v20  ;;  %v11965_v20 = vld [vmem:[#allocation7 + $0xf0] sm:$0xff] }
 0x835   :  { %13551 = vst [vmem:[#allocation102_spill] sm:$0xff] %v11965_v20 }
 0x836   :  { %3598 = vmatpush.msra.mxu0 %v11767_v19  ;;  %v3254_v19 = vld [vmem:[#allocation14 + $0x78] sm:$0xff] }
 0x837   :  { %v3147_v42 = vpop.f32.mrf.mxu3  ;;  %3279 = vmatpush.msra.mxu2 %v3254_v19  ;;  %v3525_v19 = vld [vmem:[#allocation14 + $0xc8] sm:$0xff] }
 0x838   :  { %3599 = vmatpush.msra.mxu0 %v11772_v58  ;;  %9636 = vmatmul.msk.f32.vlgmr.msra.gmra.mxu1 %vm2754_vm2, %v3147_v42  ;;  %v3253_v58 = vld [vmem:[#allocation14 + $0x70] sm:$0xff] }
 0x839   :  { %3280 = vmatpush.msra.mxu2 %v3253_v58 }
 0x83a   :  { %3600 = vmatpush.msra.mxu0 %v11777_v11  ;;  %v3252_v11 = vld [vmem:[#allocation14 + $0x68] sm:$0xff] }
 0x83b   :  { %9641 = vmatmul.msk.f32.gmra.mxu0 %vm2754_vm2, %v11896_v24  ;;  %3281 = vmatpush.msra.mxu2 %v3252_v11 }
 0x83d   :  { %3282 = vmatpush.msra.mxu2 %v3251_v61  ;;  %v3524_v61 = vld [vmem:[#allocation14 + $0xc0] sm:$0xff] }
 0x83f   :  { %v3150_v28 = vpop.f32.mrf.mxu3  ;;  %3461 = vmatpush.msrb.mxu2 %v3436_v16 }
 0x840   :  { %9637 = vmatmul.msk.f32.gmra.mxu1 %vm2754_vm2, %v3150_v28  ;;  %v3433_v28 = vld [vmem:[#allocation14 + $0xa0] sm:$0xff] }
 0x841   :  { %3462 = vmatpush.msrb.mxu2 %v3435_v60 }
 0x843   :  { %9642 = vmatmul.msk.f32.gmra.mxu0 %vm2754_vm2, %v11906_v4  ;;  %3463 = vmatpush.msrb.mxu2 %v3434_v21  ;;  %v3615_v21 = vld [vmem:[#allocation14 + $0xe0] sm:$0xff] }
 0x845   :  { %3464 = vmatpush.msrb.mxu2 %v3433_v28  ;;  %v3707_v28 = vld [vmem:[#allocation14 + $0x108] sm:$0xff] }
 0x847   :  { %v3153_v10 = vpop.f32.mrf.mxu3 }
 0x848   :  { %9638 = vmatmul.msk.f32.gmra.mxu1 %vm2754_vm2, %v3153_v10  ;;  %v3527_v10 = vld [vmem:[#allocation14 + $0xd8] sm:$0xff] }
 0x849   :  { %3552 = vmatpush.msra.mxu1 %v3527_v10 }
 0x84b   :  { %9643 = vmatmul.msk.f32.gmra.mxu0 %vm2754_vm2, %v11915_v38 }
 0x84f   :  { %v3156_v54 = vpop.f32.mrf.mxu3 }
 0x850   :  { %9639 = vmatmul.msk.f32.gmra.mxu1 %vm2754_vm2, %v3156_v54  ;;  %v3526_v54 = vld [vmem:[#allocation14 + $0xd0] sm:$0xff] }
 0x851   :  { %3553 = vmatpush.msra.mxu1 %v3526_v54 }
 0x853   :  { %9656 = vmatmul.msk.f32.vlgmr.msrb.gmra.mxu0 %vm2754_vm2, %v11924_v32  ;;  %3554 = vmatpush.msra.mxu1 %v3525_v19  ;;  %v3706_v19 = vld [vmem:[#allocation14 + $0x100] sm:$0xff] }
 0x855   :  { %3555 = vmatpush.msra.mxu1 %v3524_v61 }
 0x857   :  { %v3329_v15 = vpop.f32.mrf.mxu3 }
 0x858   :  { %9652 = vmatmul.msk.f32.vlgmr.msrb.gmra.mxu1 %vm2754_vm2, %v3329_v15 }
 0x85b   :  { %9657 = vmatmul.msk.f32.gmra.mxu0 %vm2754_vm2, %v11933_v46 }
 0x85f   :  { %v3332_v22 = vpop.f32.mrf.mxu3 }
 0x860   :  { %9653 = vmatmul.msk.f32.gmra.mxu1 %vm2754_vm2, %v3332_v22  ;;  %v3617_v22 = vld [vmem:[#allocation14 + $0xf0] sm:$0xff] }
 0x863   :  { %9658 = vmatmul.msk.f32.gmra.mxu0 %vm2754_vm2, %v11941_v51 }
 0x867   :  { %v3335_v33 = vpop.f32.mrf.mxu3 }
 0x868   :  { %9654 = vmatmul.msk.f32.gmra.mxu1 %vm2754_vm2, %v3335_v33  ;;  %v3616_v33 = vld [vmem:[#allocation14 + $0xe8] sm:$0xff] }
 0x86b   :  { %9659 = vmatmul.msk.f32.gmra.mxu0 %vm2754_vm2, %v11949_v30 }
 0x86f   :  { %v3338_v42 = vpop.f32.mrf.mxu3 }
 0x870   :  { %9655 = vmatmul.msk.f32.gmra.mxu1 %vm2754_vm2, %v3338_v42  ;;  %v3708_v42 = vld [vmem:[#allocation14 + $0x110] sm:$0xff] }
 0x873   :  { %9672 = vmatmul.msk.f32.vlgmr.msra.gmra.mxu0 %vm2754_vm2, %v11957_v59 }
 0x877   :  { %v3511_v11 = vpop.f32.mrf.mxu3 }
 0x878   :  { %9668 = vmatmul.msk.f32.vlgmr.msra.gmra.mxu1 %vm2754_vm2, %v3511_v11 }
 0x87b   :  { %9673 = vmatmul.msk.f32.gmra.mxu0 %vm2754_vm2, %v11961_v23 }
 0x87f   :  { %v3514_v52 = vpop.f32.mrf.mxu3 }
 0x880   :  { %9669 = vmatmul.msk.f32.gmra.mxu1 %vm2754_vm2, %v3514_v52  ;;  %v2743_v52 = vld [vmem:[%s13553_s25] sm:$0x3] }
 0x883   :  { %9674 = vmatmul.msk.f32.gmra.mxu0 %vm2754_vm2, %v11965_v20 }
 0x887   :  { %v3517_v15 = vpop.f32.mrf.mxu3 }
 0x888   :  { %9670 = vmatmul.msk.f32.gmra.mxu1 %vm2754_vm2, %v3517_v15  ;;  %v13555_v15 = vld [vmem:[#allocation79_spill] sm:$0xff] }
 0x88b   :  { %9675 = vmatmul.msk.f32.gmra.mxu0 %vm2754_vm2, %v11969_v62 }
 0x88f   :  { %v3520_v60 = vpop.f32.mrf.mxu3 }
 0x890   :  { %v11973_v36 = vpop.f32.mrf.mxu0  ;;  %9671 = vmatmul.msk.f32.gmra.mxu1 %vm2754_vm2, %v3520_v60 }
 0x897   :  { %v3693_v54 = vpop.f32.mrf.mxu3 }
 0x898   :  { %v11975_v53 = vpop.f32.mrf.mxu0 }
 0x89f   :  { %v3696_v11 = vpop.f32.mrf.mxu3 }
 0x8a0   :  { %v11978_v14 = vpop.f32.mrf.mxu0 }
 0x8a8   :  { %v11981_v2 = vpop.f32.mrf.mxu0 }
 0x8b0   :  { %v3238_v43 = vpop.f32.mrf.mxu0 }
 0x8b1   :  { %9644 = vmatmul.msk.f32.vlgmr.msra.gmra.mxu2 %vm2754_vm2, %v3238_v43  ;;  %v3709_v43 = vld [vmem:[#allocation14 + $0x118] sm:$0xff] }
 0x8b2   :  { %3643 = vmatpush.msra.mxu2 %v3618_v40  ;;  %3734 = vmatpush.msrb.mxu1 %v3709_v43 }
 0x8b4   :  { %3644 = vmatpush.msra.mxu2 %v3617_v22  ;;  %3735 = vmatpush.msrb.mxu1 %v3708_v42 }
 0x8b6   :  { %3645 = vmatpush.msra.mxu2 %v3616_v33  ;;  %3736 = vmatpush.msrb.mxu1 %v3707_v28  ;;  %v13556_v33 = vld [vmem:[#allocation80_spill] sm:$0xff]  ;;  %v13558_v28 = vld [vmem:[#allocation82_spill] sm:$0xff] }
 0x8b8   :  { %v3241_v58 = vpop.f32.mrf.mxu0  ;;  %3646 = vmatpush.msra.mxu2 %v3615_v21  ;;  %3737 = vmatpush.msrb.mxu1 %v3706_v19  ;;  %v13557_v21 = vld [vmem:[#allocation81_spill] sm:$0xff]  ;;  %v3106_v19 = vpop.f32.mrf.mxu2 }
 0x8b9   :  { %9645 = vmatmul.msk.f32.gmra.mxu2 %vm2754_vm2, %v3241_v58  ;;  %9684 = vmatmul.msk.f32.vlgmr.msrb.gmra.mxu1 %vm2754_vm2, %v3693_v54 }
 0x8c0   :  { %v3244_v5 = vpop.f32.mrf.mxu0 }
 0x8c1   :  { %9646 = vmatmul.msk.f32.gmra.mxu2 %vm2754_vm2, %v3244_v5  ;;  %9685 = vmatmul.msk.f32.gmra.mxu1 %vm2754_vm2, %v3696_v11  ;;  %v3699_v5 = vpop.f32.mrf.mxu3  ;;  %v3109_v11 = vpop.f32.mrf.mxu2 }
 0x8c2   :  { %v3110_v59 = vadd.f32 %v3109_v11, %v11975_v53 }
 0x8c8   :  { %v3247_v48 = vpop.f32.mrf.mxu0 }
 0x8c9   :  { %9647 = vmatmul.msk.f32.gmra.mxu2 %vm2754_vm2, %v3247_v48  ;;  %v2742_v48 = vld [vmem:[%s13554_s3] sm:$0x3]  ;;  %9686 = vmatmul.msk.f32.gmra.mxu1 %vm2754_vm2, %v3699_v5  ;;  %v3702_v22 = vpop.f32.mrf.mxu3  ;;  %v3112_v5 = vpop.f32.mrf.mxu2 }
 0x8ca   :  { %9688 = vmatpush.msk.msrb.mxu0 %vm759_vm0, %v2742_v48  ;;  %v3113_v38 = vadd.f32 %v3112_v5, %v11978_v14 }
 0x8cb   :  { %9689 = vmatmul.msk.f32.vlgmr.msrb.gmra.mxu0 %vm746_vm1, %v13555_v15 }
 0x8d0   :  { %v3420_v16 = vpop.f32.mrf.mxu0 }
 0x8d1   :  { %9660 = vmatmul.msk.f32.vlgmr.msrb.gmra.mxu2 %vm2754_vm2, %v3420_v16  ;;  %9687 = vmatmul.msk.f32.gmra.mxu1 %vm2754_vm2, %v3702_v22  ;;  %v3193_v16 = vpop.f32.mrf.mxu1  ;;  %v3115_v48 = vpop.f32.mrf.mxu2 }
 0x8d2   :  { %9693 = vmatpush.msk.msrb.mxu2 %vm759_vm0, %v2743_v52  ;;  %v3116_v44 = vadd.f32 %v3115_v48, %v11981_v2 }
 0x8d3   :  { %9690 = vmatmul.msk.f32.gmra.mxu0 %vm746_vm1, %v13556_v33 }
 0x8d8   :  { %v3423_v10 = vpop.f32.mrf.mxu0 }
 0x8d9   :  { %9661 = vmatmul.msk.f32.gmra.mxu2 %vm2754_vm2, %v3423_v10  ;;  %v3196_v42 = vpop.f32.mrf.mxu1 }
 0x8da   :  { %v3206_v30 = vadd.f32 %v3196_v42, %v3110_v59 }
 0x8db   :  { %9691 = vmatmul.msk.f32.gmra.mxu0 %vm746_vm1, %v13557_v21 }
 0x8e0   :  { %v3426_v58 = vpop.f32.mrf.mxu0 }
 0x8e1   :  { %9662 = vmatmul.msk.f32.gmra.mxu2 %vm2754_vm2, %v3426_v58  ;;  %v3199_v54 = vpop.f32.mrf.mxu1 }
 0x8e2   :  { %v3207_v24 = vadd.f32 %v3199_v54, %v3113_v38 }
 0x8e3   :  { %9692 = vmatmul.msk.f32.gmra.mxu0 %vm746_vm1, %v13558_v28 }
 0x8e8   :  { %v3429_v61 = vpop.f32.mrf.mxu0 }
 0x8e9   :  { %9663 = vmatmul.msk.f32.gmra.mxu2 %vm2754_vm2, %v3429_v61  ;;  %v3202_v58 = vpop.f32.mrf.mxu1 }
 0x8f0   :  { %v3602_v40 = vpop.f32.mrf.mxu0 }
 0x8f1   :  { %9676 = vmatmul.msk.f32.vlgmr.msra.gmra.mxu2 %vm2754_vm2, %v3602_v40  ;;  %v3375_v61 = vpop.f32.mrf.mxu1 }
 0x8f8   :  { %v3605_v60 = vpop.f32.mrf.mxu0 }
 0x8f9   :  { %9677 = vmatmul.msk.f32.gmra.mxu2 %vm2754_vm2, %v3605_v60  ;;  %v3378_v52 = vpop.f32.mrf.mxu1 }
 0x900   :  { %v3608_v43 = vpop.f32.mrf.mxu0 }
 0x901   :  { %9678 = vmatmul.msk.f32.gmra.mxu2 %vm2754_vm2, %v3608_v43  ;;  %v3381_v40 = vpop.f32.mrf.mxu1 }
 0x908   :  { %v3611_v10 = vpop.f32.mrf.mxu0 }
 0x909   :  { %9679 = vmatmul.msk.f32.gmra.mxu2 %vm2754_vm2, %v3611_v10  ;;  %v3384_v43 = vpop.f32.mrf.mxu1 }
 0x911   :  { %9694 = vmatmul.msk.f32.vlgmr.msrb.gmra.mxu2 %vm746_vm1, %v13555_v15  ;;  %v3557_v10 = vpop.f32.mrf.mxu1 }
 0x919   :  { %9695 = vmatmul.msk.f32.gmra.mxu2 %vm746_vm1, %v13556_v33  ;;  %v3560_v35 = vpop.f32.mrf.mxu1 }
 0x921   :  { %9696 = vmatmul.msk.f32.gmra.mxu2 %vm746_vm1, %v13557_v21  ;;  %v3563_v33 = vpop.f32.mrf.mxu1 }
 0x929   :  { %9697 = vmatmul.msk.f32.gmra.mxu2 %vm746_vm1, %v13558_v28  ;;  %v3566_v20 = vpop.f32.mrf.mxu1  ;;  %v3107_v28 = vadd.f32 %v3106_v19, %v11973_v36  ;;  %v3208_v36 = vadd.f32 %v3202_v58, %v3116_v44 }
 0x92b   :  { %v3205_v51 = vadd.f32 %v3193_v16, %v3107_v28 }
 0x934   :  { %v3284_v22 = vpop.f32.mrf.mxu2 }
 0x935   :  { %v3296_v4 = vadd.f32 %v3284_v22, %v3205_v51 }
 0x936   :  { %v3739_v23 = vpop.f32.mrf.mxu1 }
 0x937   :  { %v3387_v55 = vadd.f32 %v3375_v61, %v3296_v4 }
 0x93c   :  { %v3287_v60 = vpop.f32.mrf.mxu2 }
 0x93d   :  { %v3297_v46 = vadd.f32 %v3287_v60, %v3206_v30 }
 0x93e   :  { %v3742_v39 = vpop.f32.mrf.mxu1 }
 0x93f   :  { %v3388_v50 = vadd.f32 %v3378_v52, %v3297_v46 }
 0x944   :  { %v3290_v15 = vpop.f32.mrf.mxu2 }
 0x945   :  { %v3298_v12 = vadd.f32 %v3290_v15, %v3207_v24  ;;  %v10238_v24 = vld [vmem:[#allocation16] ss:$0 sm:$0xff] }
 0x946   :  { %v3745_v14 = vpop.f32.mrf.mxu1 }
 0x947   :  { %v3389_v53 = vadd.f32 %v3381_v40, %v3298_v12 }
 0x94c   :  { %v3293_v13 = vpop.f32.mrf.mxu2 }
 0x94d   :  { %v3299_v42 = vadd.f32 %v3293_v13, %v3208_v36 }
 0x94f   :  { %v3390_v54 = vadd.f32 %v3384_v43, %v3299_v42 }
 0x954   :  { %v3466_v27 = vpop.f32.mrf.mxu2 }
 0x955   :  { %v3478_v37 = vadd.f32 %v3466_v27, %v3387_v55 }
 0x957   :  { %v3569_v59 = vadd.f32 %v3557_v10, %v3478_v37  ;;  %v3748_v37 = vpop.f32.mrf.mxu1 }
 0x95c   :  { %v3469_v3 = vpop.f32.mrf.mxu2 }
 0x95d   :  { %v3479_v9 = vadd.f32 %v3469_v3, %v3388_v50 }
 0x95f   :  { %v3570_v11 = vadd.f32 %v3560_v35, %v3479_v9 }
 0x964   :  { %v3472_v62 = vpop.f32.mrf.mxu2 }
 0x965   :  { %v3480_v16 = vadd.f32 %v3472_v62, %v3389_v53 }
 0x967   :  { %v3571_v51 = vadd.f32 %v3563_v33, %v3480_v16  ;;  %v3967_v16 = vld [vmem:[#allocation17 + $0x78] sm:$0xff] }
 0x968   :  { %3988 = vmatpush.msra.mxu0 %v3967_v16 }
 0x96c   :  { %v3475_v21 = vpop.f32.mrf.mxu2 }
 0x96d   :  { %v3481_v27 = vadd.f32 %v3475_v21, %v3390_v54 }
 0x96f   :  { %v3572_v44 = vadd.f32 %v3566_v20, %v3481_v27 }
 0x974   :  { %v3648_v32 = vpop.f32.mrf.mxu2 }
 0x975   :  { %v3660_v19 = vadd.f32 %v3648_v32, %v3569_v59 }
 0x977   :  { %v3751_v4 = vadd.f32 %v3739_v23, %v3660_v19  ;;  %v3966_v19 = vld [vmem:[#allocation17 + $0x70] sm:$0xff] }
 0x978   :  { %3989 = vmatpush.msra.mxu0 %v3966_v19 }
 0x979   :  { %v12031_v12 = vadd.f32 %v10238_v24, %v3751_v4 }
 0x97b   :  { %v3777_v32 = vmul.f32 %v12031_v12, %v12031_v12  ;;  %v3763_v62 = vsel %vm3762_vm7, %v12031_v12, 0.0 }
 0x97c   :  { %v3651_v8 = vpop.f32.mrf.mxu2 }
 0x97d   :  { %v3661_v30 = vadd.f32 %v3651_v8, %v3570_v11  ;;  %v3781_v5 = vsel %vm3762_vm7, %v3777_v32, 0.0  ;;  %v3961_v32 = vld [vmem:[#allocation17 + $0x48] sm:$0xff] }
 0x97f   :  { %v3752_v38 = vadd.f32 %v3742_v39, %v3661_v30 }
 0x981   :  { %v12029_v50 = vadd.f32 %v10238_v24, %v3752_v38  ;;  %v3965_v38 = vld [vmem:[#allocation17 + $0x68] sm:$0xff] }
 0x982   :  { %3990 = vmatpush.msra.mxu0 %v3965_v38 }
 0x983   :  { %v3778_v13 = vmul.f32 %v12029_v50, %v12029_v50  ;;  %v3764_v9 = vsel %vm3762_vm7, %v12029_v50, 0.0 }
 0x984   :  { %v3654_v46 = vpop.f32.mrf.mxu2  ;;  %v3765_v61 = vadd.f32 %v3764_v9, %v3763_v62 }
 0x985   :  { %v3662_v3 = vadd.f32 %v3654_v46, %v3571_v51  ;;  %v3782_v20 = vsel %vm3762_vm7, %v3778_v13, 0.0  ;;  %v3837_v46 = vpop.f32.mrf.mxu0 }
 0x986   :  { %v3783_v40 = vadd.f32 %v3782_v20, %v3781_v5 }
 0x987   :  { %v3753_v55 = vadd.f32 %v3745_v14, %v3662_v3 }
 0x989   :  { %v12033_v35 = vadd.f32 %v10238_v24, %v3753_v55 }
 0x98b   :  { %v3779_v39 = vmul.f32 %v12033_v35, %v12033_v35  ;;  %v3766_v2 = vsel %vm3762_vm7, %v12033_v35, 0.0 }
 0x98c   :  { %v3657_v8 = vpop.f32.mrf.mxu2  ;;  %v3767_v22 = vadd.f32 %v3766_v2, %v3765_v61 }
 0x98d   :  { %v3663_v23 = vadd.f32 %v3657_v8, %v3572_v44  ;;  %v3784_v52 = vsel %vm3762_vm7, %v3779_v39, 0.0  ;;  %v3963_v44 = vld [vmem:[#allocation17 + $0x58] sm:$0xff]  ;;  %v3960_v39 = vld [vmem:[#allocation17 + $0x40] sm:$0xff]  ;;  %v3840_v62 = vpop.f32.mrf.mxu0 }
 0x98e   :  { %v3785_v15 = vadd.f32 %v3784_v52, %v3783_v40 }
 0x98f   :  { %v3754_v58 = vadd.f32 %v3748_v37, %v3663_v23  ;;  %v3962_v37 = vld [vmem:[#allocation17 + $0x50] sm:$0xff] }
 0x991   :  { %v12050_v48 = vadd.f32 %v10238_v24, %v3754_v58  ;;  %v3964_v24 = vld [vmem:[#allocation17 + $0x60] sm:$0xff] }
 0x992   :  { %3991 = vmatpush.msra.mxu0 %v3964_v24  ;;  %v4082_v24 = vld [vmem:[#allocation17 + $0x90] sm:$0xff] }
 0x993   :  { %v3768_v60 = vsel %vm3762_vm7, %v12050_v48, 0.0  ;;  %v3780_v43 = vmul.f32 %v12050_v48, %v12050_v48 }
 0x994   :  { %v3769_v10 = vadd.f32 %v3768_v60, %v3767_v22  ;;  %v3873_v3 = vpop.f32.mrf.mxu2  ;;  %3992 = vmatpush.msra.mxu0 %v3963_v44  ;;  %v4080_v44 = vld [vmem:[#allocation17 + $0x80] sm:$0xff] }
 0x995   :  { %v3786_v33 = vsel %vm3762_vm7, %v3780_v43, 0.0  ;;  %v3843_v5 = vpop.f32.mrf.mxu0 }
 0x996   :  { %v3770_v21 = vrot.slane %v3769_v10, 4  ;;  %v3787_v28 = vadd.f32 %v3786_v33, %v3785_v15  ;;  %3993 = vmatpush.msra.mxu0 %v3962_v37 }
 0x998   :  { %v3771_v53 = vadd.f32 %v3770_v21, %v3769_v10  ;;  %v3788_v11 = vrot.slane %v3787_v28, 4  ;;  %3994 = vmatpush.msra.mxu0 %v3961_v32 }
 0x99a   :  { %v3772_v36 = vrot.slane %v3771_v53, 2  ;;  %v3789_v59 = vadd.f32 %v3788_v11, %v3787_v28  ;;  %3995 = vmatpush.msra.mxu0 %v3960_v39 }
 0x99c   :  { %v3773_v30 = vadd.f32 %v3772_v36, %v3771_v53  ;;  %v3790_v42 = vrot.slane %v3789_v59, 2  ;;  %v3876_v2 = vpop.f32.mrf.mxu2 }
 0x99d   :  { %v3846_v53 = vpop.f32.mrf.mxu0 }
 0x99e   :  { %v3774_v14 = vrot.slane %v3773_v30, 1  ;;  %v3791_v51 = vadd.f32 %v3790_v42, %v3789_v59 }
 0x9a0   :  { %v3775_v54 = vadd.f32 %v3774_v14, %v3773_v30  ;;  %v3792_v4 = vrot.slane %v3791_v51, 1 }
 0x9a2   :  { %v3776_v27 = vmul.f32 %v3775_v54, %v11757_v63  ;;  %v3793_v55 = vadd.f32 %v3792_v4, %v3791_v51 }
 0x9a4   :  { %v3794_v13 = vmul.f32 %v3793_v55, %v11757_v63  ;;  %v3795_v8 = vmul.f32 %v3776_v27, %v3776_v27  ;;  %v3879_v40 = vpop.f32.mrf.mxu2  ;;  %v3798_v15 = vsub.f32 %v12031_v12, %v3776_v27  ;;  %v3799_v10 = vsub.f32 %v12029_v50, %v3776_v27 }
 0x9a5   :  { %v3800_v33 = vsub.f32 %v12033_v35, %v3776_v27  ;;  %v3801_v21 = vsub.f32 %v12050_v48, %v3776_v27  ;;  %v4081_v27 = vld [vmem:[#allocation17 + $0x88] sm:$0xff] }
 0x9a6   :  { %v3796_v9 = vsub.f32 %v3794_v13, %v3795_v8  ;;  %v13563_v8 = vld [vmem:[#allocation95_spill] sm:$0xff] }
 0x9a8   :  { %v3797_v23 = vmax.f32 %v3796_v9, 0.0  ;;  %v13564_v9 = vld [vmem:[#allocation97_spill] sm:$0xff] }
 0x9aa   :  { %v3802_v20 = vadd.f32 1e-05, %v3797_v23 }
 0x9ac   :  { %10249 = vrsqrt.f32 %v3802_v20  ;;  %vm3809_vm9 = vweird.f32 %v3802_v20  ;;  %v3882_v30 = vpop.f32.mrf.mxu2 }
 0x9b2   :  { %v10250_v58 = vpop.eup %10249 }
 0x9b3   :  { %v3804_v61 = vmul.f32 %v10250_v58, %v3802_v20  ;;  %vm3810_vm8 = vweird.f32 %v10250_v58 }
 0x9b4   :  { %vm3811_vm10 = vmor %vm3809_vm9, %vm3810_vm8 }
 0x9b5   :  { %v3805_v52 = vmul.f32 %v10250_v58, %v3804_v61  ;;  %v13567_v61 = vld [vmem:[#allocation86_spill] sm:$0xff] }
 0x9b7   :  { %v3806_v22 = vmul.f32 0.5, %v3805_v52  ;;  %v13568_v52 = vld [vmem:[#allocation88_spill] sm:$0xff] }
 0x9b9   :  { %v3807_v60 = vsub.f32 1.5, %v3806_v22  ;;  %v13569_v22 = vld [vmem:[#allocation90_spill] sm:$0xff] }
 0x9bb   :  { %v3808_v43 = vmul.f32 %v10250_v58, %v3807_v60 }
 0x9bd   :  { %v3812_v28 = vsel %vm3811_vm10, %v10250_v58, %v3808_v43  ;;  %v13570_v43 = vld [vmem:[#allocation92_spill] sm:$0xff] }
 0x9be   :  { %v3813_v11 = vmul.f32 %v3812_v28, %v3798_v15  ;;  %v3814_v36 = vmul.f32 %v3812_v28, %v3799_v10  ;;  %v3815_v59 = vmul.f32 %v3812_v28, %v3800_v33  ;;  %v3816_v16 = vmul.f32 %v3812_v28, %v3801_v21  ;;  %v13571_v15 = vld [vmem:[#allocation94_spill] sm:$0xff]  ;;  %v13572_v10 = vld [vmem:[#allocation96_spill] sm:$0xff]  ;;  %v13575_v28 = vld [vmem:[#allocation101_spill] sm:$0xff] }
 0x9bf   :  { %v13573_v33 = vld [vmem:[#allocation98_spill] sm:$0xff]  ;;  %v13574_v21 = vld [vmem:[#allocation100_spill] sm:$0xff] }
 0x9c0   :  { %v3850_v42 = vmul.f32 %v3840_v62, %v3814_v36  ;;  %v3851_v19 = vmul.f32 %v3843_v5, %v3815_v59  ;;  %v3852_v14 = vmul.f32 %v3846_v53, %v3816_v16  ;;  %v3849_v51 = vmul.f32 %v3837_v46, %v3813_v11  ;;  %v13565_v62 = vld [vmem:[#allocation99_spill] sm:$0xff]  ;;  %v4170_v53 = vld [vmem:[#allocation17 + $0xf8] sm:$0xff]  ;;  %v13576_v11 = vld [vmem:[#allocation102_spill] sm:$0xff] }
 0x9c1   :  { %v4169_v36 = vld [vmem:[#allocation17 + $0xf0] sm:$0xff]  ;;  %v4168_v59 = vld [vmem:[#allocation17 + $0xe8] sm:$0xff]  ;;  %v4167_v16 = vld [vmem:[#allocation17 + $0xe0] sm:$0xff] }
 0x9c2   :  { %v3887_v38 = vadd.f32 %v3879_v40, %v3851_v19  ;;  %v3888_v12 = vadd.f32 %v3882_v30, %v3852_v14  ;;  %v3886_v54 = vadd.f32 %v3876_v2, %v3850_v42  ;;  %v3885_v50 = vadd.f32 %v3873_v3, %v3849_v51  ;;  %v13562_v3 = vld [vmem:[#allocation93_spill] sm:$0xff]  ;;  %v13577_v19 = vld [vmem:[#allocation103_spill] sm:$0xff] }
 0x9c3   :  { %v13566_v2 = vld [vmem:[#allocation85_spill] sm:$0xff]  ;;  %v4165_v14 = vld [vmem:[#allocation17 + $0xd0] sm:$0xff] }
 0x9c4   :  { %v12063_v4 = vmax.f32 %v3888_v12, 0.0  ;;  %v12065_v35 = vmax.f32 %v3887_v38, 0.0  ;;  %v12070_v48 = vmax.f32 %v3886_v54, 0.0  ;;  %v12075_v46 = vmax.f32 %v3885_v50, 0.0  ;;  %v4253_v30 = vld [vmem:[#allocation17 + $0x138] sm:$0xff]  ;;  %v4252_v51 = vld [vmem:[#allocation17 + $0x130] sm:$0xff] }
 0x9c5   :  { %v4166_v42 = vld [vmem:[#allocation17 + $0xd8] sm:$0xff]  ;;  %v4164_v38 = vld [vmem:[#allocation17 + $0xc8] sm:$0xff]  ;;  %v4250_v50 = vld [vmem:[#allocation17 + $0x120] sm:$0xff] }
 0x9c6   :  { %3905 = vmatpush.msrb.mxu3 %v12063_v4  ;;  %3942 = vmatpush.msra.mxu1 %v12063_v4  ;;  %v4251_v12 = vld [vmem:[#allocation17 + $0x128] sm:$0xff] }
 0x9c7   :  { %4145 = vmatpush.msrb.mxu0 %v12063_v4 }
 0x9c8   :  { %3906 = vmatpush.msrb.mxu3 %v12065_v35  ;;  %3943 = vmatpush.msra.mxu1 %v12065_v35 }
 0x9c9   :  { %4146 = vmatpush.msrb.mxu0 %v12065_v35 }
 0x9ca   :  { %3907 = vmatpush.msrb.mxu3 %v12070_v48  ;;  %3944 = vmatpush.msra.mxu1 %v12070_v48 }
 0x9cb   :  { %4147 = vmatpush.msrb.mxu0 %v12070_v48 }
 0x9cc   :  { %3908 = vmatpush.msrb.mxu3 %v12075_v46  ;;  %3945 = vmatpush.msra.mxu1 %v12075_v46 }
 0x9cd   :  { %4148 = vmatpush.msrb.mxu0 %v12075_v46  ;;  %9698 = vmatmul.msk.f32.vlgmr.msrb.gmra.mxu3 %vm2754_vm2, %v11781_v18  ;;  %v3929_v18 = vld [vmem:[#allocation17 + $0x38] sm:$0xff] }
 0x9ce   :  { %9702 = vmatmul.msk.f32.vlgmr.msra.gmra.mxu1 %vm2754_vm2, %v11784_v56  ;;  %4062 = vmatpush.msra.mxu3 %v12063_v4  ;;  %v3928_v56 = vld [vmem:[#allocation17 + $0x30] sm:$0xff] }
 0x9cf   :  { %4029 = vmatpush.msra.mxu2 %v3929_v18 }
 0x9d0   :  { %4063 = vmatpush.msra.mxu3 %v12065_v35 }
 0x9d1   :  { %4030 = vmatpush.msra.mxu2 %v3928_v56 }
 0x9d2   :  { %4064 = vmatpush.msra.mxu3 %v12070_v48 }
 0x9d4   :  { %4065 = vmatpush.msra.mxu3 %v12075_v46 }
 0x9d5   :  { %9699 = vmatmul.msk.f32.gmra.mxu3 %vm2754_vm2, %v11796_v57  ;;  %v3927_v57 = vld [vmem:[#allocation17 + $0x28] sm:$0xff] }
 0x9d6   :  { %4228 = vmatpush.msrb.mxu3 %v12063_v4  ;;  %9703 = vmatmul.msk.f32.gmra.mxu1 %vm2754_vm2, %v11798_v47  ;;  %v3926_v47 = vld [vmem:[#allocation17 + $0x20] sm:$0xff] }
 0x9d7   :  { %4031 = vmatpush.msra.mxu2 %v3927_v57  ;;  %v4246_v57 = vld [vmem:[#allocation17 + $0x100] sm:$0xff] }
 0x9d8   :  { %4229 = vmatpush.msrb.mxu3 %v12065_v35 }
 0x9d9   :  { %4032 = vmatpush.msra.mxu2 %v3926_v47 }
 0x9da   :  { %4230 = vmatpush.msrb.mxu3 %v12070_v48 }
 0x9dc   :  { %4231 = vmatpush.msrb.mxu3 %v12075_v46 }
 0x9dd   :  { %9700 = vmatmul.msk.f32.gmra.mxu3 %vm2754_vm2, %v11809_v34  ;;  %v3925_v34 = vld [vmem:[#allocation17 + $0x18] sm:$0xff] }
 0x9de   :  { %9704 = vmatmul.msk.f32.gmra.mxu1 %vm2754_vm2, %v11811_v0  ;;  %4033 = vmatpush.msra.mxu2 %v3925_v34  ;;  %v3924_v0 = vld [vmem:[#allocation17 + $0x10] sm:$0xff] }
 0x9e0   :  { %4034 = vmatpush.msra.mxu2 %v3924_v0  ;;  %v4336_v0 = vld [vmem:[#allocation17 + $0x178] sm:$0xff] }
 0x9e5   :  { %9701 = vmatmul.msk.f32.gmra.mxu3 %vm2754_vm2, %v11817_v26  ;;  %v3923_v26 = vld [vmem:[#allocation17 + $0x8] sm:$0xff] }
 0x9e6   :  { %9705 = vmatmul.msk.f32.gmra.mxu1 %vm2754_vm2, %v11819_v31  ;;  %4035 = vmatpush.msra.mxu2 %v3923_v26  ;;  %v3922_v31 = vld [vmem:[#allocation17] sm:$0xff]  ;;  %v4335_v26 = vld [vmem:[#allocation17 + $0x170] sm:$0xff] }
 0x9e8   :  { %4036 = vmatpush.msra.mxu2 %v3922_v31  ;;  %v4334_v31 = vld [vmem:[#allocation17 + $0x168] sm:$0xff] }
 0x9ea   :  { %4191 = vmatpush.msrb.mxu2 %v4170_v53  ;;  %v4581_v53 = vld [vmem:[#allocation17 + $0x218] sm:$0xff] }
 0x9ec   :  { %4192 = vmatpush.msrb.mxu2 %v4169_v36  ;;  %v4579_v36 = vld [vmem:[#allocation17 + $0x208] sm:$0xff] }
 0x9ed   :  { %9714 = vmatmul.msk.f32.vlgmr.msra.gmra.mxu3 %vm2754_vm2, %v11825_v45  ;;  %v13559_v45 = vld [vmem:[#allocation87_spill] sm:$0xff] }
 0x9ee   :  { %4394 = vmatpush.msra.mxu3 %v12063_v4  ;;  %4193 = vmatpush.msrb.mxu2 %v4168_v59 }
 0x9f0   :  { %4395 = vmatpush.msra.mxu3 %v12065_v35  ;;  %4194 = vmatpush.msrb.mxu2 %v4167_v16 }
 0x9f2   :  { %4396 = vmatpush.msra.mxu3 %v12070_v48  ;;  %4195 = vmatpush.msrb.mxu2 %v4166_v42 }
 0x9f4   :  { %4397 = vmatpush.msra.mxu3 %v12075_v46  ;;  %4196 = vmatpush.msrb.mxu2 %v4165_v14 }
 0x9f5   :  { %9715 = vmatmul.msk.f32.gmra.mxu3 %vm2754_vm2, %v11832_v1  ;;  %v13560_v1 = vld [vmem:[#allocation89_spill] sm:$0xff] }
 0x9f6   :  { %4197 = vmatpush.msrb.mxu2 %v4164_v38  ;;  %v4643_v38 = vld [vmem:[%s13578_s9] sm:$0x3] }
 0x9fd   :  { %9716 = vmatmul.msk.f32.gmra.mxu3 %vm2754_vm2, %v11837_v29  ;;  %v4087_v29 = vld [vmem:[#allocation17 + $0xb8] sm:$0xff] }
 0x9fe   :  { %4108 = vmatpush.msrb.mxu1 %v4087_v29  ;;  %v4333_v29 = vld [vmem:[#allocation17 + $0x160] sm:$0xff] }
 0xa05   :  { %9717 = vmatmul.msk.f32.gmra.mxu3 %vm2754_vm2, %v11841_v25  ;;  %v4086_v25 = vld [vmem:[#allocation17 + $0xb0] sm:$0xff] }
 0xa06   :  { %4109 = vmatpush.msrb.mxu1 %v4086_v25  ;;  %v4332_v25 = vld [vmem:[#allocation17 + $0x158] sm:$0xff] }
 0xa0d   :  { %9730 = vmatmul.msk.f32.vlgmr.msrb.gmra.mxu3 %vm2754_vm2, %v11845_v17  ;;  %v4085_v17 = vld [vmem:[#allocation17 + $0xa8] sm:$0xff] }
 0xa0e   :  { %4560 = vmatpush.msrb.mxu3 %v12063_v4  ;;  %4110 = vmatpush.msrb.mxu1 %v4085_v17  ;;  %v4419_v17 = vld [vmem:[#allocation17 + $0x1b8] sm:$0xff] }
 0xa10   :  { %4561 = vmatpush.msrb.mxu3 %v12065_v35 }
 0xa12   :  { %4562 = vmatpush.msrb.mxu3 %v12070_v48 }
 0xa14   :  { %4563 = vmatpush.msrb.mxu3 %v12075_v46 }
 0xa15   :  { %9731 = vmatmul.msk.f32.gmra.mxu3 %vm2754_vm2, %v11868_v7  ;;  %v13561_v7 = vld [vmem:[#allocation91_spill] sm:$0xff] }
 0xa1d   :  { %9732 = vmatmul.msk.f32.gmra.mxu3 %vm2754_vm2, %v11874_v41  ;;  %v4084_v41 = vld [vmem:[#allocation17 + $0xa0] sm:$0xff] }
 0xa1e   :  { %4111 = vmatpush.msrb.mxu1 %v4084_v41  ;;  %v4331_v41 = vld [vmem:[#allocation17 + $0x150] sm:$0xff] }
 0xa25   :  { %9733 = vmatmul.msk.f32.gmra.mxu3 %vm2754_vm2, %v11880_v49  ;;  %v4083_v49 = vld [vmem:[#allocation17 + $0x98] sm:$0xff] }
 0xa26   :  { %4112 = vmatpush.msrb.mxu1 %v4083_v49  ;;  %v4330_v49 = vld [vmem:[#allocation17 + $0x148] sm:$0xff] }
 0xa28   :  { %4113 = vmatpush.msrb.mxu1 %v4082_v24 }
 0xa2a   :  { %4114 = vmatpush.msrb.mxu1 %v4081_v27  ;;  %v4329_v27 = vld [vmem:[#allocation17 + $0x140] sm:$0xff] }
 0xa2c   :  { %4115 = vmatpush.msrb.mxu1 %v4080_v44  ;;  %v4415_v44 = vld [vmem:[#allocation17 + $0x198] sm:$0xff] }
 0xa2d   :  { %9746 = vmatmul.msk.f32.vlgmr.msra.gmra.mxu3 %vm2754_vm2, %v11889_v6 }
 0xa2e   :  { %4274 = vmatpush.msra.mxu1 %v4253_v30  ;;  %v4578_v30 = vld [vmem:[#allocation17 + $0x200] sm:$0xff] }
 0xa30   :  { %4275 = vmatpush.msra.mxu1 %v4252_v51 }
 0xa32   :  { %4276 = vmatpush.msra.mxu1 %v4251_v12  ;;  %v4642_v12 = vld [vmem:[%s13579_s20] sm:$0x3] }
 0xa34   :  { %4277 = vmatpush.msra.mxu1 %v4250_v50 }
 0xa35   :  { %9747 = vmatmul.msk.f32.gmra.mxu3 %vm2754_vm2, %v13559_v45 }
 0xa3d   :  { %9748 = vmatmul.msk.f32.gmra.mxu3 %vm2754_vm2, %v13560_v1 }
 0xa45   :  { %9749 = vmatmul.msk.f32.gmra.mxu3 %vm2754_vm2, %v13561_v7  ;;  %v4418_v7 = vld [vmem:[#allocation17 + $0x1b0] sm:$0xff] }
 0xa4b   :  { %v3947_v6 = vpop.f32.mrf.mxu1 }
 0xa4c   :  { %9706 = vmatmul.msk.f32.vlgmr.msra.gmra.mxu0 %vm3762_vm7, %v3947_v6  ;;  %v4417_v6 = vld [vmem:[#allocation17 + $0x1a8] sm:$0xff] }
 0xa4d   :  { %4311 = vmatpush.msra.mxu0 %v12063_v4  ;;  %9762 = vmatmul.msk.f32.vlgmr.msrb.gmra.mxu3 %vm2754_vm2, %v13562_v3 }
 0xa4f   :  { %4312 = vmatpush.msra.mxu0 %v12065_v35 }
 0xa50   :  { %v3910_v55 = vpop.f32.mrf.mxu3 }
 0xa51   :  { %4313 = vmatpush.msra.mxu0 %v12070_v48  ;;  %9710 = vmatmul.msk.f32.vlgmr.msra.gmra.mxu2 %vm3762_vm7, %v3910_v55  ;;  %v4416_v55 = vld [vmem:[#allocation17 + $0x1a0] sm:$0xff] }
 0xa53   :  { %4314 = vmatpush.msra.mxu0 %v12075_v46  ;;  %v3950_v13 = vpop.f32.mrf.mxu1 }
 0xa54   :  { %9707 = vmatmul.msk.f32.gmra.mxu0 %vm3762_vm7, %v3950_v13  ;;  %v4414_v13 = vld [vmem:[#allocation17 + $0x190] sm:$0xff] }
 0xa55   :  { %9763 = vmatmul.msk.f32.gmra.mxu3 %vm2754_vm2, %v13563_v8  ;;  %v4413_v8 = vld [vmem:[#allocation17 + $0x188] sm:$0xff] }
 0xa58   :  { %v3913_v37 = vpop.f32.mrf.mxu3 }
 0xa59   :  { %9711 = vmatmul.msk.f32.gmra.mxu2 %vm3762_vm7, %v3913_v37 }
 0xa5b   :  { %v3953_v32 = vpop.f32.mrf.mxu1 }
 0xa5c   :  { %9708 = vmatmul.msk.f32.gmra.mxu0 %vm3762_vm7, %v3953_v32 }
 0xa5d   :  { %9764 = vmatmul.msk.f32.gmra.mxu3 %vm2754_vm2, %v13564_v9  ;;  %v4412_v9 = vld [vmem:[#allocation17 + $0x180] sm:$0xff] }
 0xa60   :  { %v3916_v39 = vpop.f32.mrf.mxu3 }
 0xa61   :  { %9712 = vmatmul.msk.f32.gmra.mxu2 %vm3762_vm7, %v3916_v39 }
 0xa63   :  { %v3956_v23 = vpop.f32.mrf.mxu1 }
 0xa64   :  { %9709 = vmatmul.msk.f32.gmra.mxu0 %vm3762_vm7, %v3956_v23 }
 0xa65   :  { %9765 = vmatmul.msk.f32.gmra.mxu3 %vm2754_vm2, %v13565_v62  ;;  %v4502_v62 = vld [vmem:[#allocation17 + $0x1f8] sm:$0xff] }
 0xa68   :  { %v3919_v20 = vpop.f32.mrf.mxu3 }
 0xa69   :  { %9713 = vmatmul.msk.f32.gmra.mxu2 %vm3762_vm7, %v3919_v20  ;;  %v4501_v20 = vld [vmem:[#allocation17 + $0x1f0] sm:$0xff] }
 0xa6c   :  { %9722 = vmatmul.msk.f32.vlgmr.msrb.gmra.mxu0 %vm2754_vm2, %v13566_v2  ;;  %v4500_v2 = vld [vmem:[#allocation17 + $0x1e8] sm:$0xff] }
 0xa6d   :  { %4477 = vmatpush.msrb.mxu0 %v12063_v4  ;;  %v4163_v4 = vld [vmem:[#allocation17 + $0xc0] sm:$0xff] }
 0xa6e   :  { %4198 = vmatpush.msrb.mxu2 %v4163_v4  ;;  %v12222_v4 = vld [vmem:[#allocation5] sm:$0xff] }
 0xa6f   :  { %4478 = vmatpush.msrb.mxu0 %v12065_v35  ;;  %v4249_v35 = vld [vmem:[#allocation17 + $0x118] sm:$0xff] }
 0xa70   :  { %v4067_v58 = vpop.f32.mrf.mxu3  ;;  %4278 = vmatpush.msra.mxu1 %v4249_v35  ;;  %4357 = vmatpush.msra.mxu2 %v4336_v0 }
 0xa71   :  { %4479 = vmatpush.msrb.mxu0 %v12070_v48  ;;  %9718 = vmatmul.msk.f32.vlgmr.msrb.gmra.mxu1 %vm3762_vm7, %v4067_v58  ;;  %v4248_v48 = vld [vmem:[#allocation17 + $0x110] sm:$0xff] }
 0xa72   :  { %4279 = vmatpush.msra.mxu1 %v4248_v48  ;;  %4358 = vmatpush.msra.mxu2 %v4335_v26  ;;  %v12228_v48 = vld [vmem:[#allocation5 + $0x8] sm:$0xff]  ;;  %v12238_v26 = vld [vmem:[#allocation5 + $0x18] sm:$0xff] }
 0xa73   :  { %4480 = vmatpush.msrb.mxu0 %v12075_v46  ;;  %v4247_v46 = vld [vmem:[#allocation17 + $0x108] sm:$0xff] }
 0xa74   :  { %9723 = vmatmul.msk.f32.gmra.mxu0 %vm2754_vm2, %v13567_v61  ;;  %4280 = vmatpush.msra.mxu1 %v4247_v46 }
 0xa75   :  { %4359 = vmatpush.msra.mxu2 %v4334_v31 }
 0xa76   :  { %4281 = vmatpush.msra.mxu1 %v4246_v57  ;;  %v12233_v57 = vld [vmem:[#allocation5 + $0x10] sm:$0xff] }
 0xa77   :  { %4360 = vmatpush.msra.mxu2 %v4333_v29 }
 0xa78   :  { %v4070_v5 = vpop.f32.mrf.mxu3  ;;  %4440 = vmatpush.msrb.mxu1 %v4419_v17 }
 0xa79   :  { %9719 = vmatmul.msk.f32.gmra.mxu1 %vm3762_vm7, %v4070_v5  ;;  %4361 = vmatpush.msra.mxu2 %v4332_v25  ;;  %v4499_v5 = vld [vmem:[#allocation17 + $0x1e0] sm:$0xff] }
 0xa7a   :  { %4441 = vmatpush.msrb.mxu1 %v4418_v7 }
 0xa7b   :  { %4362 = vmatpush.msra.mxu2 %v4331_v41 }
 0xa7c   :  { %9724 = vmatmul.msk.f32.gmra.mxu0 %vm2754_vm2, %v13568_v52  ;;  %4442 = vmatpush.msrb.mxu1 %v4417_v6  ;;  %v4498_v52 = vld [vmem:[#allocation17 + $0x1d8] sm:$0xff] }
 0xa7d   :  { %4363 = vmatpush.msra.mxu2 %v4330_v49 }
 0xa7e   :  { %4443 = vmatpush.msrb.mxu1 %v4416_v55 }
 0xa7f   :  { %4364 = vmatpush.msra.mxu2 %v4329_v27 }
 0xa80   :  { %v4073_v40 = vpop.f32.mrf.mxu3  ;;  %4444 = vmatpush.msrb.mxu1 %v4415_v44 }
 0xa81   :  { %9720 = vmatmul.msk.f32.gmra.mxu1 %vm3762_vm7, %v4073_v40  ;;  %v4585_v40 = vld [vmem:[#allocation17 + $0x238] sm:$0xff] }
 0xa82   :  { %4445 = vmatpush.msrb.mxu1 %v4414_v13 }
 0xa84   :  { %9725 = vmatmul.msk.f32.gmra.mxu0 %vm2754_vm2, %v13569_v22  ;;  %4446 = vmatpush.msrb.mxu1 %v4413_v8  ;;  %v4584_v22 = vld [vmem:[#allocation17 + $0x230] sm:$0xff] }
 0xa86   :  { %4447 = vmatpush.msrb.mxu1 %v4412_v9 }
 0xa88   :  { %v4076_v60 = vpop.f32.mrf.mxu3 }
 0xa89   :  { %9721 = vmatmul.msk.f32.gmra.mxu1 %vm3762_vm7, %v4076_v60  ;;  %v4497_v60 = vld [vmem:[#allocation17 + $0x1d0] sm:$0xff] }
 0xa8c   :  { %9738 = vmatmul.msk.f32.vlgmr.msra.gmra.mxu0 %vm2754_vm2, %v13570_v43  ;;  %v4583_v43 = vld [vmem:[#allocation17 + $0x228] sm:$0xff] }
 0xa8d   :  { %9770 = vmatpush.msk.msra.mxu0 %vm759_vm0, %v4642_v12 }
 0xa90   :  { %v4233_v56 = vpop.f32.mrf.mxu3 }
 0xa91   :  { %9734 = vmatmul.msk.f32.vlgmr.msra.gmra.mxu1 %vm3762_vm7, %v4233_v56 }
 0xa92   :  { %4606 = vmatpush.msra.mxu1 %v4585_v40 }
 0xa94   :  { %9739 = vmatmul.msk.f32.gmra.mxu0 %vm2754_vm2, %v13571_v15  ;;  %4607 = vmatpush.msra.mxu1 %v4584_v22  ;;  %v4496_v15 = vld [vmem:[#allocation17 + $0x1c8] sm:$0xff] }
 0xa96   :  { %4608 = vmatpush.msra.mxu1 %v4583_v43 }
 0xa98   :  { %v4236_v34 = vpop.f32.mrf.mxu3 }
 0xa99   :  { %9735 = vmatmul.msk.f32.gmra.mxu1 %vm3762_vm7, %v4236_v34 }
 0xa9c   :  { %9740 = vmatmul.msk.f32.gmra.mxu0 %vm2754_vm2, %v13572_v10 }
 0xaa0   :  { %v4239_v1 = vpop.f32.mrf.mxu3 }
 0xaa1   :  { %9736 = vmatmul.msk.f32.gmra.mxu1 %vm3762_vm7, %v4239_v1 }
 0xaa4   :  { %9741 = vmatmul.msk.f32.gmra.mxu0 %vm2754_vm2, %v13573_v33 }
 0xaa8   :  { %v4242_v3 = vpop.f32.mrf.mxu3 }
 0xaa9   :  { %9737 = vmatmul.msk.f32.gmra.mxu1 %vm3762_vm7, %v4242_v3 }
 0xaac   :  { %9754 = vmatmul.msk.f32.vlgmr.msrb.gmra.mxu0 %vm2754_vm2, %v13574_v21  ;;  %v4495_v21 = vld [vmem:[#allocation17 + $0x1c0] sm:$0xff] }
 0xab0   :  { %v4399_v32 = vpop.f32.mrf.mxu3 }
 0xab1   :  { %9750 = vmatmul.msk.f32.vlgmr.msrb.gmra.mxu1 %vm3762_vm7, %v4399_v32 }
 0xab4   :  { %9755 = vmatmul.msk.f32.gmra.mxu0 %vm2754_vm2, %v13575_v28  ;;  %v4582_v28 = vld [vmem:[#allocation17 + $0x220] sm:$0xff] }
 0xab5   :  { %4609 = vmatpush.msra.mxu1 %v4582_v28 }
 0xab7   :  { %4610 = vmatpush.msra.mxu1 %v4581_v53 }
 0xab8   :  { %v4402_v23 = vpop.f32.mrf.mxu3 }
 0xab9   :  { %9751 = vmatmul.msk.f32.gmra.mxu1 %vm3762_vm7, %v4402_v23 }
 0xabc   :  { %9756 = vmatmul.msk.f32.gmra.mxu0 %vm2754_vm2, %v13576_v11  ;;  %v4580_v11 = vld [vmem:[#allocation17 + $0x210] sm:$0xff] }
 0xabd   :  { %4611 = vmatpush.msra.mxu1 %v4580_v11 }
 0xabf   :  { %4612 = vmatpush.msra.mxu1 %v4579_v36 }
 0xac0   :  { %v4405_v61 = vpop.f32.mrf.mxu3 }
 0xac1   :  { %9752 = vmatmul.msk.f32.gmra.mxu1 %vm3762_vm7, %v4405_v61 }
 0xac2   :  { %4613 = vmatpush.msra.mxu1 %v4578_v30 }
 0xac4   :  { %9757 = vmatmul.msk.f32.gmra.mxu0 %vm2754_vm2, %v13577_v19 }
 0xac8   :  { %v4408_v33 = vpop.f32.mrf.mxu3 }
 0xac9   :  { %v12191_v54 = vpop.f32.mrf.mxu0  ;;  %9753 = vmatmul.msk.f32.gmra.mxu1 %vm3762_vm7, %v4408_v33 }
 0xacc   :  { %9771 = vmatmul.msk.f32.vlgmr.msra.gmra.mxu0 %vm746_vm1, %v12222_v4 }
 0xad0   :  { %v4565_v16 = vpop.f32.mrf.mxu3 }
 0xad1   :  { %v12193_v18 = vpop.f32.mrf.mxu0  ;;  %9766 = vmatmul.msk.f32.vlgmr.msra.gmra.mxu1 %vm3762_vm7, %v4565_v16 }
 0xad4   :  { %9772 = vmatmul.msk.f32.gmra.mxu0 %vm746_vm1, %v12228_v48  ;;  %v4038_v29 = vpop.f32.mrf.mxu2 }
 0xad5   :  { %v4039_v61 = vadd.f32 %v4038_v29, %v12191_v54 }
 0xad8   :  { %v4568_v19 = vpop.f32.mrf.mxu3 }
 0xad9   :  { %v12196_v47 = vpop.f32.mrf.mxu0  ;;  %9767 = vmatmul.msk.f32.gmra.mxu1 %vm3762_vm7, %v4568_v19 }
 0xadc   :  { %9773 = vmatmul.msk.f32.gmra.mxu0 %vm746_vm1, %v12233_v57  ;;  %v4041_v17 = vpop.f32.mrf.mxu2 }
 0xae0   :  { %v4571_v51 = vpop.f32.mrf.mxu3 }
 0xae1   :  { %v12199_v45 = vpop.f32.mrf.mxu0  ;;  %9768 = vmatmul.msk.f32.gmra.mxu1 %vm3762_vm7, %v4571_v51 }
 0xae4   :  { %9774 = vmatmul.msk.f32.gmra.mxu0 %vm746_vm1, %v12238_v26  ;;  %v4044_v41 = vpop.f32.mrf.mxu2 }
 0xae5   :  { %v4045_v43 = vadd.f32 %v4044_v41, %v12196_v47  ;;  %v13581_v41 = vld [vmem:[#allocation77_spill] sm:$0xff] }
 0xae8   :  { %v4574_v35 = vpop.f32.mrf.mxu3 }
 0xae9   :  { %v4150_v24 = vpop.f32.mrf.mxu0  ;;  %9769 = vmatmul.msk.f32.gmra.mxu1 %vm3762_vm7, %v4574_v35  ;;  %v10239_v35 = vld [vmem:[#allocation19] ss:$0 sm:$0xff] }
 0xaea   :  { %9726 = vmatmul.msk.f32.vlgmr.msrb.gmra.mxu2 %vm3762_vm7, %v4150_v24 }
 0xaeb   :  { %4523 = vmatpush.msrb.mxu2 %v4502_v62 }
 0xaec   :  { %v4047_v6 = vpop.f32.mrf.mxu2 }
 0xaed   :  { %4524 = vmatpush.msrb.mxu2 %v4501_v20 }
 0xaee   :  { %v4117_v46 = vpop.f32.mrf.mxu1 }
 0xaef   :  { %4525 = vmatpush.msrb.mxu2 %v4500_v2  ;;  %v4042_v2 = vadd.f32 %v4041_v17, %v12193_v18  ;;  %v4048_v18 = vadd.f32 %v4047_v6, %v12199_v45 }
 0xaf1   :  { %v4153_v37 = vpop.f32.mrf.mxu0  ;;  %4526 = vmatpush.msrb.mxu2 %v4499_v5 }
 0xaf2   :  { %9727 = vmatmul.msk.f32.gmra.mxu2 %vm3762_vm7, %v4153_v37 }
 0xaf3   :  { %4527 = vmatpush.msrb.mxu2 %v4498_v52  ;;  %v4129_v52 = vadd.f32 %v4117_v46, %v4039_v61 }
 0xaf5   :  { %4528 = vmatpush.msrb.mxu2 %v4497_v60 }
 0xaf6   :  { %v4120_v0 = vpop.f32.mrf.mxu1 }
 0xaf7   :  { %4529 = vmatpush.msrb.mxu2 %v4496_v15  ;;  %v4130_v5 = vadd.f32 %v4120_v0, %v4042_v2 }
 0xaf9   :  { %v4156_v39 = vpop.f32.mrf.mxu0  ;;  %4530 = vmatpush.msrb.mxu2 %v4495_v21 }
 0xafa   :  { %9728 = vmatmul.msk.f32.gmra.mxu2 %vm3762_vm7, %v4156_v39 }
 0xafe   :  { %v4123_v1 = vpop.f32.mrf.mxu1 }
 0xb01   :  { %v4159_v58 = vpop.f32.mrf.mxu0 }
 0xb02   :  { %9729 = vmatmul.msk.f32.gmra.mxu2 %vm3762_vm7, %v4159_v58 }
 0xb06   :  { %v4126_v25 = vpop.f32.mrf.mxu1 }
 0xb09   :  { %v4316_v10 = vpop.f32.mrf.mxu0 }
 0xb0a   :  { %9742 = vmatmul.msk.f32.vlgmr.msra.gmra.mxu2 %vm3762_vm7, %v4316_v10  ;;  %v4131_v10 = vadd.f32 %v4123_v1, %v4045_v43  ;;  %v13580_v1 = vld [vmem:[#allocation78_spill] sm:$0xff] }
 0xb0b   :  { %9775 = vmatpush.msk.msra.mxu2 %vm759_vm0, %v4643_v38 }
 0xb0e   :  { %v4283_v7 = vpop.f32.mrf.mxu1 }
 0xb11   :  { %v4319_v59 = vpop.f32.mrf.mxu0 }
 0xb12   :  { %9743 = vmatmul.msk.f32.gmra.mxu2 %vm3762_vm7, %v4319_v59 }
 0xb16   :  { %v4286_v49 = vpop.f32.mrf.mxu1 }
 0xb19   :  { %v4322_v42 = vpop.f32.mrf.mxu0 }
 0xb1a   :  { %9744 = vmatmul.msk.f32.gmra.mxu2 %vm3762_vm7, %v4322_v42  ;;  %v4132_v42 = vadd.f32 %v4126_v25, %v4048_v18 }
 0xb1e   :  { %v4289_v24 = vpop.f32.mrf.mxu1 }
 0xb21   :  { %v4325_v14 = vpop.f32.mrf.mxu0 }
 0xb22   :  { %9745 = vmatmul.msk.f32.gmra.mxu2 %vm3762_vm7, %v4325_v14 }
 0xb26   :  { %v4292_v55 = vpop.f32.mrf.mxu1 }
 0xb29   :  { %v4482_v50 = vpop.f32.mrf.mxu0 }
 0xb2a   :  { %9758 = vmatmul.msk.f32.vlgmr.msrb.gmra.mxu2 %vm3762_vm7, %v4482_v50 }
 0xb2e   :  { %v4449_v13 = vpop.f32.mrf.mxu1 }
 0xb31   :  { %v4485_v56 = vpop.f32.mrf.mxu0 }
 0xb32   :  { %9759 = vmatmul.msk.f32.gmra.mxu2 %vm3762_vm7, %v4485_v56  ;;  %v10237_v56 = vld [vmem:[#allocation22] ss:$0 sm:$0xff] }
 0xb33   :  { %v2788_v29 = vadd.f32 %v10237_v56, %v13580_v1  ;;  %v2785_v25 = vadd.f32 %v10237_v56, %v13581_v41  ;;  %v4845_v41 = vld [vmem:[#allocation23 + $0x40] sm:$0xff] }
 0xb36   :  { %v4452_v37 = vpop.f32.mrf.mxu1 }
 0xb39   :  { %v4488_v34 = vpop.f32.mrf.mxu0 }
 0xb3a   :  { %9760 = vmatmul.msk.f32.gmra.mxu2 %vm3762_vm7, %v4488_v34 }
 0xb3e   :  { %v4455_v9 = vpop.f32.mrf.mxu1 }
 0xb41   :  { %v4491_v31 = vpop.f32.mrf.mxu0 }
 0xb42   :  { %9761 = vmatmul.msk.f32.gmra.mxu2 %vm3762_vm7, %v4491_v31 }
 0xb46   :  { %v4458_v62 = vpop.f32.mrf.mxu1 }
 0xb4a   :  { %9776 = vmatmul.msk.f32.vlgmr.msra.gmra.mxu2 %vm746_vm1, %v12222_v4 }
 0xb4e   :  { %v4615_v58 = vpop.f32.mrf.mxu1 }
 0xb52   :  { %9777 = vmatmul.msk.f32.gmra.mxu2 %vm746_vm1, %v12228_v48 }
 0xb56   :  { %v4618_v28 = vpop.f32.mrf.mxu1 }
 0xb5a   :  { %9778 = vmatmul.msk.f32.gmra.mxu2 %vm746_vm1, %v12233_v57 }
 0xb5e   :  { %v4621_v47 = vpop.f32.mrf.mxu1 }
 0xb62   :  { %9779 = vmatmul.msk.f32.gmra.mxu2 %vm746_vm1, %v12238_v26 }
 0xb6d   :  { %v4200_v3 = vpop.f32.mrf.mxu2 }
 0xb6e   :  { %v4212_v22 = vadd.f32 %v4200_v3, %v4129_v52 }
 0xb70   :  { %v4295_v33 = vadd.f32 %v4283_v7, %v4212_v22 }
 0xb75   :  { %v4203_v27 = vpop.f32.mrf.mxu2 }
 0xb76   :  { %v4213_v40 = vadd.f32 %v4203_v27, %v4130_v5 }
 0xb78   :  { %v4296_v15 = vadd.f32 %v4286_v49, %v4213_v40  ;;  %v13582_v49 = vld [vmem:[#allocation83_spill] sm:$0xff] }
 0xb79   :  { %v2791_v6 = vadd.f32 %v10237_v56, %v13582_v49 }
 0xb7d   :  { %v4206_v44 = vpop.f32.mrf.mxu2 }
 0xb7e   :  { %v4214_v53 = vadd.f32 %v4206_v44, %v4131_v10 }
 0xb80   :  { %v4297_v16 = vadd.f32 %v4289_v24, %v4214_v53 }
 0xb85   :  { %v4209_v8 = vpop.f32.mrf.mxu2 }
 0xb86   :  { %v4215_v51 = vadd.f32 %v4209_v8, %v4132_v42  ;;  %v4624_v8 = vpop.f32.mrf.mxu1 }
 0xb88   :  { %v4298_v34 = vadd.f32 %v4292_v55, %v4215_v51 }
 0xb8d   :  { %v4366_v32 = vpop.f32.mrf.mxu2 }
 0xb8e   :  { %v4378_v11 = vadd.f32 %v4366_v32, %v4295_v33 }
 0xb90   :  { %v4461_v54 = vadd.f32 %v4449_v13, %v4378_v11 }
 0xb95   :  { %v4369_v39 = vpop.f32.mrf.mxu2 }
 0xb96   :  { %v4379_v21 = vadd.f32 %v4369_v39, %v4296_v15 }
 0xb98   :  { %v4462_v36 = vadd.f32 %v4452_v37, %v4379_v21 }
 0xb9d   :  { %v4372_v23 = vpop.f32.mrf.mxu2 }
 0xb9e   :  { %v4380_v19 = vadd.f32 %v4372_v23, %v4297_v16 }
 0xba0   :  { %v4463_v12 = vadd.f32 %v4455_v9, %v4380_v19  ;;  %v4851_v19 = vld [vmem:[#allocation23 + $0x70] sm:$0xff] }
 0xba5   :  { %v4375_v20 = vpop.f32.mrf.mxu2 }
 0xba6   :  { %v4381_v45 = vadd.f32 %v4375_v20, %v4298_v34  ;;  %v13586_v20 = vld [vmem:[#allocation84_spill] sm:$0xff] }
 0xba7   :  { %v2794_v2 = vadd.f32 %v10237_v56, %v13586_v20 }
 0xba8   :  { %v4464_v27 = vadd.f32 %v4458_v62, %v4381_v45 }
 0xbad   :  { %v4532_v60 = vpop.f32.mrf.mxu2 }
 0xbae   :  { %v4544_v14 = vadd.f32 %v4532_v60, %v4461_v54  ;;  %v4852_v54 = vld [vmem:[#allocation23 + $0x78] sm:$0xff] }
 0xbaf   :  { %4873 = vmatpush.msrb.mxu0 %v4852_v54 }
 0xbb0   :  { %v4627_v50 = vadd.f32 %v4615_v58, %v4544_v14 }
 0xbb1   :  { %4874 = vmatpush.msrb.mxu0 %v4851_v19  ;;  %v12313_v19 = vld [vmem:[#allocation7] sm:$0xff] }
 0xbb2   :  { %v4634_v17 = vadd.f32 %v10239_v35, %v4627_v50  ;;  %v4722_v50 = vpop.f32.mrf.mxu0 }
 0xbb4   :  { %v12260_v44 = vadd.f32 %v4634_v17, %v2785_v25 }
 0xbb5   :  { %v4535_v59 = vpop.f32.mrf.mxu2 }
 0xbb6   :  { %v4545_v30 = vadd.f32 %v4535_v59, %v4462_v36  ;;  %13584 = vst [vmem:[#allocation80_spill] sm:$0xff] %v12260_v44  ;;  %v4662_v9 = vmul.f32 %v12260_v44, %v12260_v44  ;;  %v4648_v58 = vsel %vm3762_vm7, %v12260_v44, 0.0 }
 0xbb8   :  { %v4628_v38 = vadd.f32 %v4618_v28, %v4545_v30  ;;  %v4666_v22 = vsel %vm3762_vm7, %v4662_v9, 0.0 }
 0xbba   :  { %v4635_v0 = vadd.f32 %v10239_v35, %v4628_v38  ;;  %v4850_v38 = vld [vmem:[#allocation23 + $0x68] sm:$0xff] }
 0xbbb   :  { %4875 = vmatpush.msrb.mxu0 %v4850_v38  ;;  %v12330_v38 = vld [vmem:[#allocation7 + $0x28] sm:$0xff] }
 0xbbc   :  { %v12258_v24 = vadd.f32 %v4635_v0, %v2788_v29  ;;  %v4848_v0 = vld [vmem:[#allocation23 + $0x58] sm:$0xff]  ;;  %v4847_v29 = vld [vmem:[#allocation23 + $0x50] sm:$0xff] }
 0xbbd   :  { %v4538_v46 = vpop.f32.mrf.mxu2 }
 0xbbe   :  { %v4546_v31 = vadd.f32 %v4538_v46, %v4463_v12  ;;  %13583 = vst [vmem:[#allocation79_spill] sm:$0xff] %v12258_v24  ;;  %v4663_v37 = vmul.f32 %v12258_v24, %v12258_v24  ;;  %v4649_v39 = vsel %vm3762_vm7, %v12258_v24, 0.0 }
 0xbbf   :  { %v4650_v40 = vadd.f32 %v4649_v39, %v4648_v58 }
 0xbc0   :  { %v4629_v7 = vadd.f32 %v4621_v47, %v4546_v31  ;;  %v4667_v61 = vsel %vm3762_vm7, %v4663_v37, 0.0 }
 0xbc1   :  { %v4668_v15 = vadd.f32 %v4667_v61, %v4666_v22 }
 0xbc2   :  { %v4636_v3 = vadd.f32 %v10239_v35, %v4629_v7  ;;  %v4846_v7 = vld [vmem:[#allocation23 + $0x48] sm:$0xff] }
 0xbc4   :  { %v12262_v13 = vadd.f32 %v4636_v3, %v2791_v6  ;;  %v4725_v6 = vpop.f32.mrf.mxu0 }
 0xbc5   :  { %v4541_v55 = vpop.f32.mrf.mxu2 }
 0xbc6   :  { %13585 = vst [vmem:[#allocation81_spill] sm:$0xff] %v12262_v13  ;;  %v4547_v32 = vadd.f32 %v4541_v55, %v4464_v27  ;;  %v4664_v23 = vmul.f32 %v12262_v13, %v12262_v13  ;;  %v4651_v5 = vsel %vm3762_vm7, %v12262_v13, 0.0 }
 0xbc7   :  { %v4652_v10 = vadd.f32 %v4651_v5, %v4650_v40 }
 0xbc8   :  { %v4630_v62 = vadd.f32 %v4624_v8, %v4547_v32  ;;  %v4669_v60 = vsel %vm3762_vm7, %v4664_v23, 0.0 }
 0xbc9   :  { %v4670_v28 = vadd.f32 %v4669_v60, %v4668_v15 }
 0xbca   :  { %v4637_v52 = vadd.f32 %v10239_v35, %v4630_v62  ;;  %v4849_v35 = vld [vmem:[#allocation23 + $0x60] sm:$0xff] }
 0xbcb   :  { %4876 = vmatpush.msrb.mxu0 %v4849_v35  ;;  %v12349_v35 = vld [vmem:[#allocation7 + $0x38] sm:$0xff] }
 0xbcc   :  { %v12280_v43 = vadd.f32 %v4637_v52, %v2794_v2  ;;  %v4728_v37 = vpop.f32.mrf.mxu0 }
 0xbcd   :  { %v4758_v34 = vpop.f32.mrf.mxu2  ;;  %4877 = vmatpush.msrb.mxu0 %v4848_v0  ;;  %v12361_v0 = vld [vmem:[#allocation7 + $0x48] sm:$0xff] }
 0xbce   :  { %13587 = vst [vmem:[#allocation82_spill] sm:$0xff] %v12280_v43  ;;  %v4653_v33 = vsel %vm3762_vm7, %v12280_v43, 0.0  ;;  %v4665_v21 = vmul.f32 %v12280_v43, %v12280_v43 }
 0xbcf   :  { %v4654_v53 = vadd.f32 %v4653_v33, %v4652_v10  ;;  %4878 = vmatpush.msrb.mxu0 %v4847_v29  ;;  %v12365_v29 = vld [vmem:[#allocation7 + $0x50] sm:$0xff] }
 0xbd0   :  { %v4671_v11 = vsel %vm3762_vm7, %v4665_v21, 0.0 }
 0xbd1   :  { %v4655_v36 = vrot.slane %v4654_v53, 4  ;;  %v4672_v59 = vadd.f32 %v4671_v11, %v4670_v28  ;;  %4879 = vmatpush.msrb.mxu0 %v4846_v7  ;;  %v12381_v7 = vld [vmem:[#allocation7 + $0x88] sm:$0xff] }
 0xbd3   :  { %v4656_v18 = vadd.f32 %v4655_v36, %v4654_v53  ;;  %v4673_v16 = vrot.slane %v4672_v59, 4  ;;  %4880 = vmatpush.msrb.mxu0 %v4845_v41  ;;  %v12385_v41 = vld [vmem:[#allocation7 + $0x90] sm:$0xff] }
 0xbd4   :  { %v4731_v52 = vpop.f32.mrf.mxu0 }
 0xbd5   :  { %v4657_v30 = vrot.slane %v4656_v18, 2  ;;  %v4674_v42 = vadd.f32 %v4673_v16, %v4672_v59  ;;  %v4761_v27 = vpop.f32.mrf.mxu2 }
 0xbd7   :  { %v4658_v14 = vadd.f32 %v4657_v30, %v4656_v18  ;;  %v4675_v51 = vrot.slane %v4674_v42, 2 }
 0xbd9   :  { %v4659_v47 = vrot.slane %v4658_v14, 1  ;;  %v4676_v12 = vadd.f32 %v4675_v51, %v4674_v42  ;;  %v12326_v51 = vld [vmem:[#allocation7 + $0x8] sm:$0xff] }
 0xbdb   :  { %v4660_v46 = vadd.f32 %v4659_v47, %v4658_v14  ;;  %v4677_v56 = vrot.slane %v4676_v12, 1  ;;  %v12317_v14 = vld [vmem:[#allocation7 + $0x20] sm:$0xff]  ;;  %v12337_v47 = vld [vmem:[#allocation7 + $0x10] sm:$0xff] }
 0xbdd   :  { %v4661_v31 = vmul.f32 %v4660_v46, %v11757_v63  ;;  %v4678_v1 = vadd.f32 %v4677_v56, %v4676_v12  ;;  %v4764_v9 = vpop.f32.mrf.mxu2  ;;  %v12341_v12 = vld [vmem:[#allocation7 + $0x30] sm:$0xff]  ;;  %v12353_v46 = vld [vmem:[#allocation7 + $0x40] sm:$0xff] }
 0xbde   :  { %v4814_v56 = vld [vmem:[#allocation23 + $0x38] sm:$0xff] }
 0xbdf   :  { %v4679_v45 = vmul.f32 %v4678_v1, %v11757_v63  ;;  %v4680_v17 = vmul.f32 %v4661_v31, %v4661_v31  ;;  %v4683_v20 = vsub.f32 %v12260_v44, %v4661_v31  ;;  %v4684_v2 = vsub.f32 %v12258_v24, %v4661_v31  ;;  %4914 = vmatpush.msrb.mxu2 %v4814_v56  ;;  %v4811_v1 = vld [vmem:[#allocation23 + $0x20] sm:$0xff] }
 0xbe0   :  { %v4685_v58 = vsub.f32 %v12262_v13, %v4661_v31  ;;  %v4686_v61 = vsub.f32 %v12280_v43, %v4661_v31  ;;  %v4812_v31 = vld [vmem:[#allocation23 + $0x28] sm:$0xff] }
 0xbe1   :  { %v4681_v25 = vsub.f32 %v4679_v45, %v4680_v17  ;;  %v12369_v45 = vld [vmem:[#allocation7 + $0x58] sm:$0xff]  ;;  %v12373_v17 = vld [vmem:[#allocation7 + $0x80] sm:$0xff] }
 0xbe3   :  { %v4682_v49 = vmax.f32 %v4681_v25, 0.0  ;;  %v12389_v25 = vld [vmem:[#allocation7 + $0x98] sm:$0xff] }
 0xbe5   :  { %v4687_v3 = vadd.f32 1e-05, %v4682_v49  ;;  %v4767_v10 = vpop.f32.mrf.mxu2  ;;  %v4810_v49 = vld [vmem:[#allocation23 + $0x18] sm:$0xff] }
 0xbe7   :  { %10251 = vrsqrt.f32 %v4687_v3  ;;  %vm4694_vm12 = vweird.f32 %v4687_v3 }
 0xbed   :  { %v10252_v55 = vpop.eup %10251 }
 0xbee   :  { %v4689_v8 = vmul.f32 %v10252_v55, %v4687_v3  ;;  %vm4695_vm11 = vweird.f32 %v10252_v55  ;;  %v12393_v3 = vld [vmem:[#allocation7 + $0xc0] sm:$0xff] }
 0xbef   :  { %vm4696_vm13 = vmor %vm4694_vm12, %vm4695_vm11 }
 0xbf0   :  { %v4690_v32 = vmul.f32 %v10252_v55, %v4689_v8  ;;  %v12397_v8 = vld [vmem:[#allocation7 + $0xc8] sm:$0xff] }
 0xbf1   :  { %13588 = vst [vmem:[#allocation87_spill] sm:$0xff] %v12397_v8 }
 0xbf2   :  { %v4691_v39 = vmul.f32 0.5, %v4690_v32  ;;  %v4972_v32 = vld [vmem:[#allocation23 + $0xb8] sm:$0xff] }
 0xbf4   :  { %v4692_v23 = vsub.f32 1.5, %v4691_v39  ;;  %v4970_v39 = vld [vmem:[#allocation23 + $0xa8] sm:$0xff] }
 0xbf6   :  { %v4693_v62 = vmul.f32 %v10252_v55, %v4692_v23  ;;  %v12405_v23 = vld [vmem:[#allocation7 + $0xd8] sm:$0xff] }
 0xbf7   :  { %13590 = vst [vmem:[#allocation91_spill] sm:$0xff] %v12405_v23 }
 0xbf8   :  { %v4697_v5 = vsel %vm4696_vm13, %v10252_v55, %v4693_v62  ;;  %v4807_v55 = vld [vmem:[#allocation23] sm:$0xff] }
 0xbf9   :  { %v4698_v40 = vmul.f32 %v4697_v5, %v4683_v20  ;;  %v4699_v22 = vmul.f32 %v4697_v5, %v4684_v2  ;;  %v4700_v60 = vmul.f32 %v4697_v5, %v4685_v58  ;;  %v4701_v15 = vmul.f32 %v4697_v5, %v4686_v61  ;;  %v4969_v62 = vld [vmem:[#allocation23 + $0xa0] sm:$0xff]  ;;  %v4968_v20 = vld [vmem:[#allocation23 + $0x98] sm:$0xff]  ;;  %v4967_v58 = vld [vmem:[#allocation23 + $0x90] sm:$0xff] }
 0xbfa   :  { %v12411_v61 = vld [vmem:[#allocation7 + $0x100] sm:$0xff] }
 0xbfb   :  { %v4735_v33 = vmul.f32 %v4725_v6, %v4699_v22  ;;  %v4736_v21 = vmul.f32 %v4728_v37, %v4700_v60  ;;  %v4737_v28 = vmul.f32 %v4731_v52, %v4701_v15  ;;  %v4734_v53 = vmul.f32 %v4722_v50, %v4698_v40  ;;  %v12345_v50 = vld [vmem:[#allocation7 + $0x18] sm:$0xff]  ;;  %v4809_v6 = vld [vmem:[#allocation23 + $0x10] sm:$0xff]  ;;  %v12401_v37 = vld [vmem:[#allocation7 + $0xd0] sm:$0xff]  ;;  %13591 = vst [vmem:[#allocation93_spill] sm:$0xff] %v12411_v61 }
 0xbfc   :  { %13589 = vst [vmem:[#allocation89_spill] sm:$0xff] %v12401_v37  ;;  %v4966_v5 = vld [vmem:[#allocation23 + $0x88] sm:$0xff]  ;;  %v4965_v40 = vld [vmem:[#allocation23 + $0x80] sm:$0xff]  ;;  %v12420_v60 = vld [vmem:[#allocation7 + $0x108] sm:$0xff] }
 0xbfd   :  { %v4772_v11 = vadd.f32 %v4764_v9, %v4736_v21  ;;  %v4773_v36 = vadd.f32 %v4767_v10, %v4737_v28  ;;  %v4771_v59 = vadd.f32 %v4761_v27, %v4735_v33  ;;  %v4770_v16 = vadd.f32 %v4758_v34, %v4734_v53  ;;  %v4813_v34 = vld [vmem:[#allocation23 + $0x30] sm:$0xff]  ;;  %v4808_v27 = vld [vmem:[#allocation23 + $0x8] sm:$0xff]  ;;  %13592 = vst [vmem:[#allocation95_spill] sm:$0xff] %v12420_v60  ;;  %v12426_v33 = vld [vmem:[#allocation7 + $0x110] sm:$0xff] }
 0xbfe   :  { %4915 = vmatpush.msrb.mxu2 %v4813_v34  ;;  %v4971_v9 = vld [vmem:[#allocation23 + $0xb0] sm:$0xff]  ;;  %13593 = vst [vmem:[#allocation97_spill] sm:$0xff] %v12426_v33  ;;  %v12432_v53 = vld [vmem:[#allocation7 + $0x118] sm:$0xff]  ;;  %v12451_v34 = vld [vmem:[#allocation7 + $0x70] sm:$0xff] }
 0xbff   :  { %v12293_v18 = vmax.f32 %v4773_v36, 0.0  ;;  %v12295_v54 = vmax.f32 %v4772_v11, 0.0  ;;  %v12300_v30 = vmax.f32 %v4771_v59, 0.0  ;;  %v12305_v42 = vmax.f32 %v4770_v16, 0.0  ;;  %13594 = vst [vmem:[#allocation99_spill] sm:$0xff] %v12432_v53  ;;  %v12437_v36 = vld [vmem:[#allocation7 + $0x60] sm:$0xff] }
 0xc00   :  { %4916 = vmatpush.msrb.mxu2 %v4812_v31  ;;  %13595 = vst [vmem:[#allocation85_spill] sm:$0xff] %v12437_v36  ;;  %v12446_v16 = vld [vmem:[#allocation7 + $0x68] sm:$0xff] }
 0xc01   :  { %4790 = vmatpush.msra.mxu3 %v12293_v18  ;;  %4827 = vmatpush.msrb.mxu1 %v12293_v18  ;;  %13596 = vst [vmem:[#allocation86_spill] sm:$0xff] %v12446_v16  ;;  %v12465_v31 = vld [vmem:[#allocation7 + $0xa8] sm:$0xff] }
 0xc02   :  { %5030 = vmatpush.msra.mxu0 %v12293_v18  ;;  %4917 = vmatpush.msrb.mxu2 %v4811_v1  ;;  %13597 = vst [vmem:[#allocation88_spill] sm:$0xff] %v12451_v34  ;;  %v12469_v1 = vld [vmem:[#allocation7 + $0xb0] sm:$0xff] }
 0xc03   :  { %4791 = vmatpush.msra.mxu3 %v12295_v54  ;;  %4828 = vmatpush.msrb.mxu1 %v12295_v54  ;;  %13600 = vst [vmem:[#allocation94_spill] sm:$0xff] %v12465_v31 }
 0xc04   :  { %5031 = vmatpush.msra.mxu0 %v12295_v54  ;;  %4918 = vmatpush.msrb.mxu2 %v4810_v49  ;;  %13601 = vst [vmem:[#allocation96_spill] sm:$0xff] %v12469_v1  ;;  %v12473_v49 = vld [vmem:[#allocation7 + $0xb8] sm:$0xff] }
 0xc05   :  { %4792 = vmatpush.msra.mxu3 %v12300_v30  ;;  %4829 = vmatpush.msrb.mxu1 %v12300_v30  ;;  %13602 = vst [vmem:[#allocation98_spill] sm:$0xff] %v12473_v49 }
 0xc06   :  { %5032 = vmatpush.msra.mxu0 %v12300_v30  ;;  %4919 = vmatpush.msrb.mxu2 %v4809_v6  ;;  %v12477_v6 = vld [vmem:[#allocation7 + $0xe0] sm:$0xff] }
 0xc07   :  { %4793 = vmatpush.msra.mxu3 %v12305_v42  ;;  %4830 = vmatpush.msrb.mxu1 %v12305_v42  ;;  %13603 = vst [vmem:[#allocation100_spill] sm:$0xff] %v12477_v6 }
 0xc08   :  { %5033 = vmatpush.msra.mxu0 %v12305_v42  ;;  %9780 = vmatmul.msk.f32.vlgmr.msra.gmra.mxu3 %vm2754_vm2, %v12313_v19 }
 0xc09   :  { %9784 = vmatmul.msk.f32.vlgmr.msrb.gmra.mxu1 %vm2754_vm2, %v12317_v14  ;;  %4947 = vmatpush.msrb.mxu3 %v12293_v18 }
 0xc0a   :  { %4920 = vmatpush.msrb.mxu2 %v4808_v27  ;;  %4993 = vmatpush.msra.mxu1 %v4972_v32  ;;  %v12481_v27 = vld [vmem:[#allocation7 + $0xe8] sm:$0xff]  ;;  %v12485_v32 = vld [vmem:[#allocation7 + $0xf0] sm:$0xff] }
 0xc0b   :  { %4948 = vmatpush.msrb.mxu3 %v12295_v54  ;;  %13604 = vst [vmem:[#allocation101_spill] sm:$0xff] %v12481_v27 }
 0xc0c   :  { %4921 = vmatpush.msrb.mxu2 %v4807_v55  ;;  %4994 = vmatpush.msra.mxu1 %v4971_v9  ;;  %v5055_v55 = vld [vmem:[#allocation23 + $0xf8] sm:$0xff]  ;;  %13605 = vst [vmem:[#allocation102_spill] sm:$0xff] %v12485_v32  ;;  %v5054_v9 = vld [vmem:[#allocation23 + $0xf0] sm:$0xff] }
 0xc0d   :  { %4949 = vmatpush.msrb.mxu3 %v12300_v30 }
 0xc0e   :  { %4995 = vmatpush.msra.mxu1 %v4970_v39  ;;  %5076 = vmatpush.msra.mxu2 %v5055_v55  ;;  %v5053_v39 = vld [vmem:[#allocation23 + $0xe8] sm:$0xff] }
 0xc0f   :  { %4950 = vmatpush.msrb.mxu3 %v12305_v42 }
 0xc10   :  { %9781 = vmatmul.msk.f32.gmra.mxu3 %vm2754_vm2, %v12326_v51  ;;  %4996 = vmatpush.msra.mxu1 %v4969_v62  ;;  %v5052_v62 = vld [vmem:[#allocation23 + $0xe0] sm:$0xff] }
 0xc11   :  { %5113 = vmatpush.msra.mxu3 %v12293_v18  ;;  %9785 = vmatmul.msk.f32.gmra.mxu1 %vm2754_vm2, %v12330_v38 }
 0xc12   :  { %4997 = vmatpush.msra.mxu1 %v4968_v20  ;;  %5077 = vmatpush.msra.mxu2 %v5054_v9  ;;  %v5138_v20 = vld [vmem:[#allocation23 + $0x138] sm:$0xff] }
 0xc13   :  { %5114 = vmatpush.msra.mxu3 %v12295_v54 }
 0xc14   :  { %4998 = vmatpush.msra.mxu1 %v4967_v58  ;;  %5078 = vmatpush.msra.mxu2 %v5053_v39  ;;  %v12489_v58 = vld [vmem:[#allocation7 + $0xf8] sm:$0xff]  ;;  %v5221_v39 = vld [vmem:[#allocation23 + $0x178] sm:$0xff] }
 0xc15   :  { %5115 = vmatpush.msra.mxu3 %v12300_v30  ;;  %13606 = vst [vmem:[#allocation103_spill] sm:$0xff] %v12489_v58 }
 0xc16   :  { %4999 = vmatpush.msra.mxu1 %v4966_v5  ;;  %5079 = vmatpush.msra.mxu2 %v5052_v62  ;;  %v5050_v5 = vld [vmem:[#allocation23 + $0xd0] sm:$0xff] }
 0xc17   :  { %5116 = vmatpush.msra.mxu3 %v12305_v42  ;;  %v5220_v62 = vld [vmem:[#allocation23 + $0x170] sm:$0xff] }
 0xc18   :  { %9782 = vmatmul.msk.f32.gmra.mxu3 %vm2754_vm2, %v12337_v47  ;;  %5000 = vmatpush.msra.mxu1 %v4965_v40  ;;  %v5049_v40 = vld [vmem:[#allocation23 + $0xc8] sm:$0xff] }
 0xc19   :  { %9786 = vmatmul.msk.f32.gmra.mxu1 %vm2754_vm2, %v12341_v12 }
 0xc1a   :  { %5159 = vmatpush.msrb.mxu1 %v5138_v20  ;;  %v5219_v20 = vld [vmem:[#allocation23 + $0x168] sm:$0xff] }
 0xc20   :  { %9783 = vmatmul.msk.f32.gmra.mxu3 %vm2754_vm2, %v12345_v50 }
 0xc21   :  { %9787 = vmatmul.msk.f32.gmra.mxu1 %vm2754_vm2, %v12349_v35 }
 0xc28   :  { %9796 = vmatmul.msk.f32.vlgmr.msrb.gmra.mxu3 %vm2754_vm2, %v12353_v46 }
 0xc29   :  { %5279 = vmatpush.msrb.mxu3 %v12293_v18 }
 0xc2b   :  { %5280 = vmatpush.msrb.mxu3 %v12295_v54 }
 0xc2d   :  { %5281 = vmatpush.msrb.mxu3 %v12300_v30 }
 0xc2f   :  { %5282 = vmatpush.msrb.mxu3 %v12305_v42 }
 0xc30   :  { %9797 = vmatmul.msk.f32.gmra.mxu3 %vm2754_vm2, %v12361_v0 }
 0xc38   :  { %9798 = vmatmul.msk.f32.gmra.mxu3 %vm2754_vm2, %v12365_v29 }
 0xc40   :  { %9799 = vmatmul.msk.f32.gmra.mxu3 %vm2754_vm2, %v12369_v45 }
 0xc48   :  { %9812 = vmatmul.msk.f32.vlgmr.msra.gmra.mxu3 %vm2754_vm2, %v12373_v17 }
 0xc49   :  { %5445 = vmatpush.msra.mxu3 %v12293_v18 }
 0xc4b   :  { %5446 = vmatpush.msra.mxu3 %v12295_v54 }
 0xc4d   :  { %5447 = vmatpush.msra.mxu3 %v12300_v30 }
 0xc4f   :  { %5448 = vmatpush.msra.mxu3 %v12305_v42 }
 0xc50   :  { %9813 = vmatmul.msk.f32.gmra.mxu3 %vm2754_vm2, %v12381_v7 }
 0xc58   :  { %9814 = vmatmul.msk.f32.gmra.mxu3 %vm2754_vm2, %v12385_v41 }
 0xc60   :  { %9815 = vmatmul.msk.f32.gmra.mxu3 %vm2754_vm2, %v12389_v25 }
 0xc68   :  { %9828 = vmatmul.msk.f32.vlgmr.msrb.gmra.mxu3 %vm2754_vm2, %v12393_v3 }
 0xc70   :  { %9829 = vmatmul.msk.f32.gmra.mxu3 %vm2754_vm2, %v12397_v8 }
 0xc78   :  { %9830 = vmatmul.msk.f32.gmra.mxu3 %vm2754_vm2, %v12401_v37 }
 0xc80   :  { %9831 = vmatmul.msk.f32.gmra.mxu3 %vm2754_vm2, %v12405_v23 }
 0xc86   :  { %v4832_v2 = vpop.f32.mrf.mxu1 }
 0xc87   :  { %9788 = vmatmul.msk.f32.vlgmr.msrb.gmra.mxu0 %vm3762_vm7, %v4832_v2  ;;  %v5051_v2 = vld [vmem:[#allocation23 + $0xd8] sm:$0xff] }
 0xc88   :  { %5196 = vmatpush.msrb.mxu0 %v12293_v18  ;;  %9844 = vmatmul.msk.f32.vlgmr.msra.gmra.mxu3 %vm2754_vm2, %v12411_v61 }
 0xc89   :  { %5080 = vmatpush.msra.mxu2 %v5051_v2 }
 0xc8a   :  { %5197 = vmatpush.msrb.mxu0 %v12295_v54 }
 0xc8b   :  { %v4795_v52 = vpop.f32.mrf.mxu3  ;;  %5081 = vmatpush.msra.mxu2 %v5050_v5 }
 0xc8c   :  { %5198 = vmatpush.msrb.mxu0 %v12300_v30  ;;  %9792 = vmatmul.msk.f32.vlgmr.msrb.gmra.mxu2 %vm3762_vm7, %v4795_v52  ;;  %v5137_v52 = vld [vmem:[#allocation23 + $0x130] sm:$0xff] }
 0xc8d   :  { %5160 = vmatpush.msrb.mxu1 %v5137_v52  ;;  %5082 = vmatpush.msra.mxu2 %v5049_v40  ;;  %v5218_v52 = vld [vmem:[#allocation23 + $0x160] sm:$0xff]  ;;  %v5217_v40 = vld [vmem:[#allocation23 + $0x158] sm:$0xff] }
 0xc8e   :  { %5199 = vmatpush.msrb.mxu0 %v12305_v42  ;;  %v4835_v22 = vpop.f32.mrf.mxu1 }
 0xc8f   :  { %9789 = vmatmul.msk.f32.gmra.mxu0 %vm3762_vm7, %v4835_v22  ;;  %v5136_v22 = vld [vmem:[#allocation23 + $0x128] sm:$0xff] }
 0xc90   :  { %9845 = vmatmul.msk.f32.gmra.mxu3 %vm2754_vm2, %v12420_v60  ;;  %5161 = vmatpush.msrb.mxu1 %v5136_v22  ;;  %v5304_v22 = vld [vmem:[#allocation23 + $0x1b8] sm:$0xff] }
 0xc93   :  { %v4798_v15 = vpop.f32.mrf.mxu3 }
 0xc94   :  { %9793 = vmatmul.msk.f32.gmra.mxu2 %vm3762_vm7, %v4798_v15 }
 0xc96   :  { %v4838_v10 = vpop.f32.mrf.mxu1 }
 0xc97   :  { %9790 = vmatmul.msk.f32.gmra.mxu0 %vm3762_vm7, %v4838_v10  ;;  %v5048_v10 = vld [vmem:[#allocation23 + $0xc0] sm:$0xff] }
 0xc98   :  { %9846 = vmatmul.msk.f32.gmra.mxu3 %vm2754_vm2, %v12426_v33  ;;  %5083 = vmatpush.msra.mxu2 %v5048_v10  ;;  %v5303_v10 = vld [vmem:[#allocation23 + $0x1b0] sm:$0xff] }
 0xc9a   :  { %5242 = vmatpush.msrb.mxu2 %v5221_v39  ;;  %v5300_v39 = vld [vmem:[#allocation23 + $0x198] sm:$0xff] }
 0xc9b   :  { %v4801_v21 = vpop.f32.mrf.mxu3 }
 0xc9c   :  { %9794 = vmatmul.msk.f32.gmra.mxu2 %vm3762_vm7, %v4801_v21  ;;  %v5135_v21 = vld [vmem:[#allocation23 + $0x120] sm:$0xff] }
 0xc9d   :  { %5162 = vmatpush.msrb.mxu1 %v5135_v21  ;;  %5243 = vmatpush.msrb.mxu2 %v5220_v62  ;;  %v5216_v21 = vld [vmem:[#allocation23 + $0x150] sm:$0xff] }
 0xc9e   :  { %v4841_v28 = vpop.f32.mrf.mxu1  ;;  %v5299_v62 = vld [vmem:[#allocation23 + $0x190] sm:$0xff] }
 0xc9f   :  { %9791 = vmatmul.msk.f32.gmra.mxu0 %vm3762_vm7, %v4841_v28  ;;  %v5134_v28 = vld [vmem:[#allocation23 + $0x118] sm:$0xff]  ;;  %5244 = vmatpush.msrb.mxu2 %v5219_v20  ;;  %v5298_v20 = vld [vmem:[#allocation23 + $0x188] sm:$0xff] }
 0xca0   :  { %9847 = vmatmul.msk.f32.gmra.mxu3 %vm2754_vm2, %v12432_v53  ;;  %5163 = vmatpush.msrb.mxu1 %v5134_v28  ;;  %v5215_v28 = vld [vmem:[#allocation23 + $0x148] sm:$0xff] }
 0xca1   :  { %5245 = vmatpush.msrb.mxu2 %v5218_v52 }
 0xca3   :  { %v4804_v11 = vpop.f32.mrf.mxu3  ;;  %5246 = vmatpush.msrb.mxu2 %v5217_v40  ;;  %v5297_v40 = vld [vmem:[#allocation23 + $0x180] sm:$0xff] }
 0xca4   :  { %9795 = vmatmul.msk.f32.gmra.mxu2 %vm3762_vm7, %v4804_v11  ;;  %v5133_v11 = vld [vmem:[#allocation23 + $0x110] sm:$0xff] }
 0xca5   :  { %5164 = vmatpush.msrb.mxu1 %v5133_v11  ;;  %5247 = vmatpush.msrb.mxu2 %v5216_v21  ;;  %v5302_v11 = vld [vmem:[#allocation23 + $0x1a8] sm:$0xff]  ;;  %v5387_v21 = vld [vmem:[#allocation23 + $0x1f8] sm:$0xff] }
 0xca7   :  { %9804 = vmatmul.msk.f32.vlgmr.msra.gmra.mxu0 %vm2754_vm2, %v12437_v36  ;;  %5248 = vmatpush.msrb.mxu2 %v5215_v28  ;;  %v5386_v28 = vld [vmem:[#allocation23 + $0x1f0] sm:$0xff] }
 0xca8   :  { %5362 = vmatpush.msra.mxu0 %v12293_v18 }
 0xcaa   :  { %5363 = vmatpush.msra.mxu0 %v12295_v54  ;;  %v12456_v54 = vld [vmem:[#allocation7 + $0x78] sm:$0xff] }
 0xcab   :  { %v4952_v59 = vpop.f32.mrf.mxu3  ;;  %13598 = vst [vmem:[#allocation90_spill] sm:$0xff] %v12456_v54 }
 0xcac   :  { %5364 = vmatpush.msra.mxu0 %v12300_v30  ;;  %9800 = vmatmul.msk.f32.vlgmr.msra.gmra.mxu1 %vm3762_vm7, %v4952_v59  ;;  %v5132_v59 = vld [vmem:[#allocation23 + $0x108] sm:$0xff] }
 0xcad   :  { %5165 = vmatpush.msrb.mxu1 %v5132_v59 }
 0xcae   :  { %5365 = vmatpush.msra.mxu0 %v12305_v42  ;;  %v12461_v42 = vld [vmem:[#allocation7 + $0xa0] sm:$0xff] }
 0xcaf   :  { %9805 = vmatmul.msk.f32.gmra.mxu0 %vm2754_vm2, %v12446_v16  ;;  %13599 = vst [vmem:[#allocation92_spill] sm:$0xff] %v12461_v42 }
 0xcb3   :  { %v4955_v56 = vpop.f32.mrf.mxu3 }
 0xcb4   :  { %9801 = vmatmul.msk.f32.gmra.mxu1 %vm3762_vm7, %v4955_v56 }
 0xcb7   :  { %9806 = vmatmul.msk.f32.gmra.mxu0 %vm2754_vm2, %v12451_v34 }
 0xcbb   :  { %v4958_v18 = vpop.f32.mrf.mxu3 }
 0xcbc   :  { %9802 = vmatmul.msk.f32.gmra.mxu1 %vm3762_vm7, %v4958_v18 }
 0xcbf   :  { %9807 = vmatmul.msk.f32.gmra.mxu0 %vm2754_vm2, %v12456_v54 }
 0xcc3   :  { %v4961_v30 = vpop.f32.mrf.mxu3 }
 0xcc4   :  { %9803 = vmatmul.msk.f32.gmra.mxu1 %vm3762_vm7, %v4961_v30  ;;  %v5131_v30 = vld [vmem:[#allocation23 + $0x100] sm:$0xff] }
 0xcc5   :  { %5166 = vmatpush.msrb.mxu1 %v5131_v30  ;;  %v5214_v30 = vld [vmem:[#allocation23 + $0x140] sm:$0xff] }
 0xcc6   :  { %5249 = vmatpush.msrb.mxu2 %v5214_v30  ;;  %v5384_v30 = vld [vmem:[#allocation23 + $0x1e0] sm:$0xff] }
 0xcc7   :  { %9820 = vmatmul.msk.f32.vlgmr.msrb.gmra.mxu0 %vm2754_vm2, %v12461_v42  ;;  %5325 = vmatpush.msra.mxu1 %v5304_v22 }
 0xcc9   :  { %5326 = vmatpush.msra.mxu1 %v5303_v10 }
 0xccb   :  { %v5118_v18 = vpop.f32.mrf.mxu3  ;;  %5327 = vmatpush.msra.mxu1 %v5302_v11  ;;  %v5385_v11 = vld [vmem:[#allocation23 + $0x1e8] sm:$0xff] }
 0xccc   :  { %9816 = vmatmul.msk.f32.vlgmr.msrb.gmra.mxu1 %vm3762_vm7, %v5118_v18 }
 0xccf   :  { %9821 = vmatmul.msk.f32.gmra.mxu0 %vm2754_vm2, %v12465_v31 }
 0xcd3   :  { %v5121_v9 = vpop.f32.mrf.mxu3 }
 0xcd4   :  { %9817 = vmatmul.msk.f32.gmra.mxu1 %vm3762_vm7, %v5121_v9  ;;  %v5301_v9 = vld [vmem:[#allocation23 + $0x1a0] sm:$0xff] }
 0xcd5   :  { %5328 = vmatpush.msra.mxu1 %v5301_v9  ;;  %v5383_v9 = vld [vmem:[#allocation23 + $0x1d8] sm:$0xff] }
 0xcd7   :  { %9822 = vmatmul.msk.f32.gmra.mxu0 %vm2754_vm2, %v12469_v1  ;;  %5329 = vmatpush.msra.mxu1 %v5300_v39  ;;  %v5470_v39 = vld [vmem:[#allocation23 + $0x238] sm:$0xff] }
 0xcd9   :  { %5330 = vmatpush.msra.mxu1 %v5299_v62  ;;  %v5469_v62 = vld [vmem:[#allocation23 + $0x230] sm:$0xff] }
 0xcdb   :  { %v5124_v5 = vpop.f32.mrf.mxu3  ;;  %5331 = vmatpush.msra.mxu1 %v5298_v20  ;;  %v5382_v20 = vld [vmem:[#allocation23 + $0x1d0] sm:$0xff] }
 0xcdc   :  { %9818 = vmatmul.msk.f32.gmra.mxu1 %vm3762_vm7, %v5124_v5 }
 0xcdd   :  { %5332 = vmatpush.msra.mxu1 %v5297_v40 }
 0xcdf   :  { %9823 = vmatmul.msk.f32.gmra.mxu0 %vm2754_vm2, %v12473_v49  ;;  %5491 = vmatpush.msrb.mxu1 %v5470_v39 }
 0xce1   :  { %5492 = vmatpush.msrb.mxu1 %v5469_v62 }
 0xce3   :  { %v5127_v18 = vpop.f32.mrf.mxu3 }
 0xce4   :  { %9819 = vmatmul.msk.f32.gmra.mxu1 %vm3762_vm7, %v5127_v18 }
 0xce7   :  { %9836 = vmatmul.msk.f32.vlgmr.msra.gmra.mxu0 %vm2754_vm2, %v12477_v6 }
 0xceb   :  { %v5284_v52 = vpop.f32.mrf.mxu3 }
 0xcec   :  { %9832 = vmatmul.msk.f32.vlgmr.msra.gmra.mxu1 %vm3762_vm7, %v5284_v52  ;;  %v5381_v52 = vld [vmem:[#allocation23 + $0x1c8] sm:$0xff] }
 0xcef   :  { %9837 = vmatmul.msk.f32.gmra.mxu0 %vm2754_vm2, %v12481_v27 }
 0xcf3   :  { %v5287_v10 = vpop.f32.mrf.mxu3 }
 0xcf4   :  { %9833 = vmatmul.msk.f32.gmra.mxu1 %vm3762_vm7, %v5287_v10  ;;  %v5380_v10 = vld [vmem:[#allocation23 + $0x1c0] sm:$0xff] }
 0xcf7   :  { %9838 = vmatmul.msk.f32.gmra.mxu0 %vm2754_vm2, %v12485_v32 }
 0xcfb   :  { %v5290_v18 = vpop.f32.mrf.mxu3 }
 0xcfc   :  { %9834 = vmatmul.msk.f32.gmra.mxu1 %vm3762_vm7, %v5290_v18 }
 0xcff   :  { %9839 = vmatmul.msk.f32.gmra.mxu0 %vm2754_vm2, %v12489_v58 }
 0xd04   :  { %v12493_v15 = vpop.f32.mrf.mxu0 }
 0xd0c   :  { %v12495_v56 = vpop.f32.mrf.mxu0 }
 0xd14   :  { %v12498_v55 = vpop.f32.mrf.mxu0 }
 0xd1c   :  { %v12501_v2 = vpop.f32.mrf.mxu0 }
 0xd24   :  { %v5035_v59 = vpop.f32.mrf.mxu0 }
 0xd25   :  { %9808 = vmatmul.msk.f32.vlgmr.msra.gmra.mxu2 %vm3762_vm7, %v5035_v59 }
 0xd26   :  { %5408 = vmatpush.msra.mxu2 %v5387_v21  ;;  %v5467_v21 = vld [vmem:[#allocation23 + $0x220] sm:$0xff] }
 0xd28   :  { %5409 = vmatpush.msra.mxu2 %v5386_v28  ;;  %v5466_v28 = vld [vmem:[#allocation23 + $0x218] sm:$0xff] }
 0xd2a   :  { %5410 = vmatpush.msra.mxu2 %v5385_v11  ;;  %v5465_v11 = vld [vmem:[#allocation23 + $0x210] sm:$0xff] }
 0xd2c   :  { %v5038_v5 = vpop.f32.mrf.mxu0  ;;  %5411 = vmatpush.msra.mxu2 %v5384_v30 }
 0xd2d   :  { %9809 = vmatmul.msk.f32.gmra.mxu2 %vm3762_vm7, %v5038_v5  ;;  %v5468_v5 = vld [vmem:[#allocation23 + $0x228] sm:$0xff] }
 0xd2e   :  { %5412 = vmatpush.msra.mxu2 %v5383_v9  ;;  %5493 = vmatpush.msrb.mxu1 %v5468_v5  ;;  %v5463_v9 = vld [vmem:[#allocation23 + $0x200] sm:$0xff] }
 0xd30   :  { %5413 = vmatpush.msra.mxu2 %v5382_v20  ;;  %5494 = vmatpush.msrb.mxu1 %v5467_v21  ;;  %v5002_v21 = vpop.f32.mrf.mxu1 }
 0xd32   :  { %5414 = vmatpush.msra.mxu2 %v5381_v52  ;;  %5495 = vmatpush.msrb.mxu1 %v5466_v28  ;;  %v4645_v52 = vld [vmem:[%s13607_s2] sm:$0x3] }
 0xd34   :  { %v5041_v22 = vpop.f32.mrf.mxu0  ;;  %5415 = vmatpush.msra.mxu2 %v5380_v10  ;;  %5496 = vmatpush.msrb.mxu1 %v5465_v11 }
 0xd35   :  { %9810 = vmatmul.msk.f32.gmra.mxu2 %vm3762_vm7, %v5041_v22  ;;  %v5293_v22 = vpop.f32.mrf.mxu3 }
 0xd36   :  { %9835 = vmatmul.msk.f32.gmra.mxu1 %vm3762_vm7, %v5293_v22 }
 0xd3c   :  { %v5044_v59 = vpop.f32.mrf.mxu0 }
 0xd3d   :  { %9811 = vmatmul.msk.f32.gmra.mxu2 %vm3762_vm7, %v5044_v59  ;;  %v5464_v59 = vld [vmem:[#allocation23 + $0x208] sm:$0xff]  ;;  %v5450_v30 = vpop.f32.mrf.mxu3 }
 0xd3e   :  { %5497 = vmatpush.msrb.mxu1 %v5464_v59  ;;  %v5005_v59 = vpop.f32.mrf.mxu1 }
 0xd40   :  { %5498 = vmatpush.msrb.mxu1 %v5463_v9  ;;  %v4923_v9 = vpop.f32.mrf.mxu2 }
 0xd41   :  { %9848 = vmatmul.msk.f32.vlgmr.msrb.gmra.mxu1 %vm3762_vm7, %v5450_v30 }
 0xd44   :  { %v5201_v40 = vpop.f32.mrf.mxu0 }
 0xd45   :  { %9824 = vmatmul.msk.f32.vlgmr.msrb.gmra.mxu2 %vm3762_vm7, %v5201_v40  ;;  %v5453_v62 = vpop.f32.mrf.mxu3  ;;  %v4644_v40 = vld [vmem:[%s13608_s19] sm:$0x3] }
 0xd46   :  { %9857 = vmatpush.msk.msrb.mxu2 %vm759_vm0, %v4645_v52  ;;  %9852 = vmatpush.msk.msrb.mxu0 %vm759_vm0, %v4644_v40  ;;  %v5008_v30 = vpop.f32.mrf.mxu1 }
 0xd47   :  { %9853 = vmatmul.msk.f32.vlgmr.msrb.gmra.mxu0 %vm746_vm1, %v12222_v4 }
 0xd49   :  { %9849 = vmatmul.msk.f32.gmra.mxu1 %vm3762_vm7, %v5453_v62  ;;  %v4926_v62 = vpop.f32.mrf.mxu2 }
 0xd4a   :  { %v4927_v6 = vadd.f32 %v4926_v62, %v12495_v56 }
 0xd4c   :  { %v5204_v18 = vpop.f32.mrf.mxu0  ;;  %v5015_v49 = vadd.f32 %v5005_v59, %v4927_v6 }
 0xd4d   :  { %9825 = vmatmul.msk.f32.gmra.mxu2 %vm3762_vm7, %v5204_v18  ;;  %v5456_v5 = vpop.f32.mrf.mxu3 }
 0xd4f   :  { %9854 = vmatmul.msk.f32.gmra.mxu0 %vm746_vm1, %v12228_v48 }
 0xd51   :  { %9850 = vmatmul.msk.f32.gmra.mxu1 %vm3762_vm7, %v5456_v5  ;;  %v4929_v5 = vpop.f32.mrf.mxu2 }
 0xd52   :  { %v4930_v54 = vadd.f32 %v4929_v5, %v12498_v55 }
 0xd54   :  { %v5207_v39 = vpop.f32.mrf.mxu0  ;;  %v5016_v16 = vadd.f32 %v5008_v30, %v4930_v54 }
 0xd55   :  { %9826 = vmatmul.msk.f32.gmra.mxu2 %vm3762_vm7, %v5207_v39  ;;  %v5459_v10 = vpop.f32.mrf.mxu3  ;;  %v5011_v39 = vpop.f32.mrf.mxu1 }
 0xd57   :  { %9855 = vmatmul.msk.f32.gmra.mxu0 %vm746_vm1, %v12233_v57 }
 0xd59   :  { %9851 = vmatmul.msk.f32.gmra.mxu1 %vm3762_vm7, %v5459_v10  ;;  %v4932_v40 = vpop.f32.mrf.mxu2 }
 0xd5a   :  { %v4933_v8 = vadd.f32 %v4932_v40, %v12501_v2 }
 0xd5c   :  { %v5210_v20 = vpop.f32.mrf.mxu0 }
 0xd5d   :  { %9827 = vmatmul.msk.f32.gmra.mxu2 %vm3762_vm7, %v5210_v20  ;;  %v5168_v20 = vpop.f32.mrf.mxu1 }
 0xd5f   :  { %9856 = vmatmul.msk.f32.gmra.mxu0 %vm746_vm1, %v12238_v26 }
 0xd64   :  { %v5367_v22 = vpop.f32.mrf.mxu0 }
 0xd65   :  { %9840 = vmatmul.msk.f32.vlgmr.msra.gmra.mxu2 %vm3762_vm7, %v5367_v22  ;;  %v5171_v52 = vpop.f32.mrf.mxu1 }
 0xd6c   :  { %v5370_v28 = vpop.f32.mrf.mxu0 }
 0xd6d   :  { %9841 = vmatmul.msk.f32.gmra.mxu2 %vm3762_vm7, %v5370_v28  ;;  %v5174_v22 = vpop.f32.mrf.mxu1 }
 0xd74   :  { %v5373_v11 = vpop.f32.mrf.mxu0 }
 0xd75   :  { %9842 = vmatmul.msk.f32.gmra.mxu2 %vm3762_vm7, %v5373_v11  ;;  %v5177_v11 = vpop.f32.mrf.mxu1 }
 0xd7c   :  { %v5376_v18 = vpop.f32.mrf.mxu0 }
 0xd7d   :  { %9843 = vmatmul.msk.f32.gmra.mxu2 %vm3762_vm7, %v5376_v18  ;;  %v5334_v18 = vpop.f32.mrf.mxu1 }
 0xd85   :  { %9858 = vmatmul.msk.f32.vlgmr.msrb.gmra.mxu2 %vm746_vm1, %v12222_v4  ;;  %v5337_v13 = vpop.f32.mrf.mxu1 }
 0xd8d   :  { %9859 = vmatmul.msk.f32.gmra.mxu2 %vm746_vm1, %v12228_v48  ;;  %v5340_v48 = vpop.f32.mrf.mxu1 }
 0xd95   :  { %9860 = vmatmul.msk.f32.gmra.mxu2 %vm746_vm1, %v12233_v57 }
 0xd9d   :  { %9861 = vmatmul.msk.f32.gmra.mxu2 %vm746_vm1, %v12238_v26  ;;  %v4924_v26 = vadd.f32 %v4923_v9, %v12493_v15  ;;  %v5017_v15 = vadd.f32 %v5011_v39, %v4933_v8 }
 0xd9f   :  { %v5014_v1 = vadd.f32 %v5002_v21, %v4924_v26 }
 0xda8   :  { %v5085_v10 = vpop.f32.mrf.mxu2 }
 0xda9   :  { %v5097_v34 = vadd.f32 %v5085_v10, %v5014_v1 }
 0xdab   :  { %v5180_v33 = vadd.f32 %v5168_v20, %v5097_v34 }
 0xdb0   :  { %v5088_v28 = vpop.f32.mrf.mxu2 }
 0xdb1   :  { %v5098_v31 = vadd.f32 %v5088_v28, %v5015_v49 }
 0xdb3   :  { %v5343_v32 = vpop.f32.mrf.mxu1  ;;  %v5181_v36 = vadd.f32 %v5171_v52, %v5098_v31 }
 0xdb8   :  { %v5091_v4 = vpop.f32.mrf.mxu2 }
 0xdb9   :  { %v5099_v60 = vadd.f32 %v5091_v4, %v5016_v16  ;;  %v10240_v16 = vld [vmem:[#allocation25] ss:$0 sm:$0xff] }
 0xdbb   :  { %v5182_v56 = vadd.f32 %v5174_v22, %v5099_v60 }
 0xdbe   :  { %v5500_v27 = vpop.f32.mrf.mxu1 }
 0xdc0   :  { %v5094_v43 = vpop.f32.mrf.mxu2 }
 0xdc1   :  { %v5100_v59 = vadd.f32 %v5094_v43, %v5017_v15  ;;  %v5727_v15 = vld [vmem:[#allocation26 + $0x78] sm:$0xff] }
 0xdc2   :  { %5748 = vmatpush.msra.mxu0 %v5727_v15 }
 0xdc3   :  { %v5183_v30 = vadd.f32 %v5177_v11, %v5100_v59 }
 0xdc6   :  { %v5503_v53 = vpop.f32.mrf.mxu1 }
 0xdc8   :  { %v5251_v24 = vpop.f32.mrf.mxu2 }
 0xdc9   :  { %v5263_v23 = vadd.f32 %v5251_v24, %v5180_v33 }
 0xdcb   :  { %v5346_v6 = vadd.f32 %v5334_v18, %v5263_v23 }
 0xdce   :  { %v5506_v55 = vpop.f32.mrf.mxu1 }
 0xdd0   :  { %v5254_v44 = vpop.f32.mrf.mxu2 }
 0xdd1   :  { %v5264_v61 = vadd.f32 %v5254_v44, %v5181_v36 }
 0xdd3   :  { %v5347_v62 = vadd.f32 %v5337_v13, %v5264_v61 }
 0xdd6   :  { %v5509_v23 = vpop.f32.mrf.mxu1 }
 0xdd8   :  { %v5257_v58 = vpop.f32.mrf.mxu2 }
 0xdd9   :  { %v5265_v21 = vadd.f32 %v5257_v58, %v5182_v56 }
 0xddb   :  { %v5348_v1 = vadd.f32 %v5340_v48, %v5265_v21 }
 0xde0   :  { %v5260_v57 = vpop.f32.mrf.mxu2 }
 0xde1   :  { %v5266_v24 = vadd.f32 %v5260_v57, %v5183_v30  ;;  %v5597_v30 = vpop.f32.mrf.mxu0 }
 0xde3   :  { %v5349_v8 = vadd.f32 %v5343_v32, %v5266_v24 }
 0xde8   :  { %v5417_v42 = vpop.f32.mrf.mxu2 }
 0xde9   :  { %v5429_v9 = vadd.f32 %v5417_v42, %v5346_v6 }
 0xdeb   :  { %v5512_v34 = vadd.f32 %v5500_v27, %v5429_v9 }
 0xded   :  { %v12551_v60 = vadd.f32 %v10240_v16, %v5512_v34 }
 0xdef   :  { %v5537_v61 = vmul.f32 %v12551_v60, %v12551_v60  ;;  %v5523_v58 = vsel %vm3762_vm7, %v12551_v60, 0.0 }
 0xdf0   :  { %v5420_v37 = vpop.f32.mrf.mxu2 }
 0xdf1   :  { %v5430_v49 = vadd.f32 %v5420_v37, %v5347_v62  ;;  %v5541_v5 = vsel %vm3762_vm7, %v5537_v61, 0.0  ;;  %v5721_v61 = vld [vmem:[#allocation26 + $0x48] sm:$0xff] }
 0xdf3   :  { %v5513_v54 = vadd.f32 %v5503_v53, %v5430_v49  ;;  %v5726_v49 = vld [vmem:[#allocation26 + $0x70] sm:$0xff] }
 0xdf4   :  { %5749 = vmatpush.msra.mxu0 %v5726_v49 }
 0xdf5   :  { %v12549_v33 = vadd.f32 %v10240_v16, %v5513_v54 }
 0xdf7   :  { %v5538_v43 = vmul.f32 %v12549_v33, %v12549_v33  ;;  %v5524_v53 = vsel %vm3762_vm7, %v12549_v33, 0.0 }
 0xdf8   :  { %v5423_v31 = vpop.f32.mrf.mxu2  ;;  %v5525_v20 = vadd.f32 %v5524_v53, %v5523_v58  ;;  %v5720_v53 = vld [vmem:[#allocation26 + $0x40] sm:$0xff]  ;;  %v5600_v58 = vpop.f32.mrf.mxu0 }
 0xdf9   :  { %v5431_v44 = vadd.f32 %v5423_v31, %v5348_v1  ;;  %v5542_v32 = vsel %vm3762_vm7, %v5538_v43, 0.0  ;;  %v5724_v31 = vld [vmem:[#allocation26 + $0x60] sm:$0xff]  ;;  %v5722_v43 = vld [vmem:[#allocation26 + $0x50] sm:$0xff] }
 0xdfa   :  { %v5543_v22 = vadd.f32 %v5542_v32, %v5541_v5 }
 0xdfb   :  { %v5514_v36 = vadd.f32 %v5506_v55, %v5431_v44  ;;  %v5725_v55 = vld [vmem:[#allocation26 + $0x68] sm:$0xff]  ;;  %v5723_v44 = vld [vmem:[#allocation26 + $0x58] sm:$0xff] }
 0xdfc   :  { %5750 = vmatpush.msra.mxu0 %v5725_v55 }
 0xdfd   :  { %v12553_v13 = vadd.f32 %v10240_v16, %v5514_v36 }
 0xdfe   :  { %5751 = vmatpush.msra.mxu0 %v5724_v31 }
 0xdff   :  { %v5539_v42 = vmul.f32 %v12553_v13, %v12553_v13  ;;  %v5526_v2 = vsel %vm3762_vm7, %v12553_v13, 0.0 }
 0xe00   :  { %v5426_v37 = vpop.f32.mrf.mxu2  ;;  %v5527_v10 = vadd.f32 %v5526_v2, %v5525_v20  ;;  %5752 = vmatpush.msra.mxu0 %v5723_v44  ;;  %v5603_v5 = vpop.f32.mrf.mxu0  ;;  %v13612_v44 = vld [vmem:[#allocation93_spill] sm:$0xff] }
 0xe01   :  { %v5432_v27 = vadd.f32 %v5426_v37, %v5349_v8  ;;  %v5544_v52 = vsel %vm3762_vm7, %v5539_v42, 0.0 }
 0xe02   :  { %v5545_v4 = vadd.f32 %v5544_v52, %v5543_v22  ;;  %5753 = vmatpush.msra.mxu0 %v5722_v43 }
 0xe03   :  { %v5515_v39 = vadd.f32 %v5509_v23, %v5432_v27 }
 0xe04   :  { %5754 = vmatpush.msra.mxu0 %v5721_v61 }
 0xe05   :  { %v12570_v40 = vadd.f32 %v10240_v16, %v5515_v39 }
 0xe06   :  { %5755 = vmatpush.msra.mxu0 %v5720_v53  ;;  %v13614_v53 = vld [vmem:[#allocation97_spill] sm:$0xff] }
 0xe07   :  { %v5528_v28 = vsel %vm3762_vm7, %v12570_v40, 0.0  ;;  %v5540_v11 = vmul.f32 %v12570_v40, %v12570_v40 }
 0xe08   :  { %v5529_v18 = vadd.f32 %v5528_v28, %v5527_v10  ;;  %v5633_v24 = vpop.f32.mrf.mxu2 }
 0xe09   :  { %v5546_v48 = vsel %vm3762_vm7, %v5540_v11, 0.0 }
 0xe0a   :  { %v5530_v57 = vrot.slane %v5529_v18, 4  ;;  %v5547_v26 = vadd.f32 %v5546_v48, %v5545_v4 }
 0xe0c   :  { %v5531_v56 = vadd.f32 %v5530_v57, %v5529_v18  ;;  %v5548_v62 = vrot.slane %v5547_v26, 4 }
 0xe0e   :  { %v5532_v6 = vrot.slane %v5531_v56, 2  ;;  %v5549_v21 = vadd.f32 %v5548_v62, %v5547_v26 }
 0xe10   :  { %v5533_v59 = vadd.f32 %v5532_v6, %v5531_v56  ;;  %v5550_v9 = vrot.slane %v5549_v21, 2  ;;  %v5636_v2 = vpop.f32.mrf.mxu2  ;;  %v5606_v56 = vpop.f32.mrf.mxu0 }
 0xe12   :  { %v5534_v1 = vrot.slane %v5533_v59, 1  ;;  %v5551_v54 = vadd.f32 %v5550_v9, %v5549_v21 }
 0xe14   :  { %v5535_v34 = vadd.f32 %v5534_v1, %v5533_v59  ;;  %v5552_v16 = vrot.slane %v5551_v54, 1 }
 0xe16   :  { %v5536_v36 = vmul.f32 %v5535_v34, %v11757_v63  ;;  %v5553_v8 = vadd.f32 %v5552_v16, %v5551_v54  ;;  %v5842_v16 = vld [vmem:[#allocation26 + $0x90] sm:$0xff] }
 0xe18   :  { %v5554_v37 = vmul.f32 %v5553_v8, %v11757_v63  ;;  %v5555_v23 = vmul.f32 %v5536_v36, %v5536_v36  ;;  %v5639_v22 = vpop.f32.mrf.mxu2  ;;  %v5558_v4 = vsub.f32 %v12551_v60, %v5536_v36  ;;  %v5559_v18 = vsub.f32 %v12549_v33, %v5536_v36  ;;  %v5840_v8 = vld [vmem:[#allocation26 + $0x80] sm:$0xff] }
 0xe19   :  { %v5560_v48 = vsub.f32 %v12553_v13, %v5536_v36  ;;  %v5561_v57 = vsub.f32 %v12570_v40, %v5536_v36 }
 0xe1a   :  { %v5556_v42 = vsub.f32 %v5554_v37, %v5555_v23  ;;  %v13613_v37 = vld [vmem:[#allocation95_spill] sm:$0xff] }
 0xe1c   :  { %v5557_v27 = vmax.f32 %v5556_v42, 0.0 }
 0xe1e   :  { %v5562_v32 = vadd.f32 1e-05, %v5557_v27 }
 0xe20   :  { %10253 = vrsqrt.f32 %v5562_v32  ;;  %vm5569_vm15 = vweird.f32 %v5562_v32  ;;  %v5642_v49 = vpop.f32.mrf.mxu2 }
 0xe26   :  { %v10254_v39 = vpop.eup %10253 }
 0xe27   :  { %v5564_v20 = vmul.f32 %v10254_v39, %v5562_v32  ;;  %vm5570_vm14 = vweird.f32 %v10254_v39 }
 0xe28   :  { %vm5571_vm3 = vmor %vm5569_vm15, %vm5570_vm14 }
 0xe29   :  { %v5565_v52 = vmul.f32 %v10254_v39, %v5564_v20  ;;  %v13617_v20 = vld [vmem:[#allocation86_spill] sm:$0xff] }
 0xe2b   :  { %v5566_v10 = vmul.f32 0.5, %v5565_v52  ;;  %v13618_v52 = vld [vmem:[#allocation88_spill] sm:$0xff] }
 0xe2d   :  { %v5567_v28 = vsub.f32 1.5, %v5566_v10  ;;  %v13619_v10 = vld [vmem:[#allocation90_spill] sm:$0xff] }
 0xe2f   :  { %v5568_v11 = vmul.f32 %v10254_v39, %v5567_v28 }
 0xe31   :  { %v5572_v26 = vsel %vm5571_vm3, %v10254_v39, %v5568_v11  ;;  %v13620_v11 = vld [vmem:[#allocation92_spill] sm:$0xff] }
 0xe32   :  { %v5573_v62 = vmul.f32 %v5572_v26, %v5558_v4  ;;  %v5574_v15 = vmul.f32 %v5572_v26, %v5559_v18  ;;  %v5575_v6 = vmul.f32 %v5572_v26, %v5560_v48  ;;  %v5576_v21 = vmul.f32 %v5572_v26, %v5561_v57  ;;  %v13621_v4 = vld [vmem:[#allocation94_spill] sm:$0xff]  ;;  %v13622_v18 = vld [vmem:[#allocation96_spill] sm:$0xff]  ;;  %v13625_v26 = vld [vmem:[#allocation101_spill] sm:$0xff] }
 0xe33   :  { %v13623_v48 = vld [vmem:[#allocation98_spill] sm:$0xff]  ;;  %v13624_v57 = vld [vmem:[#allocation100_spill] sm:$0xff] }
 0xe34   :  { %v5610_v59 = vmul.f32 %v5600_v58, %v5574_v15  ;;  %v5611_v9 = vmul.f32 %v5603_v5, %v5575_v6  ;;  %v5612_v55 = vmul.f32 %v5606_v56, %v5576_v21  ;;  %v5609_v1 = vmul.f32 %v5597_v30, %v5573_v62  ;;  %v13615_v58 = vld [vmem:[#allocation99_spill] sm:$0xff]  ;;  %v5930_v56 = vld [vmem:[#allocation26 + $0xf8] sm:$0xff]  ;;  %v5929_v15 = vld [vmem:[#allocation26 + $0xf0] sm:$0xff] }
 0xe35   :  { %v13626_v62 = vld [vmem:[#allocation102_spill] sm:$0xff]  ;;  %v5928_v6 = vld [vmem:[#allocation26 + $0xe8] sm:$0xff] }
 0xe36   :  { %v5647_v54 = vadd.f32 %v5639_v22, %v5611_v9  ;;  %v5648_v60 = vadd.f32 %v5642_v49, %v5612_v55  ;;  %v5646_v31 = vadd.f32 %v5636_v2, %v5610_v59  ;;  %v5645_v33 = vadd.f32 %v5633_v24, %v5609_v1  ;;  %v5841_v24 = vld [vmem:[#allocation26 + $0x88] sm:$0xff]  ;;  %v13616_v2 = vld [vmem:[#allocation85_spill] sm:$0xff]  ;;  %v5927_v21 = vld [vmem:[#allocation26 + $0xe0] sm:$0xff] }
 0xe37   :  { %v5926_v49 = vld [vmem:[#allocation26 + $0xd8] sm:$0xff]  ;;  %v13627_v9 = vld [vmem:[#allocation103_spill] sm:$0xff]  ;;  %v5925_v55 = vld [vmem:[#allocation26 + $0xd0] sm:$0xff] }
 0xe38   :  { %v12583_v34 = vmax.f32 %v5648_v60, 0.0  ;;  %v12585_v13 = vmax.f32 %v5647_v54, 0.0  ;;  %v12590_v40 = vmax.f32 %v5646_v31, 0.0  ;;  %v12595_v30 = vmax.f32 %v5645_v33, 0.0  ;;  %v6013_v59 = vld [vmem:[#allocation26 + $0x138] sm:$0xff]  ;;  %v6012_v1 = vld [vmem:[#allocation26 + $0x130] sm:$0xff] }
 0xe39   :  { %v5924_v54 = vld [vmem:[#allocation26 + $0xc8] sm:$0xff]  ;;  %v6010_v33 = vld [vmem:[#allocation26 + $0x120] sm:$0xff] }
 0xe3a   :  { %5665 = vmatpush.msrb.mxu3 %v12583_v34  ;;  %5702 = vmatpush.msra.mxu1 %v12583_v34  ;;  %v6011_v60 = vld [vmem:[#allocation26 + $0x128] sm:$0xff] }
 0xe3b   :  { %5905 = vmatpush.msrb.mxu0 %v12583_v34 }
 0xe3c   :  { %5666 = vmatpush.msrb.mxu3 %v12585_v13  ;;  %5703 = vmatpush.msra.mxu1 %v12585_v13 }
 0xe3d   :  { %5906 = vmatpush.msrb.mxu0 %v12585_v13 }
 0xe3e   :  { %5667 = vmatpush.msrb.mxu3 %v12590_v40  ;;  %5704 = vmatpush.msra.mxu1 %v12590_v40 }
 0xe3f   :  { %5907 = vmatpush.msrb.mxu0 %v12590_v40 }
 0xe40   :  { %5668 = vmatpush.msrb.mxu3 %v12595_v30  ;;  %5705 = vmatpush.msra.mxu1 %v12595_v30 }
 0xe41   :  { %5908 = vmatpush.msrb.mxu0 %v12595_v30  ;;  %9862 = vmatmul.msk.f32.vlgmr.msrb.gmra.mxu3 %vm2754_vm2, %v12313_v19  ;;  %v5689_v19 = vld [vmem:[#allocation26 + $0x38] sm:$0xff] }
 0xe42   :  { %9866 = vmatmul.msk.f32.vlgmr.msra.gmra.mxu1 %vm2754_vm2, %v12317_v14  ;;  %5822 = vmatpush.msra.mxu3 %v12583_v34  ;;  %v5688_v14 = vld [vmem:[#allocation26 + $0x30] sm:$0xff] }
 0xe43   :  { %5789 = vmatpush.msra.mxu2 %v5689_v19 }
 0xe44   :  { %5823 = vmatpush.msra.mxu3 %v12585_v13 }
 0xe45   :  { %5790 = vmatpush.msra.mxu2 %v5688_v14 }
 0xe46   :  { %5824 = vmatpush.msra.mxu3 %v12590_v40 }
 0xe48   :  { %5825 = vmatpush.msra.mxu3 %v12595_v30 }
 0xe49   :  { %9863 = vmatmul.msk.f32.gmra.mxu3 %vm2754_vm2, %v12326_v51  ;;  %v5687_v51 = vld [vmem:[#allocation26 + $0x28] sm:$0xff] }
 0xe4a   :  { %5988 = vmatpush.msrb.mxu3 %v12583_v34  ;;  %9867 = vmatmul.msk.f32.gmra.mxu1 %vm2754_vm2, %v12330_v38  ;;  %v5686_v38 = vld [vmem:[#allocation26 + $0x20] sm:$0xff] }
 0xe4b   :  { %5791 = vmatpush.msra.mxu2 %v5687_v51  ;;  %v6006_v51 = vld [vmem:[#allocation26 + $0x100] sm:$0xff] }
 0xe4c   :  { %5989 = vmatpush.msrb.mxu3 %v12585_v13 }
 0xe4d   :  { %5792 = vmatpush.msra.mxu2 %v5686_v38 }
 0xe4e   :  { %5990 = vmatpush.msrb.mxu3 %v12590_v40 }
 0xe50   :  { %5991 = vmatpush.msrb.mxu3 %v12595_v30 }
 0xe51   :  { %9864 = vmatmul.msk.f32.gmra.mxu3 %vm2754_vm2, %v12337_v47  ;;  %v5685_v47 = vld [vmem:[#allocation26 + $0x18] sm:$0xff] }
 0xe52   :  { %9868 = vmatmul.msk.f32.gmra.mxu1 %vm2754_vm2, %v12341_v12  ;;  %5793 = vmatpush.msra.mxu2 %v5685_v47  ;;  %v5684_v12 = vld [vmem:[#allocation26 + $0x10] sm:$0xff] }
 0xe54   :  { %5794 = vmatpush.msra.mxu2 %v5684_v12  ;;  %v6096_v12 = vld [vmem:[#allocation26 + $0x178] sm:$0xff] }
 0xe59   :  { %9865 = vmatmul.msk.f32.gmra.mxu3 %vm2754_vm2, %v12345_v50  ;;  %v5683_v50 = vld [vmem:[#allocation26 + $0x8] sm:$0xff] }
 0xe5a   :  { %9869 = vmatmul.msk.f32.gmra.mxu1 %vm2754_vm2, %v12349_v35  ;;  %5795 = vmatpush.msra.mxu2 %v5683_v50  ;;  %v5682_v35 = vld [vmem:[#allocation26] sm:$0xff]  ;;  %v6095_v50 = vld [vmem:[#allocation26 + $0x170] sm:$0xff] }
 0xe5c   :  { %5796 = vmatpush.msra.mxu2 %v5682_v35  ;;  %v6094_v35 = vld [vmem:[#allocation26 + $0x168] sm:$0xff] }
 0xe5e   :  { %5951 = vmatpush.msrb.mxu2 %v5930_v56  ;;  %v6341_v56 = vld [vmem:[#allocation26 + $0x218] sm:$0xff] }
 0xe60   :  { %5952 = vmatpush.msrb.mxu2 %v5929_v15  ;;  %v6339_v15 = vld [vmem:[#allocation26 + $0x208] sm:$0xff] }
 0xe61   :  { %9878 = vmatmul.msk.f32.vlgmr.msra.gmra.mxu3 %vm2754_vm2, %v12353_v46  ;;  %v13609_v46 = vld [vmem:[#allocation87_spill] sm:$0xff] }
 0xe62   :  { %6154 = vmatpush.msra.mxu3 %v12583_v34  ;;  %5953 = vmatpush.msrb.mxu2 %v5928_v6 }
 0xe64   :  { %6155 = vmatpush.msra.mxu3 %v12585_v13  ;;  %5954 = vmatpush.msrb.mxu2 %v5927_v21 }
 0xe66   :  { %6156 = vmatpush.msra.mxu3 %v12590_v40  ;;  %5955 = vmatpush.msrb.mxu2 %v5926_v49  ;;  %v6338_v49 = vld [vmem:[#allocation26 + $0x200] sm:$0xff] }
 0xe68   :  { %6157 = vmatpush.msra.mxu3 %v12595_v30  ;;  %5956 = vmatpush.msrb.mxu2 %v5925_v55 }
 0xe69   :  { %9879 = vmatmul.msk.f32.gmra.mxu3 %vm2754_vm2, %v12361_v0  ;;  %v13610_v0 = vld [vmem:[#allocation89_spill] sm:$0xff] }
 0xe6a   :  { %5957 = vmatpush.msrb.mxu2 %v5924_v54  ;;  %v6402_v54 = vld [vmem:[%s13628_s0] sm:$0x3] }
 0xe71   :  { %9880 = vmatmul.msk.f32.gmra.mxu3 %vm2754_vm2, %v12365_v29  ;;  %v5847_v29 = vld [vmem:[#allocation26 + $0xb8] sm:$0xff] }
 0xe72   :  { %5868 = vmatpush.msrb.mxu1 %v5847_v29  ;;  %v6093_v29 = vld [vmem:[#allocation26 + $0x160] sm:$0xff] }
 0xe79   :  { %9881 = vmatmul.msk.f32.gmra.mxu3 %vm2754_vm2, %v12369_v45  ;;  %v5846_v45 = vld [vmem:[#allocation26 + $0xb0] sm:$0xff] }
 0xe7a   :  { %5869 = vmatpush.msrb.mxu1 %v5846_v45  ;;  %v6092_v45 = vld [vmem:[#allocation26 + $0x158] sm:$0xff] }
 0xe81   :  { %9894 = vmatmul.msk.f32.vlgmr.msrb.gmra.mxu3 %vm2754_vm2, %v12373_v17  ;;  %v5845_v17 = vld [vmem:[#allocation26 + $0xa8] sm:$0xff] }
 0xe82   :  { %6320 = vmatpush.msrb.mxu3 %v12583_v34  ;;  %5870 = vmatpush.msrb.mxu1 %v5845_v17  ;;  %v6179_v17 = vld [vmem:[#allocation26 + $0x1b8] sm:$0xff] }
 0xe84   :  { %6321 = vmatpush.msrb.mxu3 %v12585_v13 }
 0xe86   :  { %6322 = vmatpush.msrb.mxu3 %v12590_v40 }
 0xe88   :  { %6323 = vmatpush.msrb.mxu3 %v12595_v30 }
 0xe89   :  { %9895 = vmatmul.msk.f32.gmra.mxu3 %vm2754_vm2, %v12381_v7  ;;  %v13611_v7 = vld [vmem:[#allocation91_spill] sm:$0xff] }
 0xe91   :  { %9896 = vmatmul.msk.f32.gmra.mxu3 %vm2754_vm2, %v12385_v41  ;;  %v5844_v41 = vld [vmem:[#allocation26 + $0xa0] sm:$0xff] }
 0xe92   :  { %5871 = vmatpush.msrb.mxu1 %v5844_v41  ;;  %v6178_v41 = vld [vmem:[#allocation26 + $0x1b0] sm:$0xff] }
 0xe99   :  { %9897 = vmatmul.msk.f32.gmra.mxu3 %vm2754_vm2, %v12389_v25  ;;  %v5843_v25 = vld [vmem:[#allocation26 + $0x98] sm:$0xff] }
 0xe9a   :  { %5872 = vmatpush.msrb.mxu1 %v5843_v25  ;;  %v6090_v25 = vld [vmem:[#allocation26 + $0x148] sm:$0xff] }
 0xe9c   :  { %5873 = vmatpush.msrb.mxu1 %v5842_v16 }
 0xe9e   :  { %5874 = vmatpush.msrb.mxu1 %v5841_v24  ;;  %v6089_v24 = vld [vmem:[#allocation26 + $0x140] sm:$0xff] }
 0xea0   :  { %5875 = vmatpush.msrb.mxu1 %v5840_v8  ;;  %v6175_v8 = vld [vmem:[#allocation26 + $0x198] sm:$0xff] }
 0xea1   :  { %9910 = vmatmul.msk.f32.vlgmr.msra.gmra.mxu3 %vm2754_vm2, %v12393_v3 }
 0xea2   :  { %6034 = vmatpush.msra.mxu1 %v6013_v59 }
 0xea4   :  { %6035 = vmatpush.msra.mxu1 %v6012_v1 }
 0xea6   :  { %6036 = vmatpush.msra.mxu1 %v6011_v60  ;;  %v6403_v60 = vld [vmem:[%s13629_s5] sm:$0x3] }
 0xea7   :  { %9943 = vmatpush.msk.msra.mxu3 %vm759_vm0, %v6403_v60 }
 0xea8   :  { %6037 = vmatpush.msra.mxu1 %v6010_v33 }
 0xea9   :  { %9911 = vmatmul.msk.f32.gmra.mxu3 %vm2754_vm2, %v13609_v46 }
 0xeb1   :  { %9912 = vmatmul.msk.f32.gmra.mxu3 %vm2754_vm2, %v13610_v0 }
 0xeb9   :  { %9913 = vmatmul.msk.f32.gmra.mxu3 %vm2754_vm2, %v13611_v7  ;;  %v6091_v7 = vld [vmem:[#allocation26 + $0x150] sm:$0xff] }
 0xebf   :  { %v5707_v3 = vpop.f32.mrf.mxu1 }
 0xec0   :  { %9870 = vmatmul.msk.f32.vlgmr.msra.gmra.mxu0 %vm3762_vm7, %v5707_v3  ;;  %v6177_v3 = vld [vmem:[#allocation26 + $0x1a8] sm:$0xff] }
 0xec1   :  { %6071 = vmatpush.msra.mxu0 %v12583_v34  ;;  %9926 = vmatmul.msk.f32.vlgmr.msrb.gmra.mxu3 %vm2754_vm2, %v13612_v44 }
 0xec3   :  { %6072 = vmatpush.msra.mxu0 %v12585_v13 }
 0xec4   :  { %v5670_v36 = vpop.f32.mrf.mxu3 }
 0xec5   :  { %6073 = vmatpush.msra.mxu0 %v12590_v40  ;;  %9874 = vmatmul.msk.f32.vlgmr.msra.gmra.mxu2 %vm3762_vm7, %v5670_v36  ;;  %v6176_v36 = vld [vmem:[#allocation26 + $0x1a0] sm:$0xff] }
 0xec7   :  { %6074 = vmatpush.msra.mxu0 %v12595_v30  ;;  %v5710_v43 = vpop.f32.mrf.mxu1 }
 0xec8   :  { %9871 = vmatmul.msk.f32.gmra.mxu0 %vm3762_vm7, %v5710_v43  ;;  %v6174_v43 = vld [vmem:[#allocation26 + $0x190] sm:$0xff] }
 0xec9   :  { %9927 = vmatmul.msk.f32.gmra.mxu3 %vm2754_vm2, %v13613_v37  ;;  %v6173_v37 = vld [vmem:[#allocation26 + $0x188] sm:$0xff] }
 0xecc   :  { %v5673_v23 = vpop.f32.mrf.mxu3 }
 0xecd   :  { %9875 = vmatmul.msk.f32.gmra.mxu2 %vm3762_vm7, %v5673_v23 }
 0xecf   :  { %v5713_v61 = vpop.f32.mrf.mxu1 }
 0xed0   :  { %9872 = vmatmul.msk.f32.gmra.mxu0 %vm3762_vm7, %v5713_v61 }
 0xed1   :  { %9928 = vmatmul.msk.f32.gmra.mxu3 %vm2754_vm2, %v13614_v53  ;;  %v6172_v53 = vld [vmem:[#allocation26 + $0x180] sm:$0xff] }
 0xed4   :  { %v5676_v42 = vpop.f32.mrf.mxu3 }
 0xed5   :  { %9876 = vmatmul.msk.f32.gmra.mxu2 %vm3762_vm7, %v5676_v42 }
 0xed7   :  { %v5716_v27 = vpop.f32.mrf.mxu1 }
 0xed8   :  { %9873 = vmatmul.msk.f32.gmra.mxu0 %vm3762_vm7, %v5716_v27 }
 0xed9   :  { %9929 = vmatmul.msk.f32.gmra.mxu3 %vm2754_vm2, %v13615_v58  ;;  %v6262_v58 = vld [vmem:[#allocation26 + $0x1f8] sm:$0xff] }
 0xedc   :  { %v5679_v32 = vpop.f32.mrf.mxu3 }
 0xedd   :  { %9877 = vmatmul.msk.f32.gmra.mxu2 %vm3762_vm7, %v5679_v32  ;;  %v6261_v32 = vld [vmem:[#allocation26 + $0x1f0] sm:$0xff] }
 0xee0   :  { %9886 = vmatmul.msk.f32.vlgmr.msrb.gmra.mxu0 %vm2754_vm2, %v13616_v2  ;;  %v6260_v2 = vld [vmem:[#allocation26 + $0x1e8] sm:$0xff] }
 0xee1   :  { %6237 = vmatpush.msrb.mxu0 %v12583_v34  ;;  %v5923_v34 = vld [vmem:[#allocation26 + $0xc0] sm:$0xff] }
 0xee2   :  { %5958 = vmatpush.msrb.mxu2 %v5923_v34  ;;  %v12742_v34 = vld [vmem:[#allocation5] sm:$0xff] }
 0xee3   :  { %6238 = vmatpush.msrb.mxu0 %v12585_v13  ;;  %v6009_v13 = vld [vmem:[#allocation26 + $0x118] sm:$0xff]  ;;  %9944 = vmatmul.msk.f32.vlgmr.msra.gmra.mxu3 %vm746_vm1, %v12742_v34 }
 0xee4   :  { %v5827_v39 = vpop.f32.mrf.mxu3  ;;  %6038 = vmatpush.msra.mxu1 %v6009_v13  ;;  %6117 = vmatpush.msra.mxu2 %v6096_v12 }
 0xee5   :  { %6239 = vmatpush.msrb.mxu0 %v12590_v40  ;;  %9882 = vmatmul.msk.f32.vlgmr.msrb.gmra.mxu1 %vm3762_vm7, %v5827_v39  ;;  %v6008_v40 = vld [vmem:[#allocation26 + $0x110] sm:$0xff] }
 0xee6   :  { %6039 = vmatpush.msra.mxu1 %v6008_v40  ;;  %6118 = vmatpush.msra.mxu2 %v6095_v50  ;;  %v12748_v40 = vld [vmem:[#allocation5 + $0x8] sm:$0xff]  ;;  %v12758_v50 = vld [vmem:[#allocation5 + $0x18] sm:$0xff] }
 0xee7   :  { %6240 = vmatpush.msrb.mxu0 %v12595_v30  ;;  %v6007_v30 = vld [vmem:[#allocation26 + $0x108] sm:$0xff] }
 0xee8   :  { %9887 = vmatmul.msk.f32.gmra.mxu0 %vm2754_vm2, %v13617_v20  ;;  %6040 = vmatpush.msra.mxu1 %v6007_v30 }
 0xee9   :  { %6119 = vmatpush.msra.mxu2 %v6094_v35 }
 0xeea   :  { %6041 = vmatpush.msra.mxu1 %v6006_v51  ;;  %v12753_v51 = vld [vmem:[#allocation5 + $0x10] sm:$0xff] }
 0xeeb   :  { %6120 = vmatpush.msra.mxu2 %v6093_v29  ;;  %9945 = vmatmul.msk.f32.gmra.mxu3 %vm746_vm1, %v12748_v40 }
 0xeec   :  { %v5830_v5 = vpop.f32.mrf.mxu3  ;;  %6200 = vmatpush.msrb.mxu1 %v6179_v17 }
 0xeed   :  { %9883 = vmatmul.msk.f32.gmra.mxu1 %vm3762_vm7, %v5830_v5  ;;  %6121 = vmatpush.msra.mxu2 %v6092_v45  ;;  %v6259_v5 = vld [vmem:[#allocation26 + $0x1e0] sm:$0xff] }
 0xeee   :  { %6201 = vmatpush.msrb.mxu1 %v6178_v41 }
 0xeef   :  { %6122 = vmatpush.msra.mxu2 %v6091_v7 }
 0xef0   :  { %9888 = vmatmul.msk.f32.gmra.mxu0 %vm2754_vm2, %v13618_v52  ;;  %6202 = vmatpush.msrb.mxu1 %v6177_v3  ;;  %v6258_v52 = vld [vmem:[#allocation26 + $0x1d8] sm:$0xff] }
 0xef1   :  { %6123 = vmatpush.msra.mxu2 %v6090_v25 }
 0xef2   :  { %6203 = vmatpush.msrb.mxu1 %v6176_v36 }
 0xef3   :  { %6124 = vmatpush.msra.mxu2 %v6089_v24  ;;  %9946 = vmatmul.msk.f32.gmra.mxu3 %vm746_vm1, %v12753_v51 }
 0xef4   :  { %v5833_v22 = vpop.f32.mrf.mxu3  ;;  %6204 = vmatpush.msrb.mxu1 %v6175_v8 }
 0xef5   :  { %9884 = vmatmul.msk.f32.gmra.mxu1 %vm3762_vm7, %v5833_v22  ;;  %v6345_v22 = vld [vmem:[#allocation26 + $0x238] sm:$0xff] }
 0xef6   :  { %6205 = vmatpush.msrb.mxu1 %v6174_v43 }
 0xef8   :  { %9889 = vmatmul.msk.f32.gmra.mxu0 %vm2754_vm2, %v13619_v10  ;;  %6206 = vmatpush.msrb.mxu1 %v6173_v37  ;;  %v6344_v10 = vld [vmem:[#allocation26 + $0x230] sm:$0xff] }
 0xefa   :  { %6207 = vmatpush.msrb.mxu1 %v6172_v53 }
 0xefb   :  { %9947 = vmatmul.msk.f32.gmra.mxu3 %vm746_vm1, %v12758_v50 }
 0xefc   :  { %v5836_v28 = vpop.f32.mrf.mxu3 }
 0xefd   :  { %9885 = vmatmul.msk.f32.gmra.mxu1 %vm3762_vm7, %v5836_v28  ;;  %v6257_v28 = vld [vmem:[#allocation26 + $0x1d0] sm:$0xff] }
 0xf00   :  { %9902 = vmatmul.msk.f32.vlgmr.msra.gmra.mxu0 %vm2754_vm2, %v13620_v11  ;;  %v6343_v11 = vld [vmem:[#allocation26 + $0x228] sm:$0xff] }
 0xf04   :  { %v5993_v14 = vpop.f32.mrf.mxu3 }
 0xf05   :  { %9898 = vmatmul.msk.f32.vlgmr.msra.gmra.mxu1 %vm3762_vm7, %v5993_v14 }
 0xf06   :  { %6366 = vmatpush.msra.mxu1 %v6345_v22 }
 0xf08   :  { %9903 = vmatmul.msk.f32.gmra.mxu0 %vm2754_vm2, %v13621_v4  ;;  %6367 = vmatpush.msra.mxu1 %v6344_v10  ;;  %v6256_v4 = vld [vmem:[#allocation26 + $0x1c8] sm:$0xff] }
 0xf0a   :  { %6368 = vmatpush.msra.mxu1 %v6343_v11 }
 0xf0c   :  { %v5996_v47 = vpop.f32.mrf.mxu3 }
 0xf0d   :  { %9899 = vmatmul.msk.f32.gmra.mxu1 %vm3762_vm7, %v5996_v47 }
 0xf10   :  { %9904 = vmatmul.msk.f32.gmra.mxu0 %vm2754_vm2, %v13622_v18 }
 0xf14   :  { %v5999_v0 = vpop.f32.mrf.mxu3 }
 0xf15   :  { %9900 = vmatmul.msk.f32.gmra.mxu1 %vm3762_vm7, %v5999_v0 }
 0xf18   :  { %9905 = vmatmul.msk.f32.gmra.mxu0 %vm2754_vm2, %v13623_v48 }
 0xf1c   :  { %v6002_v44 = vpop.f32.mrf.mxu3 }
 0xf1d   :  { %9901 = vmatmul.msk.f32.gmra.mxu1 %vm3762_vm7, %v6002_v44 }
 0xf20   :  { %9918 = vmatmul.msk.f32.vlgmr.msrb.gmra.mxu0 %vm2754_vm2, %v13624_v57  ;;  %v6255_v57 = vld [vmem:[#allocation26 + $0x1c0] sm:$0xff] }
 0xf24   :  { %v6159_v61 = vpop.f32.mrf.mxu3 }
 0xf25   :  { %9914 = vmatmul.msk.f32.vlgmr.msrb.gmra.mxu1 %vm3762_vm7, %v6159_v61  ;;  %v6414_v61 = vld [vmem:[#allocation35 + $0x30] sm:$0xff] }
 0xf28   :  { %9919 = vmatmul.msk.f32.gmra.mxu0 %vm2754_vm2, %v13625_v26  ;;  %v6342_v26 = vld [vmem:[#allocation26 + $0x220] sm:$0xff] }
 0xf29   :  { %6369 = vmatpush.msra.mxu1 %v6342_v26 }
 0xf2b   :  { %6370 = vmatpush.msra.mxu1 %v6341_v56 }
 0xf2c   :  { %v6162_v27 = vpop.f32.mrf.mxu3 }
 0xf2d   :  { %9915 = vmatmul.msk.f32.gmra.mxu1 %vm3762_vm7, %v6162_v27 }
 0xf30   :  { %9920 = vmatmul.msk.f32.gmra.mxu0 %vm2754_vm2, %v13626_v62  ;;  %v6340_v62 = vld [vmem:[#allocation26 + $0x210] sm:$0xff] }
 0xf31   :  { %6371 = vmatpush.msra.mxu1 %v6340_v62 }
 0xf33   :  { %6372 = vmatpush.msra.mxu1 %v6339_v15 }
 0xf34   :  { %v6165_v20 = vpop.f32.mrf.mxu3 }
 0xf35   :  { %9916 = vmatmul.msk.f32.gmra.mxu1 %vm3762_vm7, %v6165_v20  ;;  %v6409_v20 = vld [vmem:[#allocation35 + $0x8] sm:$0xff] }
 0xf36   :  { %6373 = vmatpush.msra.mxu1 %v6338_v49 }
 0xf38   :  { %9921 = vmatmul.msk.f32.gmra.mxu0 %vm2754_vm2, %v13627_v9 }
 0xf3c   :  { %v6168_v48 = vpop.f32.mrf.mxu3 }
 0xf3d   :  { %v12711_v31 = vpop.f32.mrf.mxu0  ;;  %9917 = vmatmul.msk.f32.gmra.mxu1 %vm3762_vm7, %v6168_v48 }
 0xf44   :  { %v6325_v21 = vpop.f32.mrf.mxu3 }
 0xf45   :  { %v12713_v19 = vpop.f32.mrf.mxu0  ;;  %9930 = vmatmul.msk.f32.vlgmr.msra.gmra.mxu1 %vm3762_vm7, %v6325_v21 }
 0xf48   :  { %v5798_v29 = vpop.f32.mrf.mxu2 }
 0xf4c   :  { %v6328_v9 = vpop.f32.mrf.mxu3 }
 0xf4d   :  { %v12716_v38 = vpop.f32.mrf.mxu0  ;;  %9931 = vmatmul.msk.f32.gmra.mxu1 %vm3762_vm7, %v6328_v9 }
 0xf50   :  { %v5801_v17 = vpop.f32.mrf.mxu2 }
 0xf51   :  { %v5802_v48 = vadd.f32 %v5801_v17, %v12713_v19  ;;  %v13630_v19 = vld [vmem:[#allocation80_spill] sm:$0xff] }
 0xf54   :  { %v6331_v1 = vpop.f32.mrf.mxu3 }
 0xf55   :  { %v12719_v46 = vpop.f32.mrf.mxu0  ;;  %9932 = vmatmul.msk.f32.gmra.mxu1 %vm3762_vm7, %v6331_v1 }
 0xf58   :  { %v5804_v41 = vpop.f32.mrf.mxu2 }
 0xf59   :  { %v5805_v49 = vadd.f32 %v5804_v41, %v12716_v38 }
 0xf5c   :  { %v6334_v13 = vpop.f32.mrf.mxu3 }
 0xf5d   :  { %v5910_v16 = vpop.f32.mrf.mxu0  ;;  %9933 = vmatmul.msk.f32.gmra.mxu1 %vm3762_vm7, %v6334_v13 }
 0xf5e   :  { %9890 = vmatmul.msk.f32.vlgmr.msrb.gmra.mxu2 %vm3762_vm7, %v5910_v16 }
 0xf5f   :  { %6283 = vmatpush.msrb.mxu2 %v6262_v58  ;;  %v6412_v58 = vld [vmem:[#allocation35 + $0x20] sm:$0xff] }
 0xf60   :  { %v5807_v3 = vpop.f32.mrf.mxu2 }
 0xf61   :  { %6284 = vmatpush.msrb.mxu2 %v6261_v32  ;;  %v6411_v32 = vld [vmem:[#allocation35 + $0x18] sm:$0xff] }
 0xf62   :  { %v5877_v30 = vpop.f32.mrf.mxu1 }
 0xf63   :  { %6285 = vmatpush.msrb.mxu2 %v6260_v2  ;;  %v6410_v2 = vld [vmem:[#allocation35 + $0x10] sm:$0xff] }
 0xf65   :  { %v5913_v23 = vpop.f32.mrf.mxu0  ;;  %6286 = vmatpush.msrb.mxu2 %v6259_v5 }
 0xf66   :  { %9891 = vmatmul.msk.f32.gmra.mxu2 %vm3762_vm7, %v5913_v23  ;;  %v6415_v23 = vld [vmem:[#allocation35 + $0x38] sm:$0xff] }
 0xf67   :  { %6287 = vmatpush.msrb.mxu2 %v6258_v52  ;;  %6440 = vmatpush.msra.mxu0 %v6415_v23  ;;  %v6408_v52 = vld [vmem:[#allocation35] sm:$0xff] }
 0xf69   :  { %6288 = vmatpush.msrb.mxu2 %v6257_v28  ;;  %6441 = vmatpush.msra.mxu0 %v6414_v61  ;;  %v5799_v28 = vadd.f32 %v5798_v29, %v12711_v31 }
 0xf6a   :  { %v5880_v12 = vpop.f32.mrf.mxu1 }
 0xf6b   :  { %6289 = vmatpush.msrb.mxu2 %v6256_v4  ;;  %v5889_v11 = vadd.f32 %v5877_v30, %v5799_v28  ;;  %v5890_v56 = vadd.f32 %v5880_v12, %v5802_v48  ;;  %v5808_v12 = vadd.f32 %v5807_v3, %v12719_v46 }
 0xf6d   :  { %v5916_v42 = vpop.f32.mrf.mxu0  ;;  %6290 = vmatpush.msrb.mxu2 %v6255_v57 }
 0xf6e   :  { %9892 = vmatmul.msk.f32.gmra.mxu2 %vm3762_vm7, %v5916_v42  ;;  %v6413_v42 = vld [vmem:[#allocation35 + $0x28] sm:$0xff] }
 0xf6f   :  { %6442 = vmatpush.msra.mxu0 %v6413_v42 }
 0xf71   :  { %6443 = vmatpush.msra.mxu0 %v6412_v58 }
 0xf72   :  { %v5883_v0 = vpop.f32.mrf.mxu1 }
 0xf73   :  { %6444 = vmatpush.msra.mxu0 %v6411_v32  ;;  %v5891_v1 = vadd.f32 %v5883_v0, %v5805_v49 }
 0xf75   :  { %v5919_v39 = vpop.f32.mrf.mxu0  ;;  %6445 = vmatpush.msra.mxu0 %v6410_v2 }
 0xf76   :  { %9893 = vmatmul.msk.f32.gmra.mxu2 %vm3762_vm7, %v5919_v39 }
 0xf77   :  { %6446 = vmatpush.msra.mxu0 %v6409_v20 }
 0xf79   :  { %6447 = vmatpush.msra.mxu0 %v6408_v52 }
 0xf7a   :  { %v12765_v45 = vpop.f32.mrf.mxu1 }
 0xf7b   :  { %v5892_v38 = vadd.f32 %v12765_v45, %v5808_v12 }
 0xf7d   :  { %v6076_v18 = vpop.f32.mrf.mxu0 }
 0xf7e   :  { %9906 = vmatmul.msk.f32.vlgmr.msra.gmra.mxu2 %vm3762_vm7, %v6076_v18 }
 0xf7f   :  { %9938 = vmatpush.msk.msra.mxu2 %vm759_vm0, %v6402_v54 }
 0xf82   :  { %v6043_v7 = vpop.f32.mrf.mxu1 }
 0xf85   :  { %v6079_v6 = vpop.f32.mrf.mxu0 }
 0xf86   :  { %9907 = vmatmul.msk.f32.gmra.mxu2 %vm3762_vm7, %v6079_v6 }
 0xf8a   :  { %v6046_v25 = vpop.f32.mrf.mxu1 }
 0xf8d   :  { %v6082_v59 = vpop.f32.mrf.mxu0 }
 0xf8e   :  { %9908 = vmatmul.msk.f32.gmra.mxu2 %vm3762_vm7, %v6082_v59 }
 0xf92   :  { %v6049_v16 = vpop.f32.mrf.mxu1 }
 0xf95   :  { %v6085_v55 = vpop.f32.mrf.mxu0 }
 0xf96   :  { %9909 = vmatmul.msk.f32.gmra.mxu2 %vm3762_vm7, %v6085_v55  ;;  %v10241_v55 = vld [vmem:[#allocation28] ss:$0 sm:$0xff] }
 0xf9a   :  { %v12773_v36 = vpop.f32.mrf.mxu1 }
 0xf9d   :  { %v6242_v33 = vpop.f32.mrf.mxu0 }
 0xf9e   :  { %9922 = vmatmul.msk.f32.vlgmr.msrb.gmra.mxu2 %vm3762_vm7, %v6242_v33 }
 0xfa2   :  { %v6209_v43 = vpop.f32.mrf.mxu1 }
 0xfa5   :  { %v6245_v14 = vpop.f32.mrf.mxu0 }
 0xfa6   :  { %9923 = vmatmul.msk.f32.gmra.mxu2 %vm3762_vm7, %v6245_v14 }
 0xfaa   :  { %v6212_v53 = vpop.f32.mrf.mxu1 }
 0xfad   :  { %v6248_v47 = vpop.f32.mrf.mxu0 }
 0xfae   :  { %9924 = vmatmul.msk.f32.gmra.mxu2 %vm3762_vm7, %v6248_v47 }
 0xfb2   :  { %v6215_v39 = vpop.f32.mrf.mxu1 }
 0xfb5   :  { %v6251_v35 = vpop.f32.mrf.mxu0 }
 0xfb6   :  { %9925 = vmatmul.msk.f32.gmra.mxu2 %vm3762_vm7, %v6251_v35 }
 0xfba   :  { %v6218_v10 = vpop.f32.mrf.mxu1 }
 0xfbe   :  { %9939 = vmatmul.msk.f32.vlgmr.msra.gmra.mxu2 %vm746_vm1, %v12742_v34 }
 0xfc2   :  { %v6375_v26 = vpop.f32.mrf.mxu1 }
 0xfc6   :  { %9940 = vmatmul.msk.f32.gmra.mxu2 %vm746_vm1, %v12748_v40 }
 0xfca   :  { %v6378_v60 = vpop.f32.mrf.mxu1 }
 0xfce   :  { %9941 = vmatmul.msk.f32.gmra.mxu2 %vm746_vm1, %v12753_v51 }
 0xfd6   :  { %9942 = vmatmul.msk.f32.gmra.mxu2 %vm746_vm1, %v12758_v50 }
 0xfe1   :  { %v5960_v44 = vpop.f32.mrf.mxu2 }
 0xfe2   :  { %v5972_v4 = vadd.f32 %v5960_v44, %v5889_v11 }
 0xfe4   :  { %v6055_v57 = vadd.f32 %v6043_v7, %v5972_v4 }
 0xfe9   :  { %v5963_v24 = vpop.f32.mrf.mxu2 }
 0xfea   :  { %v5973_v15 = vadd.f32 %v5963_v24, %v5890_v56  ;;  %v13631_v24 = vld [vmem:[#allocation79_spill] sm:$0xff] }
 0xfec   :  { %v6056_v59 = vadd.f32 %v6046_v25, %v5973_v15  ;;  %v6381_v25 = vpop.f32.mrf.mxu1 }
 0xff1   :  { %v5966_v8 = vpop.f32.mrf.mxu2 }
 0xff2   :  { %v5974_v33 = vadd.f32 %v5966_v8, %v5891_v1 }
 0xff4   :  { %v6057_v35 = vadd.f32 %v6049_v16, %v5974_v33  ;;  %v6663_v33 = vld [vmem:[#allocation29 + $0x68] sm:$0xff] }
 0xff9   :  { %v5969_v37 = vpop.f32.mrf.mxu2 }
 0xffa   :  { %v5975_v7 = vadd.f32 %v5969_v37, %v5892_v38 }
 0xffc   :  { %v6058_v23 = vadd.f32 %v12773_v36, %v5975_v7  ;;  %v6660_v7 = vld [vmem:[#allocation29 + $0x50] sm:$0xff] }
0x1001   :  { %v6126_v27 = vpop.f32.mrf.mxu2 }
0x1002   :  { %v6138_v62 = vadd.f32 %v6126_v27, %v6055_v57  ;;  %v6384_v27 = vpop.f32.mrf.mxu1 }
0x1004   :  { %v6221_v6 = vadd.f32 %v6209_v43, %v6138_v62 }
0x1009   :  { %v6129_v5 = vpop.f32.mrf.mxu2 }
0x100a   :  { %v6139_v54 = vadd.f32 %v6129_v5, %v6056_v59 }
0x100c   :  { %v6222_v30 = vadd.f32 %v6212_v53, %v6139_v54  ;;  %v13632_v53 = vld [vmem:[#allocation81_spill] sm:$0xff] }
0x100d   :  { %v6664_v54 = vld [vmem:[#allocation29 + $0x70] sm:$0xff] }
0x1011   :  { %v6132_v22 = vpop.f32.mrf.mxu2 }
0x1012   :  { %v6140_v0 = vadd.f32 %v6132_v22, %v6057_v35 }
0x1014   :  { %v6223_v44 = vadd.f32 %v6215_v39, %v6140_v0 }
0x1019   :  { %v6135_v18 = vpop.f32.mrf.mxu2 }
0x101a   :  { %v6141_v3 = vadd.f32 %v6135_v18, %v6058_v23  ;;  %v13633_v18 = vld [vmem:[#allocation82_spill] sm:$0xff] }
0x101b   :  { %v6658_v23 = vld [vmem:[#allocation29 + $0x40] sm:$0xff] }
0x101c   :  { %v6224_v45 = vadd.f32 %v6218_v10, %v6141_v3 }
0x1021   :  { %v6292_v21 = vpop.f32.mrf.mxu2 }
0x1022   :  { %v6304_v9 = vadd.f32 %v6292_v21, %v6221_v6 }
0x1024   :  { %v6387_v31 = vadd.f32 %v6375_v26, %v6304_v9  ;;  %v6665_v9 = vld [vmem:[#allocation29 + $0x78] sm:$0xff] }
0x1025   :  { %6686 = vmatpush.msrb.mxu2 %v6665_v9 }
0x1026   :  { %v6394_v13 = vadd.f32 %v10241_v55, %v6387_v31 }
0x1027   :  { %6687 = vmatpush.msrb.mxu2 %v6664_v54  ;;  %v12860_v54 = vld [vmem:[#allocation7 + $0x8] sm:$0xff] }
0x1028   :  { %v12779_v14 = vadd.f32 %v6394_v13, %v13630_v19  ;;  %v6662_v19 = vld [vmem:[#allocation29 + $0x60] sm:$0xff] }
0x1029   :  { %v6295_v47 = vpop.f32.mrf.mxu2  ;;  %6688 = vmatpush.msrb.mxu2 %v6663_v33  ;;  %v12875_v33 = vld [vmem:[#allocation7 + $0x30] sm:$0xff] }
0x102a   :  { %v6305_v29 = vadd.f32 %v6295_v47, %v6222_v30  ;;  %9934 = vmatmul.msk.f32.vlgmr.msra.gmra.mxu0 %vm3762_vm7, %v12779_v14  ;;  %v6475_v36 = vmul.f32 %v12779_v14, %v12779_v14  ;;  %v6461_v5 = vsel %vm3762_vm7, %v12779_v14, 0.0 }
0x102b   :  { %6689 = vmatpush.msrb.mxu2 %v6662_v19  ;;  %v12887_v19 = vld [vmem:[#allocation7 + $0x40] sm:$0xff] }
0x102c   :  { %v6388_v17 = vadd.f32 %v6378_v60, %v6305_v29  ;;  %v6479_v11 = vsel %vm3762_vm7, %v6475_v36, 0.0  ;;  %v6661_v29 = vld [vmem:[#allocation29 + $0x58] sm:$0xff] }
0x102d   :  { %6690 = vmatpush.msrb.mxu2 %v6661_v29  ;;  %v6625_v29 = vld [vmem:[#allocation29 + $0x28] sm:$0xff] }
0x102e   :  { %v6395_v41 = vadd.f32 %v10241_v55, %v6388_v17  ;;  %v6571_v17 = vpop.f32.mrf.mxu3 }
0x102f   :  { %6691 = vmatpush.msrb.mxu2 %v6660_v7  ;;  %v12899_v7 = vld [vmem:[#allocation7 + $0x50] sm:$0xff] }
0x1030   :  { %v12786_v8 = vadd.f32 %v6395_v41, %v13631_v24 }
0x1031   :  { %v6298_v43 = vpop.f32.mrf.mxu2 }
0x1032   :  { %v6306_v46 = vadd.f32 %v6298_v43, %v6223_v44  ;;  %9935 = vmatmul.msk.f32.gmra.mxu0 %vm3762_vm7, %v12786_v8  ;;  %v6476_v58 = vmul.f32 %v12786_v8, %v12786_v8  ;;  %v6462_v2 = vsel %vm3762_vm7, %v12786_v8, 0.0  ;;  %v6659_v44 = vld [vmem:[#allocation29 + $0x48] sm:$0xff] }
0x1033   :  { %v6463_v28 = vadd.f32 %v6462_v2, %v6461_v5  ;;  %6692 = vmatpush.msrb.mxu2 %v6659_v44  ;;  %v12907_v44 = vld [vmem:[#allocation7 + $0x80] sm:$0xff] }
0x1034   :  { %v6389_v16 = vadd.f32 %v6381_v25, %v6306_v46  ;;  %v6480_v52 = vsel %vm3762_vm7, %v6476_v58, 0.0 }
0x1035   :  { %v6481_v57 = vadd.f32 %v6480_v52, %v6479_v11  ;;  %6693 = vmatpush.msrb.mxu2 %v6658_v23 }
0x1036   :  { %v6396_v61 = vadd.f32 %v10241_v55, %v6389_v16 }
0x1038   :  { %v12792_v42 = vadd.f32 %v6396_v61, %v13632_v53 }
0x1039   :  { %v6301_v37 = vpop.f32.mrf.mxu2 }
0x103a   :  { %v6307_v32 = vadd.f32 %v6301_v37, %v6224_v45  ;;  %9936 = vmatmul.msk.f32.gmra.mxu0 %vm3762_vm7, %v12792_v42  ;;  %v6477_v39 = vmul.f32 %v12792_v42, %v12792_v42  ;;  %v6464_v22 = vsel %vm3762_vm7, %v12792_v42, 0.0  ;;  %v6574_v45 = vpop.f32.mrf.mxu3 }
0x103b   :  { %v6465_v26 = vadd.f32 %v6464_v22, %v6463_v28 }
0x103c   :  { %v6390_v20 = vadd.f32 %v6384_v27, %v6307_v32  ;;  %v6482_v4 = vsel %vm3762_vm7, %v6477_v39, 0.0 }
0x103d   :  { %v6483_v15 = vadd.f32 %v6482_v4, %v6481_v57 }
0x103e   :  { %v6397_v10 = vadd.f32 %v10241_v55, %v6390_v20 }
0x1040   :  { %v12812_v48 = vadd.f32 %v6397_v10, %v13633_v18 }
0x1041   :  { %v6535_v35 = vpop.f32.mrf.mxu2 }
0x1042   :  { %v6466_v56 = vsel %vm3762_vm7, %v12812_v48, 0.0  ;;  %v6478_v62 = vmul.f32 %v12812_v48, %v12812_v48  ;;  %9937 = vmatmul.msk.f32.gmra.mxu0 %vm3762_vm7, %v12812_v48  ;;  %v6577_v32 = vpop.f32.mrf.mxu3 }
0x1043   :  { %v6467_v6 = vadd.f32 %v6466_v56, %v6465_v26 }
0x1044   :  { %v6484_v21 = vsel %vm3762_vm7, %v6478_v62, 0.0 }
0x1045   :  { %v6468_v49 = vrot.slane %v6467_v6, 4  ;;  %v6485_v59 = vadd.f32 %v6484_v21, %v6483_v15 }
0x1047   :  { %v6469_v55 = vadd.f32 %v6468_v49, %v6467_v6  ;;  %v6486_v1 = vrot.slane %v6485_v59, 4 }
0x1049   :  { %v6470_v31 = vrot.slane %v6469_v55, 2  ;;  %v6487_v60 = vadd.f32 %v6486_v1, %v6485_v59  ;;  %v6538_v16 = vpop.f32.mrf.mxu2  ;;  %v12851_v1 = vld [vmem:[#allocation7 + $0x20] sm:$0xff] }
0x104a   :  { %v6580_v26 = vpop.f32.mrf.mxu3 }
0x104b   :  { %v6471_v13 = vadd.f32 %v6470_v31, %v6469_v55  ;;  %v6488_v30 = vrot.slane %v6487_v60, 2  ;;  %v12847_v55 = vld [vmem:[#allocation7] sm:$0xff]  ;;  %v12864_v31 = vld [vmem:[#allocation7 + $0x28] sm:$0xff] }
0x104d   :  { %v6472_v47 = vrot.slane %v6471_v13, 1  ;;  %v6489_v12 = vadd.f32 %v6488_v30, %v6487_v60  ;;  %v12871_v60 = vld [vmem:[#allocation7 + $0x10] sm:$0xff]  ;;  %v12883_v30 = vld [vmem:[#allocation7 + $0x38] sm:$0xff] }
0x104f   :  { %v6473_v38 = vadd.f32 %v6472_v47, %v6471_v13  ;;  %v6490_v0 = vrot.slane %v6489_v12, 1  ;;  %v12879_v13 = vld [vmem:[#allocation7 + $0x18] sm:$0xff] }
0x1050   :  { %v6627_v47 = vld [vmem:[#allocation29 + $0x38] sm:$0xff] }
0x1051   :  { %v6474_v41 = vmul.f32 %v6473_v38, %v11757_v63  ;;  %v6491_v25 = vadd.f32 %v6490_v0, %v6489_v12  ;;  %v6541_v27 = vpop.f32.mrf.mxu2  ;;  %v6626_v12 = vld [vmem:[#allocation29 + $0x30] sm:$0xff]  ;;  %6727 = vmatpush.msrb.mxu3 %v6627_v47  ;;  %v6624_v38 = vld [vmem:[#allocation29 + $0x20] sm:$0xff]  ;;  %v6623_v0 = vld [vmem:[#allocation29 + $0x18] sm:$0xff] }
0x1052   :  { %v12989_v47 = vld [vmem:[#allocation7 + $0x68] sm:$0xff] }
0x1053   :  { %v6492_v24 = vmul.f32 %v6491_v25, %v11757_v63  ;;  %v6493_v43 = vmul.f32 %v6474_v41, %v6474_v41  ;;  %v6496_v20 = vsub.f32 %v12779_v14, %v6474_v41  ;;  %v6497_v5 = vsub.f32 %v12786_v8, %v6474_v41  ;;  %6728 = vmatpush.msrb.mxu3 %v6626_v12  ;;  %v12903_v25 = vld [vmem:[#allocation7 + $0x58] sm:$0xff] }
0x1054   :  { %v6498_v52 = vsub.f32 %v12792_v42, %v6474_v41  ;;  %v6499_v22 = vsub.f32 %v12812_v48, %v6474_v41  ;;  %v6621_v41 = vld [vmem:[#allocation29 + $0x8] sm:$0xff]  ;;  %13646 = vst [vmem:[#allocation86_spill] sm:$0xff] %v12989_v47 }
0x1055   :  { %v6494_v46 = vsub.f32 %v6492_v24, %v6493_v43  ;;  %6729 = vmatpush.msrb.mxu3 %v6625_v29  ;;  %v12915_v24 = vld [vmem:[#allocation7 + $0x88] sm:$0xff]  ;;  %v12919_v43 = vld [vmem:[#allocation7 + $0x90] sm:$0xff] }
0x1056   :  { %v12994_v29 = vld [vmem:[#allocation7 + $0x70] sm:$0xff] }
0x1057   :  { %v6495_v3 = vmax.f32 %v6494_v46, 0.0  ;;  %6730 = vmatpush.msrb.mxu3 %v6624_v38  ;;  %v12925_v46 = vld [vmem:[#allocation7 + $0x98] sm:$0xff]  ;;  %13647 = vst [vmem:[#allocation88_spill] sm:$0xff] %v12994_v29  ;;  %v13011_v38 = vld [vmem:[#allocation7 + $0xb0] sm:$0xff] }
0x1058   :  { %13651 = vst [vmem:[#allocation96_spill] sm:$0xff] %v13011_v38 }
0x1059   :  { %v6500_v61 = vadd.f32 1e-05, %v6495_v3  ;;  %v6544_v28 = vpop.f32.mrf.mxu2  ;;  %6731 = vmatpush.msrb.mxu3 %v6623_v0  ;;  %v6620_v3 = vld [vmem:[#allocation29] sm:$0xff] }
0x105a   :  { %v13015_v0 = vld [vmem:[#allocation7 + $0xb8] sm:$0xff] }
0x105b   :  { %10255 = vrsqrt.f32 %v6500_v61  ;;  %vm6507_vm5 = vweird.f32 %v6500_v61  ;;  %13652 = vst [vmem:[#allocation98_spill] sm:$0xff] %v13015_v0 }
0x1061   :  { %v10256_v53 = vpop.eup %10255 }
0x1062   :  { %v6502_v37 = vmul.f32 %v10256_v53, %v6500_v61  ;;  %vm6508_vm4 = vweird.f32 %v10256_v53 }
0x1063   :  { %vm6509_vm6 = vmor %vm6507_vm5, %vm6508_vm4 }
0x1064   :  { %v6503_v58 = vmul.f32 %v10256_v53, %v6502_v37  ;;  %v6785_v37 = vld [vmem:[#allocation29 + $0xb8] sm:$0xff] }
0x1066   :  { %v6504_v36 = vmul.f32 0.5, %v6503_v58  ;;  %v6783_v58 = vld [vmem:[#allocation29 + $0xa8] sm:$0xff] }
0x1068   :  { %v6505_v2 = vsub.f32 1.5, %v6504_v36 }
0x106a   :  { %v6506_v39 = vmul.f32 %v10256_v53, %v6505_v2  ;;  %v6782_v2 = vld [vmem:[#allocation29 + $0xa0] sm:$0xff] }
0x106c   :  { %v6510_v10 = vsel %vm6509_vm6, %v10256_v53, %v6506_v39  ;;  %v6781_v39 = vld [vmem:[#allocation29 + $0x98] sm:$0xff] }
0x106d   :  { %v6511_v11 = vmul.f32 %v6510_v10, %v6496_v20  ;;  %v6512_v4 = vmul.f32 %v6510_v10, %v6497_v5  ;;  %v6513_v18 = vmul.f32 %v6510_v10, %v6498_v52  ;;  %v6514_v57 = vmul.f32 %v6510_v10, %v6499_v22  ;;  %v6780_v20 = vld [vmem:[#allocation29 + $0x90] sm:$0xff]  ;;  %v12947_v5 = vld [vmem:[#allocation7 + $0xd8] sm:$0xff]  ;;  %v6779_v52 = vld [vmem:[#allocation29 + $0x88] sm:$0xff] }
0x106e   :  { %13640 = vst [vmem:[#allocation91_spill] sm:$0xff] %v12947_v5 }
0x106f   :  { %v6548_v56 = vmul.f32 %v6538_v16, %v6512_v4  ;;  %v6549_v62 = vmul.f32 %v6541_v27, %v6513_v18  ;;  %v6550_v15 = vmul.f32 %v6544_v28, %v6514_v57  ;;  %v6547_v6 = vmul.f32 %v6535_v35, %v6511_v11  ;;  %v12895_v35 = vld [vmem:[#allocation7 + $0x48] sm:$0xff]  ;;  %v12929_v16 = vld [vmem:[#allocation7 + $0xc0] sm:$0xff] }
0x1070   :  { %v6784_v27 = vld [vmem:[#allocation29 + $0xb0] sm:$0xff]  ;;  %v6778_v28 = vld [vmem:[#allocation29 + $0x80] sm:$0xff] }
0x1071   :  { %v6585_v21 = vadd.f32 %v6577_v32, %v6549_v62  ;;  %v6586_v14 = vadd.f32 %v6580_v26, %v6550_v15  ;;  %v6584_v49 = vadd.f32 %v6574_v45, %v6548_v56  ;;  %v6583_v8 = vadd.f32 %v6571_v17, %v6547_v6  ;;  %v6622_v17 = vld [vmem:[#allocation29 + $0x10] sm:$0xff]  ;;  %v12954_v11 = vld [vmem:[#allocation7 + $0x100] sm:$0xff] }
0x1072   :  { %6732 = vmatpush.msrb.mxu3 %v6622_v17  ;;  %v12935_v45 = vld [vmem:[#allocation7 + $0xc8] sm:$0xff]  ;;  %v12941_v32 = vld [vmem:[#allocation7 + $0xd0] sm:$0xff]  ;;  %13641 = vst [vmem:[#allocation93_spill] sm:$0xff] %v12954_v11  ;;  %v13019_v17 = vld [vmem:[#allocation7 + $0xe0] sm:$0xff] }
0x1073   :  { %v12827_v59 = vmax.f32 %v6586_v14, 0.0  ;;  %v12829_v42 = vmax.f32 %v6585_v21, 0.0  ;;  %v12834_v48 = vmax.f32 %v6584_v49, 0.0  ;;  %v12839_v9 = vmax.f32 %v6583_v8, 0.0  ;;  %13636 = vst [vmem:[#allocation83_spill] sm:$0xff] %v12935_v45  ;;  %v12963_v57 = vld [vmem:[#allocation7 + $0x108] sm:$0xff] }
0x1074   :  { %6733 = vmatpush.msrb.mxu3 %v6621_v41  ;;  %13638 = vst [vmem:[#allocation87_spill] sm:$0xff] %v12941_v32  ;;  %v12969_v62 = vld [vmem:[#allocation7 + $0x110] sm:$0xff]  ;;  %v12975_v21 = vld [vmem:[#allocation7 + $0x118] sm:$0xff]  ;;  %v12980_v49 = vld [vmem:[#allocation7 + $0x60] sm:$0xff] }
0x1075   :  { %6603 = vmatpush.msrb.mxu1 %v12827_v59  ;;  %6640 = vmatpush.msrb.mxu0 %v12827_v59  ;;  %13642 = vst [vmem:[#allocation95_spill] sm:$0xff] %v12963_v57  ;;  %v13023_v41 = vld [vmem:[#allocation7 + $0xe8] sm:$0xff] }
0x1076   :  { %6843 = vmatpush.msra.mxu2 %v12827_v59  ;;  %6734 = vmatpush.msrb.mxu3 %v6620_v3  ;;  %13643 = vst [vmem:[#allocation97_spill] sm:$0xff] %v12969_v62  ;;  %v13027_v3 = vld [vmem:[#allocation7 + $0xf0] sm:$0xff] }
0x1077   :  { %6604 = vmatpush.msrb.mxu1 %v12829_v42  ;;  %6641 = vmatpush.msrb.mxu0 %v12829_v42  ;;  %13644 = vst [vmem:[#allocation99_spill] sm:$0xff] %v12975_v21 }
0x1078   :  { %6844 = vmatpush.msra.mxu2 %v12829_v42  ;;  %13645 = vst [vmem:[#allocation85_spill] sm:$0xff] %v12980_v49 }
0x1079   :  { %6605 = vmatpush.msrb.mxu1 %v12834_v48  ;;  %6642 = vmatpush.msrb.mxu0 %v12834_v48  ;;  %13653 = vst [vmem:[#allocation100_spill] sm:$0xff] %v13019_v17 }
0x107a   :  { %6845 = vmatpush.msra.mxu2 %v12834_v48  ;;  %13654 = vst [vmem:[#allocation101_spill] sm:$0xff] %v13023_v41 }
0x107b   :  { %6606 = vmatpush.msrb.mxu1 %v12839_v9  ;;  %6643 = vmatpush.msrb.mxu0 %v12839_v9  ;;  %13655 = vst [vmem:[#allocation102_spill] sm:$0xff] %v13027_v3 }
0x107c   :  { %6846 = vmatpush.msra.mxu2 %v12839_v9  ;;  %9948 = vmatmul.msk.f32.vlgmr.msrb.gmra.mxu1 %vm2754_vm2, %v12847_v55 }
0x107d   :  { %9952 = vmatmul.msk.f32.vlgmr.msrb.gmra.mxu0 %vm2754_vm2, %v12851_v1  ;;  %6760 = vmatpush.msra.mxu1 %v12827_v59 }
0x107e   :  { %6806 = vmatpush.msra.mxu0 %v6785_v37  ;;  %v6868_v37 = vld [vmem:[#allocation29 + $0xf8] sm:$0xff] }
0x107f   :  { %6761 = vmatpush.msra.mxu1 %v12829_v42  ;;  %6889 = vmatpush.msra.mxu3 %v6868_v37 }
0x1080   :  { %6807 = vmatpush.msra.mxu0 %v6784_v27  ;;  %v6867_v27 = vld [vmem:[#allocation29 + $0xf0] sm:$0xff] }
0x1081   :  { %6762 = vmatpush.msra.mxu1 %v12834_v48  ;;  %6890 = vmatpush.msra.mxu3 %v6867_v27 }
0x1082   :  { %6808 = vmatpush.msra.mxu0 %v6783_v58  ;;  %v6866_v58 = vld [vmem:[#allocation29 + $0xe8] sm:$0xff] }
0x1083   :  { %6763 = vmatpush.msra.mxu1 %v12839_v9  ;;  %6891 = vmatpush.msra.mxu3 %v6866_v58  ;;  %v7034_v58 = vld [vmem:[#allocation29 + $0x178] sm:$0xff] }
0x1084   :  { %9949 = vmatmul.msk.f32.gmra.mxu1 %vm2754_vm2, %v12860_v54  ;;  %6809 = vmatpush.msra.mxu0 %v6782_v2  ;;  %v13031_v2 = vld [vmem:[#allocation7 + $0xf8] sm:$0xff] }
0x1085   :  { %6926 = vmatpush.msrb.mxu1 %v12827_v59  ;;  %9953 = vmatmul.msk.f32.gmra.mxu0 %vm2754_vm2, %v12864_v31  ;;  %13656 = vst [vmem:[#allocation103_spill] sm:$0xff] %v13031_v2 }
0x1086   :  { %6810 = vmatpush.msra.mxu0 %v6781_v39  ;;  %v6865_v39 = vld [vmem:[#allocation29 + $0xe0] sm:$0xff] }
0x1087   :  { %6927 = vmatpush.msrb.mxu1 %v12829_v42  ;;  %6892 = vmatpush.msra.mxu3 %v6865_v39  ;;  %v7033_v39 = vld [vmem:[#allocation29 + $0x170] sm:$0xff] }
0x1088   :  { %6811 = vmatpush.msra.mxu0 %v6780_v20  ;;  %v6864_v20 = vld [vmem:[#allocation29 + $0xd8] sm:$0xff] }
0x1089   :  { %6928 = vmatpush.msrb.mxu1 %v12834_v48  ;;  %6893 = vmatpush.msra.mxu3 %v6864_v20  ;;  %v7032_v20 = vld [vmem:[#allocation29 + $0x168] sm:$0xff] }
0x108a   :  { %6812 = vmatpush.msra.mxu0 %v6779_v52  ;;  %v6951_v52 = vld [vmem:[#allocation29 + $0x138] sm:$0xff] }
0x108b   :  { %6929 = vmatpush.msrb.mxu1 %v12839_v9 }
0x108c   :  { %9950 = vmatmul.msk.f32.gmra.mxu1 %vm2754_vm2, %v12871_v60  ;;  %6813 = vmatpush.msra.mxu0 %v6778_v28  ;;  %v6862_v28 = vld [vmem:[#allocation29 + $0xc8] sm:$0xff] }
0x108d   :  { %9954 = vmatmul.msk.f32.gmra.mxu0 %vm2754_vm2, %v12875_v33 }
0x108e   :  { %6972 = vmatpush.msrb.mxu0 %v6951_v52 }
0x1094   :  { %9951 = vmatmul.msk.f32.gmra.mxu1 %vm2754_vm2, %v12879_v13 }
0x1095   :  { %9955 = vmatmul.msk.f32.gmra.mxu0 %vm2754_vm2, %v12883_v30 }
0x109c   :  { %9964 = vmatmul.msk.f32.vlgmr.msra.gmra.mxu1 %vm2754_vm2, %v12887_v19 }
0x109d   :  { %7092 = vmatpush.msra.mxu1 %v12827_v59 }
0x109f   :  { %7093 = vmatpush.msra.mxu1 %v12829_v42 }
0x10a1   :  { %7094 = vmatpush.msra.mxu1 %v12834_v48 }
0x10a3   :  { %7095 = vmatpush.msra.mxu1 %v12839_v9 }
0x10a4   :  { %9965 = vmatmul.msk.f32.gmra.mxu1 %vm2754_vm2, %v12895_v35 }
0x10a7   :  { %v12923_v23 = vpop.f32.mrf.mxu0 }
0x10a8   :  { %13634 = vst [vmem:[#allocation78_spill] sm:$0xff] %v12923_v23 }
0x10ac   :  { %9966 = vmatmul.msk.f32.gmra.mxu1 %vm2754_vm2, %v12899_v7 }
0x10af   :  { %v12933_v61 = vpop.f32.mrf.mxu0 }
0x10b0   :  { %13635 = vst [vmem:[#allocation77_spill] sm:$0xff] %v12933_v61 }
0x10b4   :  { %9967 = vmatmul.msk.f32.gmra.mxu1 %vm2754_vm2, %v12903_v25 }
0x10b7   :  { %v12939_v53 = vpop.f32.mrf.mxu0 }
0x10b8   :  { %13637 = vst [vmem:[#allocation84_spill] sm:$0xff] %v12939_v53 }
0x10bc   :  { %9980 = vmatmul.msk.f32.vlgmr.msrb.gmra.mxu1 %vm2754_vm2, %v12907_v44 }
0x10bd   :  { %7258 = vmatpush.msrb.mxu1 %v12827_v59 }
0x10bf   :  { %7259 = vmatpush.msrb.mxu1 %v12829_v42  ;;  %v12945_v36 = vpop.f32.mrf.mxu0 }
0x10c0   :  { %13639 = vst [vmem:[#allocation89_spill] sm:$0xff] %v12945_v36 }
0x10c1   :  { %7260 = vmatpush.msrb.mxu1 %v12834_v48 }
0x10c3   :  { %7261 = vmatpush.msrb.mxu1 %v12839_v9 }
0x10c4   :  { %9981 = vmatmul.msk.f32.gmra.mxu1 %vm2754_vm2, %v12915_v24 }
0x10cc   :  { %9982 = vmatmul.msk.f32.gmra.mxu1 %vm2754_vm2, %v12919_v43 }
0x10d4   :  { %9983 = vmatmul.msk.f32.gmra.mxu1 %vm2754_vm2, %v12925_v46 }
0x10dc   :  { %9996 = vmatmul.msk.f32.vlgmr.msra.gmra.mxu1 %vm2754_vm2, %v12929_v16 }
0x10e4   :  { %9997 = vmatmul.msk.f32.gmra.mxu1 %vm2754_vm2, %v12935_v45 }
0x10ec   :  { %9998 = vmatmul.msk.f32.gmra.mxu1 %vm2754_vm2, %v12941_v32 }
0x10f4   :  { %9999 = vmatmul.msk.f32.gmra.mxu1 %vm2754_vm2, %v12947_v5 }
0x10f9   :  { %v6608_v22 = vpop.f32.mrf.mxu1 }
0x10fa   :  { %v6645_v10 = vpop.f32.mrf.mxu0  ;;  %9960 = vmatmul.msk.f32.vlgmr.msrb.gmra.mxu3 %vm3762_vm7, %v6608_v22  ;;  %v6863_v22 = vld [vmem:[#allocation29 + $0xd0] sm:$0xff] }
0x10fb   :  { %9956 = vmatmul.msk.f32.vlgmr.msrb.gmra.mxu2 %vm3762_vm7, %v6645_v10  ;;  %v6950_v10 = vld [vmem:[#allocation29 + $0x130] sm:$0xff]  ;;  %6894 = vmatpush.msra.mxu3 %v6863_v22  ;;  %v7031_v22 = vld [vmem:[#allocation29 + $0x160] sm:$0xff] }
0x10fc   :  { %7009 = vmatpush.msrb.mxu2 %v12827_v59  ;;  %10012 = vmatmul.msk.f32.vlgmr.msrb.gmra.mxu1 %vm2754_vm2, %v12954_v11 }
0x10fd   :  { %6973 = vmatpush.msrb.mxu0 %v6950_v10  ;;  %6895 = vmatpush.msra.mxu3 %v6862_v28  ;;  %v7030_v28 = vld [vmem:[#allocation29 + $0x158] sm:$0xff] }
0x10fe   :  { %7010 = vmatpush.msrb.mxu2 %v12829_v42 }
0x1100   :  { %7011 = vmatpush.msrb.mxu2 %v12834_v48 }
0x1101   :  { %v6611_v4 = vpop.f32.mrf.mxu1 }
0x1102   :  { %7012 = vmatpush.msrb.mxu2 %v12839_v9  ;;  %v6648_v18 = vpop.f32.mrf.mxu0  ;;  %9961 = vmatmul.msk.f32.gmra.mxu3 %vm3762_vm7, %v6611_v4  ;;  %v6949_v4 = vld [vmem:[#allocation29 + $0x128] sm:$0xff] }
0x1103   :  { %9957 = vmatmul.msk.f32.gmra.mxu2 %vm3762_vm7, %v6648_v18  ;;  %6974 = vmatpush.msrb.mxu0 %v6949_v4  ;;  %v7117_v4 = vld [vmem:[#allocation29 + $0x1b8] sm:$0xff] }
0x1104   :  { %10013 = vmatmul.msk.f32.gmra.mxu1 %vm2754_vm2, %v12963_v57 }
0x1109   :  { %v6614_v26 = vpop.f32.mrf.mxu1 }
0x110a   :  { %v6651_v56 = vpop.f32.mrf.mxu0  ;;  %9962 = vmatmul.msk.f32.gmra.mxu3 %vm3762_vm7, %v6614_v26  ;;  %v6861_v26 = vld [vmem:[#allocation29 + $0xc0] sm:$0xff] }
0x110b   :  { %9958 = vmatmul.msk.f32.gmra.mxu2 %vm3762_vm7, %v6651_v56  ;;  %v6948_v56 = vld [vmem:[#allocation29 + $0x120] sm:$0xff]  ;;  %6896 = vmatpush.msra.mxu3 %v6861_v26  ;;  %v7029_v26 = vld [vmem:[#allocation29 + $0x150] sm:$0xff] }
0x110c   :  { %10014 = vmatmul.msk.f32.gmra.mxu1 %vm2754_vm2, %v12969_v62  ;;  %6975 = vmatpush.msrb.mxu0 %v6948_v56  ;;  %v7116_v56 = vld [vmem:[#allocation29 + $0x1b0] sm:$0xff] }
0x110d   :  { %7055 = vmatpush.msrb.mxu3 %v7034_v58  ;;  %v7113_v58 = vld [vmem:[#allocation29 + $0x198] sm:$0xff] }
0x110f   :  { %7056 = vmatpush.msrb.mxu3 %v7033_v39  ;;  %v7112_v39 = vld [vmem:[#allocation29 + $0x190] sm:$0xff] }
0x1111   :  { %v6617_v15 = vpop.f32.mrf.mxu1  ;;  %7057 = vmatpush.msrb.mxu3 %v7032_v20  ;;  %v7111_v20 = vld [vmem:[#allocation29 + $0x188] sm:$0xff] }
0x1112   :  { %v6654_v6 = vpop.f32.mrf.mxu0  ;;  %9963 = vmatmul.msk.f32.gmra.mxu3 %vm3762_vm7, %v6617_v15  ;;  %v6947_v15 = vld [vmem:[#allocation29 + $0x118] sm:$0xff] }
0x1113   :  { %9959 = vmatmul.msk.f32.gmra.mxu2 %vm3762_vm7, %v6654_v6  ;;  %6976 = vmatpush.msrb.mxu0 %v6947_v15  ;;  %v6946_v6 = vld [vmem:[#allocation29 + $0x110] sm:$0xff]  ;;  %v7028_v15 = vld [vmem:[#allocation29 + $0x148] sm:$0xff] }
0x1114   :  { %10015 = vmatmul.msk.f32.gmra.mxu1 %vm2754_vm2, %v12975_v21  ;;  %7058 = vmatpush.msrb.mxu3 %v7031_v22 }
0x1115   :  { %6977 = vmatpush.msrb.mxu0 %v6946_v6  ;;  %v7115_v6 = vld [vmem:[#allocation29 + $0x1a8] sm:$0xff] }
0x1116   :  { %7059 = vmatpush.msrb.mxu3 %v7030_v28 }
0x1118   :  { %7060 = vmatpush.msrb.mxu3 %v7029_v26 }
0x1119   :  { %v6765_v14 = vpop.f32.mrf.mxu1 }
0x111a   :  { %9968 = vmatmul.msk.f32.vlgmr.msra.gmra.mxu0 %vm3762_vm7, %v6765_v14  ;;  %v6945_v14 = vld [vmem:[#allocation29 + $0x108] sm:$0xff]  ;;  %7061 = vmatpush.msrb.mxu3 %v7028_v15  ;;  %v7199_v15 = vld [vmem:[#allocation29 + $0x1f0] sm:$0xff] }
0x111b   :  { %9972 = vmatmul.msk.f32.vlgmr.msra.gmra.mxu2 %vm2754_vm2, %v12980_v49  ;;  %6978 = vmatpush.msrb.mxu0 %v6945_v14 }
0x111c   :  { %7175 = vmatpush.msra.mxu2 %v12827_v59 }
0x111e   :  { %7176 = vmatpush.msra.mxu2 %v12829_v42  ;;  %v12999_v42 = vld [vmem:[#allocation7 + $0x78] sm:$0xff] }
0x111f   :  { %13648 = vst [vmem:[#allocation90_spill] sm:$0xff] %v12999_v42 }
0x1120   :  { %7177 = vmatpush.msra.mxu2 %v12834_v48  ;;  %v13003_v48 = vld [vmem:[#allocation7 + $0xa0] sm:$0xff] }
0x1121   :  { %v6768_v8 = vpop.f32.mrf.mxu1  ;;  %13649 = vst [vmem:[#allocation92_spill] sm:$0xff] %v13003_v48 }
0x1122   :  { %7178 = vmatpush.msra.mxu2 %v12839_v9  ;;  %9969 = vmatmul.msk.f32.gmra.mxu0 %vm3762_vm7, %v6768_v8  ;;  %v13007_v9 = vld [vmem:[#allocation7 + $0xa8] sm:$0xff] }
0x1123   :  { %9973 = vmatmul.msk.f32.gmra.mxu2 %vm2754_vm2, %v12989_v47  ;;  %13650 = vst [vmem:[#allocation94_spill] sm:$0xff] %v13007_v9 }
0x1129   :  { %v6771_v12 = vpop.f32.mrf.mxu1 }
0x112a   :  { %9970 = vmatmul.msk.f32.gmra.mxu0 %vm3762_vm7, %v6771_v12  ;;  %v6944_v12 = vld [vmem:[#allocation29 + $0x100] sm:$0xff] }
0x112b   :  { %9974 = vmatmul.msk.f32.gmra.mxu2 %vm2754_vm2, %v12994_v29  ;;  %6979 = vmatpush.msrb.mxu0 %v6944_v12  ;;  %v7027_v12 = vld [vmem:[#allocation29 + $0x140] sm:$0xff] }
0x112c   :  { %7062 = vmatpush.msrb.mxu3 %v7027_v12  ;;  %v7197_v12 = vld [vmem:[#allocation29 + $0x1e0] sm:$0xff] }
0x112d   :  { %7138 = vmatpush.msra.mxu0 %v7117_v4 }
0x112f   :  { %7139 = vmatpush.msra.mxu0 %v7116_v56  ;;  %v7200_v56 = vld [vmem:[#allocation29 + $0x1f8] sm:$0xff] }
0x1131   :  { %v6774_v59 = vpop.f32.mrf.mxu1  ;;  %7140 = vmatpush.msra.mxu0 %v7115_v6  ;;  %v7198_v6 = vld [vmem:[#allocation29 + $0x1e8] sm:$0xff] }
0x1132   :  { %9971 = vmatmul.msk.f32.gmra.mxu0 %vm3762_vm7, %v6774_v59 }
0x1133   :  { %9975 = vmatmul.msk.f32.gmra.mxu2 %vm2754_vm2, %v12999_v42 }
0x1139   :  { %v6931_v59 = vpop.f32.mrf.mxu1 }
0x113a   :  { %9984 = vmatmul.msk.f32.vlgmr.msrb.gmra.mxu0 %vm3762_vm7, %v6931_v59  ;;  %v7114_v59 = vld [vmem:[#allocation29 + $0x1a0] sm:$0xff] }
0x113b   :  { %9988 = vmatmul.msk.f32.vlgmr.msrb.gmra.mxu2 %vm2754_vm2, %v13003_v48  ;;  %7141 = vmatpush.msra.mxu0 %v7114_v59 }
0x113d   :  { %7142 = vmatpush.msra.mxu0 %v7113_v58  ;;  %v7283_v58 = vld [vmem:[#allocation29 + $0x238] sm:$0xff] }
0x113f   :  { %7143 = vmatpush.msra.mxu0 %v7112_v39  ;;  %v7282_v39 = vld [vmem:[#allocation29 + $0x230] sm:$0xff] }
0x1141   :  { %v6934_v27 = vpop.f32.mrf.mxu1  ;;  %7144 = vmatpush.msra.mxu0 %v7111_v20  ;;  %v7195_v20 = vld [vmem:[#allocation29 + $0x1d0] sm:$0xff] }
0x1142   :  { %9985 = vmatmul.msk.f32.gmra.mxu0 %vm3762_vm7, %v6934_v27 }
0x1143   :  { %9989 = vmatmul.msk.f32.gmra.mxu2 %vm2754_vm2, %v13007_v9 }
0x1149   :  { %v6937_v10 = vpop.f32.mrf.mxu1 }
0x114a   :  { %9986 = vmatmul.msk.f32.gmra.mxu0 %vm3762_vm7, %v6937_v10  ;;  %v7110_v10 = vld [vmem:[#allocation29 + $0x180] sm:$0xff] }
0x114b   :  { %9990 = vmatmul.msk.f32.gmra.mxu2 %vm2754_vm2, %v13011_v38  ;;  %7145 = vmatpush.msra.mxu0 %v7110_v10  ;;  %v7194_v10 = vld [vmem:[#allocation29 + $0x1c8] sm:$0xff] }
0x114d   :  { %7304 = vmatpush.msrb.mxu0 %v7283_v58 }
0x114f   :  { %7305 = vmatpush.msrb.mxu0 %v7282_v39 }
0x1151   :  { %v6940_v27 = vpop.f32.mrf.mxu1 }
0x1152   :  { %9987 = vmatmul.msk.f32.gmra.mxu0 %vm3762_vm7, %v6940_v27  ;;  %v7196_v27 = vld [vmem:[#allocation29 + $0x1d8] sm:$0xff] }
0x1153   :  { %9991 = vmatmul.msk.f32.gmra.mxu2 %vm2754_vm2, %v13015_v0 }
0x1159   :  { %v7097_v28 = vpop.f32.mrf.mxu1 }
0x115a   :  { %10000 = vmatmul.msk.f32.vlgmr.msra.gmra.mxu0 %vm3762_vm7, %v7097_v28 }
0x115b   :  { %10004 = vmatmul.msk.f32.vlgmr.msra.gmra.mxu2 %vm2754_vm2, %v13019_v17 }
0x1161   :  { %v7100_v26 = vpop.f32.mrf.mxu1 }
0x1162   :  { %10001 = vmatmul.msk.f32.gmra.mxu0 %vm3762_vm7, %v7100_v26  ;;  %v7280_v26 = vld [vmem:[#allocation29 + $0x220] sm:$0xff] }
0x1163   :  { %10005 = vmatmul.msk.f32.gmra.mxu2 %vm2754_vm2, %v13023_v41 }
0x1169   :  { %v7103_v59 = vpop.f32.mrf.mxu1 }
0x116a   :  { %10002 = vmatmul.msk.f32.gmra.mxu0 %vm3762_vm7, %v7103_v59  ;;  %v7276_v59 = vld [vmem:[#allocation29 + $0x200] sm:$0xff] }
0x116b   :  { %10006 = vmatmul.msk.f32.gmra.mxu2 %vm2754_vm2, %v13027_v3 }
0x1173   :  { %10007 = vmatmul.msk.f32.gmra.mxu2 %vm2754_vm2, %v13031_v2 }
0x117e   :  { %v13035_v18 = vpop.f32.mrf.mxu2 }
0x1186   :  { %v13037_v8 = vpop.f32.mrf.mxu2 }
0x118e   :  { %v13040_v37 = vpop.f32.mrf.mxu2 }
0x1196   :  { %v13043_v52 = vpop.f32.mrf.mxu2 }
0x119e   :  { %v6848_v14 = vpop.f32.mrf.mxu2 }
0x119f   :  { %9976 = vmatmul.msk.f32.vlgmr.msra.gmra.mxu3 %vm3762_vm7, %v6848_v14 }
0x11a0   :  { %7221 = vmatpush.msra.mxu3 %v7200_v56  ;;  %v7106_v56 = vpop.f32.mrf.mxu1 }
0x11a1   :  { %10003 = vmatmul.msk.f32.gmra.mxu0 %vm3762_vm7, %v7106_v56  ;;  %v6815_v56 = vpop.f32.mrf.mxu0 }
0x11a2   :  { %7222 = vmatpush.msra.mxu3 %v7199_v15  ;;  %v7279_v15 = vld [vmem:[#allocation29 + $0x218] sm:$0xff] }
0x11a4   :  { %7223 = vmatpush.msra.mxu3 %v7198_v6  ;;  %v7278_v6 = vld [vmem:[#allocation29 + $0x210] sm:$0xff] }
0x11a6   :  { %v6851_v22 = vpop.f32.mrf.mxu2  ;;  %7224 = vmatpush.msra.mxu3 %v7197_v12 }
0x11a7   :  { %9977 = vmatmul.msk.f32.gmra.mxu3 %vm3762_vm7, %v6851_v22  ;;  %v7281_v22 = vld [vmem:[#allocation29 + $0x228] sm:$0xff] }
0x11a8   :  { %7225 = vmatpush.msra.mxu3 %v7196_v27  ;;  %7306 = vmatpush.msrb.mxu0 %v7281_v22  ;;  %v7263_v27 = vpop.f32.mrf.mxu1 }
0x11aa   :  { %7226 = vmatpush.msra.mxu3 %v7195_v20  ;;  %7307 = vmatpush.msrb.mxu0 %v7280_v26 }
0x11ac   :  { %7227 = vmatpush.msra.mxu3 %v7194_v10  ;;  %7308 = vmatpush.msrb.mxu0 %v7279_v15  ;;  %v6404_v10 = vld [vmem:[%s13657_s1] sm:$0x3] }
0x11ad   :  { %10020 = vmatpush.msk.msrb.mxu2 %vm759_vm0, %v6404_v10 }
0x11ae   :  { %v6854_v4 = vpop.f32.mrf.mxu2  ;;  %7309 = vmatpush.msrb.mxu0 %v7278_v6  ;;  %10021 = vmatmul.msk.f32.vlgmr.msrb.gmra.mxu2 %vm746_vm1, %v12742_v34 }
0x11af   :  { %9978 = vmatmul.msk.f32.gmra.mxu3 %vm3762_vm7, %v6854_v4  ;;  %v7193_v4 = vld [vmem:[#allocation29 + $0x1c0] sm:$0xff] }
0x11b0   :  { %7228 = vmatpush.msra.mxu3 %v7193_v4  ;;  %v7266_v39 = vpop.f32.mrf.mxu1 }
0x11b6   :  { %v6857_v14 = vpop.f32.mrf.mxu2  ;;  %10022 = vmatmul.msk.f32.gmra.mxu2 %vm746_vm1, %v12748_v40 }
0x11b7   :  { %9979 = vmatmul.msk.f32.gmra.mxu3 %vm3762_vm7, %v6857_v14  ;;  %v7277_v14 = vld [vmem:[#allocation29 + $0x208] sm:$0xff] }
0x11b8   :  { %7310 = vmatpush.msrb.mxu0 %v7277_v14  ;;  %v7269_v22 = vpop.f32.mrf.mxu1  ;;  %v6818_v14 = vpop.f32.mrf.mxu0 }
0x11ba   :  { %7311 = vmatpush.msrb.mxu0 %v7276_v59 }
0x11bb   :  { %10016 = vmatmul.msk.f32.vlgmr.msrb.gmra.mxu0 %vm3762_vm7, %v7263_v27  ;;  %v6736_v27 = vpop.f32.mrf.mxu3 }
0x11be   :  { %v7014_v28 = vpop.f32.mrf.mxu2  ;;  %10023 = vmatmul.msk.f32.gmra.mxu2 %vm746_vm1, %v12753_v51 }
0x11bf   :  { %9992 = vmatmul.msk.f32.vlgmr.msrb.gmra.mxu3 %vm3762_vm7, %v7014_v28  ;;  %v6405_v28 = vld [vmem:[%s13658_s27] sm:$0x3] }
0x11c0   :  { %10025 = vmatpush.msk.msrb.mxu3 %vm759_vm0, %v6405_v28  ;;  %v7272_v26 = vpop.f32.mrf.mxu1  ;;  %v6821_v59 = vpop.f32.mrf.mxu0 }
0x11c3   :  { %10017 = vmatmul.msk.f32.gmra.mxu0 %vm3762_vm7, %v7266_v39  ;;  %v6739_v39 = vpop.f32.mrf.mxu3 }
0x11c4   :  { %v6740_v17 = vadd.f32 %v6739_v39, %v13037_v8 }
0x11c6   :  { %v7017_v12 = vpop.f32.mrf.mxu2  ;;  %10024 = vmatmul.msk.f32.gmra.mxu2 %vm746_vm1, %v12758_v50  ;;  %v6828_v0 = vadd.f32 %v6818_v14, %v6740_v17 }
0x11c7   :  { %9993 = vmatmul.msk.f32.gmra.mxu3 %vm3762_vm7, %v7017_v12 }
0x11cb   :  { %10018 = vmatmul.msk.f32.gmra.mxu0 %vm3762_vm7, %v7269_v22  ;;  %v6742_v22 = vpop.f32.mrf.mxu3 }
0x11cc   :  { %v6743_v42 = vadd.f32 %v6742_v22, %v13040_v37 }
0x11ce   :  { %v7020_v58 = vpop.f32.mrf.mxu2  ;;  %v6829_v47 = vadd.f32 %v6821_v59, %v6743_v42 }
0x11cf   :  { %9994 = vmatmul.msk.f32.gmra.mxu3 %vm3762_vm7, %v7020_v58  ;;  %v6824_v58 = vpop.f32.mrf.mxu0 }
0x11d3   :  { %10019 = vmatmul.msk.f32.gmra.mxu0 %vm3762_vm7, %v7272_v26  ;;  %v6745_v28 = vpop.f32.mrf.mxu3 }
0x11d4   :  { %v6746_v45 = vadd.f32 %v6745_v28, %v13043_v52 }
0x11d6   :  { %v7023_v20 = vpop.f32.mrf.mxu2 }
0x11d7   :  { %9995 = vmatmul.msk.f32.gmra.mxu3 %vm3762_vm7, %v7023_v20  ;;  %v6981_v20 = vpop.f32.mrf.mxu0 }
0x11de   :  { %v7180_v4 = vpop.f32.mrf.mxu2 }
0x11df   :  { %10008 = vmatmul.msk.f32.vlgmr.msra.gmra.mxu3 %vm3762_vm7, %v7180_v4  ;;  %v6984_v10 = vpop.f32.mrf.mxu0 }
0x11e6   :  { %v7183_v15 = vpop.f32.mrf.mxu2 }
0x11e7   :  { %10009 = vmatmul.msk.f32.gmra.mxu3 %vm3762_vm7, %v7183_v15  ;;  %v6987_v4 = vpop.f32.mrf.mxu0 }
0x11ee   :  { %v7186_v6 = vpop.f32.mrf.mxu2 }
0x11ef   :  { %10010 = vmatmul.msk.f32.gmra.mxu3 %vm3762_vm7, %v7186_v6  ;;  %v6990_v6 = vpop.f32.mrf.mxu0 }
0x11f6   :  { %v7189_v12 = vpop.f32.mrf.mxu2 }
0x11f7   :  { %10011 = vmatmul.msk.f32.gmra.mxu3 %vm3762_vm7, %v7189_v12  ;;  %v7147_v12 = vpop.f32.mrf.mxu0 }
0x11ff   :  { %10026 = vmatmul.msk.f32.vlgmr.msrb.gmra.mxu3 %vm746_vm1, %v12742_v34  ;;  %v7150_v61 = vpop.f32.mrf.mxu0 }
0x1207   :  { %10027 = vmatmul.msk.f32.gmra.mxu3 %vm746_vm1, %v12748_v40  ;;  %v7153_v40 = vpop.f32.mrf.mxu0 }
0x120f   :  { %10028 = vmatmul.msk.f32.gmra.mxu3 %vm746_vm1, %v12753_v51 }
0x1217   :  { %10029 = vmatmul.msk.f32.gmra.mxu3 %vm746_vm1, %v12758_v50  ;;  %v6737_v50 = vadd.f32 %v6736_v27, %v13035_v18  ;;  %v6830_v18 = vadd.f32 %v6824_v58, %v6746_v45 }
0x1219   :  { %v6827_v38 = vadd.f32 %v6815_v56, %v6737_v50 }
0x121e   :  { %v7156_v3 = vpop.f32.mrf.mxu0 }
0x1222   :  { %v6898_v26 = vpop.f32.mrf.mxu3 }
0x1223   :  { %v6910_v29 = vadd.f32 %v6898_v26, %v6827_v38 }
0x1225   :  { %v6993_v62 = vadd.f32 %v6981_v20, %v6910_v29 }
0x122a   :  { %v6901_v15 = vpop.f32.mrf.mxu3 }
0x122b   :  { %v6911_v9 = vadd.f32 %v6901_v15, %v6828_v0 }
0x122d   :  { %v6994_v49 = vadd.f32 %v6984_v10, %v6911_v9 }
0x1232   :  { %v6904_v34 = vpop.f32.mrf.mxu3 }
0x1233   :  { %v6912_v57 = vadd.f32 %v6904_v34, %v6829_v47  ;;  %v10243_v47 = vld [vmem:[#allocation31] ss:$0 sm:$0xff] }
0x1235   :  { %v6995_v8 = vadd.f32 %v6987_v4, %v6912_v57 }
0x1238   :  { %v7313_v41 = vpop.f32.mrf.mxu0 }
0x123a   :  { %v6907_v23 = vpop.f32.mrf.mxu3 }
0x123b   :  { %v6913_v14 = vadd.f32 %v6907_v23, %v6830_v18 }
0x123d   :  { %v6996_v59 = vadd.f32 %v6990_v6, %v6913_v14 }
0x1240   :  { %v7316_v21 = vpop.f32.mrf.mxu0 }
0x1242   :  { %v7064_v53 = vpop.f32.mrf.mxu3 }
0x1243   :  { %v7076_v5 = vadd.f32 %v7064_v53, %v6993_v62 }
0x1245   :  { %v7159_v17 = vadd.f32 %v7147_v12, %v7076_v5 }
0x1248   :  { %v7319_v37 = vpop.f32.mrf.mxu0 }
0x124a   :  { %v7067_v36 = vpop.f32.mrf.mxu3 }
0x124b   :  { %v7077_v11 = vadd.f32 %v7067_v36, %v6994_v49 }
0x124d   :  { %v7160_v39 = vadd.f32 %v7150_v61, %v7077_v11 }
0x1250   :  { %v7322_v5 = vpop.f32.mrf.mxu0 }
0x1252   :  { %v7070_v2 = vpop.f32.mrf.mxu3 }
0x1253   :  { %v7078_v56 = vadd.f32 %v7070_v2, %v6995_v8 }
0x1255   :  { %v7161_v38 = vadd.f32 %v7153_v40, %v7078_v56 }
0x125a   :  { %v7073_v51 = vpop.f32.mrf.mxu3 }
0x125b   :  { %v7079_v53 = vadd.f32 %v7073_v51, %v6996_v59 }
0x125d   :  { %v7162_v45 = vadd.f32 %v7156_v3, %v7079_v53  ;;  %v7530_v53 = vld [vmem:[#allocation32 + $0x28] sm:$0xff] }
0x1262   :  { %v7230_v48 = vpop.f32.mrf.mxu3 }
0x1263   :  { %v7242_v27 = vadd.f32 %v7230_v48, %v7159_v17 }
0x1265   :  { %v7325_v29 = vadd.f32 %v7313_v41, %v7242_v27 }
0x1267   :  { %v13093_v57 = vadd.f32 %v10243_v47, %v7325_v29  ;;  %v7531_v29 = vld [vmem:[#allocation32 + $0x30] sm:$0xff] }
0x1269   :  { %v7350_v11 = vmul.f32 %v13093_v57, %v13093_v57  ;;  %v7336_v2 = vsel %vm2754_vm2, %v13093_v57, 0.0 }
0x126a   :  { %v7233_v32 = vpop.f32.mrf.mxu3 }
0x126b   :  { %v7243_v0 = vadd.f32 %v7233_v32, %v7160_v39  ;;  %v7354_v22 = vsel %vm2754_vm2, %v7350_v11, 0.0 }
0x126d   :  { %v7326_v42 = vadd.f32 %v7316_v21, %v7243_v0 }
0x126f   :  { %v13091_v62 = vadd.f32 %v10243_v47, %v7326_v42 }
0x1271   :  { %v7351_v23 = vmul.f32 %v13091_v62, %v13091_v62  ;;  %v7337_v21 = vsel %vm2754_vm2, %v13091_v62, 0.0 }
0x1272   :  { %v7236_v9 = vpop.f32.mrf.mxu3  ;;  %v7338_v20 = vadd.f32 %v7337_v21, %v7336_v2 }
0x1273   :  { %v7244_v36 = vadd.f32 %v7236_v9, %v7161_v38  ;;  %v7355_v3 = vsel %vm2754_vm2, %v7351_v23, 0.0  ;;  %v7532_v38 = vld [vmem:[#allocation32 + $0x38] sm:$0xff]  ;;  %v7529_v23 = vld [vmem:[#allocation32 + $0x20] sm:$0xff] }
0x1274   :  { %v7356_v4 = vadd.f32 %v7355_v3, %v7354_v22  ;;  %7557 = vmatpush.msra.mxu2 %v7532_v38 }
0x1275   :  { %v7327_v49 = vadd.f32 %v7319_v37, %v7244_v36  ;;  %v7410_v37 = vpop.f32.mrf.mxu2 }
0x1276   :  { %7558 = vmatpush.msra.mxu2 %v7531_v29 }
0x1277   :  { %v13095_v61 = vadd.f32 %v10243_v47, %v7327_v49 }
0x1278   :  { %7559 = vmatpush.msra.mxu2 %v7530_v53  ;;  %v13666_v53 = vld [vmem:[#allocation85_spill] sm:$0xff] }
0x1279   :  { %v7352_v48 = vmul.f32 %v13095_v61, %v13095_v61  ;;  %v7339_v52 = vsel %vm2754_vm2, %v13095_v61, 0.0 }
0x127a   :  { %v7239_v32 = vpop.f32.mrf.mxu3  ;;  %v7340_v26 = vadd.f32 %v7339_v52, %v7338_v20  ;;  %7560 = vmatpush.msra.mxu2 %v7529_v23 }
0x127b   :  { %v7245_v41 = vadd.f32 %v7239_v32, %v7162_v45  ;;  %v7357_v10 = vsel %vm2754_vm2, %v7352_v48, 0.0 }
0x127c   :  { %v7358_v34 = vadd.f32 %v7357_v10, %v7356_v4 }
0x127d   :  { %v7328_v58 = vadd.f32 %v7322_v5, %v7245_v41  ;;  %v7413_v11 = vpop.f32.mrf.mxu2 }
0x127f   :  { %v7335_v28 = vadd.f32 %v10243_v47, %v7328_v58 }
0x1281   :  { %v7341_v15 = vsel %vm2754_vm2, %v7335_v28, 0.0  ;;  %v7353_v6 = vmul.f32 %v7335_v28, %v7335_v28 }
0x1282   :  { %v7342_v12 = vadd.f32 %v7341_v15, %v7340_v26  ;;  %v7446_v59 = vpop.f32.mrf.mxu3 }
0x1283   :  { %v7359_v40 = vsel %vm2754_vm2, %v7353_v6, 0.0 }
0x1284   :  { %v7343_v51 = vrot.slane %v7342_v12, 4  ;;  %v7360_v50 = vadd.f32 %v7359_v40, %v7358_v34 }
0x1285   :  { %v7416_v3 = vpop.f32.mrf.mxu2 }
0x1286   :  { %v7344_v8 = vadd.f32 %v7343_v51, %v7342_v12  ;;  %v7361_v39 = vrot.slane %v7360_v50, 4 }
0x1288   :  { %v7345_v18 = vrot.slane %v7344_v8, 2  ;;  %v7362_v17 = vadd.f32 %v7361_v39, %v7360_v50 }
0x128a   :  { %v7346_v56 = vadd.f32 %v7345_v18, %v7344_v8  ;;  %v7363_v0 = vrot.slane %v7362_v17, 2  ;;  %v7449_v48 = vpop.f32.mrf.mxu3 }
0x128c   :  { %v7347_v14 = vrot.slane %v7346_v56, 1  ;;  %v7364_v27 = vadd.f32 %v7363_v0, %v7362_v17 }
0x128d   :  { %v7419_v34 = vpop.f32.mrf.mxu2 }
0x128e   :  { %v7348_v42 = vadd.f32 %v7347_v14, %v7346_v56  ;;  %v7365_v9 = vrot.slane %v7364_v27, 1 }
0x1290   :  { %v7349_v47 = vmul.f32 %v7348_v42, %v11757_v63  ;;  %v7366_v36 = vadd.f32 %v7365_v9, %v7364_v27  ;;  %v13664_v9 = vld [vmem:[#allocation97_spill] sm:$0xff] }
0x1292   :  { %v7367_v49 = vmul.f32 %v7366_v36, %v11757_v63  ;;  %v7368_v45 = vmul.f32 %v7349_v47, %v7349_v47  ;;  %v7452_v58 = vpop.f32.mrf.mxu3  ;;  %v7371_v63 = vsub.f32 %v13093_v57, %v7349_v47  ;;  %v7372_v4 = vsub.f32 %v13091_v62, %v7349_v47 }
0x1293   :  { %v7373_v26 = vsub.f32 %v13095_v61, %v7349_v47  ;;  %v7374_v15 = vsub.f32 %v7335_v28, %v7349_v47  ;;  %v13665_v47 = vld [vmem:[#allocation99_spill] sm:$0xff] }
0x1294   :  { %v7369_v32 = vsub.f32 %v7367_v49, %v7368_v45  ;;  %v13667_v45 = vld [vmem:[#allocation86_spill] sm:$0xff] }
0x1296   :  { %v7370_v5 = vmax.f32 %v7369_v32, 0.0  ;;  %v13668_v32 = vld [vmem:[#allocation88_spill] sm:$0xff] }
0x1298   :  { %v7375_v21 = vadd.f32 1e-05, %v7370_v5 }
0x129a   :  { %10257 = vrsqrt.f32 %v7375_v21  ;;  %vm7382_vm7 = vweird.f32 %v7375_v21  ;;  %v7455_v8 = vpop.f32.mrf.mxu3 }
0x12a0   :  { %v10258_v41 = vpop.eup %10257 }
0x12a1   :  { %v7377_v2 = vmul.f32 %v10258_v41, %v7375_v21  ;;  %vm7383_vm1 = vweird.f32 %v10258_v41  ;;  %v13670_v21 = vld [vmem:[#allocation92_spill] sm:$0xff] }
0x12a2   :  { %vm7384_vm8 = vmor %vm7382_vm7, %vm7383_vm1 }
0x12a3   :  { %v7378_v52 = vmul.f32 %v10258_v41, %v7377_v2  ;;  %v13673_v2 = vld [vmem:[#allocation98_spill] sm:$0xff] }
0x12a5   :  { %v7379_v20 = vmul.f32 0.5, %v7378_v52  ;;  %v13675_v52 = vld [vmem:[#allocation101_spill] sm:$0xff] }
0x12a7   :  { %v7380_v22 = vsub.f32 1.5, %v7379_v20  ;;  %v13677_v20 = vld [vmem:[#allocation103_spill] sm:$0xff] }
0x12a9   :  { %v7381_v10 = vmul.f32 %v10258_v41, %v7380_v22  ;;  %v7727_v22 = vld [vmem:[#allocation32 + $0x78] sm:$0xff] }
0x12ab   :  { %v7385_v6 = vsel %vm7384_vm8, %v10258_v41, %v7381_v10  ;;  %v13672_v41 = vld [vmem:[#allocation96_spill] sm:$0xff] }
0x12ac   :  { %v7386_v12 = vmul.f32 %v7385_v6, %v7371_v63  ;;  %v7387_v40 = vmul.f32 %v7385_v6, %v7372_v4  ;;  %v7388_v51 = vmul.f32 %v7385_v6, %v7373_v26  ;;  %v7389_v50 = vmul.f32 %v7385_v6, %v7374_v15  ;;  %v7726_v10 = vld [vmem:[#allocation32 + $0x70] sm:$0xff]  ;;  %v7725_v63 = vld [vmem:[#allocation32 + $0x68] sm:$0xff]  ;;  %v7724_v26 = vld [vmem:[#allocation32 + $0x60] sm:$0xff] }
0x12ad   :  { %v7806_v15 = vld [vmem:[#allocation32 + $0x98] sm:$0xff]  ;;  %v7805_v6 = vld [vmem:[#allocation32 + $0x90] sm:$0xff] }
0x12ae   :  { %v7423_v39 = vmul.f32 %v7413_v11, %v7387_v40  ;;  %v7424_v18 = vmul.f32 %v7416_v3, %v7388_v51  ;;  %v7425_v17 = vmul.f32 %v7419_v34, %v7389_v50  ;;  %v7422_v56 = vmul.f32 %v7410_v37, %v7386_v12  ;;  %v13669_v11 = vld [vmem:[#allocation90_spill] sm:$0xff]  ;;  %v13674_v3 = vld [vmem:[#allocation100_spill] sm:$0xff] }
0x12af   :  { %v7804_v34 = vld [vmem:[#allocation32 + $0x88] sm:$0xff]  ;;  %v7803_v40 = vld [vmem:[#allocation32 + $0x80] sm:$0xff] }
0x12b0   :  { %v7460_v0 = vadd.f32 %v7452_v58, %v7424_v18  ;;  %v7461_v14 = vadd.f32 %v7455_v8, %v7425_v17  ;;  %v7459_v57 = vadd.f32 %v7449_v48, %v7423_v39  ;;  %v7458_v62 = vadd.f32 %v7446_v59, %v7422_v56  ;;  %v13671_v48 = vld [vmem:[#allocation94_spill] sm:$0xff]  ;;  %v7884_v56 = vld [vmem:[#allocation32 + $0xb0] sm:$0xff] }
0x12b1   :  { %v13676_v58 = vld [vmem:[#allocation102_spill] sm:$0xff] }
0x12b2   :  { %v13119_v27 = vmax.f32 %v7461_v14, 0.0  ;;  %v13121_v38 = vmax.f32 %v7460_v0, 0.0  ;;  %v13126_v61 = vmax.f32 %v7459_v57, 0.0  ;;  %v13131_v28 = vmax.f32 %v7458_v62, 0.0  ;;  %v7885_v17 = vld [vmem:[#allocation32 + $0xb8] sm:$0xff]  ;;  %v7883_v0 = vld [vmem:[#allocation32 + $0xa8] sm:$0xff] }
0x12b3   :  { %v7882_v57 = vld [vmem:[#allocation32 + $0xa0] sm:$0xff]  ;;  %v7964_v62 = vld [vmem:[#allocation32 + $0xd8] sm:$0xff] }
0x12b4   :  { %7478 = vmatpush.msra.mxu1 %v13119_v27  ;;  %7511 = vmatpush.msra.mxu0 %v13119_v27 }
0x12b5   :  { %7706 = vmatpush.msrb.mxu2 %v13119_v27 }
0x12b6   :  { %7479 = vmatpush.msra.mxu1 %v13121_v38  ;;  %7512 = vmatpush.msra.mxu0 %v13121_v38 }
0x12b7   :  { %7707 = vmatpush.msrb.mxu2 %v13121_v38 }
0x12b8   :  { %7480 = vmatpush.msra.mxu1 %v13126_v61  ;;  %7513 = vmatpush.msra.mxu0 %v13126_v61 }
0x12b9   :  { %7708 = vmatpush.msrb.mxu2 %v13126_v61 }
0x12ba   :  { %7481 = vmatpush.msra.mxu1 %v13131_v28  ;;  %7514 = vmatpush.msra.mxu0 %v13131_v28 }
0x12bb   :  { %7709 = vmatpush.msrb.mxu2 %v13131_v28  ;;  %10030 = vmatmul.msk.f32.vlgmr.msra.gmra.mxu1 %vm2754_vm2, %v12847_v55  ;;  %v7498_v55 = vld [vmem:[#allocation32 + $0x18] sm:$0xff] }
0x12bc   :  { %10034 = vmatmul.msk.f32.vlgmr.msra.gmra.mxu0 %vm2754_vm2, %v12851_v1  ;;  %7627 = vmatpush.msrb.mxu1 %v13119_v27  ;;  %v7497_v1 = vld [vmem:[#allocation32 + $0x10] sm:$0xff] }
0x12bd   :  { %7598 = vmatpush.msra.mxu3 %v7498_v55  ;;  %v7961_v55 = vld [vmem:[#allocation32 + $0xc0] sm:$0xff] }
0x12be   :  { %7628 = vmatpush.msrb.mxu1 %v13121_v38 }
0x12bf   :  { %7599 = vmatpush.msra.mxu3 %v7497_v1 }
0x12c0   :  { %7629 = vmatpush.msrb.mxu1 %v13126_v61 }
0x12c2   :  { %7630 = vmatpush.msrb.mxu1 %v13131_v28 }
0x12c3   :  { %10031 = vmatmul.msk.f32.gmra.mxu1 %vm2754_vm2, %v12860_v54  ;;  %v7496_v54 = vld [vmem:[#allocation32 + $0x8] sm:$0xff] }
0x12c4   :  { %7785 = vmatpush.msra.mxu1 %v13119_v27  ;;  %10035 = vmatmul.msk.f32.gmra.mxu0 %vm2754_vm2, %v12864_v31  ;;  %v7495_v31 = vld [vmem:[#allocation32] sm:$0xff] }
0x12c5   :  { %7600 = vmatpush.msra.mxu3 %v7496_v54 }
0x12c6   :  { %7786 = vmatpush.msra.mxu1 %v13121_v38 }
0x12c7   :  { %7601 = vmatpush.msra.mxu3 %v7495_v31 }
0x12c8   :  { %7787 = vmatpush.msra.mxu1 %v13126_v61 }
0x12c9   :  { %7752 = vmatpush.msrb.mxu3 %v7727_v22 }
0x12ca   :  { %7788 = vmatpush.msra.mxu1 %v13131_v28 }
0x12cb   :  { %10032 = vmatmul.msk.f32.gmra.mxu1 %vm2754_vm2, %v12871_v60  ;;  %v13659_v60 = vld [vmem:[#allocation83_spill] sm:$0xff]  ;;  %7753 = vmatpush.msrb.mxu3 %v7726_v10 }
0x12cc   :  { %10036 = vmatmul.msk.f32.gmra.mxu0 %vm2754_vm2, %v12875_v33  ;;  %v13660_v33 = vld [vmem:[#allocation87_spill] sm:$0xff] }
0x12cd   :  { %7754 = vmatpush.msrb.mxu3 %v7725_v63 }
0x12cf   :  { %7755 = vmatpush.msrb.mxu3 %v7724_v26 }
0x12d3   :  { %10033 = vmatmul.msk.f32.gmra.mxu1 %vm2754_vm2, %v12879_v13  ;;  %v7648_v13 = vld [vmem:[#allocation32 + $0x58] sm:$0xff] }
0x12d4   :  { %10037 = vmatmul.msk.f32.gmra.mxu0 %vm2754_vm2, %v12883_v30  ;;  %v7647_v30 = vld [vmem:[#allocation32 + $0x50] sm:$0xff] }
0x12d5   :  { %7673 = vmatpush.msrb.mxu0 %v7648_v13  ;;  %v8043_v13 = vld [vmem:[#allocation32 + $0xf8] sm:$0xff] }
0x12d7   :  { %7674 = vmatpush.msrb.mxu0 %v7647_v30  ;;  %v8042_v30 = vld [vmem:[#allocation32 + $0xf0] sm:$0xff] }
0x12db   :  { %10046 = vmatmul.msk.f32.vlgmr.msrb.gmra.mxu1 %vm2754_vm2, %v12887_v19  ;;  %v7646_v19 = vld [vmem:[#allocation32 + $0x48] sm:$0xff] }
0x12dc   :  { %7943 = vmatpush.msrb.mxu1 %v13119_v27  ;;  %7675 = vmatpush.msrb.mxu0 %v7646_v19  ;;  %v8041_v19 = vld [vmem:[#allocation32 + $0xe8] sm:$0xff] }
0x12de   :  { %7944 = vmatpush.msrb.mxu1 %v13121_v38 }
0x12e0   :  { %7945 = vmatpush.msrb.mxu1 %v13126_v61 }
0x12e2   :  { %7946 = vmatpush.msrb.mxu1 %v13131_v28 }
0x12e3   :  { %10047 = vmatmul.msk.f32.gmra.mxu1 %vm2754_vm2, %v12895_v35  ;;  %v13661_v35 = vld [vmem:[#allocation91_spill] sm:$0xff] }
0x12eb   :  { %10048 = vmatmul.msk.f32.gmra.mxu1 %vm2754_vm2, %v12899_v7 }
0x12f3   :  { %10049 = vmatmul.msk.f32.gmra.mxu1 %vm2754_vm2, %v12903_v25 }
0x12fb   :  { %10062 = vmatmul.msk.f32.vlgmr.msra.gmra.mxu1 %vm2754_vm2, %v12907_v44  ;;  %v7645_v44 = vld [vmem:[#allocation32 + $0x40] sm:$0xff] }
0x12fc   :  { %8101 = vmatpush.msra.mxu1 %v13119_v27  ;;  %7676 = vmatpush.msrb.mxu0 %v7645_v44  ;;  %v8122_v44 = vld [vmem:[#allocation32 + $0x118] sm:$0xff] }
0x12fe   :  { %8102 = vmatpush.msra.mxu1 %v13121_v38  ;;  %7831 = vmatpush.msra.mxu0 %v7806_v15 }
0x1300   :  { %8103 = vmatpush.msra.mxu1 %v13126_v61  ;;  %7832 = vmatpush.msra.mxu0 %v7805_v6 }
0x1302   :  { %8104 = vmatpush.msra.mxu1 %v13131_v28  ;;  %7833 = vmatpush.msra.mxu0 %v7804_v34 }
0x1303   :  { %10063 = vmatmul.msk.f32.gmra.mxu1 %vm2754_vm2, %v12915_v24  ;;  %v13662_v24 = vld [vmem:[#allocation93_spill] sm:$0xff] }
0x1304   :  { %7834 = vmatpush.msra.mxu0 %v7803_v40 }
0x130b   :  { %10064 = vmatmul.msk.f32.gmra.mxu1 %vm2754_vm2, %v12919_v43 }
0x1313   :  { %10065 = vmatmul.msk.f32.gmra.mxu1 %vm2754_vm2, %v12925_v46 }
0x131b   :  { %10078 = vmatmul.msk.f32.vlgmr.msrb.gmra.mxu1 %vm2754_vm2, %v12929_v16  ;;  %v13663_v16 = vld [vmem:[#allocation95_spill] sm:$0xff] }
0x1323   :  { %10079 = vmatmul.msk.f32.gmra.mxu1 %vm2754_vm2, %v13659_v60 }
0x132b   :  { %10080 = vmatmul.msk.f32.gmra.mxu1 %vm2754_vm2, %v13660_v33 }
0x1333   :  { %10081 = vmatmul.msk.f32.gmra.mxu1 %vm2754_vm2, %v13661_v35 }
0x1338   :  { %v7483_v7 = vpop.f32.mrf.mxu1 }
0x1339   :  { %v7516_v25 = vpop.f32.mrf.mxu0  ;;  %10042 = vmatmul.msk.f32.vlgmr.msra.gmra.mxu3 %vm2754_vm2, %v7483_v7  ;;  %v8040_v7 = vld [vmem:[#allocation32 + $0xe0] sm:$0xff] }
0x133a   :  { %10038 = vmatmul.msk.f32.vlgmr.msra.gmra.mxu2 %vm2754_vm2, %v7516_v25  ;;  %7910 = vmatpush.msra.mxu3 %v7885_v17 }
0x133b   :  { %7864 = vmatpush.msra.mxu2 %v13119_v27  ;;  %10094 = vmatmul.msk.f32.vlgmr.msra.gmra.mxu1 %vm2754_vm2, %v13662_v24  ;;  %v8121_v24 = vld [vmem:[#allocation32 + $0x110] sm:$0xff] }
0x133c   :  { %7911 = vmatpush.msra.mxu3 %v7884_v56 }
0x133d   :  { %7865 = vmatpush.msra.mxu2 %v13121_v38 }
0x133e   :  { %7912 = vmatpush.msra.mxu3 %v7883_v0 }
0x133f   :  { %7866 = vmatpush.msra.mxu2 %v13126_v61 }
0x1340   :  { %v7486_v43 = vpop.f32.mrf.mxu1  ;;  %7913 = vmatpush.msra.mxu3 %v7882_v57 }
0x1341   :  { %7867 = vmatpush.msra.mxu2 %v13131_v28  ;;  %v7519_v46 = vpop.f32.mrf.mxu0  ;;  %10043 = vmatmul.msk.f32.gmra.mxu3 %vm2754_vm2, %v7486_v43  ;;  %v8120_v43 = vld [vmem:[#allocation32 + $0x108] sm:$0xff] }
0x1342   :  { %10039 = vmatmul.msk.f32.gmra.mxu2 %vm2754_vm2, %v7519_v46 }
0x1343   :  { %10095 = vmatmul.msk.f32.gmra.mxu1 %vm2754_vm2, %v13663_v16  ;;  %v8119_v16 = vld [vmem:[#allocation32 + $0x100] sm:$0xff] }
0x1348   :  { %v7489_v37 = vpop.f32.mrf.mxu1 }
0x1349   :  { %v7522_v42 = vpop.f32.mrf.mxu0  ;;  %10044 = vmatmul.msk.f32.gmra.mxu3 %vm2754_vm2, %v7489_v37 }
0x134a   :  { %10040 = vmatmul.msk.f32.gmra.mxu2 %vm2754_vm2, %v7522_v42 }
0x134b   :  { %10096 = vmatmul.msk.f32.gmra.mxu1 %vm2754_vm2, %v13664_v9 }
0x1350   :  { %v7492_v59 = vpop.f32.mrf.mxu1 }
0x1351   :  { %v7525_v29 = vpop.f32.mrf.mxu0  ;;  %10045 = vmatmul.msk.f32.gmra.mxu3 %vm2754_vm2, %v7492_v59 }
0x1352   :  { %10041 = vmatmul.msk.f32.gmra.mxu2 %vm2754_vm2, %v7525_v29 }
0x1353   :  { %10097 = vmatmul.msk.f32.gmra.mxu1 %vm2754_vm2, %v13665_v47 }
0x1358   :  { %v7632_v36 = vpop.f32.mrf.mxu1 }
0x1359   :  { %10050 = vmatmul.msk.f32.vlgmr.msrb.gmra.mxu0 %vm2754_vm2, %v7632_v36 }
0x135a   :  { %10054 = vmatmul.msk.f32.vlgmr.msrb.gmra.mxu2 %vm2754_vm2, %v13666_v53  ;;  %7989 = vmatpush.msrb.mxu0 %v7964_v62 }
0x135b   :  { %8022 = vmatpush.msrb.mxu2 %v13119_v27 }
0x135d   :  { %8023 = vmatpush.msrb.mxu2 %v13121_v38  ;;  %v7963_v38 = vld [vmem:[#allocation32 + $0xd0] sm:$0xff] }
0x135e   :  { %7990 = vmatpush.msrb.mxu0 %v7963_v38 }
0x135f   :  { %8024 = vmatpush.msrb.mxu2 %v13126_v61  ;;  %v7962_v61 = vld [vmem:[#allocation32 + $0xc8] sm:$0xff] }
0x1360   :  { %v7635_v49 = vpop.f32.mrf.mxu1  ;;  %7991 = vmatpush.msrb.mxu0 %v7962_v61 }
0x1361   :  { %8025 = vmatpush.msrb.mxu2 %v13131_v28  ;;  %10051 = vmatmul.msk.f32.gmra.mxu0 %vm2754_vm2, %v7635_v49 }
0x1362   :  { %10055 = vmatmul.msk.f32.gmra.mxu2 %vm2754_vm2, %v13667_v45  ;;  %7992 = vmatpush.msrb.mxu0 %v7961_v55  ;;  %v8442_v55 = vld [vmem:[#allocation38 + $0xe8] sm:$0xff] }
0x1368   :  { %v7638_v23 = vpop.f32.mrf.mxu1 }
0x1369   :  { %10052 = vmatmul.msk.f32.gmra.mxu0 %vm2754_vm2, %v7638_v23 }
0x136a   :  { %10056 = vmatmul.msk.f32.gmra.mxu2 %vm2754_vm2, %v13668_v32 }
0x1370   :  { %v7641_v5 = vpop.f32.mrf.mxu1 }
0x1371   :  { %10053 = vmatmul.msk.f32.gmra.mxu0 %vm2754_vm2, %v7641_v5 }
0x1372   :  { %10057 = vmatmul.msk.f32.gmra.mxu2 %vm2754_vm2, %v13669_v11 }
0x1378   :  { %v7790_v51 = vpop.f32.mrf.mxu1 }
0x1379   :  { %10066 = vmatmul.msk.f32.vlgmr.msra.gmra.mxu0 %vm2754_vm2, %v7790_v51 }
0x137a   :  { %10070 = vmatmul.msk.f32.vlgmr.msra.gmra.mxu2 %vm2754_vm2, %v13670_v21  ;;  %8147 = vmatpush.msra.mxu0 %v8122_v44 }
0x137c   :  { %8148 = vmatpush.msra.mxu0 %v8121_v24 }
0x137e   :  { %8149 = vmatpush.msra.mxu0 %v8120_v43 }
0x1380   :  { %v7793_v8 = vpop.f32.mrf.mxu1  ;;  %8150 = vmatpush.msra.mxu0 %v8119_v16 }
0x1381   :  { %10067 = vmatmul.msk.f32.gmra.mxu0 %vm2754_vm2, %v7793_v8 }
0x1382   :  { %10071 = vmatmul.msk.f32.gmra.mxu2 %vm2754_vm2, %v13671_v48 }
0x1388   :  { %v7796_v18 = vpop.f32.mrf.mxu1 }
0x1389   :  { %10068 = vmatmul.msk.f32.gmra.mxu0 %vm2754_vm2, %v7796_v18 }
0x138a   :  { %10072 = vmatmul.msk.f32.gmra.mxu2 %vm2754_vm2, %v13672_v41 }
0x1390   :  { %v7799_v27 = vpop.f32.mrf.mxu1 }
0x1391   :  { %10069 = vmatmul.msk.f32.gmra.mxu0 %vm2754_vm2, %v7799_v27 }
0x1392   :  { %10073 = vmatmul.msk.f32.gmra.mxu2 %vm2754_vm2, %v13673_v2 }
0x1398   :  { %v7948_v1 = vpop.f32.mrf.mxu1 }
0x1399   :  { %10082 = vmatmul.msk.f32.vlgmr.msrb.gmra.mxu0 %vm2754_vm2, %v7948_v1  ;;  %v8440_v1 = vld [vmem:[#allocation38 + $0xd8] sm:$0xff] }
0x139a   :  { %10086 = vmatmul.msk.f32.vlgmr.msrb.gmra.mxu2 %vm2754_vm2, %v13674_v3 }
0x13a0   :  { %v7951_v31 = vpop.f32.mrf.mxu1 }
0x13a1   :  { %10083 = vmatmul.msk.f32.gmra.mxu0 %vm2754_vm2, %v7951_v31 }
0x13a2   :  { %10087 = vmatmul.msk.f32.gmra.mxu2 %vm2754_vm2, %v13675_v52 }
0x13a8   :  { %v7954_v33 = vpop.f32.mrf.mxu1 }
0x13a9   :  { %10084 = vmatmul.msk.f32.gmra.mxu0 %vm2754_vm2, %v7954_v33 }
0x13aa   :  { %10088 = vmatmul.msk.f32.gmra.mxu2 %vm2754_vm2, %v13676_v58 }
0x13b0   :  { %v7957_v25 = vpop.f32.mrf.mxu1 }
0x13b1   :  { %10085 = vmatmul.msk.f32.gmra.mxu0 %vm2754_vm2, %v7957_v25 }
0x13b2   :  { %10089 = vmatmul.msk.f32.gmra.mxu2 %vm2754_vm2, %v13677_v20 }
0x13b8   :  { %v8106_v37 = vpop.f32.mrf.mxu1 }
0x13b9   :  { %10098 = vmatmul.msk.f32.vlgmr.msra.gmra.mxu0 %vm2754_vm2, %v8106_v37 }
0x13bc   :  { %v7603_v11 = vpop.f32.mrf.mxu3 }
0x13bd   :  { %v13247_v4 = vpop.f32.mrf.mxu2 }
0x13be   :  { %v7604_v33 = vadd.f32 %v7603_v11, %v13247_v4 }
0x13c0   :  { %v8109_v9 = vpop.f32.mrf.mxu1 }
0x13c1   :  { %10099 = vmatmul.msk.f32.gmra.mxu0 %vm2754_vm2, %v8109_v9 }
0x13c4   :  { %v7606_v48 = vpop.f32.mrf.mxu3 }
0x13c5   :  { %v13249_v12 = vpop.f32.mrf.mxu2 }
0x13c6   :  { %v7607_v22 = vadd.f32 %v7606_v48, %v13249_v12  ;;  %v10242_v48 = vld [vmem:[#allocation37] ss:$0 sm:$0xff] }
0x13c8   :  { %v8112_v29 = vpop.f32.mrf.mxu1 }
0x13c9   :  { %10100 = vmatmul.msk.f32.gmra.mxu0 %vm2754_vm2, %v8112_v29 }
0x13cc   :  { %v7609_v2 = vpop.f32.mrf.mxu3 }
0x13cd   :  { %v13252_v50 = vpop.f32.mrf.mxu2 }
0x13ce   :  { %v7610_v34 = vadd.f32 %v7609_v2, %v13252_v50  ;;  %v8438_v50 = vld [vmem:[#allocation38 + $0xc8] sm:$0xff] }
0x13d0   :  { %v8115_v36 = vpop.f32.mrf.mxu1 }
0x13d1   :  { %10101 = vmatmul.msk.f32.gmra.mxu0 %vm2754_vm2, %v8115_v36  ;;  %v8242_v36 = vld [vmem:[#allocation38 + $0x60] sm:$0xff] }
0x13d4   :  { %v7612_v52 = vpop.f32.mrf.mxu3 }
0x13d5   :  { %v13255_v39 = vpop.f32.mrf.mxu2 }
0x13d6   :  { %v7678_v53 = vpop.f32.mrf.mxu0 }
0x13dd   :  { %v7711_v14 = vpop.f32.mrf.mxu2 }
0x13de   :  { %10058 = vmatmul.msk.f32.vlgmr.msrb.gmra.mxu3 %vm2754_vm2, %v7711_v14  ;;  %v7681_v23 = vpop.f32.mrf.mxu0 }
0x13df   :  { %8068 = vmatpush.msrb.mxu3 %v8043_v13  ;;  %v7691_v10 = vadd.f32 %v7681_v23, %v7607_v22  ;;  %v7613_v13 = vadd.f32 %v7612_v52, %v13255_v39  ;;  %v8240_v23 = vld [vmem:[#allocation38 + $0x50] sm:$0xff]  ;;  %v8211_v52 = vld [vmem:[#allocation38 + $0x38] sm:$0xff] }
0x13e1   :  { %8069 = vmatpush.msrb.mxu3 %v8042_v30  ;;  %v7690_v30 = vadd.f32 %v7678_v53, %v7604_v33  ;;  %v8364_v33 = vld [vmem:[#allocation38 + $0xb0] sm:$0xff] }
0x13e3   :  { %8070 = vmatpush.msrb.mxu3 %v8041_v19 }
0x13e5   :  { %v7714_v28 = vpop.f32.mrf.mxu2  ;;  %8071 = vmatpush.msrb.mxu3 %v8040_v7 }
0x13e6   :  { %10059 = vmatmul.msk.f32.gmra.mxu3 %vm2754_vm2, %v7714_v28  ;;  %v7684_v5 = vpop.f32.mrf.mxu0  ;;  %v8444_v28 = vld [vmem:[#allocation38 + $0xf8] sm:$0xff] }
0x13e7   :  { %v7692_v40 = vadd.f32 %v7684_v5, %v7610_v34  ;;  %8480 = vmatpush.msrb.mxu0 %v8444_v28  ;;  %v8241_v28 = vld [vmem:[#allocation38 + $0x58] sm:$0xff] }
0x13e9   :  { %8481 = vmatpush.msrb.mxu0 %v8442_v55  ;;  %v8239_v55 = vld [vmem:[#allocation38 + $0x48] sm:$0xff] }
0x13eb   :  { %8482 = vmatpush.msrb.mxu0 %v8440_v1  ;;  %v8210_v1 = vld [vmem:[#allocation38 + $0x30] sm:$0xff] }
0x13ed   :  { %v7717_v54 = vpop.f32.mrf.mxu2  ;;  %8483 = vmatpush.msrb.mxu0 %v8438_v50  ;;  %v8208_v50 = vld [vmem:[#allocation38 + $0x20] sm:$0xff] }
0x13ee   :  { %10060 = vmatmul.msk.f32.gmra.mxu3 %vm2754_vm2, %v7717_v54  ;;  %v7687_v21 = vpop.f32.mrf.mxu0 }
0x13ef   :  { %v7693_v19 = vadd.f32 %v7687_v21, %v7613_v13  ;;  %v8238_v21 = vld [vmem:[#allocation38 + $0x40] sm:$0xff] }
0x13f0   :  { %v8362_v13 = vld [vmem:[#allocation38 + $0xa0] sm:$0xff] }
0x13f5   :  { %v7720_v60 = vpop.f32.mrf.mxu2 }
0x13f6   :  { %10061 = vmatmul.msk.f32.gmra.mxu3 %vm2754_vm2, %v7720_v60  ;;  %v7836_v41 = vpop.f32.mrf.mxu0 }
0x13fd   :  { %v7869_v35 = vpop.f32.mrf.mxu2 }
0x13fe   :  { %10074 = vmatmul.msk.f32.vlgmr.msra.gmra.mxu3 %vm2754_vm2, %v7869_v35  ;;  %v7839_v3 = vpop.f32.mrf.mxu0 }
0x1405   :  { %v7872_v46 = vpop.f32.mrf.mxu2 }
0x1406   :  { %10075 = vmatmul.msk.f32.gmra.mxu3 %vm2754_vm2, %v7872_v46  ;;  %v7842_v58 = vpop.f32.mrf.mxu0 }
0x140d   :  { %v7875_v42 = vpop.f32.mrf.mxu2 }
0x140e   :  { %10076 = vmatmul.msk.f32.gmra.mxu3 %vm2754_vm2, %v7875_v42  ;;  %v7845_v26 = vpop.f32.mrf.mxu0 }
0x1415   :  { %v7878_v59 = vpop.f32.mrf.mxu2 }
0x1416   :  { %10077 = vmatmul.msk.f32.gmra.mxu3 %vm2754_vm2, %v7878_v59  ;;  %v7994_v18 = vpop.f32.mrf.mxu0 }
0x141d   :  { %v8027_v47 = vpop.f32.mrf.mxu2 }
0x141e   :  { %10090 = vmatmul.msk.f32.vlgmr.msrb.gmra.mxu3 %vm2754_vm2, %v8027_v47  ;;  %v7997_v0 = vpop.f32.mrf.mxu0  ;;  %v8244_v47 = vld [vmem:[#allocation38 + $0x70] sm:$0xff] }
0x141f   :  { %8261 = vmatpush.msrb.mxu1 %v8244_v47  ;;  %v8520_v47 = vld [vmem:[#allocation38 + $0x120] sm:$0xff] }
0x1421   :  { %8262 = vmatpush.msrb.mxu1 %v8242_v36  ;;  %v8518_v36 = vld [vmem:[#allocation38 + $0x110] sm:$0xff] }
0x1423   :  { %8263 = vmatpush.msrb.mxu1 %v8240_v23  ;;  %v8517_v23 = vld [vmem:[#allocation38 + $0x108] sm:$0xff] }
0x1425   :  { %v8030_v49 = vpop.f32.mrf.mxu2  ;;  %8264 = vmatpush.msrb.mxu1 %v8238_v21  ;;  %v8516_v21 = vld [vmem:[#allocation38 + $0x100] sm:$0xff] }
0x1426   :  { %10091 = vmatmul.msk.f32.gmra.mxu3 %vm2754_vm2, %v8030_v49  ;;  %v8000_v57 = vpop.f32.mrf.mxu0 }
0x1427   :  { %8324 = vmatpush.msra.mxu1 %v8211_v52  ;;  %v8598_v52 = vld [vmem:[#allocation38 + $0x158] sm:$0xff] }
0x142d   :  { %v8033_v45 = vpop.f32.mrf.mxu2 }
0x142e   :  { %10092 = vmatmul.msk.f32.gmra.mxu3 %vm2754_vm2, %v8033_v45  ;;  %v8003_v38 = vpop.f32.mrf.mxu0 }
0x1435   :  { %v8036_v32 = vpop.f32.mrf.mxu2 }
0x1436   :  { %10093 = vmatmul.msk.f32.gmra.mxu3 %vm2754_vm2, %v8036_v32  ;;  %v8152_v61 = vpop.f32.mrf.mxu0 }
0x143e   :  { %v8155_v31 = vpop.f32.mrf.mxu0 }
0x1446   :  { %v8158_v25 = vpop.f32.mrf.mxu0 }
0x144e   :  { %v8161_v45 = vpop.f32.mrf.mxu0 }
0x1461   :  { %v7757_v20 = vpop.f32.mrf.mxu3 }
0x1462   :  { %v7769_v35 = vadd.f32 %v7757_v20, %v7690_v30  ;;  %v8365_v30 = vld [vmem:[#allocation38 + $0xb8] sm:$0xff] }
0x1464   :  { %v7848_v43 = vadd.f32 %v7836_v41, %v7769_v35  ;;  %v10244_v41 = vld [vmem:[#allocation34] ss:$0 sm:$0xff]  ;;  %v8363_v35 = vld [vmem:[#allocation38 + $0xa8] sm:$0xff] }
0x1469   :  { %v7760_v63 = vpop.f32.mrf.mxu3 }
0x146a   :  { %v7770_v15 = vadd.f32 %v7760_v63, %v7691_v10 }
0x146c   :  { %v7849_v6 = vadd.f32 %v7839_v3, %v7770_v15  ;;  %v13679_v15 = vld [vmem:[#allocation84_spill] sm:$0xff] }
0x1471   :  { %v7763_v51 = vpop.f32.mrf.mxu3 }
0x1472   :  { %v7771_v8 = vadd.f32 %v7763_v51, %v7692_v40  ;;  %v8207_v51 = vld [vmem:[#allocation38 + $0x18] sm:$0xff] }
0x1474   :  { %v7850_v17 = vadd.f32 %v7842_v58, %v7771_v8  ;;  %v13678_v58 = vld [vmem:[#allocation89_spill] sm:$0xff] }
0x1475   :  { %v6459_v20 = vadd.f32 %v10242_v48, %v13678_v58  ;;  %v13680_v8 = vld [vmem:[#allocation77_spill] sm:$0xff] }
0x1476   :  { %v8597_v58 = vld [vmem:[#allocation38 + $0x150] sm:$0xff] }
0x1479   :  { %v7766_v56 = vpop.f32.mrf.mxu3 }
0x147a   :  { %v7772_v7 = vadd.f32 %v7766_v56, %v7693_v19 }
0x147c   :  { %v7851_v46 = vadd.f32 %v7845_v26, %v7772_v7  ;;  %v8209_v26 = vld [vmem:[#allocation38 + $0x28] sm:$0xff] }
0x147d   :  { %8325 = vmatpush.msra.mxu1 %v8209_v26 }
0x147f   :  { %8326 = vmatpush.msra.mxu1 %v8207_v51  ;;  %v8680_v51 = vld [vmem:[#allocation38 + $0x1b0] sm:$0xff] }
0x1481   :  { %v7915_v14 = vpop.f32.mrf.mxu3 }
0x1482   :  { %v7927_v37 = vadd.f32 %v7915_v14, %v7848_v43  ;;  %v8412_v43 = vld [vmem:[#allocation10 + $0x6] sm:$0x3] }
0x1484   :  { %v8006_v4 = vadd.f32 %v7994_v18, %v7927_v37  ;;  %v6453_v18 = vadd.f32 %v10242_v48, %v13680_v8  ;;  %v8443_v37 = vld [vmem:[#allocation38 + $0xf0] sm:$0xff]  ;;  %v8678_v8 = vld [vmem:[#allocation38 + $0x1a0] sm:$0xff] }
0x1489   :  { %v7918_v27 = vpop.f32.mrf.mxu3 }
0x148a   :  { %v7928_v16 = vadd.f32 %v7918_v27, %v7849_v6  ;;  %v6456_v6 = vadd.f32 %v10242_v48, %v13679_v15  ;;  %v8677_v15 = vld [vmem:[#allocation38 + $0x198] sm:$0xff] }
0x148c   :  { %v8007_v59 = vadd.f32 %v7997_v0, %v7928_v16  ;;  %v13681_v0 = vld [vmem:[#allocation78_spill] sm:$0xff]  ;;  %v8358_v16 = vld [vmem:[#allocation38 + $0x80] sm:$0xff] }
0x148d   :  { %v6450_v14 = vadd.f32 %v10242_v48, %v13681_v0  ;;  %v8602_v48 = vld [vmem:[#allocation38 + $0x178] sm:$0xff] }
0x1491   :  { %v7921_v62 = vpop.f32.mrf.mxu3 }
0x1492   :  { %v7929_v44 = vadd.f32 %v7921_v62, %v7850_v17  ;;  %v8213_v62 = vld [vmem:[#allocation10 + $0x2] sm:$0x3] }
0x1494   :  { %v8008_v42 = vadd.f32 %v8000_v57, %v7929_v44  ;;  %v8359_v44 = vld [vmem:[#allocation38 + $0x88] sm:$0xff] }
0x1499   :  { %v7924_v12 = vpop.f32.mrf.mxu3 }
0x149a   :  { %v7930_v9 = vadd.f32 %v7924_v12, %v7851_v46  ;;  %v8180_v12 = vld [vmem:[#allocation10] sm:$0x3]  ;;  %v8360_v46 = vld [vmem:[#allocation38 + $0x90] sm:$0xff] }
0x149c   :  { %v8009_v49 = vadd.f32 %v8003_v38, %v7930_v9  ;;  %v8245_v38 = vld [vmem:[#allocation38 + $0x78] sm:$0xff]  ;;  %v8439_v9 = vld [vmem:[#allocation38 + $0xd0] sm:$0xff] }
0x14a1   :  { %v8073_v54 = vpop.f32.mrf.mxu3 }
0x14a2   :  { %v8085_v32 = vadd.f32 %v8073_v54, %v8006_v4  ;;  %v8206_v54 = vld [vmem:[#allocation38 + $0x10] sm:$0xff] }
0x14a4   :  { %v8164_v22 = vadd.f32 %v8152_v61, %v8085_v32  ;;  %v8243_v61 = vld [vmem:[#allocation38 + $0x68] sm:$0xff] }
0x14a5   :  { %v8491_v32 = vld [vmem:[#allocation10 + $0x8] sm:$0x3] }
0x14a6   :  { %v8171_v17 = vadd.f32 %v10244_v41, %v8164_v22  ;;  %v8595_v22 = vld [vmem:[#allocation38 + $0x140] sm:$0xff] }
0x14a8   :  { %v13299_v27 = vadd.f32 %v8171_v17, %v6450_v14 }
0x14a9   :  { %v8076_v60 = vpop.f32.mrf.mxu3 }
0x14aa   :  { %v8086_v39 = vadd.f32 %v8076_v60, %v8007_v59  ;;  %v8204_v60 = vld [vmem:[#allocation38] sm:$0xff] }
0x14ab   :  { %v8437_v59 = vld [vmem:[#allocation38 + $0xc0] sm:$0xff] }
0x14ac   :  { %v8165_v2 = vadd.f32 %v8155_v31, %v8086_v39  ;;  %v8205_v31 = vld [vmem:[#allocation38 + $0x8] sm:$0xff] }
0x14ad   :  { %8327 = vmatpush.msra.mxu1 %v8205_v31  ;;  %v8728_v31 = vld [vmem:[#allocation10 + $0xe] sm:$0x3] }
0x14ae   :  { %v8172_v34 = vadd.f32 %v10244_v41, %v8165_v2  ;;  %v8600_v2 = vld [vmem:[#allocation38 + $0x168] sm:$0xff] }
0x14b0   :  { %v13294_v57 = vadd.f32 %v8172_v34, %v6453_v18  ;;  %v8676_v18 = vld [vmem:[#allocation38 + $0x190] sm:$0xff] }
0x14b1   :  { %v8079_v24 = vpop.f32.mrf.mxu3 }
0x14b2   :  { %v8087_v29 = vadd.f32 %v8079_v24, %v8008_v42  ;;  %v8333_v24 = vld [vmem:[#allocation10 + $0x4] sm:$0x3] }
0x14b3   :  { %v8441_v42 = vld [vmem:[#allocation38 + $0xe0] sm:$0xff] }
0x14b4   :  { %v8166_v5 = vadd.f32 %v8158_v25, %v8087_v29  ;;  %v8361_v25 = vld [vmem:[#allocation38 + $0x98] sm:$0xff]  ;;  %v8522_v29 = vld [vmem:[#allocation38 + $0x130] sm:$0xff] }
0x14b6   :  { %v8173_v10 = vadd.f32 %v10244_v41, %v8166_v5 }
0x14b8   :  { %v13288_v56 = vadd.f32 %v8173_v10, %v6456_v6  ;;  %v8681_v10 = vld [vmem:[#allocation38 + $0x1b8] sm:$0xff]  ;;  %v8675_v6 = vld [vmem:[#allocation38 + $0x188] sm:$0xff] }
0x14b9   :  { %v8082_v53 = vpop.f32.mrf.mxu3 }
0x14ba   :  { %v8088_v11 = vadd.f32 %v8082_v53, %v8009_v49  ;;  %v8523_v49 = vld [vmem:[#allocation38 + $0x138] sm:$0xff]  ;;  %v8521_v53 = vld [vmem:[#allocation38 + $0x128] sm:$0xff] }
0x14bc   :  { %v8167_v3 = vadd.f32 %v8161_v45, %v8088_v11  ;;  %v8519_v45 = vld [vmem:[#allocation38 + $0x118] sm:$0xff]  ;;  %v8570_v11 = vld [vmem:[#allocation10 + $0xa] sm:$0x3] }
0x14be   :  { %v8174_v63 = vadd.f32 %v10244_v41, %v8167_v3  ;;  %v8601_v41 = vld [vmem:[#allocation38 + $0x170] sm:$0xff]  ;;  %v8599_v3 = vld [vmem:[#allocation38 + $0x160] sm:$0xff] }
0x14c0   :  { %v13285_v40 = vadd.f32 %v8174_v63, %v6459_v20  ;;  %v8596_v20 = vld [vmem:[#allocation38 + $0x148] sm:$0xff] }
0x14c1   :  { %v8679_v63 = vld [vmem:[#allocation38 + $0x1a8] sm:$0xff] }
0x14c2   :  { %8196 = vmatpush.msra.mxu2 %v13285_v40  ;;  %8229 = vmatpush.msra.mxu3 %v13285_v40 }
0x14c3   :  { %8586 = vmatpush.msra.mxu0 %v13285_v40 }
0x14c4   :  { %8197 = vmatpush.msra.mxu2 %v13288_v56  ;;  %8230 = vmatpush.msra.mxu3 %v13288_v56 }
0x14c5   :  { %8587 = vmatpush.msra.mxu0 %v13288_v56 }
0x14c6   :  { %8198 = vmatpush.msra.mxu2 %v13294_v57  ;;  %8231 = vmatpush.msra.mxu3 %v13294_v57 }
0x14c7   :  { %8588 = vmatpush.msra.mxu0 %v13294_v57 }
0x14c8   :  { %8199 = vmatpush.msra.mxu2 %v13299_v27  ;;  %8232 = vmatpush.msra.mxu3 %v13299_v27 }
0x14c9   :  { %8589 = vmatpush.msra.mxu0 %v13299_v27  ;;  %10103 = vmatmul.msk.f32.vlgmr.msra.gmra.mxu3 %vm2754_vm2, %v8213_v62 }
0x14ca   :  { %8281 = vmatpush.msrb.mxu2 %v8245_v38  ;;  %8304 = vmatpush.msrb.mxu3 %v8210_v1 }
0x14cb   :  { %10102 = vmatmul.msk.f32.vlgmr.msra.gmra.mxu2 %vm2754_vm2, %v8180_v12 }
0x14cc   :  { %8282 = vmatpush.msrb.mxu2 %v8243_v61  ;;  %8305 = vmatpush.msrb.mxu3 %v8208_v50  ;;  %v8649_v50 = vld [vmem:[#allocation10 + $0xc] sm:$0x3] }
0x14ce   :  { %8283 = vmatpush.msrb.mxu2 %v8241_v28  ;;  %8306 = vmatpush.msrb.mxu3 %v8206_v54 }
0x14d0   :  { %8284 = vmatpush.msrb.mxu2 %v8239_v55  ;;  %8307 = vmatpush.msrb.mxu3 %v8204_v60  ;;  %v8674_v60 = vld [vmem:[#allocation38 + $0x180] sm:$0xff] }
0x14d2   :  { %8349 = vmatpush.msra.mxu2 %v13285_v40  ;;  %8381 = vmatpush.msra.mxu3 %v8364_v33  ;;  %v8760_v33 = vld [vmem:[#allocation38 + $0x1f8] sm:$0xff] }
0x14d4   :  { %8350 = vmatpush.msra.mxu2 %v13288_v56  ;;  %8382 = vmatpush.msra.mxu3 %v8362_v13  ;;  %v8759_v13 = vld [vmem:[#allocation38 + $0x1f0] sm:$0xff] }
0x14d6   :  { %8351 = vmatpush.msra.mxu2 %v13294_v57  ;;  %8383 = vmatpush.msra.mxu3 %v8360_v46  ;;  %v8835_v46 = vld [vmem:[#allocation38 + $0x218] sm:$0xff] }
0x14d8   :  { %8352 = vmatpush.msra.mxu2 %v13299_v27  ;;  %8384 = vmatpush.msra.mxu3 %v8358_v16  ;;  %v8833_v16 = vld [vmem:[#allocation38 + $0x208] sm:$0xff] }
0x154c   :  { %v8234_v19 = vpop.f32.mrf.mxu3 }
0x154d   :  { %10104 = vmatmul.msk.f32.vlgmr.msrb.gmra.mxu1 %vm2754_vm2, %v8234_v19  ;;  %10105 = vmatmul.msk.f32.vlgmr.msrb.gmra.mxu2 %vm2754_vm2, %v8234_v19  ;;  %v8757_v19 = vld [vmem:[#allocation38 + $0x1e0] sm:$0xff] }
0x154e   :  { %8428 = vmatpush.msrb.mxu2 %v13285_v40  ;;  %8401 = vmatpush.msrb.mxu1 %v8365_v30  ;;  %v8201_v7 = vpop.f32.mrf.mxu2  ;;  %v8758_v30 = vld [vmem:[#allocation38 + $0x1e8] sm:$0xff] }
0x154f   :  { %10106 = vmatmul.msk.f32.vlgmr.msrb.gmra.mxu3 %vm2754_vm2, %v8201_v7 }
0x1550   :  { %8429 = vmatpush.msrb.mxu2 %v13288_v56  ;;  %8402 = vmatpush.msrb.mxu1 %v8363_v35  ;;  %v8756_v35 = vld [vmem:[#allocation38 + $0x1d8] sm:$0xff] }
0x1551   :  { %8460 = vmatpush.msrb.mxu3 %v8443_v37 }
0x1552   :  { %8430 = vmatpush.msrb.mxu2 %v13294_v57  ;;  %8403 = vmatpush.msrb.mxu1 %v8361_v25  ;;  %v8754_v25 = vld [vmem:[#allocation38 + $0x1c8] sm:$0xff] }
0x1553   :  { %8461 = vmatpush.msrb.mxu3 %v8441_v42  ;;  %v8838_v42 = vld [vmem:[#allocation38 + $0x230] sm:$0xff] }
0x1554   :  { %8431 = vmatpush.msrb.mxu2 %v13299_v27  ;;  %8404 = vmatpush.msrb.mxu1 %v8359_v44  ;;  %v8753_v44 = vld [vmem:[#allocation38 + $0x1c0] sm:$0xff] }
0x1555   :  { %10107 = vmatmul.msk.f32.vlgmr.msra.gmra.mxu1 %vm2754_vm2, %v8201_v7  ;;  %10108 = vmatmul.msk.f32.vlgmr.msra.gmra.mxu2 %vm2754_vm2, %v8333_v24  ;;  %v8755_v7 = vld [vmem:[#allocation38 + $0x1d0] sm:$0xff]  ;;  %v8839_v24 = vld [vmem:[#allocation38 + $0x238] sm:$0xff] }
0x1556   :  { %8507 = vmatpush.msra.mxu1 %v13285_v40  ;;  %8462 = vmatpush.msrb.mxu3 %v8439_v9  ;;  %v8836_v9 = vld [vmem:[#allocation38 + $0x220] sm:$0xff] }
0x1557   :  { %8539 = vmatpush.msra.mxu2 %v8522_v29 }
0x1558   :  { %8508 = vmatpush.msra.mxu1 %v13288_v56  ;;  %8463 = vmatpush.msrb.mxu3 %v8437_v59  ;;  %v8834_v59 = vld [vmem:[#allocation38 + $0x210] sm:$0xff] }
0x1559   :  { %8540 = vmatpush.msra.mxu2 %v8520_v47 }
0x155a   :  { %8509 = vmatpush.msra.mxu1 %v13294_v57 }
0x155b   :  { %8541 = vmatpush.msra.mxu2 %v8518_v36 }
0x155c   :  { %8510 = vmatpush.msra.mxu1 %v13299_v27 }
0x155d   :  { %10111 = vmatmul.msk.f32.vlgmr.msrb.gmra.mxu2 %vm2754_vm2, %v8412_v43  ;;  %v8837_v43 = vld [vmem:[#allocation38 + $0x228] sm:$0xff] }
0x155e   :  { %8542 = vmatpush.msra.mxu2 %v8516_v21  ;;  %v8918_v21 = vld [vmem:[#allocation38 + $0x278] sm:$0xff] }
0x1560   :  { %8638 = vmatpush.msrb.mxu2 %v8602_v48  ;;  %v8917_v48 = vld [vmem:[#allocation38 + $0x270] sm:$0xff] }
0x1562   :  { %8639 = vmatpush.msrb.mxu2 %v8600_v2  ;;  %v8915_v2 = vld [vmem:[#allocation38 + $0x260] sm:$0xff] }
0x1564   :  { %8640 = vmatpush.msrb.mxu2 %v8598_v52  ;;  %v8914_v52 = vld [vmem:[#allocation38 + $0x258] sm:$0xff] }
0x1566   :  { %8641 = vmatpush.msrb.mxu2 %v8596_v20  ;;  %v8911_v20 = vld [vmem:[#allocation38 + $0x240] sm:$0xff] }
0x15ca   :  { %v8266_v26 = vpop.f32.mrf.mxu1 }
0x15d0   :  { %v8286_v4 = vpop.f32.mrf.mxu2 }
0x15d2   :  { %v8329_v34 = vpop.f32.mrf.mxu1  ;;  %v8309_v17 = vpop.f32.mrf.mxu3 }
0x15d3   :  { %v8330_v0 = vadd.f32 %v8329_v34, %v8286_v4  ;;  %v8310_v38 = vadd.f32 %v8309_v17, %v8266_v26  ;;  %v8991_v26 = vld [vmem:[#allocation38 + $0x288] sm:$0xff]  ;;  %v8994_v34 = vld [vmem:[#allocation38 + $0x2a0] sm:$0xff] }
0x15d8   :  { %v8354_v39 = vpop.f32.mrf.mxu2 }
0x15d9   :  { %10109 = vmatmul.msk.f32.vlgmr.msra.gmra.mxu3 %vm2754_vm2, %v8354_v39  ;;  %10110 = vmatmul.msk.f32.vlgmr.msrb.gmra.mxu1 %vm2754_vm2, %v8354_v39 }
0x15da   :  { %8559 = vmatpush.msra.mxu3 %v8523_v49  ;;  %8618 = vmatpush.msrb.mxu1 %v8601_v41  ;;  %v8916_v41 = vld [vmem:[#allocation38 + $0x268] sm:$0xff] }
0x15dc   :  { %8560 = vmatpush.msra.mxu3 %v8521_v53  ;;  %8619 = vmatpush.msrb.mxu1 %v8599_v3  ;;  %v8913_v3 = vld [vmem:[#allocation38 + $0x250] sm:$0xff] }
0x15de   :  { %8561 = vmatpush.msra.mxu3 %v8519_v45  ;;  %8620 = vmatpush.msrb.mxu1 %v8597_v58  ;;  %v8912_v58 = vld [vmem:[#allocation38 + $0x248] sm:$0xff] }
0x15e0   :  { %v8433_v5 = vpop.f32.mrf.mxu2  ;;  %8562 = vmatpush.msra.mxu3 %v8517_v23  ;;  %8621 = vmatpush.msrb.mxu1 %v8595_v22  ;;  %v8807_v23 = vld [vmem:[#allocation10 + $0x10] sm:$0x3]  ;;  %v8997_v22 = vld [vmem:[#allocation38 + $0x2b8] sm:$0xff] }
0x15e1   :  { %10112 = vmatmul.msk.f32.vlgmr.msrb.gmra.mxu3 %vm2754_vm2, %v8433_v5  ;;  %10113 = vmatmul.msk.f32.vlgmr.msrb.gmra.mxu0 %vm2754_vm2, %v8433_v5  ;;  %v8886_v5 = vld [vmem:[#allocation10 + $0x12] sm:$0x3] }
0x15e2   :  { %10114 = vmatmul.msk.f32.vlgmr.msra.gmra.mxu1 %vm2754_vm2, %v8491_v32  ;;  %8665 = vmatpush.msrb.mxu3 %v13285_v40 }
0x15e3   :  { %8717 = vmatpush.msra.mxu1 %v8681_v10  ;;  %8697 = vmatpush.msrb.mxu0 %v8680_v51  ;;  %v8995_v10 = vld [vmem:[#allocation38 + $0x2a8] sm:$0xff]  ;;  %v8992_v51 = vld [vmem:[#allocation38 + $0x290] sm:$0xff] }
0x15e4   :  { %8666 = vmatpush.msrb.mxu3 %v13288_v56 }
0x15e5   :  { %8718 = vmatpush.msra.mxu1 %v8679_v63  ;;  %8698 = vmatpush.msrb.mxu0 %v8678_v8  ;;  %v8993_v63 = vld [vmem:[#allocation38 + $0x298] sm:$0xff] }
0x15e6   :  { %8667 = vmatpush.msrb.mxu3 %v13294_v57 }
0x15e7   :  { %8719 = vmatpush.msra.mxu1 %v8677_v15  ;;  %8699 = vmatpush.msrb.mxu0 %v8676_v18 }
0x15e8   :  { %8668 = vmatpush.msrb.mxu3 %v13299_v27 }
0x15e9   :  { %10117 = vmatmul.msk.f32.vlgmr.msra.gmra.mxu0 %vm2754_vm2, %v8570_v11  ;;  %8720 = vmatpush.msra.mxu1 %v8675_v6  ;;  %v8832_v11 = vld [vmem:[#allocation38 + $0x200] sm:$0xff]  ;;  %v8996_v6 = vld [vmem:[#allocation38 + $0x2b0] sm:$0xff] }
0x15ea   :  { %8700 = vmatpush.msrb.mxu0 %v8674_v60  ;;  %v9073_v60 = vld [vmem:[#allocation38 + $0x2e0] sm:$0xff] }
0x15ec   :  { %8796 = vmatpush.msra.mxu0 %v8760_v33  ;;  %v9072_v33 = vld [vmem:[#allocation38 + $0x2d8] sm:$0xff] }
0x15ee   :  { %8797 = vmatpush.msra.mxu0 %v8758_v30  ;;  %v9070_v30 = vld [vmem:[#allocation38 + $0x2c8] sm:$0xff] }
0x15f0   :  { %8798 = vmatpush.msra.mxu0 %v8756_v35  ;;  %v9155_v35 = vld [vmem:[#allocation38 + $0x338] sm:$0xff] }
0x15f2   :  { %8799 = vmatpush.msra.mxu0 %v8754_v25  ;;  %v9151_v25 = vld [vmem:[#allocation38 + $0x318] sm:$0xff] }
0x1656   :  { %v8406_v14 = vpop.f32.mrf.mxu1 }
0x1657   :  { %v8410_v62 = vadd.f32 %v8406_v14, %v8330_v0 }
0x165c   :  { %v8386_v12 = vpop.f32.mrf.mxu3 }
0x165d   :  { %v8409_v61 = vadd.f32 %v8386_v12, %v8310_v38 }
0x165e   :  { %v8485_v28 = vpop.f32.mrf.mxu0 }
0x165f   :  { %v8489_v55 = vadd.f32 %v8485_v28, %v8410_v62  ;;  %v8512_v1 = vpop.f32.mrf.mxu1 }
0x1660   :  { %10115 = vmatmul.msk.f32.vlgmr.msra.gmra.mxu2 %vm2754_vm2, %v8512_v1  ;;  %10116 = vmatmul.msk.f32.vlgmr.msra.gmra.mxu3 %vm2754_vm2, %v8512_v1  ;;  %v8990_v1 = vld [vmem:[#allocation38 + $0x280] sm:$0xff] }
0x1661   :  { %8744 = vmatpush.msra.mxu2 %v13285_v40  ;;  %8776 = vmatpush.msra.mxu3 %v8759_v13  ;;  %v9071_v13 = vld [vmem:[#allocation38 + $0x2d0] sm:$0xff] }
0x1663   :  { %8745 = vmatpush.msra.mxu2 %v13288_v56  ;;  %8777 = vmatpush.msra.mxu3 %v8757_v19  ;;  %v9069_v19 = vld [vmem:[#allocation38 + $0x2c0] sm:$0xff] }
0x1664   :  { %v8465_v37 = vpop.f32.mrf.mxu3 }
0x1665   :  { %8746 = vmatpush.msra.mxu2 %v13294_v57  ;;  %8778 = vmatpush.msra.mxu3 %v8755_v7  ;;  %v8488_v29 = vadd.f32 %v8465_v37, %v8409_v61  ;;  %v8965_v61 = vld [vmem:[#allocation10 + $0x14] sm:$0x3]  ;;  %v9153_v7 = vld [vmem:[#allocation38 + $0x328] sm:$0xff] }
0x1666   :  { %v8591_v54 = vpop.f32.mrf.mxu0 }
0x1667   :  { %8747 = vmatpush.msra.mxu2 %v13299_v27  ;;  %10118 = vmatmul.msk.f32.vlgmr.msrb.gmra.mxu1 %vm2754_vm2, %v8591_v54 }
0x1668   :  { %10119 = vmatmul.msk.f32.vlgmr.msrb.gmra.mxu2 %vm2754_vm2, %v8591_v54  ;;  %10120 = vmatmul.msk.f32.vlgmr.msrb.gmra.mxu3 %vm2754_vm2, %v8649_v50  ;;  %v9076_v50 = vld [vmem:[#allocation38 + $0x2f8] sm:$0xff]  ;;  %v9075_v54 = vld [vmem:[#allocation38 + $0x2f0] sm:$0xff] }
0x1669   :  { %8823 = vmatpush.msrb.mxu1 %v13285_v40  ;;  %8779 = vmatpush.msra.mxu3 %v8753_v44  ;;  %v9149_v44 = vld [vmem:[#allocation38 + $0x308] sm:$0xff] }
0x166a   :  { %8855 = vmatpush.msrb.mxu2 %v8838_v42 }
0x166b   :  { %8824 = vmatpush.msrb.mxu1 %v13288_v56  ;;  %8875 = vmatpush.msrb.mxu3 %v8839_v24 }
0x166c   :  { %8856 = vmatpush.msrb.mxu2 %v8836_v9 }
0x166d   :  { %8825 = vmatpush.msrb.mxu1 %v13294_v57  ;;  %8876 = vmatpush.msrb.mxu3 %v8837_v43  ;;  %v9154_v43 = vld [vmem:[#allocation38 + $0x330] sm:$0xff] }
0x166e   :  { %8857 = vmatpush.msrb.mxu2 %v8834_v59 }
0x166f   :  { %8826 = vmatpush.msrb.mxu1 %v13299_v27  ;;  %8877 = vmatpush.msrb.mxu3 %v8835_v46  ;;  %v9152_v46 = vld [vmem:[#allocation38 + $0x320] sm:$0xff] }
0x1670   :  { %10123 = vmatmul.msk.f32.vlgmr.msra.gmra.mxu2 %vm2754_vm2, %v8728_v31  ;;  %v9074_v31 = vld [vmem:[#allocation38 + $0x2e8] sm:$0xff] }
0x1671   :  { %8878 = vmatpush.msrb.mxu3 %v8833_v16  ;;  %8858 = vmatpush.msrb.mxu2 %v8832_v11  ;;  %v9150_v16 = vld [vmem:[#allocation38 + $0x310] sm:$0xff]  ;;  %v9228_v11 = vld [vmem:[#allocation38 + $0x348] sm:$0xff] }
0x1673   :  { %8954 = vmatpush.msra.mxu2 %v8918_v21  ;;  %v9233_v21 = vld [vmem:[#allocation38 + $0x370] sm:$0xff] }
0x1675   :  { %8955 = vmatpush.msra.mxu2 %v8916_v41  ;;  %v9229_v41 = vld [vmem:[#allocation38 + $0x350] sm:$0xff] }
0x1677   :  { %8956 = vmatpush.msra.mxu2 %v8914_v52 }
0x1679   :  { %8957 = vmatpush.msra.mxu2 %v8912_v58 }
0x16e3   :  { %v8544_v47 = vpop.f32.mrf.mxu2  ;;  %v8564_v36 = vpop.f32.mrf.mxu3 }
0x16e4   :  { %v8567_v4 = vadd.f32 %v8544_v47, %v8488_v29  ;;  %v8568_v49 = vadd.f32 %v8564_v36, %v8489_v55  ;;  %v8623_v15 = vpop.f32.mrf.mxu1  ;;  %v9044_v55 = vld [vmem:[#allocation10 + $0x16] sm:$0x3] }
0x16e6   :  { %v8646_v8 = vadd.f32 %v8623_v15, %v8567_v4 }
0x16eb   :  { %v8643_v39 = vpop.f32.mrf.mxu2  ;;  %v8670_v53 = vpop.f32.mrf.mxu3 }
0x16ec   :  { %v8647_v45 = vadd.f32 %v8643_v39, %v8568_v49  ;;  %10121 = vmatmul.msk.f32.vlgmr.msrb.gmra.mxu0 %vm2754_vm2, %v8670_v53  ;;  %10122 = vmatmul.msk.f32.vlgmr.msra.gmra.mxu1 %vm2754_vm2, %v8670_v53  ;;  %v9123_v49 = vld [vmem:[#allocation10 + $0x18] sm:$0x3]  ;;  %v9202_v53 = vld [vmem:[#allocation10 + $0x1a] sm:$0x3] }
0x16ed   :  { %8902 = vmatpush.msrb.mxu0 %v13285_v40  ;;  %8934 = vmatpush.msra.mxu1 %v8917_v48  ;;  %v9231_v48 = vld [vmem:[#allocation38 + $0x360] sm:$0xff] }
0x16ef   :  { %8903 = vmatpush.msrb.mxu0 %v13288_v56  ;;  %8935 = vmatpush.msra.mxu1 %v8915_v2  ;;  %v9227_v2 = vld [vmem:[#allocation38 + $0x340] sm:$0xff] }
0x16f1   :  { %8904 = vmatpush.msrb.mxu0 %v13294_v57  ;;  %8936 = vmatpush.msra.mxu1 %v8913_v3 }
0x16f3   :  { %8905 = vmatpush.msrb.mxu0 %v13299_v27  ;;  %v8749_v32 = vpop.f32.mrf.mxu2  ;;  %8937 = vmatpush.msra.mxu1 %v8911_v20 }
0x16f4   :  { %10124 = vmatmul.msk.f32.vlgmr.msra.gmra.mxu3 %vm2754_vm2, %v8749_v32  ;;  %10125 = vmatmul.msk.f32.vlgmr.msra.gmra.mxu0 %vm2754_vm2, %v8749_v32  ;;  %v9232_v32 = vld [vmem:[#allocation38 + $0x368] sm:$0xff] }
0x16f5   :  { %10126 = vmatmul.msk.f32.vlgmr.msrb.gmra.mxu1 %vm2754_vm2, %v8807_v23  ;;  %8981 = vmatpush.msra.mxu3 %v13285_v40  ;;  %v9234_v23 = vld [vmem:[#allocation38 + $0x378] sm:$0xff] }
0x16f6   :  { %9033 = vmatpush.msrb.mxu1 %v8997_v22  ;;  %9013 = vmatpush.msra.mxu0 %v8996_v6  ;;  %v9281_v6 = vld [vmem:[#allocation10 + $0x1c] sm:$0x3] }
0x16f7   :  { %8982 = vmatpush.msra.mxu3 %v13288_v56 }
0x16f8   :  { %9034 = vmatpush.msrb.mxu1 %v8995_v10  ;;  %9014 = vmatpush.msra.mxu0 %v8994_v34 }
0x16f9   :  { %8983 = vmatpush.msra.mxu3 %v13294_v57 }
0x16fa   :  { %9035 = vmatpush.msrb.mxu1 %v8993_v63  ;;  %9015 = vmatpush.msra.mxu0 %v8992_v51  ;;  %v9360_v51 = vld [vmem:[#allocation10 + $0x1e] sm:$0x3] }
0x16fb   :  { %8984 = vmatpush.msra.mxu3 %v13299_v27 }
0x16fc   :  { %10129 = vmatmul.msk.f32.vlgmr.msrb.gmra.mxu0 %vm2754_vm2, %v8886_v5  ;;  %9036 = vmatpush.msrb.mxu1 %v8991_v26  ;;  %v9230_v5 = vld [vmem:[#allocation38 + $0x358] sm:$0xff] }
0x16fd   :  { %9016 = vmatpush.msra.mxu0 %v8990_v1  ;;  %v9386_v1 = vld [vmem:[#allocation38 + $0x3c8] sm:$0xff] }
0x16ff   :  { %9112 = vmatpush.msrb.mxu0 %v9076_v50 }
0x1701   :  { %9113 = vmatpush.msrb.mxu0 %v9074_v31 }
0x1703   :  { %9114 = vmatpush.msrb.mxu0 %v9072_v33 }
0x1705   :  { %9115 = vmatpush.msrb.mxu0 %v9070_v30 }
0x1769   :  { %v8702_v18 = vpop.f32.mrf.mxu0  ;;  %v8722_v17 = vpop.f32.mrf.mxu1 }
0x176a   :  { %v8725_v0 = vadd.f32 %v8702_v18, %v8646_v8  ;;  %v8726_v14 = vadd.f32 %v8722_v17, %v8647_v45  ;;  %v9148_v45 = vld [vmem:[#allocation38 + $0x300] sm:$0xff]  ;;  %v9312_v8 = vld [vmem:[#allocation38 + $0x3b0] sm:$0xff]  ;;  %v9313_v18 = vld [vmem:[#allocation38 + $0x3b8] sm:$0xff] }
0x176b   :  { %v9309_v17 = vld [vmem:[#allocation38 + $0x398] sm:$0xff] }
0x1771   :  { %v8801_v62 = vpop.f32.mrf.mxu0 }
0x1772   :  { %v8805_v38 = vadd.f32 %v8801_v62, %v8726_v14  ;;  %v8828_v12 = vpop.f32.mrf.mxu1  ;;  %v9391_v14 = vld [vmem:[#allocation38 + $0x3f0] sm:$0xff]  ;;  %v9392_v62 = vld [vmem:[#allocation38 + $0x3f8] sm:$0xff] }
0x1773   :  { %10127 = vmatmul.msk.f32.vlgmr.msrb.gmra.mxu2 %vm2754_vm2, %v8828_v12  ;;  %10128 = vmatmul.msk.f32.vlgmr.msrb.gmra.mxu3 %vm2754_vm2, %v8828_v12  ;;  %v9390_v12 = vld [vmem:[#allocation38 + $0x3e8] sm:$0xff] }
0x1774   :  { %9060 = vmatpush.msrb.mxu2 %v13285_v40  ;;  %9092 = vmatpush.msrb.mxu3 %v9075_v54 }
0x1776   :  { %9061 = vmatpush.msrb.mxu2 %v13288_v56  ;;  %9093 = vmatpush.msrb.mxu3 %v9073_v60 }
0x1777   :  { %v8781_v24 = vpop.f32.mrf.mxu3 }
0x1778   :  { %9062 = vmatpush.msrb.mxu2 %v13294_v57  ;;  %9094 = vmatpush.msrb.mxu3 %v9071_v13  ;;  %v8804_v37 = vadd.f32 %v8781_v24, %v8725_v0  ;;  %v9307_v0 = vld [vmem:[#allocation38 + $0x388] sm:$0xff] }
0x1779   :  { %v8907_v28 = vpop.f32.mrf.mxu0 }
0x177a   :  { %9063 = vmatpush.msrb.mxu2 %v13299_v27  ;;  %10130 = vmatmul.msk.f32.vlgmr.msra.gmra.mxu1 %vm2754_vm2, %v8907_v28 }
0x177b   :  { %10131 = vmatmul.msk.f32.vlgmr.msra.gmra.mxu2 %vm2754_vm2, %v8907_v28  ;;  %10132 = vmatmul.msk.f32.vlgmr.msra.gmra.mxu3 %vm2754_vm2, %v8965_v61  ;;  %v9387_v61 = vld [vmem:[#allocation38 + $0x3d0] sm:$0xff]  ;;  %v9388_v28 = vld [vmem:[#allocation38 + $0x3d8] sm:$0xff] }
0x177c   :  { %9139 = vmatpush.msra.mxu1 %v13285_v40  ;;  %9095 = vmatpush.msrb.mxu3 %v9069_v19 }
0x177d   :  { %9171 = vmatpush.msra.mxu2 %v9154_v43  ;;  %v8179_v43 = vld [vmem:[#allocation40] sm:$0x3] }
0x177e   :  { %9140 = vmatpush.msra.mxu1 %v13288_v56  ;;  %9191 = vmatpush.msra.mxu3 %v9155_v35 }
0x177f   :  { %9172 = vmatpush.msra.mxu2 %v9152_v46 }
0x1780   :  { %9141 = vmatpush.msra.mxu1 %v13294_v57  ;;  %9192 = vmatpush.msra.mxu3 %v9153_v7 }
0x1781   :  { %9173 = vmatpush.msra.mxu2 %v9150_v16  ;;  %v9440_v16 = vperm.slane %v8179_v43, 1 }
0x1782   :  { %9142 = vmatpush.msra.mxu1 %v13299_v27  ;;  %9193 = vmatpush.msra.mxu3 %v9151_v25 }
0x1783   :  { %10135 = vmatmul.msk.f32.vlgmr.msrb.gmra.mxu2 %vm2754_vm2, %v9044_v55  ;;  %v9385_v55 = vld [vmem:[#allocation38 + $0x3c0] sm:$0xff] }
0x1784   :  { %9194 = vmatpush.msra.mxu3 %v9149_v44  ;;  %9174 = vmatpush.msra.mxu2 %v9148_v45 }
0x1786   :  { %9270 = vmatpush.msrb.mxu2 %v9234_v23 }
0x1788   :  { %9271 = vmatpush.msrb.mxu2 %v9232_v32 }
0x178a   :  { %9272 = vmatpush.msrb.mxu2 %v9230_v5 }
0x178c   :  { %9273 = vmatpush.msrb.mxu2 %v9228_v11  ;;  %v13682_v11 = vld [vmem:[#allocation76_spill] sm:$0xff] }
0x17f6   :  { %v8860_v42 = vpop.f32.mrf.mxu2  ;;  %v8880_v9 = vpop.f32.mrf.mxu3 }
0x17f7   :  { %v8883_v59 = vadd.f32 %v8860_v42, %v8804_v37  ;;  %v8884_v29 = vadd.f32 %v8880_v9, %v8805_v38  ;;  %v8939_v3 = vpop.f32.mrf.mxu1  ;;  %v9389_v38 = vld [vmem:[#allocation38 + $0x3e0] sm:$0xff] }
0x17f9   :  { %v8962_v52 = vadd.f32 %v8939_v3, %v8883_v59 }
0x17fe   :  { %v8959_v47 = vpop.f32.mrf.mxu2  ;;  %v8986_v36 = vpop.f32.mrf.mxu3 }
0x17ff   :  { %v8963_v4 = vadd.f32 %v8959_v47, %v8884_v29  ;;  %10133 = vmatmul.msk.f32.vlgmr.msra.gmra.mxu0 %vm2754_vm2, %v8986_v36  ;;  %10134 = vmatmul.msk.f32.vlgmr.msrb.gmra.mxu1 %vm2754_vm2, %v8986_v36  ;;  %v9439_v47 = vperm.slane %v8179_v43, 0 }
0x1800   :  { %9218 = vmatpush.msra.mxu0 %v13285_v40  ;;  %9250 = vmatpush.msrb.mxu1 %v9233_v21 }
0x1802   :  { %9219 = vmatpush.msra.mxu0 %v13288_v56  ;;  %9251 = vmatpush.msrb.mxu1 %v9231_v48 }
0x1804   :  { %9220 = vmatpush.msra.mxu0 %v13294_v57  ;;  %9252 = vmatpush.msrb.mxu1 %v9229_v41 }
0x1806   :  { %9221 = vmatpush.msra.mxu0 %v13299_v27  ;;  %v9065_v39 = vpop.f32.mrf.mxu2  ;;  %9253 = vmatpush.msrb.mxu1 %v9227_v2 }
0x1807   :  { %10136 = vmatmul.msk.f32.vlgmr.msrb.gmra.mxu3 %vm2754_vm2, %v9065_v39  ;;  %10137 = vmatmul.msk.f32.vlgmr.msrb.gmra.mxu0 %vm2754_vm2, %v9065_v39 }
0x1808   :  { %10138 = vmatmul.msk.f32.vlgmr.msra.gmra.mxu1 %vm2754_vm2, %v9123_v49  ;;  %9297 = vmatpush.msrb.mxu3 %v13285_v40 }
0x1809   :  { %9329 = vmatpush.msrb.mxu0 %v9312_v8  ;;  %9349 = vmatpush.msra.mxu1 %v9313_v18 }
0x180a   :  { %9298 = vmatpush.msrb.mxu3 %v13288_v56 }
0x180c   :  { %9299 = vmatpush.msrb.mxu3 %v13294_v57 }
0x180e   :  { %9300 = vmatpush.msrb.mxu3 %v13299_v27 }
0x180f   :  { %10141 = vmatmul.msk.f32.vlgmr.msra.gmra.mxu0 %vm2754_vm2, %v9202_v53 }
0x187c   :  { %v9018_v58 = vpop.f32.mrf.mxu0  ;;  %v9038_v20 = vpop.f32.mrf.mxu1 }
0x187d   :  { %v9041_v22 = vadd.f32 %v9018_v58, %v8962_v52  ;;  %v9042_v10 = vadd.f32 %v9038_v20, %v8963_v4 }
0x1884   :  { %v9117_v63 = vpop.f32.mrf.mxu0 }
0x1885   :  { %v9121_v26 = vadd.f32 %v9117_v63, %v9042_v10  ;;  %v9144_v15 = vpop.f32.mrf.mxu1 }
0x1886   :  { %10139 = vmatmul.msk.f32.vlgmr.msra.gmra.mxu2 %vm2754_vm2, %v9144_v15  ;;  %10140 = vmatmul.msk.f32.vlgmr.msra.gmra.mxu3 %vm2754_vm2, %v9144_v15 }
0x1887   :  { %9376 = vmatpush.msra.mxu2 %v13285_v40  ;;  %v9310_v40 = vld [vmem:[#allocation38 + $0x3a0] sm:$0xff]  ;;  %9408 = vmatpush.msra.mxu3 %v9391_v14 }
0x1888   :  { %9330 = vmatpush.msrb.mxu0 %v9310_v40 }
0x1889   :  { %9377 = vmatpush.msra.mxu2 %v13288_v56  ;;  %v9311_v56 = vld [vmem:[#allocation38 + $0x3a8] sm:$0xff]  ;;  %9409 = vmatpush.msra.mxu3 %v9389_v38 }
0x188a   :  { %9350 = vmatpush.msra.mxu1 %v9311_v56  ;;  %v9097_v50 = vpop.f32.mrf.mxu3 }
0x188b   :  { %9378 = vmatpush.msra.mxu2 %v13294_v57  ;;  %v9308_v57 = vld [vmem:[#allocation38 + $0x390] sm:$0xff]  ;;  %9410 = vmatpush.msra.mxu3 %v9387_v61  ;;  %v9120_v54 = vadd.f32 %v9097_v50, %v9041_v22 }
0x188c   :  { %v9223_v34 = vpop.f32.mrf.mxu0  ;;  %9331 = vmatpush.msrb.mxu0 %v9308_v57  ;;  %9351 = vmatpush.msra.mxu1 %v9309_v17 }
0x188d   :  { %9379 = vmatpush.msra.mxu2 %v13299_v27  ;;  %10142 = vmatmul.msk.f32.vlgmr.msrb.gmra.mxu1 %vm2754_vm2, %v9223_v34  ;;  %v9306_v27 = vld [vmem:[#allocation38 + $0x380] sm:$0xff] }
0x188e   :  { %10143 = vmatmul.msk.f32.vlgmr.msrb.gmra.mxu2 %vm2754_vm2, %v9223_v34  ;;  %10144 = vmatmul.msk.f32.vlgmr.msrb.gmra.mxu3 %vm2754_vm2, %v9281_v6 }
0x188f   :  { %9332 = vmatpush.msrb.mxu0 %v9306_v27  ;;  %9352 = vmatpush.msra.mxu1 %v9307_v0 }
0x1890   :  { %9411 = vmatpush.msra.mxu3 %v9385_v55 }
0x1891   :  { %9428 = vmatpush.msra.mxu0 %v9392_v62 }
0x1893   :  { %9429 = vmatpush.msra.mxu0 %v9390_v12 }
0x1895   :  { %9430 = vmatpush.msra.mxu0 %v9388_v28 }
0x1896   :  { %10147 = vmatmul.msk.f32.vlgmr.msra.gmra.mxu2 %vm2754_vm2, %v9360_v51 }
0x1897   :  { %9431 = vmatpush.msra.mxu0 %v9386_v1 }
0x1909   :  { %v9176_v31 = vpop.f32.mrf.mxu2  ;;  %v9196_v60 = vpop.f32.mrf.mxu3 }
0x190a   :  { %v9199_v33 = vadd.f32 %v9176_v31, %v9120_v54  ;;  %v9200_v13 = vadd.f32 %v9196_v60, %v9121_v26  ;;  %v9255_v25 = vpop.f32.mrf.mxu1 }
0x190c   :  { %v9278_v9 = vadd.f32 %v9255_v25, %v9199_v33 }
0x1911   :  { %v9275_v30 = vpop.f32.mrf.mxu2  ;;  %v9302_v19 = vpop.f32.mrf.mxu3 }
0x1912   :  { %v9279_v35 = vadd.f32 %v9275_v30, %v9200_v13  ;;  %10145 = vmatmul.msk.f32.vlgmr.msrb.gmra.mxu0 %vm2754_vm2, %v9302_v19  ;;  %10146 = vmatmul.msk.f32.vlgmr.msra.gmra.mxu1 %vm2754_vm2, %v9302_v19 }
0x1919   :  { %v9381_v7 = vpop.f32.mrf.mxu2 }
0x191a   :  { %10148 = vmatmul.msk.f32.vlgmr.msra.gmra.mxu3 %vm2754_vm2, %v9381_v7  ;;  %10149 = vmatmul.msk.f32.vlgmr.msra.gmra.mxu0 %vm2754_vm2, %v9381_v7 }
0x198f   :  { %v9334_v44 = vpop.f32.mrf.mxu0  ;;  %v9354_v24 = vpop.f32.mrf.mxu1 }
0x1990   :  { %v9358_v46 = vadd.f32 %v9354_v24, %v9279_v35  ;;  %v9357_v29 = vadd.f32 %v9334_v44, %v9278_v9 }
0x1997   :  { %v9433_v37 = vpop.f32.mrf.mxu0 }
0x1998   :  { %v9437_v42 = vadd.f32 %v9433_v37, %v9358_v46 }
0x199a   :  { %v9444_v59 = vadd.f32 %v9440_v16, %v9437_v42 }
0x199c   :  { %10259 = vtanh.f32 %v9444_v59 }
0x199d   :  { %v9413_v36 = vpop.f32.mrf.mxu3 }
0x199e   :  { %v9436_v4 = vadd.f32 %v9413_v36, %v9357_v29 }
0x19a0   :  { %v9443_v49 = vadd.f32 %v9439_v47, %v9436_v4 }
0x19a2   :  { %v10260_v39 = vpop.eup %10259  ;;  %10261 = vtanh.f32 %v9443_v49 }
0x19a3   :  { %v9448_v53 = vmul.f32 0.1, %v10260_v39 }
0x19a5   :  { %v9451_v23 = vrot.slane %v9448_v53, 6 }
0x19a8   :  { %v10262_v45 = vpop.eup %10261 }
0x19a9   :  { %v9447_v32 = vmul.f32 0.1, %v10262_v45 }
0x19ab   :  { %v9452_v5 = vsel %vm759_vm0, %v9447_v32, %v9451_v23 }
0x19ac   :  { %v9454_v21 = vadd.f32 %v9452_v5, %v13682_v11 }
0x19ae   :  { %9455 = vst [vmem:[#allocation41] sm:$0xf] %v9454_v21 }
0x19af   :  { %10966 = shalt.err (!%p10963_p3)
}
0x19b0   :  { %9466 = dma.vmem_to_hbm [thread:$0]  %s9462_s24, 64, %s9464_s4, [#allocation4]  }
0x19b1   :  { %10993 = dma.done.wait [#allocation4], 64  }
0x19b2   :  { %10994 = vsyncadd [#allocation4], 4294967232 }
0x19b3   :  { %9471 = vsyncpa [#allocation3], 1 }
0x19b4   :  { %9472 = vsyncpa [#allocation6], 1 }
0x19b5   :  { %9473 = vsyncpa [#allocation9], 1 }
0x19b6   :  { %9474 = vsyncpa [#allocation12], 1 }
0x19b7   :  { %9475 = vsyncpa [#allocation15], 1 }
0x19b8   :  { %9476 = vsyncpa [#allocation18], 1 }
0x19b9   :  { %9477 = vsyncpa [#allocation21], 1 }
0x19ba   :  { %9478 = vsyncpa [#allocation24], 1 }
0x19bb   :  { %9479 = vsyncpa [#allocation27], 1 }
0x19bc   :  { %9480 = vsyncpa [#allocation30], 1 }
0x19bd   :  { %9481 = vsyncpa [#allocation33], 1 }
0x19be   :  { %9482 = vsyncpa [#allocation36], 1 }
0x19bf   :  { %9483 = vsyncpa [#allocation39], 1 }
0x19c0   :  { %9484 = vsyncpa [#allocation4], 1 }

</bundles_post_ra>
